<compile_context>
chip_gen: v7x
topology: tpu7x:2x2x1
jax: 0.10.0
libtpu: 0.0.40
codegen_flags: <defaults>
</compile_context>

<pallas_src>
import jax
import jax.numpy as jnp
import numpy as np
from jax import lax
from jax.experimental import pallas as pl
from jax.experimental.pallas import tpu as pltpu

EPS_NORM = 1e-12   # clamp inside the equivariant norm
EPS_LN = 1e-5      # torch.nn.LayerNorm default eps

_NONLIN = {
    "relu": lambda x: jnp.maximum(x, 0.0),
    "elu": jax.nn.elu,
    "tanh": jnp.tanh,
}


def _layer_norm(v, g, b):
    """LayerNorm over the channel (lane) axis, f32 math, affine (g, b) of shape (1, C)."""
    c = v.shape[-1]
    mean = jnp.sum(v, axis=-1, keepdims=True) * (1.0 / c)
    cen = v - mean
    var = jnp.sum(cen * cen, axis=-1, keepdims=True) * (1.0 / c)
    return cen * lax.rsqrt(var + EPS_LN) * g + b


def make_init_kernel(num_layers, use_norm=True, nonlinearity="relu"):
    """Kernel over one node block: num_layers x [NormSE3 -> LinearSE3] for degrees 0 and 1."""
    nonlin = _NONLIN[nonlinearity]
    stride = 6 if use_norm else 2
    n_param = stride * num_layers

    def kernel(*refs):
        x0_ref, x1_ref = refs[0], refs[1]
        p = refs[2:2 + n_param]
        y0_ref = refs[2 + n_param]
        y1_ref = refs[3 + n_param]

        f0 = x0_ref[...].astype(jnp.float32)        # (TN, C0)
        f1 = x1_ref[...].astype(jnp.float32)        # (3, TN, C1)  spatial component leading

        for l in range(num_layers):
            lp = p[l * stride:(l + 1) * stride]
            if use_norm:
                g0_ref, b0_ref, g1_ref, b1_ref, w0_ref, w1_ref = lp

                # ---- NormSE3, degree 0 (representation dim == 1) ----
                ss0 = f0 * f0 + EPS_NORM
                inv0 = lax.rsqrt(ss0)                                   # EUP
                norm0 = ss0 * inv0                                      # == sqrt(ss0)
                t0 = nonlin(_layer_norm(norm0, g0_ref[...], b0_ref[...]))
                f0 = t0 * (f0 * inv0)                                   # gate * phase

                # ---- NormSE3, degree 1 (norm over the 3 spatial components) ----
                ss1 = f1[0] * f1[0] + f1[1] * f1[1] + f1[2] * f1[2] + EPS_NORM
                inv1 = lax.rsqrt(ss1)
                norm1 = ss1 * inv1
                t1 = nonlin(_layer_norm(norm1, g1_ref[...], b1_ref[...]))
                f1 = f1 * (t1 * inv1)[None, :, :]                       # equivariant gate
            else:
                w0_ref, w1_ref = lp

            # ---- LinearSE3: bf16 MXU operands, f32 accumulation ----
            f0 = jnp.dot(f0.astype(jnp.bfloat16), w0_ref[...],
                         preferred_element_type=jnp.float32)            # (TN, C0_out)

            tn, c1 = f1.shape[1], f1.shape[2]
            # fuse the 3 spatial components into one (3*TN, C1) matmul (same W per component)
            o1 = jnp.dot(f1.reshape(3 * tn, c1).astype(jnp.bfloat16), w1_ref[...],
                         preferred_element_type=jnp.float32)            # (3*TN, C1_out)
            f1 = o1.reshape(3, tn, o1.shape[-1])

        y0_ref[...] = f0.astype(y0_ref.dtype)
        y1_ref[...] = f1.astype(y1_ref.dtype)

    return kernel


def initialization_forward(x0, x1, params, *, use_norm=True, nonlinearity="relu", tile_n=256):
    """x0: (N, C0) degree-0 feats; x1: (3, N, C1) degree-1 feats (spatial leading)."""
    N, C0_in = x0.shape
    _, _, C1_in = x1.shape
    num_layers = len(params)
    C0_out = params[-1]["w0"].shape[1]
    C1_out = params[-1]["w1"].shape[1]

    TN = min(tile_n, N)
    n_blocks = pl.cdiv(N, TN)
    N_pad = n_blocks * TN
    if N_pad != N:   # zero-pad node axis to a whole number of blocks (pad rows produce zeros)
        x0 = jnp.pad(x0, ((0, N_pad - N), (0, 0)))
        x1 = jnp.pad(x1, ((0, 0), (0, N_pad - N), (0, 0)))

    in_specs = [
        pl.BlockSpec((TN, C0_in), lambda i: (i, 0)),
        pl.BlockSpec((3, TN, C1_in), lambda i: (0, i, 0)),
    ]
    flat_inputs = [x0, x1]
    param_names = ("g0", "b0", "g1", "b1", "w0", "w1") if use_norm else ("w0", "w1")
    for lp in params:
        for name in param_names:
            arr = lp[name]
            flat_inputs.append(arr)
            in_specs.append(pl.BlockSpec(arr.shape, lambda i, nd=arr.ndim: (0,) * nd))

    out_specs = [
        pl.BlockSpec((TN, C0_out), lambda i: (i, 0)),
        pl.BlockSpec((3, TN, C1_out), lambda i: (0, i, 0)),
    ]
    out_shape = (
        jax.ShapeDtypeStruct((N_pad, C0_out), jnp.float32),
        jax.ShapeDtypeStruct((3, N_pad, C1_out), jnp.float32),
    )

    y0, y1 = pl.pallas_call(
        make_init_kernel(num_layers, use_norm=use_norm, nonlinearity=nonlinearity),
        out_shape=out_shape,
        grid_spec=pltpu.PrefetchScalarGridSpec(
            num_scalar_prefetch=0,
            grid=(n_blocks,),
            in_specs=in_specs,
            out_specs=out_specs,
        ),
        compiler_params=pltpu.CompilerParams(
            dimension_semantics=("parallel",),       # node blocks are independent
            vmem_limit_bytes=32 * 1024 * 1024,       # explicit; fits all generations (v7x 64 MiB)
        ),
    )(*flat_inputs)

    return y0[:N], y1[:, :N]


# ---------------- pure-JAX reference (mirrors the PyTorch module) ----------------

def ref_forward(x0, x1, params, use_norm=True, nonlinearity="relu"):
    nonlin = _NONLIN[nonlinearity]
    f0 = x0.astype(jnp.float32)
    f1 = x1.astype(jnp.float32)
    for lp in params:
        if use_norm:
            n0 = jnp.sqrt(f0 * f0 + EPS_NORM)
            f0 = nonlin(_layer_norm(n0, lp["g0"], lp["b0"])) * (f0 / n0)
            n1 = jnp.sqrt(f1[0] ** 2 + f1[1] ** 2 + f1[2] ** 2 + EPS_NORM)
            f1 = f1 * (nonlin(_layer_norm(n1, lp["g1"], lp["b1"])) / n1)[None]
        f0 = jnp.dot(f0.astype(jnp.bfloat16), lp["w0"], preferred_element_type=jnp.float32)
        n, c1 = f1.shape[1], f1.shape[2]
        f1 = jnp.dot(f1.reshape(3 * n, c1).astype(jnp.bfloat16), lp["w1"],
                     preferred_element_type=jnp.float32).reshape(3, n, -1)
    return f0, f1


def make_params(key, c0_in, c1_in, c0_out, c1_out, num_layers):
    params = []
    c0, c1 = c0_in, c1_in
    for _ in range(num_layers):
        key, *ks = jax.random.split(key, 7)
        g0 = 1.0 + 0.1 * jax.random.normal(ks[0], (1, c0), jnp.float32)
        b0 = 0.1 * jax.random.normal(ks[1], (1, c0), jnp.float32)
        g1 = 1.0 + 0.1 * jax.random.normal(ks[2], (1, c1), jnp.float32)
        b1 = 0.1 * jax.random.normal(ks[3], (1, c1), jnp.float32)
        w0 = (jax.random.normal(ks[4], (c0, c0_out), jnp.float32)
              / jnp.sqrt(jnp.float32(c0))).astype(jnp.bfloat16)
        w1 = (jax.random.normal(ks[5], (c1, c1_out), jnp.float32)
              / jnp.sqrt(jnp.float32(c1))).astype(jnp.bfloat16)
        params.append(dict(g0=g0, b0=b0, g1=g1, b1=b1, w0=w0, w1=w1))
        c0, c1 = c0_out, c1_out
    return params


if __name__ == "__main__":
    # Config mirroring the module: fiber_init={0:32,1:16}, fiber_init_pass={0:64,1:32},
    # norm=[True], nonlinearity='relu', num_linear_layers=2.
    config = {
        "nonlinearity": "relu",
        "norm": [True],
        "fiber_init": {0: 32, 1: 16},
        "fiber_init_pass": {0: 64, 1: 32},
        "num_linear_layers": 2,
    }
    N = 512
    C0_in, C1_in = config["fiber_init"][0], config["fiber_init"][1]
    C0_out, C1_out = config["fiber_init_pass"][0], config["fiber_init_pass"][1]

    key = jax.random.PRNGKey(0)
    k0, k1, kp = jax.random.split(key, 3)
    x0 = jax.random.normal(k0, (N, C0_in), jnp.float32)        # degree-0 node features
    x1 = jax.random.normal(k1, (3, N, C1_in), jnp.float32)     # degree-1 node features (x,y,z leading)
    params = make_params(kp, C0_in, C1_in, C0_out, C1_out, config["num_linear_layers"])

    y0, y1 = initialization_forward(
        x0, x1, params,
        use_norm=config["norm"][0],
        nonlinearity=config["nonlinearity"],
        tile_n=256,
    )
    jax.block_until_ready((y0, y1))

    r0, r1 = ref_forward(x0, x1, params,
                         use_norm=config["norm"][0],
                         nonlinearity=config["nonlinearity"])

    assert y0.shape == (N, C0_out) and y1.shape == (3, N, C1_out)
    assert bool(jnp.all(jnp.isfinite(y0))) and bool(jnp.all(jnp.isfinite(y1)))
    np.testing.assert_allclose(np.asarray(y0), np.asarray(r0), rtol=2e-2, atol=2e-2)
    np.testing.assert_allclose(np.asarray(y1), np.asarray(r1), rtol=2e-2, atol=2e-2)
    print("KERNEL_OK")
</pallas_src>

<mosaic_0001>
module attributes {stable_mosaic.version = 11 : i64} {
  func.func @kernel(%arg0: i32, %arg1: memref<256x32xf32, #tpu.memory_space<vmem>>, %arg2: memref<3x256x16xf32, #tpu.memory_space<vmem>>, %arg3: memref<1x32xf32, #tpu.memory_space<vmem>>, %arg4: memref<1x32xf32, #tpu.memory_space<vmem>>, %arg5: memref<1x16xf32, #tpu.memory_space<vmem>>, %arg6: memref<1x16xf32, #tpu.memory_space<vmem>>, %arg7: memref<32x64xbf16, #tpu.memory_space<vmem>>, %arg8: memref<16x32xbf16, #tpu.memory_space<vmem>>, %arg9: memref<1x64xf32, #tpu.memory_space<vmem>>, %arg10: memref<1x64xf32, #tpu.memory_space<vmem>>, %arg11: memref<1x32xf32, #tpu.memory_space<vmem>>, %arg12: memref<1x32xf32, #tpu.memory_space<vmem>>, %arg13: memref<64x64xbf16, #tpu.memory_space<vmem>>, %arg14: memref<32x32xbf16, #tpu.memory_space<vmem>>, %arg15: memref<256x64xf32, #tpu.memory_space<vmem>>, %arg16: memref<3x256x32xf32, #tpu.memory_space<vmem>>) attributes {dimension_semantics = [#tpu.dimension_semantics<parallel>], iteration_bounds = array<i64: 2>, scalar_prefetch = 0 : i64, scratch_operands = 0 : i64, tpu.core_type = #tpu.core_type<tc>, window_params = [{transform_indices = @transform_0, window_bounds = array<i64: 256, 32>}, {transform_indices = @transform_1, window_bounds = array<i64: 3, 256, 16>}, {pipeline_mode = #tpu.pipeline_mode<synchronous>, transform_indices = @transform_2, window_bounds = array<i64: 1, 32>}, {pipeline_mode = #tpu.pipeline_mode<synchronous>, transform_indices = @transform_3, window_bounds = array<i64: 1, 32>}, {pipeline_mode = #tpu.pipeline_mode<synchronous>, transform_indices = @transform_4, window_bounds = array<i64: 1, 16>}, {pipeline_mode = #tpu.pipeline_mode<synchronous>, transform_indices = @transform_5, window_bounds = array<i64: 1, 16>}, {pipeline_mode = #tpu.pipeline_mode<synchronous>, transform_indices = @transform_6, window_bounds = array<i64: 32, 64>}, {pipeline_mode = #tpu.pipeline_mode<synchronous>, transform_indices = @transform_7, window_bounds = array<i64: 16, 32>}, {pipeline_mode = #tpu.pipeline_mode<synchronous>, transform_indices = @transform_8, window_bounds = array<i64: 1, 64>}, {pipeline_mode = #tpu.pipeline_mode<synchronous>, transform_indices = @transform_9, window_bounds = array<i64: 1, 64>}, {pipeline_mode = #tpu.pipeline_mode<synchronous>, transform_indices = @transform_10, window_bounds = array<i64: 1, 32>}, {pipeline_mode = #tpu.pipeline_mode<synchronous>, transform_indices = @transform_11, window_bounds = array<i64: 1, 32>}, {pipeline_mode = #tpu.pipeline_mode<synchronous>, transform_indices = @transform_12, window_bounds = array<i64: 64, 64>}, {pipeline_mode = #tpu.pipeline_mode<synchronous>, transform_indices = @transform_13, window_bounds = array<i64: 32, 32>}, {transform_indices = @transform_14, window_bounds = array<i64: 256, 64>}, {transform_indices = @transform_15, window_bounds = array<i64: 3, 256, 32>}]} {
    %c0 = arith.constant 0 : index
    %c0_0 = arith.constant 0 : index
    %0 = vector.load %arg1[%c0, %c0_0] : memref<256x32xf32, #tpu.memory_space<vmem>>, vector<256x32xf32>
    %c0_1 = arith.constant 0 : index
    %c0_2 = arith.constant 0 : index
    %c0_3 = arith.constant 0 : index
    %1 = vector.load %arg2[%c0_1, %c0_2, %c0_3] : memref<3x256x16xf32, #tpu.memory_space<vmem>>, vector<3x256x16xf32>
    %2 = arith.mulf %0, %0 : vector<256x32xf32>
    %cst = arith.constant 9.99999996E-13 : f32
    %3 = vector.broadcast %cst : f32 to vector<256x32xf32>
    %4 = arith.addf %2, %3 : vector<256x32xf32>
    %5 = math.rsqrt %4 : vector<256x32xf32>
    %6 = arith.mulf %4, %5 : vector<256x32xf32>
    %c0_4 = arith.constant 0 : index
    %c0_5 = arith.constant 0 : index
    %7 = vector.load %arg3[%c0_4, %c0_5] : memref<1x32xf32, #tpu.memory_space<vmem>>, vector<1x32xf32>
    %c0_6 = arith.constant 0 : index
    %c0_7 = arith.constant 0 : index
    %8 = vector.load %arg4[%c0_6, %c0_7] : memref<1x32xf32, #tpu.memory_space<vmem>>, vector<1x32xf32>
    %cst_8 = arith.constant dense<0.000000e+00> : vector<256xf32>
    %9 = vector.multi_reduction <add>, %6, %cst_8 [1] : vector<256x32xf32> to vector<256xf32>
    %10 = vector.shape_cast %9 : vector<256xf32> to vector<256x1xf32>
    %cst_9 = arith.constant 3.125000e-02 : f32
    %11 = vector.broadcast %cst_9 : f32 to vector<256x1xf32>
    %12 = arith.mulf %10, %11 : vector<256x1xf32>
    %13 = vector.broadcast %12 : vector<256x1xf32> to vector<256x32xf32>
    %14 = arith.subf %6, %13 : vector<256x32xf32>
    %15 = arith.mulf %14, %14 : vector<256x32xf32>
    %cst_10 = arith.constant dense<0.000000e+00> : vector<256xf32>
    %16 = vector.multi_reduction <add>, %15, %cst_10 [1] : vector<256x32xf32> to vector<256xf32>
    %17 = vector.shape_cast %16 : vector<256xf32> to vector<256x1xf32>
    %cst_11 = arith.constant 3.125000e-02 : f32
    %18 = vector.broadcast %cst_11 : f32 to vector<256x1xf32>
    %19 = arith.mulf %17, %18 : vector<256x1xf32>
    %cst_12 = arith.constant 9.99999974E-6 : f32
    %20 = vector.broadcast %cst_12 : f32 to vector<256x1xf32>
    %21 = arith.addf %19, %20 : vector<256x1xf32>
    %22 = math.rsqrt %21 : vector<256x1xf32>
    %23 = vector.broadcast %22 : vector<256x1xf32> to vector<256x32xf32>
    %24 = arith.mulf %14, %23 : vector<256x32xf32>
    %25 = vector.broadcast %7 : vector<1x32xf32> to vector<256x32xf32>
    %26 = arith.mulf %24, %25 : vector<256x32xf32>
    %27 = vector.broadcast %8 : vector<1x32xf32> to vector<256x32xf32>
    %28 = arith.addf %26, %27 : vector<256x32xf32>
    %cst_13 = arith.constant 0.000000e+00 : f32
    %29 = vector.broadcast %cst_13 : f32 to vector<256x32xf32>
    %30 = arith.maximumf %28, %29 : vector<256x32xf32>
    %31 = arith.mulf %0, %5 : vector<256x32xf32>
    %32 = arith.mulf %30, %31 : vector<256x32xf32>
    %33 = vector.extract_strided_slice %1 {offsets = [0, 0, 0], sizes = [1, 256, 16], strides = [1, 1, 1]} : vector<3x256x16xf32> to vector<1x256x16xf32>
    %34 = vector.shape_cast %33 : vector<1x256x16xf32> to vector<256x16xf32>
    %35 = vector.extract_strided_slice %1 {offsets = [0, 0, 0], sizes = [1, 256, 16], strides = [1, 1, 1]} : vector<3x256x16xf32> to vector<1x256x16xf32>
    %36 = vector.shape_cast %35 : vector<1x256x16xf32> to vector<256x16xf32>
    %37 = arith.mulf %34, %36 : vector<256x16xf32>
    %38 = vector.extract_strided_slice %1 {offsets = [1, 0, 0], sizes = [1, 256, 16], strides = [1, 1, 1]} : vector<3x256x16xf32> to vector<1x256x16xf32>
    %39 = vector.shape_cast %38 : vector<1x256x16xf32> to vector<256x16xf32>
    %40 = vector.extract_strided_slice %1 {offsets = [1, 0, 0], sizes = [1, 256, 16], strides = [1, 1, 1]} : vector<3x256x16xf32> to vector<1x256x16xf32>
    %41 = vector.shape_cast %40 : vector<1x256x16xf32> to vector<256x16xf32>
    %42 = arith.mulf %39, %41 : vector<256x16xf32>
    %43 = arith.addf %37, %42 : vector<256x16xf32>
    %44 = vector.extract_strided_slice %1 {offsets = [2, 0, 0], sizes = [1, 256, 16], strides = [1, 1, 1]} : vector<3x256x16xf32> to vector<1x256x16xf32>
    %45 = vector.shape_cast %44 : vector<1x256x16xf32> to vector<256x16xf32>
    %46 = vector.extract_strided_slice %1 {offsets = [2, 0, 0], sizes = [1, 256, 16], strides = [1, 1, 1]} : vector<3x256x16xf32> to vector<1x256x16xf32>
    %47 = vector.shape_cast %46 : vector<1x256x16xf32> to vector<256x16xf32>
    %48 = arith.mulf %45, %47 : vector<256x16xf32>
    %49 = arith.addf %43, %48 : vector<256x16xf32>
    %cst_14 = arith.constant 9.99999996E-13 : f32
    %50 = vector.broadcast %cst_14 : f32 to vector<256x16xf32>
    %51 = arith.addf %49, %50 : vector<256x16xf32>
    %52 = math.rsqrt %51 : vector<256x16xf32>
    %53 = arith.mulf %51, %52 : vector<256x16xf32>
    %c0_15 = arith.constant 0 : index
    %c0_16 = arith.constant 0 : index
    %54 = vector.load %arg5[%c0_15, %c0_16] : memref<1x16xf32, #tpu.memory_space<vmem>>, vector<1x16xf32>
    %c0_17 = arith.constant 0 : index
    %c0_18 = arith.constant 0 : index
    %55 = vector.load %arg6[%c0_17, %c0_18] : memref<1x16xf32, #tpu.memory_space<vmem>>, vector<1x16xf32>
    %cst_19 = arith.constant dense<0.000000e+00> : vector<256xf32>
    %56 = vector.multi_reduction <add>, %53, %cst_19 [1] : vector<256x16xf32> to vector<256xf32>
    %57 = vector.shape_cast %56 : vector<256xf32> to vector<256x1xf32>
    %cst_20 = arith.constant 6.250000e-02 : f32
    %58 = vector.broadcast %cst_20 : f32 to vector<256x1xf32>
    %59 = arith.mulf %57, %58 : vector<256x1xf32>
    %60 = vector.broadcast %59 : vector<256x1xf32> to vector<256x16xf32>
    %61 = arith.subf %53, %60 : vector<256x16xf32>
    %62 = arith.mulf %61, %61 : vector<256x16xf32>
    %cst_21 = arith.constant dense<0.000000e+00> : vector<256xf32>
    %63 = vector.multi_reduction <add>, %62, %cst_21 [1] : vector<256x16xf32> to vector<256xf32>
    %64 = vector.shape_cast %63 : vector<256xf32> to vector<256x1xf32>
    %cst_22 = arith.constant 6.250000e-02 : f32
    %65 = vector.broadcast %cst_22 : f32 to vector<256x1xf32>
    %66 = arith.mulf %64, %65 : vector<256x1xf32>
    %cst_23 = arith.constant 9.99999974E-6 : f32
    %67 = vector.broadcast %cst_23 : f32 to vector<256x1xf32>
    %68 = arith.addf %66, %67 : vector<256x1xf32>
    %69 = math.rsqrt %68 : vector<256x1xf32>
    %70 = vector.broadcast %69 : vector<256x1xf32> to vector<256x16xf32>
    %71 = arith.mulf %61, %70 : vector<256x16xf32>
    %72 = vector.broadcast %54 : vector<1x16xf32> to vector<256x16xf32>
    %73 = arith.mulf %71, %72 : vector<256x16xf32>
    %74 = vector.broadcast %55 : vector<1x16xf32> to vector<256x16xf32>
    %75 = arith.addf %73, %74 : vector<256x16xf32>
    %cst_24 = arith.constant 0.000000e+00 : f32
    %76 = vector.broadcast %cst_24 : f32 to vector<256x16xf32>
    %77 = arith.maximumf %75, %76 : vector<256x16xf32>
    %78 = arith.mulf %77, %52 : vector<256x16xf32>
    %79 = vector.shape_cast %78 : vector<256x16xf32> to vector<1x256x16xf32>
    %80 = vector.broadcast %79 : vector<1x256x16xf32> to vector<3x256x16xf32>
    %81 = arith.mulf %1, %80 : vector<3x256x16xf32>
    %82 = arith.truncf %32 : vector<256x32xf32> to vector<256x32xbf16>
    %c0_25 = arith.constant 0 : index
    %c0_26 = arith.constant 0 : index
    %83 = vector.load %arg7[%c0_25, %c0_26] : memref<32x64xbf16, #tpu.memory_space<vmem>>, vector<32x64xbf16>
    %cst_27 = arith.constant dense<0.000000e+00> : vector<256x64xf32>
    %84 = tpu.matmul %82, %83, %cst_27 {dimension_numbers = #tpu.dot_dimension_numbers<[1], [0], [0], [1], [0, 0, 1, 1], [], []>} : vector<256x32xbf16>, vector<32x64xbf16>, vector<256x64xf32> -> vector<256x64xf32>
    %85 = vector.shape_cast %81 : vector<3x256x16xf32> to vector<768x16xf32>
    %86 = arith.truncf %85 : vector<768x16xf32> to vector<768x16xbf16>
    %c0_28 = arith.constant 0 : index
    %c0_29 = arith.constant 0 : index
    %87 = vector.load %arg8[%c0_28, %c0_29] : memref<16x32xbf16, #tpu.memory_space<vmem>>, vector<16x32xbf16>
    %cst_30 = arith.constant dense<0.000000e+00> : vector<768x32xf32>
    %88 = tpu.matmul %86, %87, %cst_30 {dimension_numbers = #tpu.dot_dimension_numbers<[1], [0], [0], [1], [0, 0, 1, 1], [], []>} : vector<768x16xbf16>, vector<16x32xbf16>, vector<768x32xf32> -> vector<768x32xf32>
    %89 = vector.shape_cast %88 : vector<768x32xf32> to vector<3x256x32xf32>
    %90 = arith.mulf %84, %84 : vector<256x64xf32>
    %cst_31 = arith.constant 9.99999996E-13 : f32
    %91 = vector.broadcast %cst_31 : f32 to vector<256x64xf32>
    %92 = arith.addf %90, %91 : vector<256x64xf32>
    %93 = math.rsqrt %92 : vector<256x64xf32>
    %94 = arith.mulf %92, %93 : vector<256x64xf32>
    %c0_32 = arith.constant 0 : index
    %c0_33 = arith.constant 0 : index
    %95 = vector.load %arg9[%c0_32, %c0_33] : memref<1x64xf32, #tpu.memory_space<vmem>>, vector<1x64xf32>
    %c0_34 = arith.constant 0 : index
    %c0_35 = arith.constant 0 : index
    %96 = vector.load %arg10[%c0_34, %c0_35] : memref<1x64xf32, #tpu.memory_space<vmem>>, vector<1x64xf32>
    %cst_36 = arith.constant dense<0.000000e+00> : vector<256xf32>
    %97 = vector.multi_reduction <add>, %94, %cst_36 [1] : vector<256x64xf32> to vector<256xf32>
    %98 = vector.shape_cast %97 : vector<256xf32> to vector<256x1xf32>
    %cst_37 = arith.constant 1.562500e-02 : f32
    %99 = vector.broadcast %cst_37 : f32 to vector<256x1xf32>
    %100 = arith.mulf %98, %99 : vector<256x1xf32>
    %101 = vector.broadcast %100 : vector<256x1xf32> to vector<256x64xf32>
    %102 = arith.subf %94, %101 : vector<256x64xf32>
    %103 = arith.mulf %102, %102 : vector<256x64xf32>
    %cst_38 = arith.constant dense<0.000000e+00> : vector<256xf32>
    %104 = vector.multi_reduction <add>, %103, %cst_38 [1] : vector<256x64xf32> to vector<256xf32>
    %105 = vector.shape_cast %104 : vector<256xf32> to vector<256x1xf32>
    %cst_39 = arith.constant 1.562500e-02 : f32
    %106 = vector.broadcast %cst_39 : f32 to vector<256x1xf32>
    %107 = arith.mulf %105, %106 : vector<256x1xf32>
    %cst_40 = arith.constant 9.99999974E-6 : f32
    %108 = vector.broadcast %cst_40 : f32 to vector<256x1xf32>
    %109 = arith.addf %107, %108 : vector<256x1xf32>
    %110 = math.rsqrt %109 : vector<256x1xf32>
    %111 = vector.broadcast %110 : vector<256x1xf32> to vector<256x64xf32>
    %112 = arith.mulf %102, %111 : vector<256x64xf32>
    %113 = vector.broadcast %95 : vector<1x64xf32> to vector<256x64xf32>
    %114 = arith.mulf %112, %113 : vector<256x64xf32>
    %115 = vector.broadcast %96 : vector<1x64xf32> to vector<256x64xf32>
    %116 = arith.addf %114, %115 : vector<256x64xf32>
    %cst_41 = arith.constant 0.000000e+00 : f32
    %117 = vector.broadcast %cst_41 : f32 to vector<256x64xf32>
    %118 = arith.maximumf %116, %117 : vector<256x64xf32>
    %119 = arith.mulf %84, %93 : vector<256x64xf32>
    %120 = arith.mulf %118, %119 : vector<256x64xf32>
    %121 = vector.extract_strided_slice %89 {offsets = [0, 0, 0], sizes = [1, 256, 32], strides = [1, 1, 1]} : vector<3x256x32xf32> to vector<1x256x32xf32>
    %122 = vector.shape_cast %121 : vector<1x256x32xf32> to vector<256x32xf32>
    %123 = vector.extract_strided_slice %89 {offsets = [0, 0, 0], sizes = [1, 256, 32], strides = [1, 1, 1]} : vector<3x256x32xf32> to vector<1x256x32xf32>
    %124 = vector.shape_cast %123 : vector<1x256x32xf32> to vector<256x32xf32>
    %125 = arith.mulf %122, %124 : vector<256x32xf32>
    %126 = vector.extract_strided_slice %89 {offsets = [1, 0, 0], sizes = [1, 256, 32], strides = [1, 1, 1]} : vector<3x256x32xf32> to vector<1x256x32xf32>
    %127 = vector.shape_cast %126 : vector<1x256x32xf32> to vector<256x32xf32>
    %128 = vector.extract_strided_slice %89 {offsets = [1, 0, 0], sizes = [1, 256, 32], strides = [1, 1, 1]} : vector<3x256x32xf32> to vector<1x256x32xf32>
    %129 = vector.shape_cast %128 : vector<1x256x32xf32> to vector<256x32xf32>
    %130 = arith.mulf %127, %129 : vector<256x32xf32>
    %131 = arith.addf %125, %130 : vector<256x32xf32>
    %132 = vector.extract_strided_slice %89 {offsets = [2, 0, 0], sizes = [1, 256, 32], strides = [1, 1, 1]} : vector<3x256x32xf32> to vector<1x256x32xf32>
    %133 = vector.shape_cast %132 : vector<1x256x32xf32> to vector<256x32xf32>
    %134 = vector.extract_strided_slice %89 {offsets = [2, 0, 0], sizes = [1, 256, 32], strides = [1, 1, 1]} : vector<3x256x32xf32> to vector<1x256x32xf32>
    %135 = vector.shape_cast %134 : vector<1x256x32xf32> to vector<256x32xf32>
    %136 = arith.mulf %133, %135 : vector<256x32xf32>
    %137 = arith.addf %131, %136 : vector<256x32xf32>
    %cst_42 = arith.constant 9.99999996E-13 : f32
    %138 = vector.broadcast %cst_42 : f32 to vector<256x32xf32>
    %139 = arith.addf %137, %138 : vector<256x32xf32>
    %140 = math.rsqrt %139 : vector<256x32xf32>
    %141 = arith.mulf %139, %140 : vector<256x32xf32>
    %c0_43 = arith.constant 0 : index
    %c0_44 = arith.constant 0 : index
    %142 = vector.load %arg11[%c0_43, %c0_44] : memref<1x32xf32, #tpu.memory_space<vmem>>, vector<1x32xf32>
    %c0_45 = arith.constant 0 : index
    %c0_46 = arith.constant 0 : index
    %143 = vector.load %arg12[%c0_45, %c0_46] : memref<1x32xf32, #tpu.memory_space<vmem>>, vector<1x32xf32>
    %cst_47 = arith.constant dense<0.000000e+00> : vector<256xf32>
    %144 = vector.multi_reduction <add>, %141, %cst_47 [1] : vector<256x32xf32> to vector<256xf32>
    %145 = vector.shape_cast %144 : vector<256xf32> to vector<256x1xf32>
    %cst_48 = arith.constant 3.125000e-02 : f32
    %146 = vector.broadcast %cst_48 : f32 to vector<256x1xf32>
    %147 = arith.mulf %145, %146 : vector<256x1xf32>
    %148 = vector.broadcast %147 : vector<256x1xf32> to vector<256x32xf32>
    %149 = arith.subf %141, %148 : vector<256x32xf32>
    %150 = arith.mulf %149, %149 : vector<256x32xf32>
    %cst_49 = arith.constant dense<0.000000e+00> : vector<256xf32>
    %151 = vector.multi_reduction <add>, %150, %cst_49 [1] : vector<256x32xf32> to vector<256xf32>
    %152 = vector.shape_cast %151 : vector<256xf32> to vector<256x1xf32>
    %cst_50 = arith.constant 3.125000e-02 : f32
    %153 = vector.broadcast %cst_50 : f32 to vector<256x1xf32>
    %154 = arith.mulf %152, %153 : vector<256x1xf32>
    %cst_51 = arith.constant 9.99999974E-6 : f32
    %155 = vector.broadcast %cst_51 : f32 to vector<256x1xf32>
    %156 = arith.addf %154, %155 : vector<256x1xf32>
    %157 = math.rsqrt %156 : vector<256x1xf32>
    %158 = vector.broadcast %157 : vector<256x1xf32> to vector<256x32xf32>
    %159 = arith.mulf %149, %158 : vector<256x32xf32>
    %160 = vector.broadcast %142 : vector<1x32xf32> to vector<256x32xf32>
    %161 = arith.mulf %159, %160 : vector<256x32xf32>
    %162 = vector.broadcast %143 : vector<1x32xf32> to vector<256x32xf32>
    %163 = arith.addf %161, %162 : vector<256x32xf32>
    %cst_52 = arith.constant 0.000000e+00 : f32
    %164 = vector.broadcast %cst_52 : f32 to vector<256x32xf32>
    %165 = arith.maximumf %163, %164 : vector<256x32xf32>
    %166 = arith.mulf %165, %140 : vector<256x32xf32>
    %167 = vector.shape_cast %166 : vector<256x32xf32> to vector<1x256x32xf32>
    %168 = vector.broadcast %167 : vector<1x256x32xf32> to vector<3x256x32xf32>
    %169 = arith.mulf %89, %168 : vector<3x256x32xf32>
    %170 = arith.truncf %120 : vector<256x64xf32> to vector<256x64xbf16>
    %c0_53 = arith.constant 0 : index
    %c0_54 = arith.constant 0 : index
    %171 = vector.load %arg13[%c0_53, %c0_54] : memref<64x64xbf16, #tpu.memory_space<vmem>>, vector<64x64xbf16>
    %cst_55 = arith.constant dense<0.000000e+00> : vector<256x64xf32>
    %172 = tpu.matmul %170, %171, %cst_55 {dimension_numbers = #tpu.dot_dimension_numbers<[1], [0], [0], [1], [0, 0, 1, 1], [], []>} : vector<256x64xbf16>, vector<64x64xbf16>, vector<256x64xf32> -> vector<256x64xf32>
    %173 = vector.shape_cast %169 : vector<3x256x32xf32> to vector<768x32xf32>
    %174 = arith.truncf %173 : vector<768x32xf32> to vector<768x32xbf16>
    %c0_56 = arith.constant 0 : index
    %c0_57 = arith.constant 0 : index
    %175 = vector.load %arg14[%c0_56, %c0_57] : memref<32x32xbf16, #tpu.memory_space<vmem>>, vector<32x32xbf16>
    %cst_58 = arith.constant dense<0.000000e+00> : vector<768x32xf32>
    %176 = tpu.matmul %174, %175, %cst_58 {dimension_numbers = #tpu.dot_dimension_numbers<[1], [0], [0], [1], [0, 0, 1, 1], [], []>} : vector<768x32xbf16>, vector<32x32xbf16>, vector<768x32xf32> -> vector<768x32xf32>
    %177 = vector.shape_cast %176 : vector<768x32xf32> to vector<3x256x32xf32>
    %c0_59 = arith.constant 0 : index
    %c0_60 = arith.constant 0 : index
    %178 = vector.load %arg15[%c0_59, %c0_60] : memref<256x64xf32, #tpu.memory_space<vmem>>, vector<256x64xf32>
    tpu.vector_store %arg15[%c0_59, %c0_60], %172 {strides = array<i32>} : memref<256x64xf32, #tpu.memory_space<vmem>>, vector<256x64xf32>,
    %c0_61 = arith.constant 0 : index
    %c0_62 = arith.constant 0 : index
    %c0_63 = arith.constant 0 : index
    %179 = vector.load %arg16[%c0_61, %c0_62, %c0_63] : memref<3x256x32xf32, #tpu.memory_space<vmem>>, vector<3x256x32xf32>
    tpu.vector_store %arg16[%c0_61, %c0_62, %c0_63], %177 {strides = array<i32>} : memref<3x256x32xf32, #tpu.memory_space<vmem>>, vector<3x256x32xf32>,
    return
  }
  func.func @transform_0(%arg0: i32) -> (i32, i32) {
    %c0_i32 = arith.constant 0 : i32
    %c0_i32_0 = arith.constant 0 : i32
    return %arg0, %c0_i32 : i32, i32
  }
  func.func @transform_1(%arg0: i32) -> (i32, i32, i32) {
    %c0_i32 = arith.constant 0 : i32
    %c0_i32_0 = arith.constant 0 : i32
    %c0_i32_1 = arith.constant 0 : i32
    return %c0_i32, %arg0, %c0_i32_0 : i32, i32, i32
  }
  func.func @transform_2(%arg0: i32) -> (i32, i32) {
    %c0_i32 = arith.constant 0 : i32
    %c0_i32_0 = arith.constant 0 : i32
    %c0_i32_1 = arith.constant 0 : i32
    return %c0_i32, %c0_i32_0 : i32, i32
  }
  func.func @transform_3(%arg0: i32) -> (i32, i32) {
    %c0_i32 = arith.constant 0 : i32
    %c0_i32_0 = arith.constant 0 : i32
    %c0_i32_1 = arith.constant 0 : i32
    return %c0_i32, %c0_i32_0 : i32, i32
  }
  func.func @transform_4(%arg0: i32) -> (i32, i32) {
    %c0_i32 = arith.constant 0 : i32
    %c0_i32_0 = arith.constant 0 : i32
    %c0_i32_1 = arith.constant 0 : i32
    return %c0_i32, %c0_i32_0 : i32, i32
  }
  func.func @transform_5(%arg0: i32) -> (i32, i32) {
    %c0_i32 = arith.constant 0 : i32
    %c0_i32_0 = arith.constant 0 : i32
    %c0_i32_1 = arith.constant 0 : i32
    return %c0_i32, %c0_i32_0 : i32, i32
  }
  func.func @transform_6(%arg0: i32) -> (i32, i32) {
    %c0_i32 = arith.constant 0 : i32
    %c0_i32_0 = arith.constant 0 : i32
    %c0_i32_1 = arith.constant 0 : i32
    return %c0_i32, %c0_i32_0 : i32, i32
  }
  func.func @transform_7(%arg0: i32) -> (i32, i32) {
    %c0_i32 = arith.constant 0 : i32
    %c0_i32_0 = arith.constant 0 : i32
    %c0_i32_1 = arith.constant 0 : i32
    return %c0_i32, %c0_i32_0 : i32, i32
  }
  func.func @transform_8(%arg0: i32) -> (i32, i32) {
    %c0_i32 = arith.constant 0 : i32
    %c0_i32_0 = arith.constant 0 : i32
    %c0_i32_1 = arith.constant 0 : i32
    return %c0_i32, %c0_i32_0 : i32, i32
  }
  func.func @transform_9(%arg0: i32) -> (i32, i32) {
    %c0_i32 = arith.constant 0 : i32
    %c0_i32_0 = arith.constant 0 : i32
    %c0_i32_1 = arith.constant 0 : i32
    return %c0_i32, %c0_i32_0 : i32, i32
  }
  func.func @transform_10(%arg0: i32) -> (i32, i32) {
    %c0_i32 = arith.constant 0 : i32
    %c0_i32_0 = arith.constant 0 : i32
    %c0_i32_1 = arith.constant 0 : i32
    return %c0_i32, %c0_i32_0 : i32, i32
  }
  func.func @transform_11(%arg0: i32) -> (i32, i32) {
    %c0_i32 = arith.constant 0 : i32
    %c0_i32_0 = arith.constant 0 : i32
    %c0_i32_1 = arith.constant 0 : i32
    return %c0_i32, %c0_i32_0 : i32, i32
  }
  func.func @transform_12(%arg0: i32) -> (i32, i32) {
    %c0_i32 = arith.constant 0 : i32
    %c0_i32_0 = arith.constant 0 : i32
    %c0_i32_1 = arith.constant 0 : i32
    return %c0_i32, %c0_i32_0 : i32, i32
  }
  func.func @transform_13(%arg0: i32) -> (i32, i32) {
    %c0_i32 = arith.constant 0 : i32
    %c0_i32_0 = arith.constant 0 : i32
    %c0_i32_1 = arith.constant 0 : i32
    return %c0_i32, %c0_i32_0 : i32, i32
  }
  func.func @transform_14(%arg0: i32) -> (i32, i32) {
    %c0_i32 = arith.constant 0 : i32
    %c0_i32_0 = arith.constant 0 : i32
    return %arg0, %c0_i32 : i32, i32
  }
  func.func @transform_15(%arg0: i32) -> (i32, i32, i32) {
    %c0_i32 = arith.constant 0 : i32
    %c0_i32_0 = arith.constant 0 : i32
    %c0_i32_1 = arith.constant 0 : i32
    return %c0_i32, %arg0, %c0_i32_0 : i32, i32, i32
  }
}

</mosaic_0001>

<bundles_post_ra>
// kernel: tpu_custom_call.1
= control target key start
LH: loop header
LB: loop body
LE: loop exit
PB: predicated region body
PF: predicated region fallthrough
CT: control target
= control target key end

     0   :  { %s8044_s18 = smov 0   ;;  %s8046_s19 = smov 0   ;;  %s13196_s0 = inlined_call_operand.vmem [shape: f32[512,32], index: 0, kind: input, shape index: {}]   ;;  %s13197_s1 = inlined_call_operand.vmem [shape: f32[3,512,16], index: 1, kind: input, shape index: {}]   ;;  %s13198_s2 = inlined_call_operand.vmem [shape: f32[1,32], index: 2, kind: input, shape index: {}]   ;;  %s13199_s3 = inlined_call_operand.vmem [shape: f32[1,32], index: 3, kind: input, shape index: {}]   ;;  %s13200_s4 = inlined_call_operand.vmem [shape: f32[1,16], index: 4, kind: input, shape index: {}]   ;;  %s13201_s5 = inlined_call_operand.vmem [shape: f32[1,16], index: 5, kind: input, shape index: {}]   ;;  %s13202_s6 = inlined_call_operand.vmem [shape: bf16[32,64], index: 6, kind: input, shape index: {}]   ;;  %s13203_s7 = inlined_call_operand.vmem [shape: bf16[16,32], index: 7, kind: input, shape index: {}]   ;;  %s13204_s8 = inlined_call_operand.vmem [shape: f32[1,64], index: 8, kind: input, shape index: {}]   ;;  %s13205_s9 = inlined_call_operand.vmem [shape: f32[1,64], index: 9, kind: input, shape index: {}]   ;;  %s13206_s10 = inlined_call_operand.vmem [shape: f32[1,32], index: 10, kind: input, shape index: {}]   ;;  %s13207_s11 = inlined_call_operand.vmem [shape: f32[1,32], index: 11, kind: input, shape index: {}]   ;;  %s13208_s12 = inlined_call_operand.vmem [shape: bf16[64,64], index: 12, kind: input, shape index: {}]   ;;  %s13209_s13 = inlined_call_operand.vmem [shape: bf16[32,32], index: 13, kind: input, shape index: {}]   ;;  %s13210_s14 = inlined_call_operand.vmem [shape: f32[512,64], index: 14, kind: output, shape index: {0}]   ;;  %s13211_s15 = inlined_call_operand.vmem [shape: f32[3,512,32], index: 15, kind: output, shape index: {1}]  }
   0x1   :  { %s8048_s20 = smov 0  }
   0x2 LB: > { %s8060_s21 = sadd.s32 4294967295, %s7962_s20   ;;  %s8063_s22 = sadd.s32 1, %s7962_s20   ;;  %s7962_s20 = sphi %s8048_s20, %s14407_s20   ;;  %s7958_s19 = sphi %s8046_s19, %s14406_s19   ;;  %s7954_s18 = sphi %s8044_s18, %s14405_s18  }
   0x3   : > { %s56_s23 = ssub.s32 %s7962_s20, %s8063_s22  ;;  %s59_s24 = sadd.s32 1, %s7958_s19 }
   0x4   : > { %p57_p0 = scmp.eq.s32.totalorder %s56_s23, 0  ;;  %p66_p1 = scmp.ne.s32.totalorder %s7958_s19, %s7954_s18 }
   0x5   : > { %p67_p2 = scmp.eq.s32.totalorder %s7962_s20, 0  ;;  %p374_p3 = scmp.eq.s32.totalorder %s8060_s21, 1 }
   0x6   : > { %s8073_s25 = scalar_select %p57_p0, %s7958_s19, %s59_s24  }
   0x7   : > { %p68_p4 = por %p67_p2, %p66_p1  ;;  %p8075_p5 = por %p374_p3, %p66_p1 }
   0x8   : > { %p6725_p6 = scmp.ge.s32.totalorder %s7962_s20, 2 }
   0xa   : > { %432 = sbr.rel (%p6725_p6) target bundleno = 70 (0x46), region = 64 }
  0x11   : > { %444 = sbr.rel (!%p68_p4) target bundleno = 70 (0x46), region = 72  ;;  %s446_s27 = sand.u32 (%p68_p4), 1, %s7958_s19  }
  0x12   : > { %s6882_s28 = sshll.u32 (%p68_p4), %s7962_s20, 8  ;;  %s7295_s29 = smul.u32 (%p68_p4), 768, %s446_s27 }
  0x13   : > { %s8085_s17 = scalar_lea.vmem (%p68_p4), %s13197_s1, %s6882_s28 }
  0x14   : > { %v669_v0 = vld [vmem:[%s8085_s17] sm:$0xff] (%p68_p4)  ;;  %v671_v1 = vld [vmem:[%s8085_s17 + $0x8] sm:$0xff] (%p68_p4)  ;;  %v673_v2 = vld [vmem:[%s8085_s17 + $0x10] sm:$0xff] (%p68_p4)  ;;  %s8093_s23 = scalar_lea.vmem (%p68_p4), [#allocation2], %s7295_s29 }
  0x15   : > { %v675_v3 = vld [vmem:[%s8085_s17 + $0x18] sm:$0xff] (%p68_p4)  ;;  %v677_v4 = vld [vmem:[%s8085_s17 + $0x20] sm:$0xff] (%p68_p4)  ;;  %v679_v5 = vld [vmem:[%s8085_s17 + $0x28] sm:$0xff] (%p68_p4)  ;;  %670 = vst [vmem:[%s8093_s23] sm:$0xff] (%p68_p4), %v669_v0 }
  0x16   : > { %672 = vst [vmem:[%s8093_s23 + $0x8] sm:$0xff] (%p68_p4), %v671_v1  ;;  %674 = vst [vmem:[%s8093_s23 + $0x10] sm:$0xff] (%p68_p4), %v673_v2  ;;  %v681_v6 = vld [vmem:[%s8085_s17 + $0x30] sm:$0xff] (%p68_p4)  ;;  %v683_v7 = vld [vmem:[%s8085_s17 + $0x38] sm:$0xff] (%p68_p4) }
  0x17   : > { %676 = vst [vmem:[%s8093_s23 + $0x18] sm:$0xff] (%p68_p4), %v675_v3  ;;  %678 = vst [vmem:[%s8093_s23 + $0x20] sm:$0xff] (%p68_p4), %v677_v4  ;;  %v685_v8 = vld [vmem:[%s8085_s17 + $0x40] sm:$0xff] (%p68_p4)  ;;  %v687_v9 = vld [vmem:[%s8085_s17 + $0x48] sm:$0xff] (%p68_p4) }
  0x18   : > { %680 = vst [vmem:[%s8093_s23 + $0x28] sm:$0xff] %v679_v5  ;;  %682 = vst [vmem:[%s8093_s23 + $0x30] sm:$0xff] %v681_v6  ;;  %v689_v10 = vld [vmem:[%s8085_s17 + $0x50] sm:$0xff]  ;;  %v691_v11 = vld [vmem:[%s8085_s17 + $0x58] sm:$0xff] }
  0x19   : > { %684 = vst [vmem:[%s8093_s23 + $0x38] sm:$0xff] %v683_v7  ;;  %686 = vst [vmem:[%s8093_s23 + $0x40] sm:$0xff] %v685_v8  ;;  %v693_v12 = vld [vmem:[%s8085_s17 + $0x60] sm:$0xff]  ;;  %v695_v13 = vld [vmem:[%s8085_s17 + $0x68] sm:$0xff] }
  0x1a   : > { %688 = vst [vmem:[%s8093_s23 + $0x48] sm:$0xff] %v687_v9  ;;  %690 = vst [vmem:[%s8093_s23 + $0x50] sm:$0xff] %v689_v10  ;;  %v697_v14 = vld [vmem:[%s8085_s17 + $0x70] sm:$0xff]  ;;  %v699_v15 = vld [vmem:[%s8085_s17 + $0x78] sm:$0xff] }
  0x1b   : > { %692 = vst [vmem:[%s8093_s23 + $0x58] sm:$0xff] %v691_v11  ;;  %694 = vst [vmem:[%s8093_s23 + $0x60] sm:$0xff] %v693_v12  ;;  %v701_v16 = vld [vmem:[%s8085_s17 + $0x80] sm:$0xff]  ;;  %v703_v17 = vld [vmem:[%s8085_s17 + $0x88] sm:$0xff] }
  0x1c   : > { %696 = vst [vmem:[%s8093_s23 + $0x68] sm:$0xff] %v695_v13  ;;  %698 = vst [vmem:[%s8093_s23 + $0x70] sm:$0xff] %v697_v14  ;;  %v705_v18 = vld [vmem:[%s8085_s17 + $0x90] sm:$0xff]  ;;  %v707_v19 = vld [vmem:[%s8085_s17 + $0x98] sm:$0xff] }
  0x1d   : > { %700 = vst [vmem:[%s8093_s23 + $0x78] sm:$0xff] %v699_v15  ;;  %702 = vst [vmem:[%s8093_s23 + $0x80] sm:$0xff] %v701_v16  ;;  %v709_v20 = vld [vmem:[%s8085_s17 + $0xa0] sm:$0xff]  ;;  %v711_v21 = vld [vmem:[%s8085_s17 + $0xa8] sm:$0xff] }
  0x1e   : > { %704 = vst [vmem:[%s8093_s23 + $0x88] sm:$0xff] %v703_v17  ;;  %706 = vst [vmem:[%s8093_s23 + $0x90] sm:$0xff] %v705_v18  ;;  %v713_v22 = vld [vmem:[%s8085_s17 + $0xb0] sm:$0xff]  ;;  %v715_v23 = vld [vmem:[%s8085_s17 + $0xb8] sm:$0xff] }
  0x1f   : > { %708 = vst [vmem:[%s8093_s23 + $0x98] sm:$0xff] %v707_v19  ;;  %710 = vst [vmem:[%s8093_s23 + $0xa0] sm:$0xff] %v709_v20  ;;  %v717_v24 = vld [vmem:[%s8085_s17 + $0xc0] sm:$0xff]  ;;  %v719_v25 = vld [vmem:[%s8085_s17 + $0xc8] sm:$0xff] }
  0x20   : > { %712 = vst [vmem:[%s8093_s23 + $0xa8] sm:$0xff] %v711_v21  ;;  %714 = vst [vmem:[%s8093_s23 + $0xb0] sm:$0xff] %v713_v22  ;;  %v721_v26 = vld [vmem:[%s8085_s17 + $0xd0] sm:$0xff]  ;;  %v723_v27 = vld [vmem:[%s8085_s17 + $0xd8] sm:$0xff] }
  0x21   : > { %716 = vst [vmem:[%s8093_s23 + $0xb8] sm:$0xff] %v715_v23  ;;  %718 = vst [vmem:[%s8093_s23 + $0xc0] sm:$0xff] %v717_v24  ;;  %v725_v28 = vld [vmem:[%s8085_s17 + $0xe0] sm:$0xff]  ;;  %v727_v29 = vld [vmem:[%s8085_s17 + $0xe8] sm:$0xff] }
  0x22   : > { %720 = vst [vmem:[%s8093_s23 + $0xc8] sm:$0xff] %v719_v25  ;;  %722 = vst [vmem:[%s8093_s23 + $0xd0] sm:$0xff] %v721_v26  ;;  %v729_v30 = vld [vmem:[%s8085_s17 + $0xf0] sm:$0xff]  ;;  %v731_v31 = vld [vmem:[%s8085_s17 + $0xf8] sm:$0xff] }
  0x23   : > { %724 = vst [vmem:[%s8093_s23 + $0xd8] sm:$0xff] %v723_v27  ;;  %726 = vst [vmem:[%s8093_s23 + $0xe0] sm:$0xff] %v725_v28  ;;  %v733_v32 = vld [vmem:[%s8085_s17 + $0x200] sm:$0xff]  ;;  %v735_v33 = vld [vmem:[%s8085_s17 + $0x208] sm:$0xff] }
  0x24   : > { %728 = vst [vmem:[%s8093_s23 + $0xe8] sm:$0xff] %v727_v29  ;;  %730 = vst [vmem:[%s8093_s23 + $0xf0] sm:$0xff] %v729_v30  ;;  %v737_v34 = vld [vmem:[%s8085_s17 + $0x210] sm:$0xff]  ;;  %v739_v35 = vld [vmem:[%s8085_s17 + $0x218] sm:$0xff] }
  0x25   : > { %732 = vst [vmem:[%s8093_s23 + $0xf8] sm:$0xff] %v731_v31  ;;  %734 = vst [vmem:[%s8093_s23 + $0x100] sm:$0xff] %v733_v32  ;;  %v741_v36 = vld [vmem:[%s8085_s17 + $0x220] sm:$0xff]  ;;  %v743_v37 = vld [vmem:[%s8085_s17 + $0x228] sm:$0xff] }
  0x26   : > { %736 = vst [vmem:[%s8093_s23 + $0x108] sm:$0xff] %v735_v33  ;;  %738 = vst [vmem:[%s8093_s23 + $0x110] sm:$0xff] %v737_v34  ;;  %v745_v38 = vld [vmem:[%s8085_s17 + $0x230] sm:$0xff]  ;;  %v747_v39 = vld [vmem:[%s8085_s17 + $0x238] sm:$0xff] }
  0x27   : > { %740 = vst [vmem:[%s8093_s23 + $0x118] sm:$0xff] %v739_v35  ;;  %742 = vst [vmem:[%s8093_s23 + $0x120] sm:$0xff] %v741_v36  ;;  %v749_v40 = vld [vmem:[%s8085_s17 + $0x240] sm:$0xff]  ;;  %v751_v41 = vld [vmem:[%s8085_s17 + $0x248] sm:$0xff] }
  0x28   : > { %744 = vst [vmem:[%s8093_s23 + $0x128] sm:$0xff] %v743_v37  ;;  %746 = vst [vmem:[%s8093_s23 + $0x130] sm:$0xff] %v745_v38  ;;  %v753_v42 = vld [vmem:[%s8085_s17 + $0x250] sm:$0xff]  ;;  %v755_v43 = vld [vmem:[%s8085_s17 + $0x258] sm:$0xff] }
  0x29   : > { %748 = vst [vmem:[%s8093_s23 + $0x138] sm:$0xff] %v747_v39  ;;  %750 = vst [vmem:[%s8093_s23 + $0x140] sm:$0xff] %v749_v40  ;;  %v757_v44 = vld [vmem:[%s8085_s17 + $0x260] sm:$0xff]  ;;  %v759_v45 = vld [vmem:[%s8085_s17 + $0x268] sm:$0xff] }
  0x2a   : > { %752 = vst [vmem:[%s8093_s23 + $0x148] sm:$0xff] %v751_v41  ;;  %754 = vst [vmem:[%s8093_s23 + $0x150] sm:$0xff] %v753_v42  ;;  %v761_v46 = vld [vmem:[%s8085_s17 + $0x270] sm:$0xff]  ;;  %v763_v47 = vld [vmem:[%s8085_s17 + $0x278] sm:$0xff] }
  0x2b   : > { %756 = vst [vmem:[%s8093_s23 + $0x158] sm:$0xff] %v755_v43  ;;  %758 = vst [vmem:[%s8093_s23 + $0x160] sm:$0xff] %v757_v44  ;;  %v765_v48 = vld [vmem:[%s8085_s17 + $0x280] sm:$0xff]  ;;  %v767_v49 = vld [vmem:[%s8085_s17 + $0x288] sm:$0xff] }
  0x2c   : > { %760 = vst [vmem:[%s8093_s23 + $0x168] sm:$0xff] %v759_v45  ;;  %762 = vst [vmem:[%s8093_s23 + $0x170] sm:$0xff] %v761_v46  ;;  %v769_v50 = vld [vmem:[%s8085_s17 + $0x290] sm:$0xff]  ;;  %v771_v51 = vld [vmem:[%s8085_s17 + $0x298] sm:$0xff] }
  0x2d   : > { %764 = vst [vmem:[%s8093_s23 + $0x178] sm:$0xff] %v763_v47  ;;  %766 = vst [vmem:[%s8093_s23 + $0x180] sm:$0xff] %v765_v48  ;;  %v773_v52 = vld [vmem:[%s8085_s17 + $0x2a0] sm:$0xff]  ;;  %v775_v53 = vld [vmem:[%s8085_s17 + $0x2a8] sm:$0xff] }
  0x2e   : > { %768 = vst [vmem:[%s8093_s23 + $0x188] sm:$0xff] %v767_v49  ;;  %770 = vst [vmem:[%s8093_s23 + $0x190] sm:$0xff] %v769_v50  ;;  %v777_v54 = vld [vmem:[%s8085_s17 + $0x2b0] sm:$0xff]  ;;  %v779_v55 = vld [vmem:[%s8085_s17 + $0x2b8] sm:$0xff] }
  0x2f   : > { %772 = vst [vmem:[%s8093_s23 + $0x198] sm:$0xff] %v771_v51  ;;  %774 = vst [vmem:[%s8093_s23 + $0x1a0] sm:$0xff] %v773_v52  ;;  %v781_v56 = vld [vmem:[%s8085_s17 + $0x2c0] sm:$0xff]  ;;  %v783_v57 = vld [vmem:[%s8085_s17 + $0x2c8] sm:$0xff] }
  0x30   : > { %776 = vst [vmem:[%s8093_s23 + $0x1a8] sm:$0xff] %v775_v53  ;;  %778 = vst [vmem:[%s8093_s23 + $0x1b0] sm:$0xff] %v777_v54  ;;  %v785_v58 = vld [vmem:[%s8085_s17 + $0x2d0] sm:$0xff]  ;;  %v787_v59 = vld [vmem:[%s8085_s17 + $0x2d8] sm:$0xff] }
  0x31   : > { %780 = vst [vmem:[%s8093_s23 + $0x1b8] sm:$0xff] %v779_v55  ;;  %782 = vst [vmem:[%s8093_s23 + $0x1c0] sm:$0xff] %v781_v56  ;;  %v789_v60 = vld [vmem:[%s8085_s17 + $0x2e0] sm:$0xff]  ;;  %v791_v61 = vld [vmem:[%s8085_s17 + $0x2e8] sm:$0xff] }
  0x32   : > { %784 = vst [vmem:[%s8093_s23 + $0x1c8] sm:$0xff] %v783_v57  ;;  %786 = vst [vmem:[%s8093_s23 + $0x1d0] sm:$0xff] %v785_v58  ;;  %v793_v62 = vld [vmem:[%s8085_s17 + $0x2f0] sm:$0xff]  ;;  %v795_v63 = vld [vmem:[%s8085_s17 + $0x2f8] sm:$0xff] }
  0x33   : > { %788 = vst [vmem:[%s8093_s23 + $0x1d8] sm:$0xff] %v787_v59  ;;  %790 = vst [vmem:[%s8093_s23 + $0x1e0] sm:$0xff] %v789_v60  ;;  %v797_v0 = vld [vmem:[%s8085_s17 + $0x400] sm:$0xff]  ;;  %v799_v1 = vld [vmem:[%s8085_s17 + $0x408] sm:$0xff] }
  0x34   : > { %792 = vst [vmem:[%s8093_s23 + $0x1e8] sm:$0xff] %v791_v61  ;;  %794 = vst [vmem:[%s8093_s23 + $0x1f0] sm:$0xff] %v793_v62  ;;  %v801_v2 = vld [vmem:[%s8085_s17 + $0x410] sm:$0xff]  ;;  %v803_v3 = vld [vmem:[%s8085_s17 + $0x418] sm:$0xff] }
  0x35   : > { %796 = vst [vmem:[%s8093_s23 + $0x1f8] sm:$0xff] %v795_v63  ;;  %798 = vst [vmem:[%s8093_s23 + $0x200] sm:$0xff] %v797_v0  ;;  %v805_v4 = vld [vmem:[%s8085_s17 + $0x420] sm:$0xff]  ;;  %v807_v5 = vld [vmem:[%s8085_s17 + $0x428] sm:$0xff] }
  0x36   : > { %800 = vst [vmem:[%s8093_s23 + $0x208] sm:$0xff] %v799_v1  ;;  %802 = vst [vmem:[%s8093_s23 + $0x210] sm:$0xff] %v801_v2  ;;  %v809_v6 = vld [vmem:[%s8085_s17 + $0x430] sm:$0xff]  ;;  %v811_v7 = vld [vmem:[%s8085_s17 + $0x438] sm:$0xff] }
  0x37   : > { %804 = vst [vmem:[%s8093_s23 + $0x218] sm:$0xff] %v803_v3  ;;  %806 = vst [vmem:[%s8093_s23 + $0x220] sm:$0xff] %v805_v4  ;;  %v813_v8 = vld [vmem:[%s8085_s17 + $0x440] sm:$0xff]  ;;  %v815_v9 = vld [vmem:[%s8085_s17 + $0x448] sm:$0xff] }
  0x38   : > { %808 = vst [vmem:[%s8093_s23 + $0x228] sm:$0xff] %v807_v5  ;;  %810 = vst [vmem:[%s8093_s23 + $0x230] sm:$0xff] %v809_v6  ;;  %v817_v10 = vld [vmem:[%s8085_s17 + $0x450] sm:$0xff]  ;;  %v819_v11 = vld [vmem:[%s8085_s17 + $0x458] sm:$0xff] }
  0x39   : > { %812 = vst [vmem:[%s8093_s23 + $0x238] sm:$0xff] %v811_v7  ;;  %814 = vst [vmem:[%s8093_s23 + $0x240] sm:$0xff] %v813_v8  ;;  %v821_v12 = vld [vmem:[%s8085_s17 + $0x460] sm:$0xff]  ;;  %v823_v13 = vld [vmem:[%s8085_s17 + $0x468] sm:$0xff] }
  0x3a   : > { %816 = vst [vmem:[%s8093_s23 + $0x248] sm:$0xff] %v815_v9  ;;  %818 = vst [vmem:[%s8093_s23 + $0x250] sm:$0xff] %v817_v10  ;;  %v825_v14 = vld [vmem:[%s8085_s17 + $0x470] sm:$0xff]  ;;  %v827_v15 = vld [vmem:[%s8085_s17 + $0x478] sm:$0xff] }
  0x3b   : > { %820 = vst [vmem:[%s8093_s23 + $0x258] sm:$0xff] %v819_v11  ;;  %822 = vst [vmem:[%s8093_s23 + $0x260] sm:$0xff] %v821_v12  ;;  %v829_v16 = vld [vmem:[%s8085_s17 + $0x480] sm:$0xff]  ;;  %v831_v17 = vld [vmem:[%s8085_s17 + $0x488] sm:$0xff] }
  0x3c   : > { %824 = vst [vmem:[%s8093_s23 + $0x268] sm:$0xff] %v823_v13  ;;  %826 = vst [vmem:[%s8093_s23 + $0x270] sm:$0xff] %v825_v14  ;;  %v833_v18 = vld [vmem:[%s8085_s17 + $0x490] sm:$0xff]  ;;  %v835_v19 = vld [vmem:[%s8085_s17 + $0x498] sm:$0xff] }
  0x3d   : > { %828 = vst [vmem:[%s8093_s23 + $0x278] sm:$0xff] %v827_v15  ;;  %830 = vst [vmem:[%s8093_s23 + $0x280] sm:$0xff] %v829_v16  ;;  %v837_v20 = vld [vmem:[%s8085_s17 + $0x4a0] sm:$0xff]  ;;  %v839_v21 = vld [vmem:[%s8085_s17 + $0x4a8] sm:$0xff] }
  0x3e   : > { %832 = vst [vmem:[%s8093_s23 + $0x288] sm:$0xff] %v831_v17  ;;  %834 = vst [vmem:[%s8093_s23 + $0x290] sm:$0xff] %v833_v18  ;;  %v841_v22 = vld [vmem:[%s8085_s17 + $0x4b0] sm:$0xff]  ;;  %v843_v23 = vld [vmem:[%s8085_s17 + $0x4b8] sm:$0xff] }
  0x3f   : > { %836 = vst [vmem:[%s8093_s23 + $0x298] sm:$0xff] %v835_v19  ;;  %838 = vst [vmem:[%s8093_s23 + $0x2a0] sm:$0xff] %v837_v20  ;;  %v845_v24 = vld [vmem:[%s8085_s17 + $0x4c0] sm:$0xff]  ;;  %v847_v25 = vld [vmem:[%s8085_s17 + $0x4c8] sm:$0xff] }
  0x40   : > { %840 = vst [vmem:[%s8093_s23 + $0x2a8] sm:$0xff] %v839_v21  ;;  %842 = vst [vmem:[%s8093_s23 + $0x2b0] sm:$0xff] %v841_v22  ;;  %v849_v26 = vld [vmem:[%s8085_s17 + $0x4d0] sm:$0xff]  ;;  %v851_v27 = vld [vmem:[%s8085_s17 + $0x4d8] sm:$0xff] }
  0x41   : > { %844 = vst [vmem:[%s8093_s23 + $0x2b8] sm:$0xff] %v843_v23  ;;  %846 = vst [vmem:[%s8093_s23 + $0x2c0] sm:$0xff] %v845_v24  ;;  %v853_v28 = vld [vmem:[%s8085_s17 + $0x4e0] sm:$0xff]  ;;  %v855_v29 = vld [vmem:[%s8085_s17 + $0x4e8] sm:$0xff] }
  0x42   : > { %848 = vst [vmem:[%s8093_s23 + $0x2c8] sm:$0xff] %v847_v25  ;;  %850 = vst [vmem:[%s8093_s23 + $0x2d0] sm:$0xff] %v849_v26  ;;  %v857_v30 = vld [vmem:[%s8085_s17 + $0x4f0] sm:$0xff]  ;;  %v859_v31 = vld [vmem:[%s8085_s17 + $0x4f8] sm:$0xff] }
  0x43   : > { %852 = vst [vmem:[%s8093_s23 + $0x2d8] sm:$0xff] %v851_v27  ;;  %854 = vst [vmem:[%s8093_s23 + $0x2e0] sm:$0xff] %v853_v28 }
  0x44   : > { %856 = vst [vmem:[%s8093_s23 + $0x2e8] sm:$0xff] %v855_v29  ;;  %858 = vst [vmem:[%s8093_s23 + $0x2f0] sm:$0xff] %v857_v30 }
  0x45   : > { %860 = vst [vmem:[%s8093_s23 + $0x2f8] sm:$0xff] %v859_v31 }
  0x46 PF: > { %p6728_p7 = scmp.ge.s32.totalorder %s7962_s20, 1  ;;  %p865_p8 = scmp.lt.s32.totalorder %s7962_s20, 3 }
  0x48   : > { %p866_p9 = pnand %p6728_p7, %p865_p8 }
  0x4a   : > { %869 = sbr.rel (%p866_p9) target bundleno = 1627 (0x65b), region = 110 }
  0x51   : > { %s872_s24 = sand.u32 1, %s7954_s18   ;;  %vm2048_vm0 = vcmask 130048   ;;  %s6729_s18 = sshll.u32 %s8060_s21, 5  ;;  %vm1201_vm1 = vcmask 261120   ;;  %vm3689_vm2 = vcmask 523264  }
  0x52   : > { %s8284_s27 = smul.u32 768, %s872_s24  ;;  %p929_p10 = scmp.lt.s32.totalorder %s6729_s18, 63 }
  0x54   : > { %s8287_s28 = scalar_lea.vmem [#allocation2], %s8284_s27  ;;  %s14409_s18 = smov (!%p929_p10, %s6729_s18), 63 }
  0x55   : > { %v975_v32 = vld [vmem:[%s8287_s28] sm:$0xff]  ;;  %v977_v38 = vld [vmem:[%s8287_s28 + $0x10] sm:$0xff]  ;;  %v976_v44 = vld [vmem:[%s8287_s28 + $0x8] sm:$0xff]  ;;  %s6730_s20 = sshll.u32 %s14409_s18, 3  ;;  %s12623_s24 = scalar_lea.vmem [#allocation3], %s8284_s27 }
  0x56   : > { %v1007_v33 = vld [vmem:[%s8287_s28 + $0x100] sm:$0xff]  ;;  %v1790_v35 = vmul.f32 %v975_v32, %v975_v32  ;;  %v1009_v39 = vld [vmem:[%s8287_s28 + $0x110] sm:$0xff]  ;;  %v1792_v41 = vmul.f32 %v977_v38, %v977_v38  ;;  %v1008_v45 = vld [vmem:[%s8287_s28 + $0x108] sm:$0xff]  ;;  %v1791_v48 = vmul.f32 %v976_v44, %v976_v44  ;;  %s8722_s16 = scalar_lea.vmem %s13196_s0, %s6730_s20  ;;  %s12824_s29 = scalar_lea.vmem %s13210_s14, %s6730_s20 }
  0x57   : > { %v1039_v34 = vld [vmem:[%s8287_s28 + $0x200] sm:$0xff]  ;;  %v1822_v36 = vmul.f32 %v1007_v33, %v1007_v33  ;;  %v1041_v40 = vld [vmem:[%s8287_s28 + $0x210] sm:$0xff]  ;;  %v1824_v42 = vmul.f32 %v1009_v39, %v1009_v39  ;;  %v1040_v46 = vld [vmem:[%s8287_s28 + $0x208] sm:$0xff]  ;;  %v1823_v49 = vmul.f32 %v1008_v45, %v1008_v45  ;;  %s6883_s18 = sshll.u32 (%p8075_p5), %s8060_s21, 8 }
  0x58   : > { %v1886_v37 = vmul.f32 %v1039_v34, %v1039_v34  ;;  %v1888_v43 = vmul.f32 %v1041_v40, %v1041_v40  ;;  %v1887_v50 = vmul.f32 %v1040_v46, %v1040_v46  ;;  %v978_v51 = vld [vmem:[%s8287_s28 + $0x18] sm:$0xff]  ;;  %v979_v58 = vld [vmem:[%s8287_s28 + $0x20] sm:$0xff]  ;;  %v980_v1 = vld [vmem:[%s8287_s28 + $0x28] sm:$0xff] }
  0x59   : > { %v1854_v47 = vadd.f32 %v1822_v36, %v1790_v35  ;;  %v1010_v52 = vld [vmem:[%s8287_s28 + $0x118] sm:$0xff]  ;;  %v1856_v54 = vadd.f32 %v1824_v42, %v1792_v41  ;;  %v1793_v55 = vmul.f32 %v978_v51, %v978_v51  ;;  %v1011_v59 = vld [vmem:[%s8287_s28 + $0x120] sm:$0xff]  ;;  %v1855_v62 = vadd.f32 %v1823_v49, %v1791_v48  ;;  %v1012_v2 = vld [vmem:[%s8287_s28 + $0x128] sm:$0xff] }
  0x5a   : > { %v1042_v53 = vld [vmem:[%s8287_s28 + $0x218] sm:$0xff]  ;;  %v1825_v56 = vmul.f32 %v1010_v52, %v1010_v52  ;;  %v1043_v60 = vld [vmem:[%s8287_s28 + $0x220] sm:$0xff]  ;;  %v1794_v63 = vmul.f32 %v979_v58, %v979_v58  ;;  %v1826_v0 = vmul.f32 %v1011_v59, %v1011_v59  ;;  %v1044_v3 = vld [vmem:[%s8287_s28 + $0x228] sm:$0xff]  ;;  %v1795_v7 = vmul.f32 %v980_v1, %v980_v1 }
  0x5b   : > { %v1889_v57 = vmul.f32 %v1042_v53, %v1042_v53  ;;  %v1918_v61 = vadd.f32 %v1886_v37, %v1854_v47  ;;  %v1920_v4 = vadd.f32 %v1888_v43, %v1856_v54  ;;  %v1890_v6 = vmul.f32 %v1043_v60, %v1043_v60  ;;  %v981_v8 = vld [vmem:[%s8287_s28 + $0x30] sm:$0xff]  ;;  %v982_v19 = vld [vmem:[%s8287_s28 + $0x38] sm:$0xff]  ;;  %v983_v28 = vld [vmem:[%s8287_s28 + $0x40] sm:$0xff] }
  0x5c   : > { %v1857_v5 = vadd.f32 %v1825_v56, %v1793_v55  ;;  %v1919_v10 = vadd.f32 %v1887_v50, %v1855_v62  ;;  %v1858_v11 = vadd.f32 %v1826_v0, %v1794_v63  ;;  %v1827_v12 = vmul.f32 %v1012_v2, %v1012_v2  ;;  %v1013_v13 = vld [vmem:[%s8287_s28 + $0x130] sm:$0xff]  ;;  %v1014_v23 = vld [vmem:[%s8287_s28 + $0x138] sm:$0xff]  ;;  %v1015_v29 = vld [vmem:[%s8287_s28 + $0x140] sm:$0xff] }
  0x5d   : > { %v8308_v9 = vadd.f32 1e-12, %v1918_v61  ;;  %v1045_v14 = vld [vmem:[%s8287_s28 + $0x230] sm:$0xff]  ;;  %v8312_v15 = vadd.f32 1e-12, %v1920_v4  ;;  %v1891_v17 = vmul.f32 %v1044_v3, %v1044_v3  ;;  %v1796_v18 = vmul.f32 %v981_v8, %v981_v8  ;;  %v1046_v24 = vld [vmem:[%s8287_s28 + $0x238] sm:$0xff] }
  0x5e   : > { %v1921_v16 = vadd.f32 %v1889_v57, %v1857_v5  ;;  %v8316_v20 = vadd.f32 1e-12, %v1919_v10  ;;  %v1922_v21 = vadd.f32 %v1890_v6, %v1858_v11  ;;  %v1859_v22 = vadd.f32 %v1827_v12, %v1795_v7  ;;  %v1047_v33 = vld [vmem:[%s8287_s28 + $0x240] sm:$0xff]  ;;  %v984_v34 = vld [vmem:[%s8287_s28 + $0x48] sm:$0xff]  ;;  %v985_v43 = vld [vmem:[%s8287_s28 + $0x50] sm:$0xff] }
  0x5f   : > { %7330 = vrsqrt.f32 %v8308_v9  ;;  %v1828_v26 = vmul.f32 %v1013_v13, %v1013_v13  ;;  %v1892_v27 = vmul.f32 %v1045_v14, %v1045_v14  ;;  %v1797_v32 = vmul.f32 %v982_v19, %v982_v19  ;;  %v1016_v38 = vld [vmem:[%s8287_s28 + $0x148] sm:$0xff]  ;;  %v1017_v44 = vld [vmem:[%s8287_s28 + $0x150] sm:$0xff]  ;;  %v986_v50 = vld [vmem:[%s8287_s28 + $0x58] sm:$0xff] }
  0x60   : > { %7332 = vrsqrt.f32 %v8312_v15  ;;  %v8321_v25 = vadd.f32 1e-12, %v1921_v16  ;;  %v8326_v30 = vadd.f32 1e-12, %v1922_v21  ;;  %v1923_v31 = vadd.f32 %v1891_v17, %v1859_v22  ;;  %v1048_v39 = vld [vmem:[%s8287_s28 + $0x248] sm:$0xff]  ;;  %v1049_v49 = vld [vmem:[%s8287_s28 + $0x250] sm:$0xff] }
  0x61   : > { %7334 = vrsqrt.f32 %v8316_v20  ;;  %v1860_v35 = vadd.f32 %v1828_v26, %v1796_v18  ;;  %v1829_v36 = vmul.f32 %v1014_v23, %v1014_v23  ;;  %v1893_v37 = vmul.f32 %v1046_v24, %v1046_v24  ;;  %v1018_v54 = vld [vmem:[%s8287_s28 + $0x158] sm:$0xff]  ;;  %v987_v60 = vld [vmem:[%s8287_s28 + $0x60] sm:$0xff]  ;;  %v988_v26 = vld [vmem:[%s8287_s28 + $0x68] sm:$0xff] }
  0x62   : > { %7336 = vrsqrt.f32 %v8321_v25  ;;  %v8334_v40 = vadd.f32 1e-12, %v1923_v31  ;;  %v1798_v41 = vmul.f32 %v983_v28, %v983_v28  ;;  %v1830_v42 = vmul.f32 %v1015_v29, %v1015_v29  ;;  %v1050_v59 = vld [vmem:[%s8287_s28 + $0x258] sm:$0xff]  ;;  %v1019_v4 = vld [vmem:[%s8287_s28 + $0x160] sm:$0xff] }
  0x63   : > { %7338 = vrsqrt.f32 %v8326_v30  ;;  %v1924_v45 = vadd.f32 %v1892_v27, %v1860_v35  ;;  %v1861_v46 = vadd.f32 %v1829_v36, %v1797_v32  ;;  %v1894_v47 = vmul.f32 %v1047_v33, %v1047_v33  ;;  %v1020_v27 = vld [vmem:[%s8287_s28 + $0x168] sm:$0xff]  ;;  %v1021_v36 = vld [vmem:[%s8287_s28 + $0x170] sm:$0xff] }
  0x64   : > { %v1799_v48 = vmul.f32 %v984_v34, %v984_v34  ;;  %7340 = vrsqrt.f32 %v8334_v40  ;;  %v1862_v51 = vadd.f32 %v1830_v42, %v1798_v41  ;;  %v1831_v52 = vmul.f32 %v1016_v38, %v1016_v38  ;;  %v1052_v32 = vld [vmem:[%s8287_s28 + $0x268] sm:$0xff] }
  0x65   : > { %v1895_v53 = vmul.f32 %v1048_v39, %v1048_v39  ;;  %v8342_v55 = vadd.f32 1e-12, %v1924_v45  ;;  %v1925_v56 = vadd.f32 %v1893_v37, %v1861_v46  ;;  %v1800_v57 = vmul.f32 %v985_v43, %v985_v43  ;;  %v1053_v43 = vld [vmem:[%s8287_s28 + $0x270] sm:$0xff] }
  0x66   : > { %v1832_v58 = vmul.f32 %v1017_v44, %v1017_v44  ;;  %v1926_v61 = vadd.f32 %v1894_v47, %v1862_v51  ;;  %v1863_v62 = vadd.f32 %v1831_v52, %v1799_v48  ;;  %v1896_v63 = vmul.f32 %v1049_v49, %v1049_v49  ;;  %v1022_v44 = vld [vmem:[%s8287_s28 + $0x178] sm:$0xff] }
  0x67   : > { %v1801_v0 = vmul.f32 %v986_v50, %v986_v50  ;;  %7342 = vrsqrt.f32 %v8342_v55  ;;  %v8347_v1 = vadd.f32 1e-12, %v1925_v56  ;;  %v1833_v3 = vmul.f32 %v1018_v54, %v1018_v54  ;;  %v1054_v52 = vld [vmem:[%s8287_s28 + $0x278] sm:$0xff]  ;;  %v1023_v54 = vld [vmem:[%s8287_s28 + $0x180] sm:$0xff] }
  0x68   : > { %v1864_v2 = vadd.f32 %v1832_v58, %v1800_v57  ;;  %v8352_v6 = vadd.f32 1e-12, %v1926_v61  ;;  %v1927_v7 = vadd.f32 %v1895_v53, %v1863_v62  ;;  %v1897_v8 = vmul.f32 %v1050_v59, %v1050_v59  ;;  %v991_v53 = vld [vmem:[%s8287_s28 + $0x80] sm:$0xff] }
  0x69   : > { %v8350_v5 = vpop.eup %7330  ;;  %v1802_v10 = vmul.f32 %v987_v60, %v987_v60  ;;  %7344 = vrsqrt.f32 %v8347_v1  ;;  %v1865_v14 = vadd.f32 %v1833_v3, %v1801_v0  ;;  %v1834_v19 = vmul.f32 %v1019_v4, %v1019_v4  ;;  %v1055_v4 = vld [vmem:[%s8287_s28 + $0x280] sm:$0xff] }
  0x6a   : > { %13562 = vst [vmem:[#allocation4_spill] sm:$0xff] %v8350_v5  ;;  %v8354_v11 = vpop.eup %7332  ;;  %v8358_v12 = vmul.f32 %v8350_v5, %v8308_v9  ;;  %v1928_v13 = vadd.f32 %v1896_v63, %v1864_v2  ;;  %7346 = vrsqrt.f32 %v8352_v6  ;;  %v8368_v18 = vadd.f32 1e-12, %v1927_v7 }
  0x6b   : > { %13563 = vst [vmem:[#allocation5_spill] sm:$0xff] %v8354_v11  ;;  %v8361_v16 = vpop.eup %7334  ;;  %v8365_v17 = vmul.f32 %v8354_v11, %v8312_v15  ;;  %v1929_v24 = vadd.f32 %v1897_v8, %v1865_v14  ;;  %v1051_v15 = vld [vmem:[%s8287_s28 + $0x260] sm:$0xff]  ;;  %v1803_v41 = vmul.f32 %v988_v26, %v988_v26  ;;  %v1835_v42 = vmul.f32 %v1020_v27, %v1020_v27  ;;  %v1025_v26 = vld [vmem:[%s8287_s28 + $0x190] sm:$0xff] }
  0x6c   : > { %13564 = vst [vmem:[#allocation6_spill] sm:$0xff] %v8361_v16  ;;  %v8370_v21 = vpop.eup %7336  ;;  %v2049_v9 = vsel %vm2048_vm0, %v8358_v12, 0.0  ;;  %v8376_v22 = vmul.f32 %v8361_v16, %v8316_v20  ;;  %v8378_v23 = vadd.f32 1e-12, %v1928_v13  ;;  %7348 = vrsqrt.f32 %v8368_v18  ;;  %v1024_v13 = vld [vmem:[%s8287_s28 + $0x188] sm:$0xff] }
  0x6d   : > { %13565 = vst [vmem:[#allocation7_spill] sm:$0xff] %v8370_v21  ;;  %v8383_v28 = vpop.eup %7338  ;;  %2050 = vadd.xlane.f32.xlu0 %v2049_v9  ;;  %v2055_v29 = vsel %vm2048_vm0, %v8365_v17, 0.0  ;;  %v8389_v31 = vmul.f32 %v8370_v21, %v8321_v25  ;;  %v1866_v20 = vadd.f32 %v1834_v19, %v1802_v10  ;;  %v8400_v35 = vadd.f32 1e-12, %v1929_v24  ;;  %v989_v25 = vld [vmem:[%s8287_s28 + $0x70] sm:$0xff]  ;;  %v992_v10 = vld [vmem:[%s8287_s28 + $0x88] sm:$0xff] }
  0x6e   : > { %13566 = vst [vmem:[#allocation8_spill] sm:$0xff] %v8383_v28  ;;  %2056 = vadd.xlane.f32.xlu1 %v2055_v29  ;;  %v2052_v33 = vsel %vm2048_vm0, %v8376_v22, 0.0  ;;  %v8397_v34 = vmul.f32 %v8383_v28, %v8326_v30  ;;  %7350 = vrsqrt.f32 %v8378_v23  ;;  %v8404_v37 = vpop.eup %7340  ;;  %v1898_v39 = vmul.f32 %v1051_v15, %v1051_v15  ;;  %v990_v30 = vld [vmem:[%s8287_s28 + $0x78] sm:$0xff]  ;;  %v1056_v24 = vld [vmem:[%s8287_s28 + $0x288] sm:$0xff]  ;;  %v993_v15 = vld [vmem:[%s8287_s28 + $0x90] sm:$0xff] }
  0x6f   : > { %13567 = vst [vmem:[#allocation9_spill] sm:$0xff] %v8404_v37  ;;  %v2058_v38 = vsel %vm2048_vm0, %v8389_v31, 0.0  ;;  %v8415_v46 = vmul.f32 %v8404_v37, %v8334_v40  ;;  %7352 = vrsqrt.f32 %v8400_v35  ;;  %v1899_v47 = vmul.f32 %v1052_v32, %v1052_v32 }
  0x70   : > { %v2061_v45 = vsel %vm2048_vm0, %v8397_v34, 0.0  ;;  %v1930_v48 = vadd.f32 %v1898_v39, %v1866_v20  ;;  %v1867_v49 = vadd.f32 %v1835_v42, %v1803_v41  ;;  %v1804_v50 = vmul.f32 %v989_v25, %v989_v25 }
  0x71   : > { %2053 = vadd.xlane.f32.xlu0 %v2052_v33  ;;  %v1836_v51 = vmul.f32 %v1021_v36, %v1021_v36  ;;  %v8421_v56 = vpop.eup %7342  ;;  %v2064_v40 = vsel %vm2048_vm0, %v8415_v46, 0.0  ;;  %v1900_v57 = vmul.f32 %v1053_v43, %v1053_v43  ;;  %v1805_v58 = vmul.f32 %v990_v30, %v990_v30  ;;  %v994_v30 = vld [vmem:[%s8287_s28 + $0x98] sm:$0xff] }
  0x72   : > { %13568 = vst [vmem:[#allocation10_spill] sm:$0xff] %v8421_v56  ;;  %2059 = vadd.xlane.f32.xlu1 %v2058_v38  ;;  %v1837_v59 = vmul.f32 %v1022_v44, %v1022_v44  ;;  %v8427_v60 = vmul.f32 %v8421_v56, %v8342_v55  ;;  %v8429_v61 = vadd.f32 1e-12, %v1930_v48  ;;  %v1931_v62 = vadd.f32 %v1899_v47, %v1867_v49  ;;  %v1057_v38 = vld [vmem:[%s8287_s28 + $0x290] sm:$0xff] }
  0x73   : > { %v1868_v63 = vadd.f32 %v1836_v51, %v1804_v50  ;;  %v8431_v0 = vpop.eup %7344  ;;  %v1901_v3 = vmul.f32 %v1054_v52, %v1054_v52  ;;  %v1806_v7 = vmul.f32 %v991_v53, %v991_v53  ;;  %v1838_v8 = vmul.f32 %v1023_v54, %v1023_v54  ;;  %v1058_v52 = vld [vmem:[%s8287_s28 + $0x298] sm:$0xff] }
  0x74   : > { %13569 = vst [vmem:[#allocation11_spill] sm:$0xff] %v8431_v0  ;;  %v1869_v2 = vadd.f32 %v1837_v59, %v1805_v58  ;;  %v8436_v14 = vpop.eup %7346  ;;  %v2067_v55 = vsel %vm2048_vm0, %v8427_v60, 0.0  ;;  %v8442_v19 = vmul.f32 %v8431_v0, %v8347_v1  ;;  %7354 = vrsqrt.f32 %v8429_v61  ;;  %v1027_v58 = vld [vmem:[%s8287_s28 + $0x1a0] sm:$0xff] }
  0x75   : > { %13570 = vst [vmem:[#allocation12_spill] sm:$0xff] %v8436_v14  ;;  %2062 = vadd.xlane.f32.xlu0 %v2061_v45  ;;  %v8445_v9 = vadd.f32 1e-12, %v1931_v62  ;;  %v8452_v27 = vmul.f32 %v8436_v14, %v8352_v6  ;;  %v1932_v29 = vadd.f32 %v1900_v57, %v1868_v63  ;;  %v1870_v32 = vadd.f32 %v1838_v8, %v1806_v7  ;;  %v995_v57 = vld [vmem:[%s8287_s28 + $0xa0] sm:$0xff]  ;;  %v1028_v7 = vld [vmem:[%s8287_s28 + $0x1a8] sm:$0xff] }
  0x76   : > { %2065 = vadd.xlane.f32.xlu1 %v2064_v40  ;;  %v1933_v20 = vadd.f32 %v1901_v3, %v1869_v2  ;;  %v8454_v33 = vpop.eup %7348  ;;  %v2070_v1 = vsel %vm2048_vm0, %v8442_v19, 0.0  ;;  %v1902_v25 = vmul.f32 %v1055_v4, %v1055_v4  ;;  %v1807_v36 = vmul.f32 %v992_v10, %v992_v10  ;;  %v1059_v3 = vld [vmem:[%s8287_s28 + $0x2a0] sm:$0xff]  ;;  %v996_v4 = vld [vmem:[%s8287_s28 + $0xa8] sm:$0xff] }
  0x77   : > { %13571 = vst [vmem:[#allocation13_spill] sm:$0xff] %v8454_v33  ;;  %7356 = vrsqrt.f32 %v8445_v9  ;;  %v2073_v41 = vsel %vm2048_vm0, %v8452_v27, 0.0  ;;  %v8466_v6 = vmul.f32 %v8454_v33, %v8368_v18  ;;  %v8468_v42 = vadd.f32 1e-12, %v1932_v29  ;;  %v997_v29 = vld [vmem:[%s8287_s28 + $0xb0] sm:$0xff] }
  0x78   : > { %v8460_v39 = vpop.eup %7350  ;;  %v8470_v43 = vadd.f32 1e-12, %v1933_v20  ;;  %v1934_v45 = vadd.f32 %v1902_v25, %v1870_v32  ;;  %v1839_v47 = vmul.f32 %v1024_v13, %v1024_v13  ;;  %v1903_v48 = vmul.f32 %v1056_v24, %v1056_v24 }
  0x79   : > { %13572 = vst [vmem:[#allocation14_spill] sm:$0xff] %v8460_v39  ;;  %2068 = vadd.xlane.f32.xlu0 %v2067_v55  ;;  %v8475_v44 = vmul.f32 %v8460_v39, %v8378_v23  ;;  %v8477_v49 = vpop.eup %7352  ;;  %v2076_v18 = vsel %vm2048_vm0, %v8466_v6, 0.0  ;;  %7358 = vrsqrt.f32 %v8468_v42  ;;  %v1808_v50 = vmul.f32 %v993_v15, %v993_v15  ;;  %v1026_v23 = vld [vmem:[%s8287_s28 + $0x198] sm:$0xff] }
  0x7a   : > { %13573 = vst [vmem:[#allocation15_spill] sm:$0xff] %v8477_v49  ;;  %2071 = vadd.xlane.f32.xlu1 %v2070_v1  ;;  %v1840_v51 = vmul.f32 %v1025_v26, %v1025_v26  ;;  %v8488_v54 = vmul.f32 %v8477_v49, %v8400_v35  ;;  %7360 = vrsqrt.f32 %v8470_v43  ;;  %v8491_v40 = vadd.f32 1e-12, %v1934_v45  ;;  %v1060_v26 = vld [vmem:[%s8287_s28 + $0x2a8] sm:$0xff] }
  0x7b   : > { %v2079_v53 = vsel %vm2048_vm0, %v8475_v44, 0.0  ;;  %v1871_v59 = vadd.f32 %v1839_v47, %v1807_v36  ;;  %v1904_v63 = vmul.f32 %v1057_v38, %v1057_v38  ;;  %v1809_v2 = vmul.f32 %v994_v30, %v994_v30  ;;  %v1029_v47 = vld [vmem:[%s8287_s28 + $0x1b0] sm:$0xff] }
  0x7c   : > { %v1872_v62 = vadd.f32 %v1840_v51, %v1808_v50  ;;  %v2082_v35 = vsel %vm2048_vm0, %v8488_v54, 0.0  ;;  %7362 = vrsqrt.f32 %v8491_v40  ;;  %v1841_v8 = vmul.f32 %v1026_v23, %v1026_v23  ;;  %v1061_v23 = vld [vmem:[%s8287_s28 + $0x2b0] sm:$0xff] }
  0x7d   : > { %2074 = vadd.xlane.f32.xlu0 %v2073_v41  ;;  %v1905_v10 = vmul.f32 %v1058_v52, %v1058_v52  ;;  %v1935_v13 = vadd.f32 %v1903_v48, %v1871_v59  ;;  %v1810_v24 = vmul.f32 %v995_v57, %v995_v57  ;;  %v1842_v15 = vmul.f32 %v1027_v58, %v1027_v58  ;;  %v998_v57 = vld [vmem:[%s8287_s28 + $0xb8] sm:$0xff] }
  0x7e   : > { %2077 = vadd.xlane.f32.xlu1 %v2076_v18  ;;  %v1936_v55 = vadd.f32 %v1904_v63, %v1872_v62  ;;  %v8503_v20 = vpop.eup %7354  ;;  %v1873_v32 = vadd.f32 %v1841_v8, %v1809_v2  ;;  %v1906_v1 = vmul.f32 %v1059_v3, %v1059_v3  ;;  %v1811_v25 = vmul.f32 %v996_v4, %v996_v4  ;;  %v1030_v2 = vld [vmem:[%s8287_s28 + $0x1b8] sm:$0xff] }
  0x7f   : > { %13574 = vst [vmem:[#allocation16_spill] sm:$0xff] %v8503_v20  ;;  %v1843_v36 = vmul.f32 %v1028_v7, %v1028_v7  ;;  %v8507_v38 = vmul.f32 %v8503_v20, %v8429_v61  ;;  %v8509_v41 = vadd.f32 1e-12, %v1935_v13  ;;  %v1874_v45 = vadd.f32 %v1842_v15, %v1810_v24  ;;  %v1062_v3 = vld [vmem:[%s8287_s28 + $0x2b8] sm:$0xff] }
  0x80   : > { %v8511_v30 = vadd.f32 1e-12, %v1936_v55  ;;  %v1937_v18 = vadd.f32 %v1905_v10, %v1873_v32  ;;  %v1907_v51 = vmul.f32 %v1060_v26, %v1060_v26  ;;  %v1812_v52 = vmul.f32 %v997_v29, %v997_v29  ;;  %v999_v10 = vld [vmem:[%s8287_s28 + $0xc0] sm:$0xff] }
  0x81   : > { %v8514_v48 = vpop.eup %7356  ;;  %2080 = vadd.xlane.f32.xlu0 %v2079_v53  ;;  %v1875_v50 = vadd.f32 %v1843_v36, %v1811_v25  ;;  %v2085_v61 = vsel %vm2048_vm0, %v8507_v38, 0.0  ;;  %7364 = vrsqrt.f32 %v8509_v41  ;;  %v1938_v53 = vadd.f32 %v1906_v1, %v1874_v45  ;;  %v1031_v26 = vld [vmem:[%s8287_s28 + $0x1c0] sm:$0xff]  ;;  %v1000_v25 = vld [vmem:[%s8287_s28 + $0xc8] sm:$0xff] }
  0x82   : > { %13575 = vst [vmem:[#allocation17_spill] sm:$0xff] %v8514_v48  ;;  %2083 = vadd.xlane.f32.xlu1 %v2082_v35  ;;  %v8522_v58 = vmul.f32 %v8514_v48, %v8445_v9  ;;  %7366 = vrsqrt.f32 %v8511_v30  ;;  %v8526_v59 = vadd.f32 1e-12, %v1937_v18  ;;  %v1844_v63 = vmul.f32 %v1029_v47, %v1029_v47  ;;  %v1032_v36 = vld [vmem:[%s8287_s28 + $0x1c8] sm:$0xff] }
  0x83   : > { %v1939_v62 = vadd.f32 %v1907_v51, %v1875_v50  ;;  %v8530_v4 = vpop.eup %7358  ;;  %v8534_v35 = vadd.f32 1e-12, %v1938_v53  ;;  %v1908_v9 = vmul.f32 %v1061_v23, %v1061_v23  ;;  %v1813_v8 = vmul.f32 %v998_v57, %v998_v57  ;;  %v1064_v50 = vld [vmem:[%s8287_s28 + $0x2c8] sm:$0xff]  ;;  %v1033_v53 = vld [vmem:[%s8287_s28 + $0x1d0] sm:$0xff] }
  0x84   : > { %13576 = vst [vmem:[#allocation18_spill] sm:$0xff] %v8530_v4  ;;  %v2088_v7 = vsel %vm2048_vm0, %v8522_v58, 0.0  ;;  %v8537_v13 = vpop.eup %7360  ;;  %v8541_v55 = vmul.f32 %v8530_v4, %v8468_v42  ;;  %7368 = vrsqrt.f32 %v8526_v59  ;;  %v1876_v15 = vadd.f32 %v1844_v63, %v1812_v52  ;;  %v1063_v42 = vld [vmem:[%s8287_s28 + $0x2c0] sm:$0xff] }
  0x85   : > { %13577 = vst [vmem:[#allocation19_spill] sm:$0xff] %v8537_v13  ;;  %2086 = vadd.xlane.f32.xlu0 %v2085_v61  ;;  %v8544_v24 = vadd.f32 1e-12, %v1939_v62  ;;  %v8549_v29 = vmul.f32 %v8537_v13, %v8470_v43  ;;  %7370 = vrsqrt.f32 %v8534_v35  ;;  %v1845_v32 = vmul.f32 %v1030_v2, %v1030_v2  ;;  %v1001_v61 = vld [vmem:[%s8287_s28 + $0xd0] sm:$0xff] }
  0x86   : > { %2089 = vadd.xlane.f32.xlu1 %v2088_v7  ;;  %v1909_v1 = vmul.f32 %v1062_v3, %v1062_v3  ;;  %v8555_v45 = vpop.eup %7362  ;;  %v2091_v47 = vsel %vm2048_vm0, %v8541_v55, 0.0  ;;  %v1940_v43 = vadd.f32 %v1908_v9, %v1876_v15  ;;  %v1814_v18 = vmul.f32 %v999_v10, %v999_v10  ;;  %v1065_v7 = vld [vmem:[%s8287_s28 + $0x2d0] sm:$0xff]  ;;  %v1002_v9 = vld [vmem:[%s8287_s28 + $0xd8] sm:$0xff] }
  0x87   : > { %13578 = vst [vmem:[#allocation20_spill] sm:$0xff] %v8555_v45  ;;  %7372 = vrsqrt.f32 %v8544_v24  ;;  %v2094_v51 = vsel %vm2048_vm0, %v8549_v29, 0.0  ;;  %v8565_v23 = vmul.f32 %v8555_v45, %v8491_v40  ;;  %v1877_v52 = vadd.f32 %v1845_v32, %v1813_v8  ;;  %v1034_v32 = vld [vmem:[%s8287_s28 + $0x1d8] sm:$0xff] }
  0x88   : > { %v1846_v57 = vmul.f32 %v1031_v26, %v1031_v26  ;;  %v8569_v62 = vadd.f32 1e-12, %v1940_v43  ;;  %v1910_v63 = vmul.f32 %v1063_v42, %v1063_v42  ;;  %v1815_v2 = vmul.f32 %v1000_v25, %v1000_v25  ;;  %v1066_v45 = vld [vmem:[%s8287_s28 + $0x2d8] sm:$0xff] }
  0x89   : > { %2092 = vadd.xlane.f32.xlu0 %v2091_v47  ;;  %v1847_v3 = vmul.f32 %v1032_v36, %v1032_v36  ;;  %v2097_v10 = vsel %vm2048_vm0, %v8565_v23, 0.0  ;;  %v1941_v40 = vadd.f32 %v1909_v1, %v1877_v52  ;;  %v1911_v8 = vmul.f32 %v1064_v50, %v1064_v50 }
  0x8a   : > { %2095 = vadd.xlane.f32.xlu1 %v2094_v51  ;;  %v1878_v15 = vadd.f32 %v1846_v57, %v1814_v18  ;;  %7374 = vrsqrt.f32 %v8569_v62  ;;  %v1816_v47 = vmul.f32 %v1001_v61, %v1001_v61  ;;  %v1848_v43 = vmul.f32 %v1033_v53, %v1033_v53  ;;  %v1003_v57 = vld [vmem:[%s8287_s28 + $0xe0] sm:$0xff] }
  0x8b   : > { %v1879_v26 = vadd.f32 %v1847_v3, %v1815_v2  ;;  %v8578_v42 = vpop.eup %7364  ;;  %v8580_v25 = vadd.f32 1e-12, %v1941_v40  ;;  %v1912_v51 = vmul.f32 %v1065_v7, %v1065_v7  ;;  %v1817_v13 = vmul.f32 %v1002_v9, %v1002_v9 }
  0x8c   : > { %13579 = vst [vmem:[#allocation21_spill] sm:$0xff] %v8578_v42  ;;  %v1942_v36 = vadd.f32 %v1910_v63, %v1878_v15  ;;  %v8582_v4 = vpop.eup %7366  ;;  %v8586_v1 = vmul.f32 %v8578_v42, %v8509_v41  ;;  %v1880_v50 = vadd.f32 %v1848_v43, %v1816_v47  ;;  %v1849_v52 = vmul.f32 %v1034_v32, %v1034_v32  ;;  %v1036_v43 = vld [vmem:[%s8287_s28 + $0x1e8] sm:$0xff] }
  0x8d   : > { %13580 = vst [vmem:[#allocation22_spill] sm:$0xff] %v8582_v4  ;;  %2098 = vadd.xlane.f32.xlu0 %v2097_v10  ;;  %v1943_v18 = vadd.f32 %v1911_v8, %v1879_v26  ;;  %v8591_v61 = vmul.f32 %v8582_v4, %v8511_v30  ;;  %7376 = vrsqrt.f32 %v8580_v25  ;;  %v1913_v63 = vmul.f32 %v1066_v45, %v1066_v45  ;;  %v1035_v10 = vld [vmem:[%s8287_s28 + $0x1e0] sm:$0xff]  ;;  %v1070_v4 = vld [vmem:[%s8287_s28 + $0x2f8] sm:$0xff] }
  0x8e   : > { %v8594_v53 = vadd.f32 1e-12, %v1942_v36  ;;  %v8596_v2 = vpop.eup %7368  ;;  %v2100_v41 = vsel %vm2048_vm0, %v8586_v1, 0.0  ;;  %v1944_v7 = vadd.f32 %v1912_v51, %v1880_v50  ;;  %v1881_v9 = vadd.f32 %v1849_v52, %v1817_v13  ;;  %v1067_v30 = vld [vmem:[%s8287_s28 + $0x2e0] sm:$0xff]  ;;  %v1004_v13 = vld [vmem:[%s8287_s28 + $0xe8] sm:$0xff] }
  0x8f   : > { %13581 = vst [vmem:[#allocation23_spill] sm:$0xff] %v8596_v2  ;;  %v8600_v3 = vadd.f32 1e-12, %v1943_v18  ;;  %v8604_v40 = vpop.eup %7370  ;;  %2101 = vadd.xlane.f32.xlu1 %v2100_v41  ;;  %v2103_v15 = vsel %vm2048_vm0, %v8591_v61, 0.0  ;;  %v8610_v45 = vmul.f32 %v8596_v2, %v8526_v59  ;;  %v1818_v8 = vmul.f32 %v1003_v57, %v1003_v57  ;;  %v1068_v36 = vld [vmem:[%s8287_s28 + $0x2e8] sm:$0xff]  ;;  %v1037_v57 = vld [vmem:[%s8287_s28 + $0x1f0] sm:$0xff] }
  0x90   : > { %13582 = vst [vmem:[#allocation24_spill] sm:$0xff] %v8604_v40  ;;  %7378 = vrsqrt.f32 %v8594_v53  ;;  %v8618_v26 = vmul.f32 %v8604_v40, %v8534_v35  ;;  %v1976_v47 = vadd.f32 1e-12, %v1944_v7  ;;  %v1945_v59 = vadd.f32 %v1913_v63, %v1881_v9  ;;  %v1005_v35 = vld [vmem:[%s8287_s28 + $0xf0] sm:$0xff] }
  0x91   : > { %v8614_v32 = vpop.eup %7372  ;;  %2104 = vadd.xlane.f32.xlu0 %v2103_v15  ;;  %7380 = vrsqrt.f32 %v8600_v3  ;;  %v2106_v51 = vsel %vm2048_vm0, %v8610_v45, 0.0  ;;  %v1850_v50 = vmul.f32 %v1035_v10, %v1035_v10  ;;  %v1914_v52 = vmul.f32 %v1067_v30, %v1067_v30  ;;  %v1069_v41 = vld [vmem:[%s8287_s28 + $0x2f0] sm:$0xff]  ;;  %v1006_v15 = vld [vmem:[%s8287_s28 + $0xf8] sm:$0xff] }
  0x92   : > { %13583 = vst [vmem:[#allocation25_spill] sm:$0xff] %v8614_v32  ;;  %v8627_v18 = vmul.f32 %v8614_v32, %v8544_v24  ;;  %v2109_v7 = vsel %vm2048_vm0, %v8618_v26, 0.0  ;;  %7382 = vrsqrt.f32 %v1976_v47  ;;  %v1977_v63 = vadd.f32 1e-12, %v1945_v59  ;;  %v1038_v10 = vld [vmem:[%s8287_s28 + $0x1f8] sm:$0xff] }
  0x93   : > { %v1819_v9 = vmul.f32 %v1004_v13, %v1004_v13  ;;  %2107 = vadd.xlane.f32.xlu1 %v2106_v51  ;;  %v1882_v24 = vadd.f32 %v1850_v50, %v1818_v8  ;;  %v1851_v32 = vmul.f32 %v1036_v43, %v1036_v43  ;;  %v1915_v2 = vmul.f32 %v1068_v36, %v1068_v36 }
  0x94   : > { %v2112_v40 = vsel %vm2048_vm0, %v8627_v18, 0.0  ;;  %v8639_v30 = vpop.eup %7374  ;;  %7384 = vrsqrt.f32 %v1977_v63  ;;  %v1820_v42 = vmul.f32 %v1005_v35, %v1005_v35  ;;  %v1852_v48 = vmul.f32 %v1037_v57, %v1037_v57 }
  0x95   : > { %13584 = vst [vmem:[#allocation26_spill] sm:$0xff] %v8639_v30  ;;  %2110 = vadd.xlane.f32.xlu0 %v2109_v7  ;;  %v1916_v20 = vmul.f32 %v1069_v41, %v1069_v41  ;;  %v8643_v13 = vmul.f32 %v8639_v30, %v8569_v62  ;;  %v1946_v59 = vadd.f32 %v1914_v52, %v1882_v24 }
  0x96   : > { %v1883_v51 = vadd.f32 %v1851_v32, %v1819_v9  ;;  %v1821_v49 = vmul.f32 %v1006_v15, %v1006_v15  ;;  %v1884_v39 = vadd.f32 %v1852_v48, %v1820_v42  ;;  %v1853_v8 = vmul.f32 %v1038_v10, %v1038_v10 }
  0x97   : > { %v1917_v43 = vmul.f32 %v1070_v4, %v1070_v4  ;;  %v8645_v36 = vpop.eup %7376  ;;  %2113 = vadd.xlane.f32.xlu1 %v2112_v40  ;;  %v2115_v50 = vsel %vm2048_vm0, %v8643_v13, 0.0  ;;  %v1978_v7 = vadd.f32 1e-12, %v1946_v59 }
  0x98   : > { %13585 = vst [vmem:[#allocation27_spill] sm:$0xff] %v8645_v36  ;;  %v1947_v35 = vadd.f32 %v1915_v2, %v1883_v51  ;;  %v8651_v57 = vmul.f32 %v8645_v36, %v8580_v25  ;;  %v1948_v62 = vadd.f32 %v1916_v20, %v1884_v39  ;;  %v1885_v52 = vadd.f32 %v1853_v8, %v1821_v49 }
  0x99   : > { %2116 = vadd.xlane.f32.xlu0 %v2115_v50  ;;  %7386 = vrsqrt.f32 %v1978_v7 }
  0x9a   : > { %v8653_v32 = vpop.eup %7378  ;;  %v1979_v48 = vadd.f32 1e-12, %v1947_v35  ;;  %v2118_v42 = vsel %vm2048_vm0, %v8651_v57, 0.0  ;;  %v1980_v2 = vadd.f32 1e-12, %v1948_v62  ;;  %v1949_v41 = vadd.f32 %v1917_v43, %v1885_v52 }
  0x9b   : > { %13586 = vst [vmem:[#allocation28_spill] sm:$0xff] %v8653_v32  ;;  %v8655_v4 = vpop.eup %7380  ;;  %v8661_v40 = vmul.f32 %v8653_v32, %v8594_v53  ;;  %2119 = vadd.xlane.f32.xlu1 %v2118_v42  ;;  %v945_v42 = vld [vmem:[%s8722_s16 + $0x10] sm:$0xff] }
  0x9c   : > { %13587 = vst [vmem:[#allocation29_spill] sm:$0xff] %v8655_v4  ;;  %v8665_v39 = vmul.f32 %v8655_v4, %v8600_v3  ;;  %7388 = vrsqrt.f32 %v1979_v48  ;;  %v8667_v49 = vpop.eup %7382  ;;  %v1981_v25 = vadd.f32 1e-12, %v1949_v41  ;;  %v953_v32 = vld [vmem:[%s8722_s16 + $0x50] sm:$0xff] }
  0x9d   : > { %13588 = vst [vmem:[#allocation30_spill] sm:$0xff] %v8667_v49  ;;  %v2121_v20 = vsel %vm2048_vm0, %v8661_v40, 0.0  ;;  %7390 = vrsqrt.f32 %v1980_v2  ;;  %v8674_v9 = vmul.f32 %v8667_v49, %v1976_v47  ;;  %v1081_v30 = vmul.f32 %v953_v32, %v953_v32 }
  0x9e   : > { %2122 = vadd.xlane.f32.xlu0 %v2121_v20  ;;  %v2124_v53 = vsel %vm2048_vm0, %v8665_v39, 0.0  ;;  %v8676_v15 = vpop.eup %7384  ;;  %7392 = vrsqrt.f32 %v1981_v25  ;;  %v946_v20 = vld [vmem:[%s8722_s16 + $0x18] sm:$0xff] }
  0x9f   : > { %13589 = vst [vmem:[#allocation31_spill] sm:$0xff] %v8676_v15  ;;  %2125 = vadd.xlane.f32.xlu1 %v2124_v53  ;;  %v2127_v3 = vsel %vm2048_vm0, %v8674_v9, 0.0  ;;  %v8681_v24 = vmul.f32 %v8676_v15, %v1977_v63  ;;  %v1074_v53 = vmul.f32 %v946_v20, %v946_v20  ;;  %v8768_v0 = vadd.f32 1e-12, %v1081_v30 }
  0xa1   : > { %v2130_v10 = vsel %vm2048_vm0, %v8681_v24, 0.0  ;;  %13599 = vst [vmem:[#allocation41_spill] sm:$0xff] %v8768_v0 }
  0xa2   : > { %2128 = vadd.xlane.f32.xlu0 %v2127_v3 }
  0xa3   : > { %v8685_v59 = vpop.eup %7386  ;;  %2131 = vadd.xlane.f32.xlu1 %v2130_v10  ;;  %v8730_v10 = vadd.f32 1e-12, %v1074_v53 }
  0xa4   : > { %13590 = vst [vmem:[#allocation32_spill] sm:$0xff] %v8685_v59  ;;  %v8688_v47 = vmul.f32 %v8685_v59, %v1978_v7  ;;  %v951_v59 = vld [vmem:[%s8722_s16 + $0x40] sm:$0xff] }
  0xa6   : > { %v8690_v51 = vpop.eup %7388  ;;  %v2133_v43 = vsel %vm2048_vm0, %v8688_v47, 0.0 }
  0xa7   : > { %13591 = vst [vmem:[#allocation33_spill] sm:$0xff] %v8690_v51  ;;  %v8692_v8 = vpop.eup %7390  ;;  %v8697_v63 = vmul.f32 %v8690_v51, %v1979_v48  ;;  %2134 = vadd.xlane.f32.xlu0 %v2133_v43  ;;  %v950_v51 = vld [vmem:[%s8722_s16 + $0x38] sm:$0xff] }
  0xa8   : > { %13592 = vst [vmem:[#allocation34_spill] sm:$0xff] %v8692_v8  ;;  %v8700_v50 = vmul.f32 %v8692_v8, %v1980_v2  ;;  %v8702_v35 = vpop.eup %7392  ;;  %v1073_v2 = vmul.f32 %v945_v42, %v945_v42  ;;  %v1078_v53 = vmul.f32 %v950_v51, %v950_v51 }
  0xa9   : > { %13593 = vst [vmem:[#allocation35_spill] sm:$0xff] %v8702_v35  ;;  %v2136_v7 = vsel %vm2048_vm0, %v8697_v63, 0.0  ;;  %v8709_v52 = vmul.f32 %v8702_v35, %v1981_v25  ;;  %v947_v25 = vld [vmem:[%s8722_s16 + $0x20] sm:$0xff] }
  0xaa   : > { %2137 = vadd.xlane.f32.xlu1 %v2136_v7  ;;  %v2139_v62 = vsel %vm2048_vm0, %v8700_v50, 0.0  ;;  %v8725_v41 = vadd.f32 1e-12, %v1073_v2  ;;  %v1075_v3 = vmul.f32 %v947_v25, %v947_v25  ;;  %v948_v7 = vld [vmem:[%s8722_s16 + $0x28] sm:$0xff]  ;;  %v8746_v15 = vadd.f32 1e-12, %v1078_v53 }
  0xab   : > { %2140 = vadd.xlane.f32.xlu0 %v2139_v62  ;;  %v2142_v48 = vsel %vm2048_vm0, %v8709_v52, 0.0  ;;  %v949_v62 = vld [vmem:[%s8722_s16 + $0x30] sm:$0xff] }
  0xac   : > { %7394 = vrsqrt.f32 %v8725_v41  ;;  %v8732_v43 = vadd.f32 1e-12, %v1075_v3  ;;  %v1077_v2 = vmul.f32 %v949_v62, %v949_v62  ;;  %v1079_v3 = vmul.f32 %v951_v59, %v951_v59  ;;  %13594 = vst [vmem:[#allocation36_spill] sm:$0xff] %v8746_v15 }
  0xad   : > { %7396 = vrsqrt.f32 %v8730_v10 }
  0xae   : > { %2143 = vadd.xlane.f32.xlu1 %v2142_v48  ;;  %v1076_v48 = vmul.f32 %v948_v7, %v948_v7  ;;  %7398 = vrsqrt.f32 %v8732_v43  ;;  %v8740_v8 = vadd.f32 1e-12, %v1077_v2  ;;  %v8748_v49 = vadd.f32 1e-12, %v1079_v3 }
  0xb0   : > { %v8738_v35 = vadd.f32 1e-12, %v1076_v48  ;;  %13595 = vst [vmem:[#allocation37_spill] sm:$0xff] %v8748_v49  ;;  %v952_v48 = vld [vmem:[%s8722_s16 + $0x48] sm:$0xff] }
  0xb1   : > { %v1080_v36 = vmul.f32 %v952_v48, %v952_v48 }
  0xb2   : > { %7400 = vrsqrt.f32 %v8738_v35 }
  0xb3   : > { %7402 = vrsqrt.f32 %v8740_v8  ;;  %v8761_v53 = vadd.f32 1e-12, %v1080_v36 }
  0xb4   : > { %7404 = vrsqrt.f32 %v8746_v15 }
  0xb5   : > { %7406 = vrsqrt.f32 %v8748_v49  ;;  %13597 = vst [vmem:[#allocation39_spill] sm:$0xff] %v8761_v53 }
  0xb6   : > { %v8750_v4 = vpop.eup %7394  ;;  %7408 = vrsqrt.f32 %v8761_v53 }
  0xb7   : > { %v8755_v2 = vmul.f32 %v8750_v4, %v945_v42  ;;  %v8759_v33 = vpop.eup %7396  ;;  %v954_v42 = vld [vmem:[%s8722_s16 + $0x58] sm:$0xff]  ;;  %7410 = vrsqrt.f32 %v8768_v0 }
  0xb8   : > { %v8763_v3 = vpop.eup %7398  ;;  %v8766_v14 = vmul.f32 %v8759_v33, %v946_v20  ;;  %v1082_v37 = vmul.f32 %v954_v42, %v954_v42 }
  0xb9   : > { %13596 = vst [vmem:[#allocation38_spill] sm:$0xff] %v8755_v2  ;;  %v955_v2 = vld [vmem:[%s8722_s16 + $0x60] sm:$0xff]  ;;  %v8773_v56 = vmul.f32 %v8763_v3, %v947_v25  ;;  %v956_v25 = vld [vmem:[%s8722_s16 + $0x68] sm:$0xff] }
  0xba   : > { %13598 = vst [vmem:[#allocation40_spill] sm:$0xff] %v8766_v14  ;;  %v1083_v36 = vmul.f32 %v955_v2, %v955_v2  ;;  %v8779_v21 = vadd.f32 1e-12, %v1082_v37  ;;  %v1084_v16 = vmul.f32 %v956_v25, %v956_v25 }
  0xbb   : > { %13600 = vst [vmem:[#allocation42_spill] sm:$0xff] %v8773_v56  ;;  %v957_v56 = vld [vmem:[%s8722_s16 + $0x70] sm:$0xff] }
  0xbc   : > { %v8777_v28 = vpop.eup %7400  ;;  %13601 = vst [vmem:[#allocation43_spill] sm:$0xff] %v8779_v21  ;;  %v8786_v14 = vadd.f32 1e-12, %v1083_v36  ;;  %7412 = vrsqrt.f32 %v8779_v21  ;;  %v1085_v37 = vmul.f32 %v957_v56, %v957_v56  ;;  %v8797_v0 = vadd.f32 1e-12, %v1084_v16 }
  0xbd   : > { %v8781_v20 = vpop.eup %7402  ;;  %v8784_v30 = vmul.f32 %v8777_v28, %v948_v7 }
  0xbe   : > { %13603 = vst [vmem:[#allocation45_spill] sm:$0xff] %v8786_v14  ;;  %v8791_v11 = vmul.f32 %v8781_v20, %v949_v62  ;;  %7414 = vrsqrt.f32 %v8786_v14  ;;  %v8795_v5 = vpop.eup %7404  ;;  %13606 = vst [vmem:[#allocation48_spill] sm:$0xff] %v8797_v0  ;;  %v958_v62 = vld [vmem:[%s8722_s16 + $0x78] sm:$0xff] }
  0xbf   : > { %13602 = vst [vmem:[#allocation44_spill] sm:$0xff] %v8784_v30  ;;  %13605 = vst [vmem:[#allocation47_spill] sm:$0xff] %v8795_v5  ;;  %v8799_v7 = vpop.eup %7406  ;;  %v8802_v36 = vmul.f32 %v8795_v5, %v950_v51  ;;  %v8804_v30 = vadd.f32 1e-12, %v1085_v37  ;;  %7416 = vrsqrt.f32 %v8797_v0  ;;  %v1086_v14 = vmul.f32 %v958_v62, %v958_v62 }
  0xc0   : > { %13604 = vst [vmem:[#allocation46_spill] sm:$0xff] %v8791_v11  ;;  %13607 = vst [vmem:[#allocation49_spill] sm:$0xff] %v8799_v7  ;;  %v959_v11 = vld [vmem:[%s8722_s16 + $0x80] sm:$0xff]  ;;  %v8809_v21 = vmul.f32 %v8799_v7, %v951_v59  ;;  %v8813_v53 = vpop.eup %7408  ;;  %v960_v59 = vld [vmem:[%s8722_s16 + $0x88] sm:$0xff] }
  0xc1   : > { %13608 = vst [vmem:[#allocation50_spill] sm:$0xff] %v8802_v36  ;;  %13609 = vst [vmem:[#allocation51_spill] sm:$0xff] %v8804_v30  ;;  %7418 = vrsqrt.f32 %v8804_v30  ;;  %v1087_v16 = vmul.f32 %v959_v11, %v959_v11  ;;  %v8815_v49 = vadd.f32 1e-12, %v1086_v14  ;;  %v8817_v51 = vpop.eup %7410  ;;  %v8820_v37 = vmul.f32 %v8813_v53, %v952_v48 }
  0xc2   : > { %13610 = vst [vmem:[#allocation52_spill] sm:$0xff] %v8809_v21  ;;  %13611 = vst [vmem:[#allocation53_spill] sm:$0xff] %v8813_v53  ;;  %v961_v21 = vld [vmem:[%s8722_s16 + $0x90] sm:$0xff]  ;;  %v8827_v0 = vmul.f32 %v8817_v51, %v953_v32  ;;  %v1088_v30 = vmul.f32 %v960_v59, %v960_v59  ;;  %v962_v32 = vld [vmem:[%s8722_s16 + $0x98] sm:$0xff] }
  0xc3   : > { %13612 = vst [vmem:[#allocation54_spill] sm:$0xff] %v8815_v49  ;;  %13613 = vst [vmem:[#allocation55_spill] sm:$0xff] %v8817_v51  ;;  %v8822_v36 = vadd.f32 1e-12, %v1087_v16  ;;  %7420 = vrsqrt.f32 %v8815_v49  ;;  %v1089_v14 = vmul.f32 %v961_v21, %v961_v21 }
  0xc4   : > { %13614 = vst [vmem:[#allocation56_spill] sm:$0xff] %v8820_v37  ;;  %13616 = vst [vmem:[#allocation58_spill] sm:$0xff] %v8827_v0  ;;  %v8833_v5 = vadd.f32 1e-12, %v1088_v30  ;;  %v963_v0 = vld [vmem:[%s8722_s16 + $0xa0] sm:$0xff] }
  0xc5   : > { %13615 = vst [vmem:[#allocation57_spill] sm:$0xff] %v8822_v36  ;;  %7422 = vrsqrt.f32 %v8822_v36  ;;  %v8840_v37 = vadd.f32 1e-12, %v1089_v14  ;;  %v1090_v36 = vmul.f32 %v962_v32, %v962_v32  ;;  %v1091_v30 = vmul.f32 %v963_v0, %v963_v0 }
  0xc6   : > { %v8831_v7 = vpop.eup %7412  ;;  %13618 = vst [vmem:[#allocation60_spill] sm:$0xff] %v8833_v5  ;;  %7424 = vrsqrt.f32 %v8833_v5 }
  0xc7   : > { %13617 = vst [vmem:[#allocation59_spill] sm:$0xff] %v8831_v7  ;;  %v8838_v16 = vmul.f32 %v8831_v7, %v954_v42  ;;  %13621 = vst [vmem:[#allocation63_spill] sm:$0xff] %v8840_v37  ;;  %7426 = vrsqrt.f32 %v8840_v37  ;;  %v8851_v53 = vadd.f32 1e-12, %v1090_v36 }
  0xc8   : > { %v8835_v48 = vpop.eup %7414 }
  0xc9   : > { %13619 = vst [vmem:[#allocation61_spill] sm:$0xff] %v8835_v48  ;;  %13620 = vst [vmem:[#allocation62_spill] sm:$0xff] %v8838_v16  ;;  %v8845_v49 = vmul.f32 %v8835_v48, %v955_v2  ;;  %v8849_v51 = vpop.eup %7416  ;;  %v8858_v16 = vadd.f32 1e-12, %v1091_v30  ;;  %v964_v2 = vld [vmem:[%s8722_s16 + $0xa8] sm:$0xff]  ;;  %7428 = vrsqrt.f32 %v8851_v53 }
  0xca   : > { %13623 = vst [vmem:[#allocation65_spill] sm:$0xff] %v8849_v51  ;;  %13624 = vst [vmem:[#allocation66_spill] sm:$0xff] %v8851_v53  ;;  %v8856_v14 = vmul.f32 %v8849_v51, %v956_v25  ;;  %v1092_v37 = vmul.f32 %v964_v2, %v964_v2 }
  0xcb   : > { %13622 = vst [vmem:[#allocation64_spill] sm:$0xff] %v8845_v49  ;;  %v8853_v42 = vpop.eup %7418  ;;  %13627 = vst [vmem:[#allocation69_spill] sm:$0xff] %v8858_v16  ;;  %v965_v49 = vld [vmem:[%s8722_s16 + $0xb0] sm:$0xff]  ;;  %7430 = vrsqrt.f32 %v8858_v16 }
  0xcc   : > { %13625 = vst [vmem:[#allocation67_spill] sm:$0xff] %v8853_v42  ;;  %13626 = vst [vmem:[#allocation68_spill] sm:$0xff] %v8856_v14  ;;  %v8863_v5 = vmul.f32 %v8853_v42, %v957_v56  ;;  %v1093_v36 = vmul.f32 %v965_v49, %v965_v49  ;;  %v8869_v7 = vadd.f32 1e-12, %v1092_v37  ;;  %v966_v56 = vld [vmem:[%s8722_s16 + $0xb8] sm:$0xff] }
  0xcd   : > { %v8867_v48 = vpop.eup %7420  ;;  %v1094_v16 = vmul.f32 %v966_v56, %v966_v56 }
  0xce   : > { %13628 = vst [vmem:[#allocation70_spill] sm:$0xff] %v8863_v5  ;;  %13629 = vst [vmem:[#allocation71_spill] sm:$0xff] %v8867_v48  ;;  %v8874_v30 = vmul.f32 %v8867_v48, %v958_v62  ;;  %v8876_v14 = vadd.f32 1e-12, %v1093_v36  ;;  %v967_v5 = vld [vmem:[%s8722_s16 + $0xc0] sm:$0xff]  ;;  %7432 = vrsqrt.f32 %v8869_v7 }
  0xcf   : > { %13630 = vst [vmem:[#allocation72_spill] sm:$0xff] %v8869_v7  ;;  %v8871_v25 = vpop.eup %7422  ;;  %v1095_v37 = vmul.f32 %v967_v5, %v967_v5  ;;  %v8887_v51 = vadd.f32 1e-12, %v1094_v16 }
  0xd0   : > { %13631 = vst [vmem:[#allocation73_spill] sm:$0xff] %v8871_v25  ;;  %13632 = vst [vmem:[#allocation74_spill] sm:$0xff] %v8874_v30  ;;  %v8881_v53 = vmul.f32 %v8871_v25, %v959_v11  ;;  %7434 = vrsqrt.f32 %v8876_v14  ;;  %v8885_v42 = vpop.eup %7424  ;;  %v968_v11 = vld [vmem:[%s8722_s16 + $0xc8] sm:$0xff] }
  0xd1   : > { %13633 = vst [vmem:[#allocation75_spill] sm:$0xff] %v8876_v14  ;;  %13635 = vst [vmem:[#allocation77_spill] sm:$0xff] %v8885_v42  ;;  %v8889_v62 = vpop.eup %7426  ;;  %v8892_v36 = vmul.f32 %v8885_v42, %v960_v59  ;;  %v8894_v30 = vadd.f32 1e-12, %v1095_v37  ;;  %7436 = vrsqrt.f32 %v8887_v51  ;;  %v1096_v14 = vmul.f32 %v968_v11, %v968_v11 }
  0xd2   : > { %13634 = vst [vmem:[#allocation76_spill] sm:$0xff] %v8881_v53  ;;  %13636 = vst [vmem:[#allocation78_spill] sm:$0xff] %v8887_v51  ;;  %v969_v53 = vld [vmem:[%s8722_s16 + $0xd0] sm:$0xff]  ;;  %v8899_v7 = vmul.f32 %v8889_v62, %v961_v21  ;;  %v970_v21 = vld [vmem:[%s8722_s16 + $0xd8] sm:$0xff] }
  0xd3   : > { %13637 = vst [vmem:[#allocation79_spill] sm:$0xff] %v8889_v62  ;;  %13638 = vst [vmem:[#allocation80_spill] sm:$0xff] %v8892_v36  ;;  %7438 = vrsqrt.f32 %v8894_v30  ;;  %v1097_v16 = vmul.f32 %v969_v53, %v969_v53  ;;  %v8903_v25 = vpop.eup %7428  ;;  %v8905_v48 = vadd.f32 1e-12, %v1096_v14 }
  0xd4   : > { %13639 = vst [vmem:[#allocation81_spill] sm:$0xff] %v8894_v30  ;;  %13640 = vst [vmem:[#allocation82_spill] sm:$0xff] %v8899_v7  ;;  %v8910_v37 = vmul.f32 %v8903_v25, %v962_v32  ;;  %v971_v7 = vld [vmem:[%s8722_s16 + $0xe0] sm:$0xff]  ;;  %v1098_v30 = vmul.f32 %v970_v21, %v970_v21 }
  0xd5   : > { %13641 = vst [vmem:[#allocation83_spill] sm:$0xff] %v8903_v25  ;;  %13642 = vst [vmem:[#allocation84_spill] sm:$0xff] %v8905_v48  ;;  %v8907_v59 = vpop.eup %7430  ;;  %v8912_v36 = vadd.f32 1e-12, %v1097_v16  ;;  %7440 = vrsqrt.f32 %v8905_v48  ;;  %v1099_v14 = vmul.f32 %v971_v7, %v971_v7 }
  0xd6   : > { %13643 = vst [vmem:[#allocation85_spill] sm:$0xff] %v8907_v59  ;;  %13644 = vst [vmem:[#allocation86_spill] sm:$0xff] %v8910_v37  ;;  %v8917_v51 = vmul.f32 %v8907_v59, %v963_v0  ;;  %v8923_v42 = vadd.f32 1e-12, %v1098_v30  ;;  %v972_v0 = vld [vmem:[%s8722_s16 + $0xe8] sm:$0xff] }
  0xd7   : > { %13645 = vst [vmem:[#allocation87_spill] sm:$0xff] %v8912_v36  ;;  %7442 = vrsqrt.f32 %v8912_v36  ;;  %v8930_v37 = vadd.f32 1e-12, %v1099_v14  ;;  %v1100_v36 = vmul.f32 %v972_v0, %v972_v0 }
  0xd8   : > { %13646 = vst [vmem:[#allocation88_spill] sm:$0xff] %v8917_v51  ;;  %v8921_v62 = vpop.eup %7432  ;;  %13647 = vst [vmem:[#allocation89_spill] sm:$0xff] %v8923_v42  ;;  %v973_v51 = vld [vmem:[%s8722_s16 + $0xf0] sm:$0xff]  ;;  %7444 = vrsqrt.f32 %v8923_v42 }
  0xd9   : > { %v8928_v16 = vmul.f32 %v8921_v62, %v964_v2  ;;  %13649 = vst [vmem:[#allocation91_spill] sm:$0xff] %v8930_v37  ;;  %7446 = vrsqrt.f32 %v8930_v37  ;;  %v1101_v30 = vmul.f32 %v973_v51, %v973_v51  ;;  %v8941_v25 = vadd.f32 1e-12, %v1100_v36 }
  0xda   : > { %v8925_v32 = vpop.eup %7434 }
  0xdb   : > { %13648 = vst [vmem:[#allocation90_spill] sm:$0xff] %v8928_v16  ;;  %v8935_v48 = vmul.f32 %v8925_v32, %v965_v49  ;;  %v8939_v59 = vpop.eup %7436  ;;  %13651 = vst [vmem:[#allocation93_spill] sm:$0xff] %v8941_v25  ;;  %v8948_v14 = vadd.f32 1e-12, %v1101_v30  ;;  %v974_v16 = vld [vmem:[%s8722_s16 + $0xf8] sm:$0xff]  ;;  %7448 = vrsqrt.f32 %v8941_v25 }
  0xdc   : > { %v8946_v2 = vmul.f32 %v8939_v59, %v966_v56 }
  0xdd   : > { %13650 = vst [vmem:[#allocation92_spill] sm:$0xff] %v8935_v48  ;;  %v8943_v15 = vpop.eup %7438  ;;  %13654 = vst [vmem:[#allocation96_spill] sm:$0xff] %v8948_v14  ;;  %v1102_v48 = vmul.f32 %v974_v16, %v974_v16  ;;  %7450 = vrsqrt.f32 %v8948_v14 }
  0xde   : > { %13652 = vst [vmem:[#allocation94_spill] sm:$0xff] %v8943_v15  ;;  %13653 = vst [vmem:[#allocation95_spill] sm:$0xff] %v8946_v2  ;;  %v8952_v49 = vmul.f32 %v8943_v15, %v967_v5 }
  0xdf   : > { %v8956_v37 = vpop.eup %7440  ;;  %v8958_v36 = vadd.f32 1e-12, %v1102_v48 }
  0xe0   : > { %13655 = vst [vmem:[#allocation97_spill] sm:$0xff] %v8952_v49  ;;  %v8963_v56 = vmul.f32 %v8956_v37, %v968_v11 }
  0xe1   : > { %13656 = vst [vmem:[#allocation98_spill] sm:$0xff] %v8958_v36  ;;  %v8960_v42 = vpop.eup %7442  ;;  %7452 = vrsqrt.f32 %v8958_v36 }
  0xe2   : > { %13657 = vst [vmem:[#allocation99_spill] sm:$0xff] %v8960_v42  ;;  %13658 = vst [vmem:[#allocation100_spill] sm:$0xff] %v8963_v56  ;;  %v8966_v30 = vmul.f32 %v8960_v42, %v969_v53  ;;  %v8969_v5 = vpop.eup %7444 }
  0xe3   : > { %v8971_v49 = vpop.eup %7446  ;;  %v8974_v14 = vmul.f32 %v8969_v5, %v970_v21 }
  0xe4   : > { %13659 = vst [vmem:[#allocation101_spill] sm:$0xff] %v8966_v30  ;;  %v8977_v15 = vmul.f32 %v8971_v49, %v971_v7 }
  0xe5   : > { %13660 = vst [vmem:[#allocation102_spill] sm:$0xff] %v8974_v14  ;;  %v8979_v56 = vpop.eup %7448 }
  0xe6   : > { %13661 = vst [vmem:[#allocation103_spill] sm:$0xff] %v8977_v15  ;;  %v8990_v21 = vmul.f32 %v8979_v56, %v972_v0 }
  0xe7   : > { %v8984_v30 = vpop.eup %7450 }
  0xe8   : > { %13664 = vst [vmem:[#allocation106_spill] sm:$0xff] %v8990_v21 }
  0xfa   : > { %v2051_v2 = vpop.xlane.xlu0 %2050 }
  0xfb   : > { %v2145_v48 = vmul.f32 0.0625, %v2051_v2  ;;  %v2057_v25 = vpop.xlane.xlu1 %2056 }
  0xfc   : > { %v2147_v11 = vmul.f32 0.0625, %v2057_v25  ;;  %v8995_v25 = vmul.f32 %v8984_v30, %v973_v51 }
  0xfd   : > { %v8982_v53 = vsub.f32 %v8358_v12, %v2145_v48  ;;  %v8999_v48 = vpop.eup %7452 }
  0xfe   : > { %v8987_v36 = vsub.f32 %v8365_v17, %v2147_v11  ;;  %v2054_v42 = vpop.xlane.xlu0 %2053  ;;  %13665 = vst [vmem:[#allocation107_spill] sm:$0xff] %v8995_v25  ;;  %v9009_v21 = vmul.f32 %v8999_v48, %v974_v16 }
  0xff   : > { %13662 = vst [vmem:[#allocation104_spill] sm:$0xff] %v8982_v53  ;;  %v2146_v2 = vmul.f32 0.0625, %v2054_v42  ;;  %v2060_v14 = vpop.xlane.xlu1 %2059  ;;  %v2209_v7 = vmul.f32 %v8982_v53, %v8982_v53 }
 0x100   : > { %13663 = vst [vmem:[#allocation105_spill] sm:$0xff] %v8987_v36  ;;  %v2148_v15 = vmul.f32 0.0625, %v2060_v14  ;;  %v2211_v12 = vmul.f32 %v8987_v36, %v8987_v36  ;;  %13666 = vst [vmem:[#allocation108_spill] sm:$0xff] %v9009_v21 }
 0x101   : > { %v9002_v17 = vsub.f32 %v8376_v22, %v2146_v2  ;;  %v2241_v0 = vsel %vm2048_vm0, %v2209_v7, 0.0 }
 0x102   : > { %v9006_v42 = vsub.f32 %v8389_v31, %v2148_v15  ;;  %2242 = vadd.xlane.f32.xlu0 %v2241_v0  ;;  %v2063_v11 = vpop.xlane.xlu0 %2062  ;;  %v2247_v25 = vsel %vm2048_vm0, %v2211_v12, 0.0 }
 0x103   : > { %v2149_v51 = vmul.f32 0.0625, %v2063_v11  ;;  %v2066_v14 = vpop.xlane.xlu1 %2065  ;;  %v2210_v36 = vmul.f32 %v9002_v17, %v9002_v17 }
 0x104   : > { %v2150_v53 = vmul.f32 0.0625, %v2066_v14  ;;  %v2212_v22 = vmul.f32 %v9006_v42, %v9006_v42 }
 0x105   : > { %v9017_v2 = vsub.f32 %v8397_v34, %v2149_v51  ;;  %v2244_v31 = vsel %vm2048_vm0, %v2210_v36, 0.0 }
 0x106   : > { %v9021_v15 = vsub.f32 %v8415_v46, %v2150_v53  ;;  %2248 = vadd.xlane.f32.xlu0 %v2247_v25  ;;  %2245 = vadd.xlane.f32.xlu1 %v2244_v31  ;;  %v2069_v16 = vpop.xlane.xlu0 %2068  ;;  %v2250_v0 = vsel %vm2048_vm0, %v2212_v22, 0.0 }
 0x107   : > { %v2151_v7 = vmul.f32 0.0625, %v2069_v16  ;;  %v2072_v12 = vpop.xlane.xlu1 %2071  ;;  %v2213_v11 = vmul.f32 %v9017_v2, %v9017_v2 }
 0x108   : > { %v2152_v14 = vmul.f32 0.0625, %v2072_v12  ;;  %v2214_v34 = vmul.f32 %v9021_v15, %v9021_v15 }
 0x109   : > { %v9029_v51 = vsub.f32 %v8427_v60, %v2151_v7  ;;  %v2253_v46 = vsel %vm2048_vm0, %v2213_v11, 0.0 }
 0x10a   : > { %v9033_v36 = vsub.f32 %v8442_v19, %v2152_v14  ;;  %2251 = vadd.xlane.f32.xlu1 %v2250_v0  ;;  %2254 = vadd.xlane.f32.xlu0 %v2253_v46  ;;  %v2075_v53 = vpop.xlane.xlu0 %2074  ;;  %v2256_v31 = vsel %vm2048_vm0, %v2214_v34, 0.0 }
 0x10b   : > { %v2153_v25 = vmul.f32 0.0625, %v2075_v53  ;;  %v2078_v22 = vpop.xlane.xlu1 %2077  ;;  %v2215_v16 = vmul.f32 %v9029_v51, %v9029_v51 }
 0x10c   : > { %v2154_v12 = vmul.f32 0.0625, %v2078_v22  ;;  %v2216_v60 = vmul.f32 %v9033_v36, %v9033_v36 }
 0x10d   : > { %v9041_v7 = vsub.f32 %v8452_v27, %v2153_v25  ;;  %v2259_v19 = vsel %vm2048_vm0, %v2215_v16, 0.0 }
 0x10e   : > { %v9045_v0 = vsub.f32 %v8466_v6, %v2154_v12  ;;  %2257 = vadd.xlane.f32.xlu1 %v2256_v31  ;;  %2260 = vadd.xlane.f32.xlu0 %v2259_v19  ;;  %v2081_v11 = vpop.xlane.xlu0 %2080  ;;  %v2262_v46 = vsel %vm2048_vm0, %v2216_v60, 0.0 }
 0x10f   : > { %v2155_v14 = vmul.f32 0.0625, %v2081_v11  ;;  %v2084_v34 = vpop.xlane.xlu1 %2083  ;;  %v2217_v53 = vmul.f32 %v9041_v7, %v9041_v7 }
 0x110   : > { %v2156_v22 = vmul.f32 0.0625, %v2084_v34  ;;  %v2218_v27 = vmul.f32 %v9045_v0, %v9045_v0 }
 0x111   : > { %v9053_v25 = vsub.f32 %v8475_v44, %v2155_v14  ;;  %v2265_v6 = vsel %vm2048_vm0, %v2217_v53, 0.0 }
 0x112   : > { %v9057_v31 = vsub.f32 %v8488_v54, %v2156_v22  ;;  %2263 = vadd.xlane.f32.xlu1 %v2262_v46  ;;  %2266 = vadd.xlane.f32.xlu0 %v2265_v6  ;;  %v2087_v16 = vpop.xlane.xlu0 %2086  ;;  %v2268_v19 = vsel %vm2048_vm0, %v2218_v27, 0.0 }
 0x113   : > { %v2157_v12 = vmul.f32 0.0625, %v2087_v16  ;;  %v2090_v60 = vpop.xlane.xlu1 %2089  ;;  %v2219_v11 = vmul.f32 %v9053_v25, %v9053_v25 }
 0x114   : > { %v2158_v34 = vmul.f32 0.0625, %v2090_v60  ;;  %v2220_v44 = vmul.f32 %v9057_v31, %v9057_v31 }
 0x115   : > { %v9065_v14 = vsub.f32 %v8507_v38, %v2157_v12  ;;  %v2271_v54 = vsel %vm2048_vm0, %v2219_v11, 0.0 }
 0x116   : > { %v9069_v46 = vsub.f32 %v8522_v58, %v2158_v34  ;;  %2269 = vadd.xlane.f32.xlu1 %v2268_v19  ;;  %2272 = vadd.xlane.f32.xlu0 %v2271_v54  ;;  %v2093_v53 = vpop.xlane.xlu0 %2092  ;;  %v2274_v6 = vsel %vm2048_vm0, %v2220_v44, 0.0 }
 0x117   : > { %v2159_v22 = vmul.f32 0.0625, %v2093_v53  ;;  %v2096_v27 = vpop.xlane.xlu1 %2095  ;;  %v2221_v16 = vmul.f32 %v9065_v14, %v9065_v14 }
 0x118   : > { %v2160_v60 = vmul.f32 0.0625, %v2096_v27  ;;  %v2222_v38 = vmul.f32 %v9069_v46, %v9069_v46 }
 0x119   : > { %v9077_v12 = vsub.f32 %v8541_v55, %v2159_v22  ;;  %v2277_v58 = vsel %vm2048_vm0, %v2221_v16, 0.0 }
 0x11a   : > { %v9081_v19 = vsub.f32 %v8549_v29, %v2160_v60  ;;  %2275 = vadd.xlane.f32.xlu1 %v2274_v6  ;;  %2278 = vadd.xlane.f32.xlu0 %v2277_v58  ;;  %v2099_v11 = vpop.xlane.xlu0 %2098  ;;  %v2280_v44 = vsel %vm2048_vm0, %v2222_v38, 0.0 }
 0x11b   : > { %v2161_v34 = vmul.f32 0.0625, %v2099_v11  ;;  %v2223_v54 = vmul.f32 %v9077_v12, %v9077_v12 }
 0x11c   : > { %v2224_v53 = vmul.f32 %v9081_v19, %v9081_v19  ;;  %v2102_v22 = vpop.xlane.xlu1 %2101 }
 0x11d   : > { %v9089_v55 = vsub.f32 %v8565_v23, %v2161_v34  ;;  %v2283_v27 = vsel %vm2048_vm0, %v2223_v54, 0.0  ;;  %v2162_v29 = vmul.f32 0.0625, %v2102_v22 }
 0x11e   : > { %2281 = vadd.xlane.f32.xlu1 %v2280_v44  ;;  %2284 = vadd.xlane.f32.xlu0 %v2283_v27  ;;  %v2105_v6 = vpop.xlane.xlu0 %2104  ;;  %v2286_v60 = vsel %vm2048_vm0, %v2224_v53, 0.0 }
 0x11f   : > { %v2163_v16 = vmul.f32 0.0625, %v2105_v6  ;;  %v2225_v38 = vmul.f32 %v9089_v55, %v9089_v55  ;;  %v9096_v58 = vsub.f32 %v8586_v1, %v2162_v29 }
 0x120   : > { %v2108_v23 = vpop.xlane.xlu1 %2107 }
 0x121   : > { %v9099_v11 = vsub.f32 %v8591_v61, %v2163_v16  ;;  %v2289_v34 = vsel %vm2048_vm0, %v2225_v38, 0.0  ;;  %v2164_v54 = vmul.f32 0.0625, %v2108_v23  ;;  %v2226_v53 = vmul.f32 %v9096_v58, %v9096_v58 }
 0x122   : > { %2287 = vadd.xlane.f32.xlu1 %v2286_v60  ;;  %2290 = vadd.xlane.f32.xlu0 %v2289_v34  ;;  %v2111_v44 = vpop.xlane.xlu0 %2110  ;;  %v943_v34 = vld [vmem:[%s8722_s16] sm:$0xff] }
 0x123   : > { %v2165_v22 = vmul.f32 0.0625, %v2111_v44  ;;  %v2227_v27 = vmul.f32 %v9099_v11, %v9099_v11  ;;  %v9107_v1 = vsub.f32 %v8610_v45, %v2164_v54  ;;  %v2292_v61 = vsel %vm2048_vm0, %v2226_v53, 0.0  ;;  %v944_v53 = vld [vmem:[%s8722_s16 + $0x8] sm:$0xff] }
 0x124   : > { %v2114_v6 = vpop.xlane.xlu1 %2113 }
 0x125   : > { %v9111_v29 = vsub.f32 %v8618_v26, %v2165_v22  ;;  %v2295_v16 = vsel %vm2048_vm0, %v2227_v27, 0.0  ;;  %v2166_v60 = vmul.f32 0.0625, %v2114_v6  ;;  %v2228_v23 = vmul.f32 %v9107_v1, %v9107_v1 }
 0x126   : > { %2293 = vadd.xlane.f32.xlu1 %v2292_v61  ;;  %2296 = vadd.xlane.f32.xlu0 %v2295_v16  ;;  %v2117_v38 = vpop.xlane.xlu0 %2116  ;;  %v1071_v6 = vmul.f32 %v943_v34, %v943_v34 }
 0x127   : > { %13667 = vst [vmem:[#allocation109_spill] sm:$0xff] %v9111_v29  ;;  %v2167_v44 = vmul.f32 0.0625, %v2117_v38  ;;  %v2229_v45 = vmul.f32 %v9111_v29, %v9111_v29  ;;  %v9120_v54 = vsub.f32 %v8627_v18, %v2166_v60  ;;  %v2298_v26 = vsel %vm2048_vm0, %v2228_v23, 0.0 }
 0x128   : > { %v2120_v27 = vpop.xlane.xlu1 %2119  ;;  %v1072_v60 = vmul.f32 %v944_v53, %v944_v53 }
 0x129   : > { %v9125_v22 = vsub.f32 %v8643_v13, %v2167_v44  ;;  %v2301_v61 = vsel %vm2048_vm0, %v2229_v45, 0.0  ;;  %v2168_v16 = vmul.f32 0.0625, %v2120_v27  ;;  %v2230_v38 = vmul.f32 %v9120_v54, %v9120_v54 }
 0x12a   : > { %2299 = vadd.xlane.f32.xlu1 %v2298_v26  ;;  %2302 = vadd.xlane.f32.xlu0 %v2301_v61  ;;  %v1103_v45 = vadd.f32 1e-12, %v1071_v6 }
 0x12b   : > { %13668 = vst [vmem:[#allocation110_spill] sm:$0xff] %v9125_v22  ;;  %v2123_v21 = vpop.xlane.xlu0 %2122  ;;  %v2231_v18 = vmul.f32 %v9125_v22, %v9125_v22  ;;  %v9133_v23 = vsub.f32 %v8651_v57, %v2168_v16  ;;  %v2304_v44 = vsel %vm2048_vm0, %v2230_v38, 0.0  ;;  %v1104_v22 = vadd.f32 1e-12, %v1072_v60 }
 0x12c   : > { %v2169_v13 = vmul.f32 0.0625, %v2123_v21  ;;  %v2126_v29 = vpop.xlane.xlu1 %2125  ;;  %7454 = vrsqrt.f32 %v1103_v45 }
 0x12d   : > { %v2307_v34 = vsel %vm2048_vm0, %v2231_v18, 0.0  ;;  %v2170_v27 = vmul.f32 0.0625, %v2126_v29  ;;  %v2232_v61 = vmul.f32 %v9133_v23, %v9133_v23  ;;  %7456 = vrsqrt.f32 %v1104_v22 }
 0x12e   : > { %v9138_v26 = vsub.f32 %v8661_v40, %v2169_v13  ;;  %2305 = vadd.xlane.f32.xlu1 %v2304_v44  ;;  %2308 = vadd.xlane.f32.xlu0 %v2307_v34 }
 0x12f   : > { %v2129_v53 = vpop.xlane.xlu0 %2128  ;;  %v9143_v57 = vsub.f32 %v8665_v39, %v2170_v27  ;;  %v2310_v16 = vsel %vm2048_vm0, %v2232_v61, 0.0  ;;  %v7321_v39 = vld [vmem:[%s13203_s7] sm:$0xff]  }
 0x130   : > { %v2171_v21 = vmul.f32 0.0625, %v2129_v53  ;;  %v2233_v6 = vmul.f32 %v9138_v26, %v9138_v26  ;;  %v2132_v38 = vpop.xlane.xlu1 %2131  ;;  %7057 = vmatprep.subr.bf16.mxu1 %v7321_v39 }
 0x131   : > { %v2172_v29 = vmul.f32 0.0625, %v2132_v38  ;;  %v2234_v60 = vmul.f32 %v9143_v57, %v9143_v57  ;;  %7058 = vmatpush3.bf16.msra.mxu1 %v7321_v39 }
 0x132   : > { %v9149_v40 = vsub.f32 %v8674_v9, %v2171_v21  ;;  %2311 = vadd.xlane.f32.xlu1 %v2310_v16  ;;  %v2313_v18 = vsel %vm2048_vm0, %v2233_v6, 0.0 }
 0x133   : > { %2314 = vadd.xlane.f32.xlu0 %v2313_v18  ;;  %v9158_v13 = vsub.f32 %v8681_v24, %v2172_v29  ;;  %v2316_v44 = vsel %vm2048_vm0, %v2234_v60, 0.0 }
 0x134   : > { %v2235_v9 = vmul.f32 %v9149_v40, %v9149_v40  ;;  %v2135_v34 = vpop.xlane.xlu0 %2134 }
 0x135   : > { %v2173_v27 = vmul.f32 0.0625, %v2135_v34  ;;  %v2236_v53 = vmul.f32 %v9158_v13, %v9158_v13 }
 0x136   : > { %2317 = vadd.xlane.f32.xlu1 %v2316_v44  ;;  %v2319_v61 = vsel %vm2048_vm0, %v2235_v9, 0.0  ;;  %v9175_v39 = vpop.eup %7454 }
 0x137   : > { %v2138_v21 = vpop.xlane.xlu1 %2137  ;;  %2320 = vadd.xlane.f32.xlu0 %v2319_v61  ;;  %v9167_v24 = vsub.f32 %v8688_v47, %v2173_v27  ;;  %v2322_v6 = vsel %vm2048_vm0, %v2236_v53, 0.0  ;;  %13669 = vst [vmem:[#allocation111_spill] sm:$0xff] %v9175_v39  ;;  %v9183_v61 = vpop.eup %7456 }
 0x138   : > { %v2174_v16 = vmul.f32 0.0625, %v2138_v21  ;;  %v2141_v38 = vpop.xlane.xlu0 %2140  ;;  %13670 = vst [vmem:[#allocation112_spill] sm:$0xff] %v9183_v61 }
 0x139   : > { %v2175_v18 = vmul.f32 0.0625, %v2141_v38  ;;  %v2237_v60 = vmul.f32 %v9167_v24, %v9167_v24  ;;  %v9198_v38 = vmul.f32 %v9183_v61, %v1104_v22 }
 0x13a   : > { %v9171_v29 = vsub.f32 %v8697_v63, %v2174_v16  ;;  %2323 = vadd.xlane.f32.xlu1 %v2322_v6 }
 0x13b   : > { %v2144_v44 = vpop.xlane.xlu1 %2143  ;;  %v9178_v9 = vsub.f32 %v8700_v50, %v2175_v18  ;;  %v2325_v34 = vsel %vm2048_vm0, %v2237_v60, 0.0  ;;  %v9192_v50 = vmul.f32 %v9175_v39, %v1103_v45  ;;  %v9205_v45 = vmul.f32 %v8750_v4, %v8725_v41 }
 0x13c   : > { %v2176_v47 = vmul.f32 0.0625, %v2144_v44  ;;  %v2238_v27 = vmul.f32 %v9171_v29, %v9171_v29  ;;  %2326 = vadd.xlane.f32.xlu0 %v2325_v34  ;;  %v1205_v60 = vsel %vm1201_vm1, %v9198_v38, 0.0  ;;  %v9211_v44 = vmul.f32 %v8759_v33, %v8730_v10  ;;  %v13672_v34 = vld [vmem:[#allocation47_spill] sm:$0xff] }
 0x13d   : > { %v2239_v21 = vmul.f32 %v9178_v9, %v9178_v9  ;;  %v1202_v18 = vsel %vm1201_vm1, %v9192_v50, 0.0  ;;  %v1208_v22 = vsel %vm1201_vm1, %v9205_v45, 0.0  ;;  %v9223_v41 = vmul.f32 %v8777_v28, %v8738_v35  ;;  %v13673_v35 = vld [vmem:[#allocation37_spill] sm:$0xff] }
 0x13e   : > { %v9186_v63 = vsub.f32 %v8709_v52, %v2176_v47  ;;  %v2328_v53 = vsel %vm2048_vm0, %v2238_v27, 0.0  ;;  %v9217_v47 = vmul.f32 %v8763_v3, %v8732_v43  ;;  %v1211_v4 = vsel %vm1201_vm1, %v9211_v44, 0.0  ;;  %v13671_v3 = vld [vmem:[#allocation36_spill] sm:$0xff] }
 0x13f   : > { %2329 = vadd.xlane.f32.xlu1 %v2328_v53  ;;  %v2331_v16 = vsel %vm2048_vm0, %v2239_v21, 0.0  ;;  %v9229_v10 = vmul.f32 %v8781_v20, %v8740_v8  ;;  %v1217_v43 = vsel %vm1201_vm1, %v9223_v41, 0.0  ;;  %v9235_v27 = vmul.f32 %v13672_v34, %v13671_v3  ;;  %v13674_v53 = vld [vmem:[#allocation49_spill] sm:$0xff]  ;;  %v13675_v20 = vld [vmem:[#allocation39_spill] sm:$0xff] }
 0x140   : > { %v2240_v6 = vmul.f32 %v9186_v63, %v9186_v63  ;;  %2332 = vadd.xlane.f32.xlu0 %v2331_v16  ;;  %v1214_v33 = vsel %vm1201_vm1, %v9217_v47, 0.0  ;;  %v9241_v21 = vmul.f32 %v13674_v53, %v13673_v35  ;;  %v13676_v16 = vld [vmem:[#allocation53_spill] sm:$0xff] }
 0x141   : > { %v1220_v28 = vsel %vm1201_vm1, %v9229_v10, 0.0  ;;  %v1223_v8 = vsel %vm1201_vm1, %v9235_v27, 0.0  ;;  %v13682_v35 = vld [vmem:[#allocation61_spill] sm:$0xff] }
 0x142   : > { %v2334_v52 = vsel %vm2048_vm0, %v2240_v6, 0.0  ;;  %v9247_v6 = vmul.f32 %v13676_v16, %v13675_v20  ;;  %v13685_v16 = vld [vmem:[#allocation65_spill] sm:$0xff] }
 0x143   : > { %2335 = vadd.xlane.f32.xlu1 %v2334_v52  ;;  %v1226_v52 = vsel %vm1201_vm1, %v9241_v21, 0.0 }
 0x144   : > { %1203 = vadd.xlane.f32.xlu0 %v1202_v18  ;;  %v13677_v18 = vld [vmem:[#allocation41_spill] sm:$0xff] }
 0x147   : > { %1206 = vadd.xlane.f32.xlu1 %v1205_v60  ;;  %v13678_v60 = vld [vmem:[#allocation55_spill] sm:$0xff] }
 0x148   : > { %1209 = vadd.xlane.f32.xlu0 %v1208_v22  ;;  %v9253_v22 = vmul.f32 %v13678_v60, %v13677_v18 }
 0x14a   : > { %v1232_v34 = vsel %vm1201_vm1, %v9253_v22, 0.0 }
 0x14b   : > { %1212 = vadd.xlane.f32.xlu1 %v1211_v4  ;;  %v1229_v4 = vsel %vm1201_vm1, %v9247_v6, 0.0 }
 0x14c   : > { %1215 = vadd.xlane.f32.xlu0 %v1214_v33  ;;  %v13679_v33 = vld [vmem:[#allocation43_spill] sm:$0xff] }
 0x14f   : > { %1218 = vadd.xlane.f32.xlu1 %v1217_v43  ;;  %v13680_v43 = vld [vmem:[#allocation59_spill] sm:$0xff] }
 0x150   : > { %1221 = vadd.xlane.f32.xlu0 %v1220_v28  ;;  %v9259_v3 = vmul.f32 %v13680_v43, %v13679_v33  ;;  %v13681_v28 = vld [vmem:[#allocation45_spill] sm:$0xff]  ;;  %v13688_v33 = vld [vmem:[#allocation67_spill] sm:$0xff] }
 0x151   : > { %v9265_v53 = vmul.f32 %v13682_v35, %v13681_v28  ;;  %v13691_v35 = vld [vmem:[#allocation71_spill] sm:$0xff] }
 0x152   : > { %v1235_v20 = vsel %vm1201_vm1, %v9259_v3, 0.0 }
 0x153   : > { %1224 = vadd.xlane.f32.xlu1 %v1223_v8  ;;  %13683 = vst [vmem:[#allocation36_spill] sm:$0xff] %v9265_v53  ;;  %v13684_v8 = vld [vmem:[#allocation48_spill] sm:$0xff]  ;;  %v1238_v60 = vsel %vm1201_vm1, %v9265_v53, 0.0 }
 0x154   : > { %1227 = vadd.xlane.f32.xlu0 %v1226_v52  ;;  %v9271_v18 = vmul.f32 %v13685_v16, %v13684_v8  ;;  %v13687_v52 = vld [vmem:[#allocation51_spill] sm:$0xff]  ;;  %v13694_v16 = vld [vmem:[#allocation73_spill] sm:$0xff] }
 0x155   : > { %v9277_v43 = vmul.f32 %v13688_v33, %v13687_v52  ;;  %v13696_v33 = vld [vmem:[#allocation77_spill] sm:$0xff] }
 0x156   : > { %13686 = vst [vmem:[#allocation47_spill] sm:$0xff] %v9271_v18  ;;  %v1241_v28 = vsel %vm1201_vm1, %v9271_v18, 0.0 }
 0x157   : > { %1230 = vadd.xlane.f32.xlu1 %v1229_v4  ;;  %13689 = vst [vmem:[#allocation37_spill] sm:$0xff] %v9277_v43  ;;  %v13690_v4 = vld [vmem:[#allocation54_spill] sm:$0xff]  ;;  %v1244_v8 = vsel %vm1201_vm1, %v9277_v43, 0.0 }
 0x158   : > { %1233 = vadd.xlane.f32.xlu0 %v1232_v34  ;;  %v9283_v61 = vmul.f32 %v13691_v35, %v13690_v4  ;;  %v13693_v34 = vld [vmem:[#allocation57_spill] sm:$0xff]  ;;  %v13699_v35 = vld [vmem:[#allocation79_spill] sm:$0xff] }
 0x159   : > { %v9289_v39 = vmul.f32 %v13694_v16, %v13693_v34  ;;  %v13702_v16 = vld [vmem:[#allocation83_spill] sm:$0xff] }
 0x15a   : > { %13692 = vst [vmem:[#allocation49_spill] sm:$0xff] %v9283_v61  ;;  %v1247_v52 = vsel %vm1201_vm1, %v9283_v61, 0.0 }
 0x15b   : > { %1236 = vadd.xlane.f32.xlu1 %v1235_v20  ;;  %v13695_v20 = vld [vmem:[#allocation60_spill] sm:$0xff]  ;;  %v1250_v4 = vsel %vm1201_vm1, %v9289_v39, 0.0 }
 0x15c   : > { %1239 = vadd.xlane.f32.xlu0 %v1238_v60  ;;  %v9295_v53 = vmul.f32 %v13696_v33, %v13695_v20  ;;  %v13698_v60 = vld [vmem:[#allocation63_spill] sm:$0xff]  ;;  %v13705_v33 = vld [vmem:[#allocation85_spill] sm:$0xff] }
 0x15d   : > { %v9301_v18 = vmul.f32 %v13699_v35, %v13698_v60 }
 0x15e   : > { %13697 = vst [vmem:[#allocation39_spill] sm:$0xff] %v9295_v53  ;;  %v1253_v34 = vsel %vm1201_vm1, %v9295_v53, 0.0  ;;  %v13739_v53 = vld [vmem:[#allocation8_spill] sm:$0xff] }
 0x15f   : > { %1242 = vadd.xlane.f32.xlu1 %v1241_v28  ;;  %13700 = vst [vmem:[#allocation53_spill] sm:$0xff] %v9301_v18  ;;  %v13701_v28 = vld [vmem:[#allocation66_spill] sm:$0xff]  ;;  %v1256_v20 = vsel %vm1201_vm1, %v9301_v18, 0.0 }
 0x160   : > { %1245 = vadd.xlane.f32.xlu0 %v1244_v8  ;;  %v9307_v43 = vmul.f32 %v13702_v16, %v13701_v28  ;;  %v13704_v8 = vld [vmem:[#allocation69_spill] sm:$0xff] }
 0x161   : > { %v9313_v61 = vmul.f32 %v13705_v33, %v13704_v8 }
 0x162   : > { %13703 = vst [vmem:[#allocation41_spill] sm:$0xff] %v9307_v43  ;;  %v1259_v60 = vsel %vm1201_vm1, %v9307_v43, 0.0 }
 0x163   : > { %1248 = vadd.xlane.f32.xlu1 %v1247_v52  ;;  %13706 = vst [vmem:[#allocation55_spill] sm:$0xff] %v9313_v61  ;;  %v13707_v52 = vld [vmem:[#allocation72_spill] sm:$0xff]  ;;  %v1262_v28 = vsel %vm1201_vm1, %v9313_v61, 0.0 }
 0x164   : > { %1251 = vadd.xlane.f32.xlu0 %v1250_v4  ;;  %v9319_v35 = vmul.f32 %v8921_v62, %v13707_v52  ;;  %v13709_v4 = vld [vmem:[#allocation75_spill] sm:$0xff]  ;;  %v13714_v52 = vld [vmem:[#allocation94_spill] sm:$0xff] }
 0x165   : > { %v9325_v16 = vmul.f32 %v8925_v32, %v13709_v4 }
 0x166   : > { %13708 = vst [vmem:[#allocation43_spill] sm:$0xff] %v9319_v35  ;;  %v1265_v8 = vsel %vm1201_vm1, %v9319_v35, 0.0 }
 0x167   : > { %1254 = vadd.xlane.f32.xlu1 %v1253_v34  ;;  %13710 = vst [vmem:[#allocation59_spill] sm:$0xff] %v9325_v16  ;;  %v13711_v34 = vld [vmem:[#allocation78_spill] sm:$0xff]  ;;  %v1268_v62 = vsel %vm1201_vm1, %v9325_v16, 0.0 }
 0x168   : > { %1257 = vadd.xlane.f32.xlu0 %v1256_v20  ;;  %v9331_v33 = vmul.f32 %v8939_v59, %v13711_v34  ;;  %v13713_v20 = vld [vmem:[#allocation81_spill] sm:$0xff]  ;;  %v13719_v34 = vld [vmem:[#allocation99_spill] sm:$0xff] }
 0x169   : > { %v9337_v43 = vmul.f32 %v13714_v52, %v13713_v20 }
 0x16a   : > { %13712 = vst [vmem:[#allocation45_spill] sm:$0xff] %v9331_v33  ;;  %v1271_v32 = vsel %vm1201_vm1, %v9331_v33, 0.0 }
 0x16b   : > { %1260 = vadd.xlane.f32.xlu1 %v1259_v60  ;;  %13715 = vst [vmem:[#allocation61_spill] sm:$0xff] %v9337_v43  ;;  %v13716_v60 = vld [vmem:[#allocation84_spill] sm:$0xff]  ;;  %v1274_v59 = vsel %vm1201_vm1, %v9337_v43, 0.0 }
 0x16c   : > { %1263 = vadd.xlane.f32.xlu0 %v1262_v28  ;;  %v9343_v4 = vmul.f32 %v8956_v37, %v13716_v60  ;;  %v13718_v28 = vld [vmem:[#allocation87_spill] sm:$0xff] }
 0x16d   : > { %v9349_v35 = vmul.f32 %v13719_v34, %v13718_v28 }
 0x16e   : > { %13717 = vst [vmem:[#allocation48_spill] sm:$0xff] %v9343_v4  ;;  %v1277_v20 = vsel %vm1201_vm1, %v9343_v4, 0.0 }
 0x16f   : > { %1266 = vadd.xlane.f32.xlu1 %v1265_v8  ;;  %13720 = vst [vmem:[#allocation65_spill] sm:$0xff] %v9349_v35  ;;  %v13721_v8 = vld [vmem:[#allocation89_spill] sm:$0xff]  ;;  %v1280_v37 = vsel %vm1201_vm1, %v9349_v35, 0.0 }
 0x170   : > { %1269 = vadd.xlane.f32.xlu0 %v1268_v62  ;;  %v9355_v52 = vmul.f32 %v8969_v5, %v13721_v8  ;;  %v13723_v62 = vld [vmem:[#allocation91_spill] sm:$0xff] }
 0x171   : > { %v9361_v60 = vmul.f32 %v8971_v49, %v13723_v62 }
 0x172   : > { %13722 = vst [vmem:[#allocation51_spill] sm:$0xff] %v9355_v52  ;;  %v1283_v28 = vsel %vm1201_vm1, %v9355_v52, 0.0 }
 0x173   : > { %1272 = vadd.xlane.f32.xlu1 %v1271_v32  ;;  %13724 = vst [vmem:[#allocation67_spill] sm:$0xff] %v9361_v60  ;;  %v13725_v32 = vld [vmem:[#allocation93_spill] sm:$0xff]  ;;  %v1286_v5 = vsel %vm1201_vm1, %v9361_v60, 0.0 }
 0x174   : > { %1275 = vadd.xlane.f32.xlu0 %v1274_v59  ;;  %v9367_v34 = vmul.f32 %v8979_v56, %v13725_v32  ;;  %v13727_v59 = vld [vmem:[#allocation96_spill] sm:$0xff] }
 0x175   : > { %v9373_v8 = vmul.f32 %v8984_v30, %v13727_v59 }
 0x176   : > { %13726 = vst [vmem:[#allocation54_spill] sm:$0xff] %v9367_v34  ;;  %v1289_v49 = vsel %vm1201_vm1, %v9367_v34, 0.0 }
 0x177   : > { %1278 = vadd.xlane.f32.xlu1 %v1277_v20  ;;  %13728 = vst [vmem:[#allocation71_spill] sm:$0xff] %v9373_v8  ;;  %v13729_v20 = vld [vmem:[#allocation98_spill] sm:$0xff]  ;;  %v1292_v56 = vsel %vm1201_vm1, %v9373_v8, 0.0 }
 0x178   : > { %1281 = vadd.xlane.f32.xlu0 %v1280_v37  ;;  %v9379_v62 = vmul.f32 %v8999_v48, %v13729_v20 }
 0x17a   : > { %13730 = vst [vmem:[#allocation57_spill] sm:$0xff] %v9379_v62  ;;  %v1295_v37 = vsel %vm1201_vm1, %v9379_v62, 0.0 }
 0x17b   : > { %1284 = vadd.xlane.f32.xlu1 %v1283_v28 }
 0x17c   : > { %1287 = vadd.xlane.f32.xlu0 %v1286_v5 }
 0x17f   : > { %1290 = vadd.xlane.f32.xlu1 %v1289_v49 }
 0x180   : > { %1293 = vadd.xlane.f32.xlu0 %v1292_v56 }
 0x183   : > { %1296 = vadd.xlane.f32.xlu1 %v1295_v37 }
 0x18f   : > { %v2243_v30 = vpop.xlane.xlu0 %2242 }
 0x190   : > { %v2337_v32 = vmul.f32 0.0625, %v2243_v30 }
 0x192   : > { %v2369_v28 = vadd.f32 1e-05, %v2337_v32 }
 0x193   : > { %v2246_v59 = vpop.xlane.xlu1 %2245  ;;  %v2249_v60 = vpop.xlane.xlu0 %2248 }
 0x194   : > { %7458 = vrsqrt.f32 %v2369_v28  ;;  %v2338_v34 = vmul.f32 0.0625, %v2246_v59  ;;  %v2339_v52 = vmul.f32 0.0625, %v2249_v60  ;;  %v9388_v60 = vld [vmem:[%s13200_s4] ss:$0 sm:$0xff] }
 0x195   : > { %v13731_v28 = vld [vmem:[#allocation104_spill] sm:$0xff] }
 0x196   : > { %v2370_v48 = vadd.f32 1e-05, %v2338_v34  ;;  %v2371_v20 = vadd.f32 1e-05, %v2339_v52 }
 0x197   : > { %v2252_v5 = vpop.xlane.xlu1 %2251  ;;  %v2255_v35 = vpop.xlane.xlu0 %2254 }
 0x198   : > { %7460 = vrsqrt.f32 %v2370_v48  ;;  %v2340_v8 = vmul.f32 0.0625, %v2252_v5  ;;  %v2341_v49 = vmul.f32 0.0625, %v2255_v35 }
 0x199   : > { %7462 = vrsqrt.f32 %v2371_v20 }
 0x19a   : > { %v2372_v4 = vadd.f32 1e-05, %v2340_v8  ;;  %v2373_v62 = vadd.f32 1e-05, %v2341_v49 }
 0x19b   : > { %v2258_v56 = vpop.xlane.xlu1 %2257  ;;  %v2261_v37 = vpop.xlane.xlu0 %2260 }
 0x19c   : > { %7464 = vrsqrt.f32 %v2372_v4  ;;  %v2342_v30 = vmul.f32 0.0625, %v2258_v56  ;;  %v2343_v32 = vmul.f32 0.0625, %v2261_v37  ;;  %v9394_v4 = vld [vmem:[%s13201_s5] ss:$0 sm:$0xff] }
 0x19d   : > { %7466 = vrsqrt.f32 %v2373_v62 }
 0x19e   : > { %v7459_v43 = vpop.eup %7458  ;;  %v2374_v52 = vadd.f32 1e-05, %v2342_v30  ;;  %v2375_v34 = vadd.f32 1e-05, %v2343_v32 }
 0x19f   : > { %v2433_v59 = vmul.f32 %v7459_v43, %v13731_v28  ;;  %v2264_v35 = vpop.xlane.xlu1 %2263  ;;  %v2267_v48 = vpop.xlane.xlu0 %2266  ;;  %v13732_v28 = vld [vmem:[#allocation105_spill] sm:$0xff] }
 0x1a0   : > { %7468 = vrsqrt.f32 %v2374_v52  ;;  %v2344_v8 = vmul.f32 0.0625, %v2264_v35  ;;  %v2345_v20 = vmul.f32 0.0625, %v2267_v48 }
 0x1a1   : > { %7470 = vrsqrt.f32 %v2375_v34  ;;  %v2471_v62 = vmul.f32 %v9388_v60, %v2433_v59 }
 0x1a2   : > { %v7461_v5 = vpop.eup %7460  ;;  %v2376_v49 = vadd.f32 1e-05, %v2344_v8  ;;  %v2377_v56 = vadd.f32 1e-05, %v2345_v20 }
 0x1a3   : > { %v7463_v37 = vpop.eup %7462  ;;  %v2434_v30 = vmul.f32 %v7461_v5, %v9002_v17  ;;  %v2270_v43 = vpop.xlane.xlu1 %2269  ;;  %v2509_v52 = vadd.f32 %v9394_v4, %v2471_v62 }
 0x1a4   : > { %v2273_v32 = vpop.xlane.xlu0 %2272  ;;  %v2435_v35 = vmul.f32 %v7463_v37, %v13732_v28  ;;  %7472 = vrsqrt.f32 %v2376_v49  ;;  %v2346_v48 = vmul.f32 0.0625, %v2270_v43  ;;  %v13733_v49 = vld [vmem:[#allocation4_spill] sm:$0xff] }
 0x1a5   : > { %v2347_v33 = vmul.f32 0.0625, %v2273_v32  ;;  %7474 = vrsqrt.f32 %v2377_v56  ;;  %v2472_v34 = vmul.f32 %v9388_v60, %v2434_v30  ;;  %v2541_v16 = vmax.f32 %v2509_v52, 0.0 }
 0x1a6   : > { %v7465_v59 = vpop.eup %7464  ;;  %v2473_v8 = vmul.f32 %v9388_v60, %v2435_v35  ;;  %v2378_v20 = vadd.f32 1e-05, %v2346_v48 }
 0x1a7   : > { %v2379_v61 = vadd.f32 1e-05, %v2347_v33  ;;  %v7467_v18 = vpop.eup %7466  ;;  %v2436_v17 = vmul.f32 %v7465_v59, %v9006_v42  ;;  %v2276_v5 = vpop.xlane.xlu1 %2275  ;;  %v2510_v37 = vadd.f32 %v9394_v4, %v2472_v34  ;;  %v9405_v43 = vmul.f32 %v13733_v49, %v2541_v16  ;;  %v7842_v42 = vld [vmem:[%s8287_s28] sm:$0xff] }
 0x1a8   : > { %v2279_v62 = vpop.xlane.xlu0 %2278  ;;  %v2437_v56 = vmul.f32 %v7467_v18, %v9017_v2  ;;  %7476 = vrsqrt.f32 %v2378_v20  ;;  %v2348_v30 = vmul.f32 0.0625, %v2276_v5  ;;  %v2511_v34 = vadd.f32 %v9394_v4, %v2473_v8  ;;  %v13735_v5 = vld [vmem:[#allocation6_spill] sm:$0xff]  ;;  %v7843_v8 = vld [vmem:[%s8287_s28 + $0x8] sm:$0xff] }
 0x1a9   : > { %13734 = vst [vmem:[#allocation73_spill] sm:$0xff] %v9405_v43  ;;  %v2349_v32 = vmul.f32 0.0625, %v2279_v62  ;;  %v2474_v52 = vmul.f32 %v9388_v60, %v2436_v17  ;;  %7478 = vrsqrt.f32 %v2379_v61  ;;  %v2542_v33 = vmax.f32 %v2510_v37, 0.0 }
 0x1aa   : > { %v7469_v28 = vpop.eup %7468  ;;  %v2380_v35 = vadd.f32 1e-05, %v2348_v30  ;;  %v2605_v59 = vmul.f32 %v7842_v42, %v9405_v43  ;;  %v2475_v49 = vmul.f32 %v9388_v60, %v2437_v56  ;;  %v2543_v42 = vmax.f32 %v2511_v34, 0.0 }
 0x1ab   : > { %v2381_v48 = vadd.f32 1e-05, %v2349_v32  ;;  %v7471_v16 = vpop.eup %7470  ;;  %v2438_v2 = vmul.f32 %v7469_v28, %v9021_v15  ;;  %v2282_v18 = vpop.xlane.xlu1 %2281  ;;  %v9415_v17 = vmul.f32 %v13735_v5, %v2542_v33  ;;  %v2512_v61 = vadd.f32 %v9394_v4, %v2474_v52 }
 0x1ac   : > { %v2285_v20 = vpop.xlane.xlu0 %2284  ;;  %v2439_v62 = vmul.f32 %v7471_v16, %v9029_v51  ;;  %7480 = vrsqrt.f32 %v2380_v35  ;;  %v2350_v37 = vmul.f32 0.0625, %v2282_v18 }
 0x1ad   : > { %v2351_v30 = vmul.f32 0.0625, %v2285_v20  ;;  %v2476_v32 = vmul.f32 %v9388_v60, %v2438_v2  ;;  %7482 = vrsqrt.f32 %v2381_v48  ;;  %v2606_v56 = vmul.f32 %v7843_v8, %v9415_v17  ;;  %v13736_v20 = vld [vmem:[#allocation5_spill] sm:$0xff] }
 0x1ae   : > { %v7473_v15 = vpop.eup %7472  ;;  %v2477_v28 = vmul.f32 %v9388_v60, %v2439_v62  ;;  %v2382_v43 = vadd.f32 1e-05, %v2350_v37  ;;  %v2544_v5 = vmax.f32 %v2512_v61, 0.0  ;;  %v9425_v2 = vmul.f32 %v13736_v20, %v2543_v42 }
 0x1af   : > { %v2383_v33 = vadd.f32 1e-05, %v2351_v30  ;;  %v7475_v52 = vpop.eup %7474  ;;  %v2440_v51 = vmul.f32 %v7473_v15, %v9033_v36  ;;  %v2288_v35 = vpop.xlane.xlu1 %2287  ;;  %v2942_v18 = vpack.c.bf16 %v2606_v56, %v2605_v59  ;;  %v2513_v48 = vadd.f32 %v9394_v4, %v2475_v49  ;;  %v13738_v36 = vld [vmem:[#allocation7_spill] sm:$0xff]  ;;  %v7844_v59 = vld [vmem:[%s8287_s28 + $0x10] sm:$0xff] }
 0x1b0   : > { %v2291_v16 = vpop.xlane.xlu0 %2290  ;;  %13737 = vst [vmem:[#allocation60_spill] sm:$0xff] %v9425_v2  ;;  %v2441_v34 = vmul.f32 %v7475_v52, %v9041_v7  ;;  %7484 = vrsqrt.f32 %v2382_v43  ;;  %v2352_v8 = vmul.f32 0.0625, %v2288_v35  ;;  %v9432_v37 = vmul.f32 %v13738_v36, %v2544_v5  ;;  %v7845_v35 = vld [vmem:[%s8287_s28 + $0x18] sm:$0xff] }
 0x1b1   : > { %v2353_v62 = vmul.f32 0.0625, %v2291_v16  ;;  %v2478_v61 = vmul.f32 %v9388_v60, %v2440_v51  ;;  %7486 = vrsqrt.f32 %v2383_v33  ;;  %7059 = vmatprep.mubr.msk.bf16.mxu1 %vm2048_vm0, %v2942_v18  ;;  %v2607_v30 = vmul.f32 %v7844_v59, %v9425_v2 }
 0x1b2   : > { %v7477_v56 = vpop.eup %7476  ;;  %v2479_v49 = vmul.f32 %v9388_v60, %v2441_v34  ;;  %v2384_v42 = vadd.f32 1e-05, %v2352_v8  ;;  %v2514_v43 = vadd.f32 %v9394_v4, %v2476_v32  ;;  %v2608_v16 = vmul.f32 %v7845_v35, %v9432_v37 }
 0x1b3   : > { %v2385_v7 = vadd.f32 1e-05, %v2353_v62  ;;  %v7479_v15 = vpop.eup %7478  ;;  %v2442_v52 = vmul.f32 %v7477_v56, %v9045_v0  ;;  %v2294_v51 = vpop.xlane.xlu1 %2293  ;;  %v2545_v5 = vmax.f32 %v2513_v48, 0.0  ;;  %v2515_v18 = vadd.f32 %v9394_v4, %v2477_v28 }
 0x1b4   : > { %v2297_v33 = vpop.xlane.xlu0 %2296  ;;  %v2443_v20 = vmul.f32 %v7479_v15, %v9053_v25  ;;  %7488 = vrsqrt.f32 %v2384_v42  ;;  %v2354_v36 = vmul.f32 0.0625, %v2294_v51  ;;  %v2943_v32 = vpack.c.bf16 %v2608_v16, %v2607_v30  ;;  %v7846_v16 = vld [vmem:[%s8287_s28 + $0x20] sm:$0xff] }
 0x1b5   : > { %v2355_v34 = vmul.f32 0.0625, %v2297_v33  ;;  %v2480_v8 = vmul.f32 %v9388_v60, %v2442_v52  ;;  %7490 = vrsqrt.f32 %v2385_v7  ;;  %v2546_v62 = vmax.f32 %v2514_v43, 0.0  ;;  %v13740_v7 = vld [vmem:[#allocation9_spill] sm:$0xff] }
 0x1b6   : > { %v7481_v59 = vpop.eup %7480  ;;  %v2481_v0 = vmul.f32 %v9388_v60, %v2443_v20  ;;  %v2386_v56 = vadd.f32 1e-05, %v2354_v36  ;;  %v9446_v48 = vmul.f32 %v13739_v53, %v2545_v5  ;;  %7060 = vmatmul.mubr.msk.bf16.vlgmr.msra.gmra.mrb[0].mxu1 %vm2048_vm0, %v2943_v32  ;;  %v2516_v43 = vadd.f32 %v9394_v4, %v2478_v61  ;;  %v7847_v5 = vld [vmem:[%s8287_s28 + $0x28] sm:$0xff] }
 0x1b7   : > { %v2387_v2 = vadd.f32 1e-05, %v2355_v34  ;;  %v7483_v28 = vpop.eup %7482  ;;  %v2444_v25 = vmul.f32 %v7481_v59, %v9057_v31  ;;  %v2300_v42 = vpop.xlane.xlu1 %2299  ;;  %v9451_v30 = vmul.f32 %v13740_v7, %v2546_v62  ;;  %v2547_v52 = vmax.f32 %v2515_v18, 0.0 }
 0x1b8   : > { %v2303_v15 = vpop.xlane.xlu0 %2302  ;;  %v2445_v51 = vmul.f32 %v7483_v28, %v9065_v14  ;;  %7492 = vrsqrt.f32 %v2386_v56  ;;  %v2356_v33 = vmul.f32 0.0625, %v2300_v42  ;;  %v2609_v31 = vmul.f32 %v7846_v16, %v9446_v48  ;;  %v13741_v28 = vld [vmem:[#allocation10_spill] sm:$0xff] }
 0x1b9   : > { %v2357_v53 = vmul.f32 0.0625, %v2303_v15  ;;  %v2482_v35 = vmul.f32 %v9388_v60, %v2444_v25  ;;  %7494 = vrsqrt.f32 %v2387_v2  ;;  %v2610_v20 = vmul.f32 %v7847_v5, %v9451_v30 }
 0x1ba   : > { %v7485_v36 = vpop.eup %7484  ;;  %v9461_v34 = vmul.f32 %v9388_v60, %v2445_v51  ;;  %v2388_v61 = vadd.f32 1e-05, %v2356_v33  ;;  %v2548_v32 = vmax.f32 %v2516_v43, 0.0  ;;  %v9465_v25 = vmul.f32 %v13741_v28, %v2547_v52 }
 0x1bb   : > { %v2389_v18 = vadd.f32 1e-05, %v2357_v53  ;;  %v7487_v14 = vpop.eup %7486  ;;  %v2446_v62 = vmul.f32 %v7485_v36, %v9069_v46  ;;  %v2944_v59 = vpack.c.bf16 %v2610_v20, %v2609_v31  ;;  %v2306_v56 = vpop.xlane.xlu1 %2305  ;;  %v2517_v42 = vadd.f32 %v9394_v4, %v2479_v49  ;;  %v13742_v46 = vld [vmem:[#allocation11_spill] sm:$0xff]  ;;  %v7848_v53 = vld [vmem:[%s8287_s28 + $0x30] sm:$0xff] }
 0x1bc   : > { %v2309_v2 = vpop.xlane.xlu0 %2308  ;;  %v2447_v15 = vmul.f32 %v7487_v14, %v9077_v12  ;;  %7496 = vrsqrt.f32 %v2388_v61  ;;  %v2358_v7 = vmul.f32 0.0625, %v2306_v56  ;;  %v9474_v33 = vmul.f32 %v13742_v46, %v2548_v32  ;;  %v7849_v61 = vld [vmem:[%s8287_s28 + $0x38] sm:$0xff] }
 0x1bd   : > { %v2359_v51 = vmul.f32 0.0625, %v2309_v2  ;;  %v9470_v43 = vmul.f32 %v9388_v60, %v2446_v62  ;;  %7498 = vrsqrt.f32 %v2389_v18  ;;  %7063 = vmatprep.mubr.msk.bf16.mxu1 %vm2048_vm0, %v2944_v59  ;;  %v2611_v52 = vmul.f32 %v7848_v53, %v9465_v25 }
 0x1be   : > { %v7489_v16 = vpop.eup %7488  ;;  %v9479_v49 = vmul.f32 %v9388_v60, %v2447_v15  ;;  %v2390_v12 = vadd.f32 1e-05, %v2358_v7  ;;  %v2518_v5 = vadd.f32 %v9394_v4, %v2480_v8  ;;  %v2612_v18 = vmul.f32 %v7849_v61, %v9474_v33  ;;  %v7850_v61 = vld [vmem:[%s8287_s28 + $0x40] sm:$0xff] }
 0x1bf   : > { %v2391_v31 = vadd.f32 1e-05, %v2359_v51  ;;  %v7491_v20 = vpop.eup %7490  ;;  %v2448_v36 = vmul.f32 %v7489_v16, %v9081_v19  ;;  %v2312_v14 = vpop.xlane.xlu1 %2311  ;;  %v2549_v32 = vmax.f32 %v2517_v42, 0.0  ;;  %v2519_v62 = vadd.f32 %v9394_v4, %v2481_v0  ;;  %v13743_v0 = vld [vmem:[#allocation12_spill] sm:$0xff] }
 0x1c0   : > { %v2449_v59 = vmul.f32 %v7491_v20, %v9089_v55  ;;  %7500 = vrsqrt.f32 %v2390_v12  ;;  %v2360_v56 = vmul.f32 0.0625, %v2312_v14  ;;  %v2315_v2 = vpop.xlane.xlu0 %2314  ;;  %v2550_v28 = vmax.f32 %v2518_v5, 0.0  ;;  %v13744_v55 = vld [vmem:[#allocation13_spill] sm:$0xff] }
 0x1c1   : > { %v9488_v15 = vmul.f32 %v9388_v60, %v2448_v36  ;;  %7502 = vrsqrt.f32 %v2391_v31  ;;  %v2945_v8 = vpack.c.bf16 %v2612_v18, %v2611_v52  ;;  %v2361_v19 = vmul.f32 0.0625, %v2315_v2  ;;  %v7851_v14 = vld [vmem:[%s8287_s28 + $0x48] sm:$0xff] }
 0x1c2   : > { %v7493_v7 = vpop.eup %7492  ;;  %v9491_v51 = vmul.f32 %v9388_v60, %v2449_v59  ;;  %v2392_v42 = vadd.f32 1e-05, %v2360_v56  ;;  %v9494_v46 = vmul.f32 %v13743_v0, %v2549_v32  ;;  %v9497_v53 = vmul.f32 %v13744_v55, %v2550_v28 }
 0x1c3   : > { %v7495_v16 = vpop.eup %7494  ;;  %v2450_v12 = vmul.f32 %v7493_v7, %v9096_v58  ;;  %7064 = vmatmul.mubr.msk.bf16.gmra.mrb[4].mxu1 %vm2048_vm0, %v2945_v8  ;;  %v2393_v52 = vadd.f32 1e-05, %v2361_v19  ;;  %v2318_v31 = vpop.xlane.xlu1 %2317  ;;  %v2520_v5 = vadd.f32 %v9394_v4, %v2482_v35  ;;  %v2551_v20 = vmax.f32 %v2519_v62, 0.0  ;;  %v13745_v8 = vld [vmem:[#allocation14_spill] sm:$0xff] }
 0x1c4   : > { %v2451_v36 = vmul.f32 %v7495_v16, %v9099_v11  ;;  %7504 = vrsqrt.f32 %v2392_v42  ;;  %v2613_v18 = vmul.f32 %v7850_v61, %v9494_v46  ;;  %v2614_v32 = vmul.f32 %v7851_v14, %v9497_v53  ;;  %v2321_v59 = vpop.xlane.xlu0 %2320 }
 0x1c5   : > { %v9508_v56 = vmul.f32 %v9388_v60, %v2450_v12  ;;  %7506 = vrsqrt.f32 %v2393_v52  ;;  %v2362_v58 = vmul.f32 0.0625, %v2318_v31  ;;  %v2363_v2 = vmul.f32 0.0625, %v2321_v59  ;;  %v13746_v52 = vld [vmem:[#allocation109_spill] sm:$0xff] }
 0x1c6   : > { %v7497_v28 = vpop.eup %7496  ;;  %v9511_v35 = vmul.f32 %v9388_v60, %v2451_v36  ;;  %v2946_v11 = vpack.c.bf16 %v2614_v32, %v2613_v18  ;;  %v2552_v62 = vmax.f32 %v2520_v5, 0.0  ;;  %v9514_v19 = vmul.f32 %v13745_v8, %v2551_v20  ;;  %v13747_v36 = vld [vmem:[#allocation15_spill] sm:$0xff]  ;;  %v7852_v5 = vld [vmem:[%s8287_s28 + $0x50] sm:$0xff] }
 0x1c7   : > { %v7499_v7 = vpop.eup %7498  ;;  %v2452_v42 = vmul.f32 %v7497_v28, %v9107_v1  ;;  %v2394_v0 = vadd.f32 1e-05, %v2362_v58  ;;  %v2395_v55 = vadd.f32 1e-05, %v2363_v2  ;;  %v2324_v16 = vpop.xlane.xlu1 %2323  ;;  %v2521_v12 = vadd.f32 %v9394_v4, %v9461_v34  ;;  %v7853_v58 = vld [vmem:[%s8287_s28 + $0x58] sm:$0xff] }
 0x1c8   : > { %v2453_v31 = vmul.f32 %v7499_v7, %v13746_v52  ;;  %7067 = vmatprep.mubr.msk.bf16.mxu1 %vm2048_vm0, %v2946_v11  ;;  %v9522_v61 = vmul.f32 %v13747_v36, %v2552_v62  ;;  %v2615_v20 = vmul.f32 %v7852_v5, %v9514_v19  ;;  %v2364_v18 = vmul.f32 0.0625, %v2324_v16 }
 0x1c9   : > { %v9527_v1 = vmul.f32 %v9388_v60, %v2452_v42  ;;  %7508 = vrsqrt.f32 %v2394_v0  ;;  %v2522_v14 = vadd.f32 %v9394_v4, %v9470_v43  ;;  %v2553_v32 = vmax.f32 %v2521_v12, 0.0  ;;  %v2327_v11 = vpop.xlane.xlu0 %2326  ;;  %v13748_v0 = vld [vmem:[#allocation16_spill] sm:$0xff]  ;;  %v13749_v43 = vld [vmem:[#allocation110_spill] sm:$0xff] }
 0x1ca   : > { %v7501_v34 = vpop.eup %7500  ;;  %v9532_v59 = vmul.f32 %v9388_v60, %v2453_v31  ;;  %7510 = vrsqrt.f32 %v2395_v55  ;;  %v2616_v2 = vmul.f32 %v7853_v58, %v9522_v61  ;;  %v2396_v28 = vadd.f32 1e-05, %v2364_v18  ;;  %v13750_v18 = vld [vmem:[#allocation17_spill] sm:$0xff] }
 0x1cb   : > { %v7503_v62 = vpop.eup %7502  ;;  %v2454_v8 = vmul.f32 %v7501_v34, %v9120_v54  ;;  %v2365_v7 = vmul.f32 0.0625, %v2327_v11  ;;  %v2554_v42 = vmax.f32 %v2522_v14, 0.0  ;;  %v9538_v16 = vmul.f32 %v13748_v0, %v2553_v32  ;;  %v7854_v14 = vld [vmem:[%s8287_s28 + $0x60] sm:$0xff] }
 0x1cc   : > { %v2455_v12 = vmul.f32 %v7503_v62, %v13749_v43  ;;  %v2947_v52 = vpack.c.bf16 %v2616_v2, %v2615_v20  ;;  %7512 = vrsqrt.f32 %v2396_v28  ;;  %v2330_v31 = vpop.xlane.xlu1 %2329  ;;  %v2523_v55 = vadd.f32 %v9394_v4, %v9479_v49 }
 0x1cd   : > { %v9544_v36 = vmul.f32 %v9388_v60, %v2454_v8  ;;  %v2397_v5 = vadd.f32 1e-05, %v2365_v7  ;;  %v9547_v54 = vmul.f32 %v13750_v18, %v2554_v42  ;;  %v2617_v32 = vmul.f32 %v7854_v14, %v9538_v16  ;;  %v2333_v2 = vpop.xlane.xlu0 %2332  ;;  %v7855_v8 = vld [vmem:[%s8287_s28 + $0x68] sm:$0xff] }
 0x1ce   : > { %v7505_v34 = vpop.eup %7504  ;;  %v9552_v58 = vmul.f32 %v9388_v60, %v2455_v12  ;;  %7068 = vmatmul.mubr.msk.bf16.gmra.mrb[8].mxu1 %vm2048_vm0, %v2947_v52  ;;  %v2366_v20 = vmul.f32 0.0625, %v2330_v31  ;;  %v2524_v49 = vadd.f32 %v9394_v4, %v9488_v15  ;;  %v2555_v28 = vmax.f32 %v2523_v55, 0.0  ;;  %v13751_v52 = vld [vmem:[#allocation18_spill] sm:$0xff] }
 0x1cf   : > { %v7507_v11 = vpop.eup %7506  ;;  %v2456_v62 = vmul.f32 %v7505_v34, %v9133_v23  ;;  %7514 = vrsqrt.f32 %v2397_v5  ;;  %v2618_v7 = vmul.f32 %v7855_v8, %v9547_v54  ;;  %v2367_v42 = vmul.f32 0.0625, %v2333_v2  ;;  %v13752_v34 = vld [vmem:[#allocation19_spill] sm:$0xff] }
 0x1d0   : > { %v2457_v0 = vmul.f32 %v7507_v11, %v9138_v26  ;;  %v2398_v43 = vadd.f32 1e-05, %v2366_v20  ;;  %v2556_v12 = vmax.f32 %v2524_v49, 0.0  ;;  %v9562_v31 = vmul.f32 %v13751_v52, %v2555_v28  ;;  %v2336_v18 = vpop.xlane.xlu1 %2335  ;;  %v7856_v26 = vld [vmem:[%s8287_s28 + $0x70] sm:$0xff] }
 0x1d1   : > { %v9565_v15 = vmul.f32 %v9388_v60, %v2456_v62  ;;  %v2948_v55 = vpack.c.bf16 %v2618_v7, %v2617_v32  ;;  %v2399_v14 = vadd.f32 1e-05, %v2367_v42  ;;  %v2368_v23 = vmul.f32 0.0625, %v2336_v18  ;;  %v1204_v49 = vpop.xlane.xlu0 %1203  ;;  %v7857_v42 = vld [vmem:[%s8287_s28 + $0x78] sm:$0xff] }
 0x1d2   : > { %v9568_v5 = vmul.f32 %v9388_v60, %v2457_v0  ;;  %7516 = vrsqrt.f32 %v2398_v43  ;;  %v9571_v2 = vmul.f32 %v13752_v34, %v2556_v12  ;;  %v2619_v20 = vmul.f32 %v7856_v26, %v9562_v31 }
 0x1d3   : > { %v7509_v28 = vpop.eup %7508  ;;  %7071 = vmatprep.mubr.msk.bf16.mxu1 %vm2048_vm0, %v2948_v55  ;;  %7518 = vrsqrt.f32 %v2399_v14  ;;  %v2400_v11 = vadd.f32 1e-05, %v2368_v23  ;;  %v1298_v32 = vmul.f32 0.03125, %v1204_v49  ;;  %v2525_v62 = vadd.f32 %v9394_v4, %v9491_v51 }
 0x1d4   : > { %v7511_v8 = vpop.eup %7510  ;;  %v2458_v7 = vmul.f32 %v7509_v28, %v9143_v57  ;;  %v2620_v0 = vmul.f32 %v7857_v42, %v9571_v2  ;;  %v2526_v43 = vadd.f32 %v9394_v4, %v9508_v56  ;;  %v1207_v12 = vpop.xlane.xlu1 %1206  ;;  %v2527_v52 = vadd.f32 %v9394_v4, %v9511_v35 }
 0x1d5   : > { %v2459_v18 = vmul.f32 %v7511_v8, %v9149_v40  ;;  %7520 = vrsqrt.f32 %v2400_v11  ;;  %v9587_v55 = vsub.f32 %v9192_v50, %v1298_v32  ;;  %v2557_v51 = vmax.f32 %v2525_v62, 0.0  ;;  %v1210_v56 = vpop.xlane.xlu0 %1209  ;;  %v13753_v40 = vld [vmem:[#allocation20_spill] sm:$0xff]  ;;  %v13754_v11 = vld [vmem:[#allocation21_spill] sm:$0xff] }
 0x1d6   : > { %v7513_v14 = vpop.eup %7512  ;;  %v9590_v57 = vmul.f32 %v9388_v60, %v2458_v7  ;;  %v2949_v23 = vpack.c.bf16 %v2620_v0, %v2619_v20  ;;  %v2558_v34 = vmax.f32 %v2526_v43, 0.0  ;;  %v1299_v26 = vmul.f32 0.03125, %v1207_v12  ;;  %v7858_v0 = vld [vmem:[%s8287_s28 + $0x80] sm:$0xff] }
 0x1d7   : > { %v9593_v49 = vmul.f32 %v9388_v60, %v2459_v18  ;;  %v2460_v35 = vmul.f32 %v7513_v14, %v9158_v13  ;;  %v9597_v28 = vmul.f32 %v13753_v40, %v2557_v51  ;;  %v1300_v50 = vmul.f32 0.03125, %v1210_v56  ;;  %v7859_v51 = vld [vmem:[%s8287_s28 + $0x88] sm:$0xff] }
 0x1d8   : > { %7072 = vmatmul.mubr.msk.bf16.gmra.mrb[12].mxu1 %vm2048_vm0, %v2949_v23  ;;  %v9601_v32 = vmul.f32 %v13754_v11, %v2558_v34  ;;  %v9604_v20 = vsub.f32 %v9198_v38, %v1299_v26  ;;  %v2528_v62 = vadd.f32 %v9394_v4, %v9527_v1  ;;  %v2559_v8 = vmax.f32 %v2527_v52, 0.0  ;;  %v1213_v7 = vpop.xlane.xlu1 %1212  ;;  %v13755_v52 = vld [vmem:[#allocation22_spill] sm:$0xff]  ;;  %v13756_v11 = vld [vmem:[#allocation23_spill] sm:$0xff] }
 0x1d9   : > { %v7515_v42 = vpop.eup %7514  ;;  %v9609_v13 = vmul.f32 %v9388_v60, %v2460_v35  ;;  %v2621_v43 = vmul.f32 %v7858_v0, %v9597_v28  ;;  %v9614_v12 = vsub.f32 %v9205_v45, %v1300_v50  ;;  %v1301_v18 = vmul.f32 0.03125, %v1213_v7  ;;  %v1216_v34 = vpop.xlane.xlu0 %1215 }
 0x1da   : > { %v2461_v38 = vmul.f32 %v7515_v42, %v9167_v24  ;;  %v2622_v14 = vmul.f32 %v7859_v51, %v9601_v32  ;;  %v2560_v1 = vmax.f32 %v2528_v62, 0.0  ;;  %v9620_v23 = vmul.f32 %v13755_v52, %v2559_v8  ;;  %v7860_v8 = vld [vmem:[%s8287_s28 + $0x90] sm:$0xff] }
 0x1db   : > { %v9623_v26 = vsub.f32 %v9211_v44, %v1301_v18  ;;  %v1362_v56 = vmul.f32 %v9587_v55, %v9587_v55  ;;  %v1302_v45 = vmul.f32 0.03125, %v1216_v34  ;;  %v2529_v35 = vadd.f32 %v9394_v4, %v9532_v59 }
 0x1dc   : > { %v7517_v24 = vpop.eup %7516  ;;  %v9630_v40 = vmul.f32 %v9388_v60, %v2461_v38  ;;  %v2950_v50 = vpack.c.bf16 %v2622_v14, %v2621_v43  ;;  %v9633_v62 = vmul.f32 %v13756_v11, %v2560_v1  ;;  %v2623_v44 = vmul.f32 %v7860_v8, %v9620_v23  ;;  %v1219_v7 = vpop.xlane.xlu1 %1218  ;;  %v7861_v38 = vld [vmem:[%s8287_s28 + $0x98] sm:$0xff] }
 0x1dd   : > { %v7519_v42 = vpop.eup %7518  ;;  %v2462_v0 = vmul.f32 %v7517_v24, %v9171_v29  ;;  %v1394_v18 = vsel %vm1201_vm1, %v1362_v56, 0.0  ;;  %v9640_v51 = vsub.f32 %v9217_v47, %v1302_v45  ;;  %v2530_v59 = vadd.f32 %v9394_v4, %v9544_v36  ;;  %v1222_v52 = vpop.xlane.xlu0 %1221 }
 0x1de   : > { %v2463_v43 = vmul.f32 %v7519_v42, %v9178_v9  ;;  %7075 = vmatprep.mubr.msk.bf16.mxu1 %vm2048_vm0, %v2950_v50  ;;  %v2624_v14 = vmul.f32 %v7861_v38, %v9633_v62  ;;  %1395 = vadd.xlane.f32.xlu0 %v1394_v18  ;;  %v2561_v1 = vmax.f32 %v2529_v35, 0.0  ;;  %v1363_v29 = vmul.f32 %v9604_v20, %v9604_v20  ;;  %v13757_v50 = vld [vmem:[#allocation24_spill] sm:$0xff]  ;;  %v13758_v42 = vld [vmem:[#allocation25_spill] sm:$0xff] }
 0x1df   : > { %v7521_v34 = vpop.eup %7520  ;;  %v9651_v47 = vmul.f32 %v9388_v60, %v2462_v0  ;;  %v2562_v56 = vmax.f32 %v2530_v59, 0.0  ;;  %v1303_v36 = vmul.f32 0.03125, %v1219_v7  ;;  %v1364_v9 = vmul.f32 %v9614_v12, %v9614_v12 }
 0x1e0   : > { %v9656_v45 = vmul.f32 %v9388_v60, %v2463_v43  ;;  %v2464_v24 = vmul.f32 %v7521_v34, %v9186_v63  ;;  %v2951_v35 = vpack.c.bf16 %v2624_v14, %v2623_v44  ;;  %v9660_v11 = vmul.f32 %v13757_v50, %v2561_v1  ;;  %v1225_v8 = vpop.xlane.xlu1 %1224  ;;  %v7862_v63 = vld [vmem:[%s8287_s28 + $0xa0] sm:$0xff] }
 0x1e1   : > { %v9663_v18 = vmul.f32 %v13758_v42, %v2562_v56  ;;  %v1397_v0 = vsel %vm1201_vm1, %v1363_v29, 0.0  ;;  %v9667_v7 = vsub.f32 %v9223_v41, %v1303_v36  ;;  %v1400_v59 = vsel %vm1201_vm1, %v1364_v9, 0.0  ;;  %v1228_v1 = vpop.xlane.xlu0 %1227  ;;  %v7863_v29 = vld [vmem:[%s8287_s28 + $0xa8] sm:$0xff] }
 0x1e2   : > { %v9671_v43 = vmul.f32 %v9388_v60, %v2464_v24  ;;  %7076 = vmatmul.mubr.msk.bf16.gmra.mrb[16].mxu1 %vm2048_vm0, %v2951_v35  ;;  %v2625_v44 = vmul.f32 %v7862_v63, %v9660_v11  ;;  %1398 = vadd.xlane.f32.xlu1 %v1397_v0  ;;  %v1304_v38 = vmul.f32 0.03125, %v1222_v52  ;;  %v2531_v14 = vadd.f32 %v9394_v4, %v9552_v58  ;;  %v13762_v0 = vld [vmem:[#allocation26_spill] sm:$0xff] }
 0x1e3   : > { %13759 = vst [vmem:[#allocation77_spill] sm:$0xff] %v9667_v7  ;;  %v2626_v41 = vmul.f32 %v7863_v29, %v9663_v18  ;;  %1401 = vadd.xlane.f32.xlu0 %v1400_v59  ;;  %v2532_v34 = vadd.f32 %v9394_v4, %v9565_v15  ;;  %v1365_v60 = vmul.f32 %v9623_v26, %v9623_v26  ;;  %v1305_v56 = vmul.f32 0.03125, %v1225_v8 }
 0x1e4   : > { %v9685_v36 = vsub.f32 %v9229_v10, %v1304_v38  ;;  %v2563_v9 = vmax.f32 %v2531_v14, 0.0  ;;  %v1366_v52 = vmul.f32 %v9640_v51, %v9640_v51  ;;  %v1306_v58 = vmul.f32 0.03125, %v1228_v1  ;;  %v1231_v24 = vpop.xlane.xlu1 %1230  ;;  %v13764_v38 = vld [vmem:[#allocation27_spill] sm:$0xff] }
 0x1e5   : > { %v2952_v35 = vpack.c.bf16 %v2626_v41, %v2625_v44  ;;  %v2564_v50 = vmax.f32 %v2532_v34, 0.0  ;;  %v1403_v42 = vsel %vm1201_vm1, %v1365_v60, 0.0  ;;  %v9691_v15 = vsub.f32 %v9235_v27, %v1305_v56  ;;  %v1234_v44 = vpop.xlane.xlu0 %1233  ;;  %v7864_v41 = vld [vmem:[%s8287_s28 + $0xb0] sm:$0xff] }
 0x1e6   : > { %13760 = vst [vmem:[#allocation63_spill] sm:$0xff] %v9685_v36  ;;  %v9694_v59 = vmul.f32 %v13762_v0, %v2563_v9  ;;  %1404 = vadd.xlane.f32.xlu1 %v1403_v42  ;;  %v1406_v10 = vsel %vm1201_vm1, %v1366_v52, 0.0  ;;  %v9698_v8 = vsub.f32 %v9241_v21, %v1306_v58  ;;  %v2533_v63 = vadd.f32 %v9394_v4, %v9568_v5  ;;  %v7865_v9 = vld [vmem:[%s8287_s28 + $0xb8] sm:$0xff] }
 0x1e7   : > { %13761 = vst [vmem:[#allocation79_spill] sm:$0xff] %v9691_v15  ;;  %7079 = vmatprep.mubr.msk.bf16.mxu1 %vm2048_vm0, %v2952_v35  ;;  %v9704_v14 = vmul.f32 %v13764_v38, %v2564_v50  ;;  %1407 = vadd.xlane.f32.xlu0 %v1406_v10  ;;  %v2534_v27 = vadd.f32 %v9394_v4, %v9590_v57  ;;  %v1307_v29 = vmul.f32 0.03125, %v1231_v24  ;;  %v1308_v60 = vmul.f32 0.03125, %v1234_v44  ;;  %v13766_v24 = vld [vmem:[#allocation28_spill] sm:$0xff]  ;;  %v13768_v38 = vld [vmem:[#allocation29_spill] sm:$0xff] }
 0x1e8   : > { %13763 = vst [vmem:[#allocation66_spill] sm:$0xff] %v9698_v8  ;;  %v1367_v1 = vmul.f32 %v9667_v7, %v9667_v7  ;;  %v2627_v21 = vmul.f32 %v7864_v41, %v9694_v59  ;;  %v2565_v34 = vmax.f32 %v2533_v63, 0.0  ;;  %v1368_v5 = vmul.f32 %v9685_v36, %v9685_v36  ;;  %v1237_v56 = vpop.xlane.xlu1 %1236 }
 0x1e9   : > { %v2628_v52 = vmul.f32 %v7865_v9, %v9704_v14  ;;  %v2566_v58 = vmax.f32 %v2534_v27, 0.0  ;;  %v9718_v35 = vsub.f32 %v9247_v6, %v1307_v29  ;;  %v9725_v0 = vsub.f32 %v9253_v22, %v1308_v60  ;;  %v1240_v63 = vpop.xlane.xlu0 %1239  ;;  %v7866_v29 = vld [vmem:[%s8287_s28 + $0xc0] sm:$0xff] }
 0x1ea   : > { %v1409_v57 = vsel %vm1201_vm1, %v1367_v1, 0.0  ;;  %v9721_v50 = vmul.f32 %v13766_v24, %v2565_v34  ;;  %v1412_v42 = vsel %vm1201_vm1, %v1368_v5, 0.0  ;;  %v2535_v10 = vadd.f32 %v9394_v4, %v9593_v49 }
 0x1eb   : > { %13765 = vst [vmem:[#allocation83_spill] sm:$0xff] %v9718_v35  ;;  %1410 = vadd.xlane.f32.xlu1 %v1409_v57  ;;  %13767 = vst [vmem:[#allocation69_spill] sm:$0xff] %v9725_v0  ;;  %v2953_v44 = vpack.c.bf16 %v2628_v52, %v2627_v21  ;;  %v9730_v27 = vmul.f32 %v13768_v38, %v2566_v58  ;;  %1413 = vadd.xlane.f32.xlu0 %v1412_v42  ;;  %v1309_v34 = vmul.f32 0.03125, %v1237_v56  ;;  %v7867_v21 = vld [vmem:[%s8287_s28 + $0xc8] sm:$0xff]  ;;  %v13769_v58 = vld [vmem:[#allocation30_spill] sm:$0xff] }
 0x1ec   : > { %v2536_v6 = vadd.f32 %v9394_v4, %v9609_v13  ;;  %v1369_v1 = vmul.f32 %v9691_v15, %v9691_v15  ;;  %v2629_v41 = vmul.f32 %v7866_v29, %v9721_v50  ;;  %v2567_v22 = vmax.f32 %v2535_v10, 0.0  ;;  %v1243_v5 = vpop.xlane.xlu1 %1242  ;;  %v13771_v38 = vld [vmem:[#allocation31_spill] sm:$0xff] }
 0x1ed   : > { %v1370_v49 = vmul.f32 %v9698_v8, %v9698_v8  ;;  %7080 = vmatmul.mubr.msk.bf16.gmra.mrb[20].mxu1 %vm2048_vm0, %v2953_v44  ;;  %v2630_v60 = vmul.f32 %v7867_v21, %v9730_v27  ;;  %v1310_v52 = vmul.f32 0.03125, %v1240_v63  ;;  %v9748_v56 = vsub.f32 %v9259_v3, %v1309_v34  ;;  %v1246_v10 = vpop.xlane.xlu0 %1245  ;;  %v13772_v63 = vld [vmem:[#allocation36_spill] sm:$0xff]  ;;  %v7868_v3 = vld [vmem:[%s8287_s28 + $0xd0] sm:$0xff] }
 0x1ee   : > { %v2568_v9 = vmax.f32 %v2536_v6, 0.0  ;;  %v1415_v13 = vsel %vm1201_vm1, %v1369_v1, 0.0  ;;  %v9745_v57 = vmul.f32 %v13769_v58, %v2567_v22  ;;  %v2537_v42 = vadd.f32 %v9394_v4, %v9630_v40 }
 0x1ef   : > { %1416 = vadd.xlane.f32.xlu1 %v1415_v13  ;;  %13770 = vst [vmem:[#allocation85_spill] sm:$0xff] %v9748_v56  ;;  %v1418_v24 = vsel %vm1201_vm1, %v1370_v49, 0.0  ;;  %v2954_v44 = vpack.c.bf16 %v2630_v60, %v2629_v41  ;;  %v9757_v1 = vsub.f32 %v13772_v63, %v1310_v52  ;;  %v2538_v29 = vadd.f32 %v9394_v4, %v9651_v47  ;;  %v7869_v41 = vld [vmem:[%s8287_s28 + $0xd8] sm:$0xff]  ;;  %v13774_v52 = vld [vmem:[#allocation32_spill] sm:$0xff] }
 0x1f0   : > { %v9754_v6 = vmul.f32 %v13771_v38, %v2568_v9  ;;  %1419 = vadd.xlane.f32.xlu0 %v1418_v24  ;;  %v2631_v22 = vmul.f32 %v7868_v3, %v9745_v57  ;;  %v2569_v34 = vmax.f32 %v2537_v42, 0.0  ;;  %v1371_v49 = vmul.f32 %v9718_v35, %v9718_v35  ;;  %v1249_v21 = vpop.xlane.xlu1 %1248 }
 0x1f1   : > { %13773 = vst [vmem:[#allocation72_spill] sm:$0xff] %v9757_v1  ;;  %v1311_v40 = vmul.f32 0.03125, %v1243_v5  ;;  %7083 = vmatprep.mubr.msk.bf16.mxu1 %vm2048_vm0, %v2954_v44  ;;  %v2570_v9 = vmax.f32 %v2538_v29, 0.0  ;;  %v1372_v13 = vmul.f32 %v9725_v0, %v9725_v0  ;;  %v1312_v47 = vmul.f32 0.03125, %v1246_v10  ;;  %v1252_v42 = vpop.xlane.xlu0 %1251  ;;  %v13775_v44 = vld [vmem:[#allocation33_spill] sm:$0xff]  ;;  %v13776_v29 = vld [vmem:[#allocation47_spill] sm:$0xff] }
 0x1f2   : > { %v2632_v60 = vmul.f32 %v7869_v41, %v9754_v6  ;;  %v9771_v58 = vmul.f32 %v13774_v52, %v2569_v34  ;;  %v1421_v24 = vsel %vm1201_vm1, %v1371_v49, 0.0  ;;  %v2539_v5 = vadd.f32 %v9394_v4, %v9656_v45  ;;  %v7870_v41 = vld [vmem:[%s8287_s28 + $0xe0] sm:$0xff]  ;;  %v13778_v49 = vld [vmem:[#allocation37_spill] sm:$0xff]  ;;  %v13797_v0 = vld [vmem:[#allocation59_spill] sm:$0xff] }
 0x1f3   : > { %v9777_v63 = vmul.f32 %v13775_v44, %v2570_v9  ;;  %1422 = vadd.xlane.f32.xlu1 %v1421_v24  ;;  %v9780_v3 = vsub.f32 %v13776_v29, %v1311_v40  ;;  %v1424_v10 = vsel %vm1201_vm1, %v1372_v13, 0.0  ;;  %v9786_v52 = vsub.f32 %v13778_v49, %v1312_v47  ;;  %v7871_v9 = vld [vmem:[%s8287_s28 + $0xe8] sm:$0xff]  ;;  %v13780_v29 = vld [vmem:[#allocation34_spill] sm:$0xff]  ;;  %v13781_v49 = vld [vmem:[#allocation35_spill] sm:$0xff] }
 0x1f4   : > { %v2955_v38 = vpack.c.bf16 %v2632_v60, %v2631_v22  ;;  %v2633_v34 = vmul.f32 %v7870_v41, %v9771_v58  ;;  %1425 = vadd.xlane.f32.xlu0 %v1424_v10  ;;  %v2540_v45 = vadd.f32 %v9394_v4, %v9671_v43  ;;  %v2571_v22 = vmax.f32 %v2539_v5, 0.0  ;;  %v1255_v60 = vpop.xlane.xlu1 %1254 }
 0x1f5   : > { %13777 = vst [vmem:[#allocation75_spill] sm:$0xff] %v9780_v3  ;;  %13779 = vst [vmem:[#allocation78_spill] sm:$0xff] %v9786_v52  ;;  %v2634_v40 = vmul.f32 %v7871_v9, %v9777_v63  ;;  %v1373_v13 = vmul.f32 %v9748_v56, %v9748_v56  ;;  %v1313_v24 = vmul.f32 0.03125, %v1249_v21  ;;  %v1374_v44 = vmul.f32 %v9757_v1, %v9757_v1  ;;  %v1258_v43 = vpop.xlane.xlu0 %1257  ;;  %v7872_v21 = vld [vmem:[%s8287_s28 + $0x108] sm:$0xff] }
 0x1f6   : > { %7084 = vmatmul.mubr.msk.bf16.gmra.mrb[24].mxu1 %vm2048_vm0, %v2955_v38  ;;  %v2572_v47 = vmax.f32 %v2540_v45, 0.0  ;;  %v9798_v10 = vmul.f32 %v13780_v29, %v2571_v22  ;;  %v1314_v4 = vmul.f32 0.03125, %v1252_v42  ;;  %v2638_v56 = vmul.f32 %v7872_v21, %v9415_v17  ;;  %v13782_v45 = vld [vmem:[#allocation49_spill] sm:$0xff]  ;;  %v7873_v29 = vld [vmem:[%s8287_s28 + $0xf0] sm:$0xff]  ;;  %v7875_v21 = vld [vmem:[%s8287_s28 + $0x100] sm:$0xff] }
 0x1f7   : > { %v2956_v5 = vpack.c.bf16 %v2634_v40, %v2633_v34  ;;  %v1427_v38 = vsel %vm1201_vm1, %v1373_v13, 0.0  ;;  %v1430_v41 = vsel %vm1201_vm1, %v1374_v44, 0.0  ;;  %v9808_v22 = vsub.f32 %v13782_v45, %v1313_v24  ;;  %v7874_v24 = vld [vmem:[%s8287_s28 + $0xf8] sm:$0xff]  ;;  %v13788_v1 = vld [vmem:[#allocation53_spill] sm:$0xff] }
 0x1f8   : > { %v9803_v9 = vmul.f32 %v13781_v49, %v2572_v47  ;;  %1428 = vadd.xlane.f32.xlu1 %v1427_v38  ;;  %1431 = vadd.xlane.f32.xlu0 %v1430_v41  ;;  %v1315_v42 = vmul.f32 0.03125, %v1255_v60  ;;  %v1261_v34 = vpop.xlane.xlu1 %1260  ;;  %v9812_v40 = vsub.f32 %v9289_v39, %v1314_v4  ;;  %v1375_v13 = vmul.f32 %v9780_v3, %v9780_v3  ;;  %v13785_v60 = vld [vmem:[#allocation39_spill] sm:$0xff]  ;;  %v13787_v39 = vld [vmem:[#allocation73_spill] sm:$0xff] }
 0x1f9   : > { %13783 = vst [vmem:[#allocation81_spill] sm:$0xff] %v9808_v22  ;;  %7087 = vmatprep.mubr.msk.bf16.mxu1 %vm2048_vm0, %v2956_v5  ;;  %v1376_v44 = vmul.f32 %v9786_v52, %v9786_v52  ;;  %v1316_v47 = vmul.f32 0.03125, %v1258_v43  ;;  %v2635_v38 = vmul.f32 %v7873_v29, %v9798_v10  ;;  %v1264_v5 = vpop.xlane.xlu0 %1263  ;;  %v2637_v4 = vmul.f32 %v7875_v21, %v13787_v39 }
 0x1fa   : > { %13784 = vst [vmem:[#allocation94_spill] sm:$0xff] %v9812_v40  ;;  %v2636_v41 = vmul.f32 %v7874_v24, %v9803_v9  ;;  %v9823_v49 = vsub.f32 %v13785_v60, %v1315_v42  ;;  %v1433_v45 = vsel %vm1201_vm1, %v1375_v13, 0.0  ;;  %v1377_v29 = vmul.f32 %v9808_v22, %v9808_v22 }
 0x1fb   : > { %v1436_v3 = vsel %vm1201_vm1, %v1376_v44, 0.0  ;;  %v9830_v52 = vsub.f32 %v13788_v1, %v1316_v47  ;;  %v1317_v42 = vmul.f32 0.03125, %v1261_v34  ;;  %v2958_v60 = vpack.c.bf16 %v2638_v56, %v2637_v4 }
 0x1fc   : > { %13786 = vst [vmem:[#allocation84_spill] sm:$0xff] %v9823_v49  ;;  %v2957_v43 = vpack.c.bf16 %v2636_v41, %v2635_v38  ;;  %1434 = vadd.xlane.f32.xlu1 %v1433_v45  ;;  %1437 = vadd.xlane.f32.xlu0 %v1436_v3  ;;  %v1267_v24 = vpop.xlane.xlu1 %1266  ;;  %v1378_v21 = vmul.f32 %v9812_v40, %v9812_v40  ;;  %v1318_v13 = vmul.f32 0.03125, %v1264_v5  ;;  %v1439_v44 = vsel %vm1201_vm1, %v1377_v29, 0.0  ;;  %v13790_v3 = vld [vmem:[#allocation41_spill] sm:$0xff]  ;;  %v7876_v41 = vld [vmem:[%s8287_s28 + $0x118] sm:$0xff] }
 0x1fd   : > { %13789 = vst [vmem:[#allocation87_spill] sm:$0xff] %v9830_v52  ;;  %v1379_v1 = vmul.f32 %v9823_v49, %v9823_v49  ;;  %v9841_v47 = vsub.f32 %v13790_v3, %v1317_v42  ;;  %v1319_v38 = vmul.f32 0.03125, %v1267_v24  ;;  %v1380_v56 = vmul.f32 %v9830_v52, %v9830_v52  ;;  %v1270_v34 = vpop.xlane.xlu0 %1269  ;;  %v13792_v45 = vld [vmem:[#allocation55_spill] sm:$0xff]  ;;  %v7877_v49 = vld [vmem:[%s8287_s28 + $0x110] sm:$0xff]  ;;  %v13794_v42 = vld [vmem:[#allocation60_spill] sm:$0xff] }
 0x1fe   : > { %7088 = vmatmul.mubr.msk.bf16.gmra.mrb[28].mxu1 %vm2048_vm0, %v2957_v43  ;;  %v2640_v5 = vmul.f32 %v7876_v41, %v9432_v37  ;;  %v1442_v4 = vsel %vm1201_vm1, %v1378_v21, 0.0  ;;  %v9850_v43 = vsub.f32 %v13792_v45, %v1318_v13  ;;  %v1320_v29 = vmul.f32 0.03125, %v1270_v34  ;;  %v7878_v24 = vld [vmem:[%s8287_s28 + $0x128] sm:$0xff]  ;;  %v13795_v52 = vld [vmem:[#allocation43_spill] sm:$0xff] }
 0x1ff   : > { %13791 = vst [vmem:[#allocation99_spill] sm:$0xff] %v9841_v47  ;;  %7091 = vmatprep.mubr.msk.bf16.mxu1 %vm2048_vm0, %v2958_v60  ;;  %v2639_v3 = vmul.f32 %v7877_v49, %v13794_v42  ;;  %v2642_v40 = vmul.f32 %v7878_v24, %v9451_v30  ;;  %v9857_v60 = vsub.f32 %v13795_v52, %v1319_v38  ;;  %v1445_v41 = vsel %vm1201_vm1, %v1379_v1, 0.0  ;;  %v7879_v49 = vld [vmem:[%s8287_s28 + $0x120] sm:$0xff] }
 0x200   : > { %13793 = vst [vmem:[#allocation89_spill] sm:$0xff] %v9850_v43  ;;  %1440 = vadd.xlane.f32.xlu1 %v1439_v44  ;;  %1443 = vadd.xlane.f32.xlu0 %v1442_v4  ;;  %v1273_v22 = vpop.xlane.xlu1 %1272  ;;  %v1448_v21 = vsel %vm1201_vm1, %v1380_v56, 0.0  ;;  %v9862_v13 = vsub.f32 %v13797_v0, %v1320_v29  ;;  %v1381_v34 = vmul.f32 %v9841_v47, %v9841_v47 }
 0x201   : > { %13796 = vst [vmem:[#allocation91_spill] sm:$0xff] %v9857_v60  ;;  %v2641_v45 = vmul.f32 %v7879_v49, %v9446_v48  ;;  %v1321_v24 = vmul.f32 0.03125, %v1273_v22  ;;  %v1382_v44 = vmul.f32 %v9850_v43, %v9850_v43  ;;  %v1276_v52 = vpop.xlane.xlu0 %1275  ;;  %v2959_v38 = vpack.c.bf16 %v2640_v5, %v2639_v3  ;;  %v13799_v49 = vld [vmem:[#allocation45_spill] sm:$0xff] }
 0x202   : > { %13798 = vst [vmem:[#allocation93_spill] sm:$0xff] %v9862_v13  ;;  %v1322_v4 = vmul.f32 0.03125, %v1276_v52  ;;  %v1451_v0 = vsel %vm1201_vm1, %v1381_v34, 0.0  ;;  %v1383_v56 = vmul.f32 %v9857_v60, %v9857_v60  ;;  %v1384_v22 = vmul.f32 %v9862_v13, %v9862_v13  ;;  %v7881_v52 = vld [vmem:[%s8287_s28 + $0x148] sm:$0xff]  ;;  %v13803_v60 = vld [vmem:[#allocation48_spill] sm:$0xff] }
 0x203   : > { %v2960_v1 = vpack.c.bf16 %v2642_v40, %v2641_v45  ;;  %v9876_v43 = vsub.f32 %v13799_v49, %v1321_v24  ;;  %v1454_v5 = vsel %vm1201_vm1, %v1382_v44, 0.0  ;;  %v13801_v40 = vld [vmem:[#allocation61_spill] sm:$0xff]  ;;  %v2646_v13 = vmul.f32 %v7881_v52, %v9497_v53  ;;  %v7882_v44 = vld [vmem:[%s8287_s28 + $0x130] sm:$0xff] }
 0x204   : > { %1446 = vadd.xlane.f32.xlu1 %v1445_v41  ;;  %1449 = vadd.xlane.f32.xlu0 %v1448_v21  ;;  %v1279_v29 = vpop.xlane.xlu1 %1278  ;;  %v9880_v3 = vsub.f32 %v13801_v40, %v1322_v4  ;;  %v7880_v21 = vld [vmem:[%s8287_s28 + $0x138] sm:$0xff]  ;;  %v2643_v4 = vmul.f32 %v7882_v44, %v9465_v25  ;;  %v1457_v40 = vsel %vm1201_vm1, %v1383_v56, 0.0  ;;  %v13805_v52 = vld [vmem:[#allocation65_spill] sm:$0xff] }
 0x205   : > { %13800 = vst [vmem:[#allocation96_spill] sm:$0xff] %v9876_v43  ;;  %v1323_v41 = vmul.f32 0.03125, %v1279_v29  ;;  %v2644_v34 = vmul.f32 %v7880_v21, %v9474_v33  ;;  %v1282_v45 = vpop.xlane.xlu0 %1281  ;;  %v7883_v29 = vld [vmem:[%s8287_s28 + $0x140] sm:$0xff] }
 0x206   : > { %13802 = vst [vmem:[#allocation98_spill] sm:$0xff] %v9880_v3  ;;  %7092 = vmatmul.mubr.msk.bf16.gmra.mrb[32].mxu1 %vm2048_vm0, %v2959_v38  ;;  %v1324_v49 = vmul.f32 0.03125, %v1282_v45  ;;  %v2645_v38 = vmul.f32 %v7883_v29, %v9494_v46  ;;  %v1386_v45 = vmul.f32 %v9880_v3, %v9880_v3  ;;  %v7888_v3 = vld [vmem:[%s8287_s28 + $0x1b0] sm:$0xff] }
 0x207   : > { %7095 = vmatprep.mubr.msk.bf16.mxu1 %vm2048_vm0, %v2960_v1  ;;  %v9889_v24 = vsub.f32 %v13803_v60, %v1323_v41  ;;  %v1460_v1 = vsel %vm1201_vm1, %v1384_v22, 0.0  ;;  %v1385_v60 = vmul.f32 %v9876_v43, %v9876_v43  ;;  %v2961_v44 = vpack.c.bf16 %v2644_v34, %v2643_v4 }
 0x208   : > { %1452 = vadd.xlane.f32.xlu1 %v1451_v0  ;;  %1455 = vadd.xlane.f32.xlu0 %v1454_v5  ;;  %v1285_v21 = vpop.xlane.xlu1 %1284  ;;  %v9898_v47 = vsub.f32 %v13805_v52, %v1324_v49  ;;  %v2962_v0 = vpack.c.bf16 %v2646_v13, %v2645_v38  ;;  %v7884_v5 = vld [vmem:[%s8287_s28 + $0x150] sm:$0xff]  ;;  %v7885_v49 = vld [vmem:[%s8287_s28 + $0x158] sm:$0xff] }
 0x209   : > { %13804 = vst [vmem:[#allocation104_spill] sm:$0xff] %v9889_v24  ;;  %v1325_v41 = vmul.f32 0.03125, %v1285_v21  ;;  %v1288_v29 = vpop.xlane.xlu0 %1287  ;;  %v2647_v56 = vmul.f32 %v7884_v5, %v9514_v19  ;;  %v1387_v22 = vmul.f32 %v9889_v24, %v9889_v24  ;;  %v2648_v21 = vmul.f32 %v7885_v49, %v9522_v61  ;;  %v13807_v52 = vld [vmem:[#allocation51_spill] sm:$0xff]  ;;  %v7886_v24 = vld [vmem:[%s8287_s28 + $0x1a0] sm:$0xff] }
 0x20a   : > { %13806 = vst [vmem:[#allocation105_spill] sm:$0xff] %v9898_v47  ;;  %v1326_v35 = vmul.f32 0.03125, %v1288_v29  ;;  %v1388_v4 = vmul.f32 %v9898_v47, %v9898_v47  ;;  %v1463_v38 = vsel %vm1201_vm1, %v1385_v60, 0.0  ;;  %v1466_v29 = vsel %vm1201_vm1, %v1386_v45, 0.0  ;;  %v13809_v5 = vld [vmem:[#allocation67_spill] sm:$0xff] }
 0x20b   : > { %v9911_v34 = vsub.f32 %v13807_v52, %v1325_v41  ;;  %v9923_v41 = vmul.f32 %v7886_v24, %v9660_v11  ;;  %v7887_v52 = vld [vmem:[%s8287_s28 + $0x1a8] sm:$0xff]  ;;  %v9931_v60 = vmul.f32 %v7888_v3, %v9694_v59  ;;  %v7889_v45 = vld [vmem:[%s8287_s28 + $0x1b8] sm:$0xff] }
 0x20c   : > { %1458 = vadd.xlane.f32.xlu1 %v1457_v40  ;;  %1461 = vadd.xlane.f32.xlu0 %v1460_v1  ;;  %v1291_v13 = vpop.xlane.xlu1 %1290  ;;  %v9918_v40 = vsub.f32 %v13809_v5, %v1326_v35  ;;  %v9927_v47 = vmul.f32 %v7887_v52, %v9663_v18  ;;  %v9935_v35 = vmul.f32 %v7889_v45, %v9704_v14  ;;  %v7891_v24 = vld [vmem:[%s8287_s28 + $0x168] sm:$0xff]  ;;  %v1469_v52 = vsel %vm1201_vm1, %v1387_v22, 0.0  ;;  %v13811_v22 = vld [vmem:[#allocation71_spill] sm:$0xff] }
 0x20d   : > { %13808 = vst [vmem:[#allocation4_spill] sm:$0xff] %v9911_v34  ;;  %v1327_v1 = vmul.f32 0.03125, %v1291_v13  ;;  %v1294_v49 = vpop.xlane.xlu0 %1293  ;;  %v2650_v5 = vmul.f32 %v7891_v24, %v9547_v54  ;;  %v1472_v3 = vsel %vm1201_vm1, %v1388_v4, 0.0  ;;  %v1389_v45 = vmul.f32 %v9911_v34, %v9911_v34  ;;  %v13810_v24 = vld [vmem:[#allocation54_spill] sm:$0xff] }
 0x20e   : > { %7096 = vmatmul.mubr.msk.bf16.gmra.mrb[36].mxu1 %vm2048_vm0, %v2961_v44  ;;  %v7890_v44 = vld [vmem:[%s8287_s28 + $0x160] sm:$0xff]  ;;  %v1328_v43 = vmul.f32 0.03125, %v1294_v49  ;;  %v1390_v4 = vmul.f32 %v9918_v40, %v9918_v40  ;;  %v7892_v49 = vld [vmem:[%s8287_s28 + $0x1d0] sm:$0xff] }
 0x20f   : > { %7099 = vmatprep.mubr.msk.bf16.mxu1 %vm2048_vm0, %v2962_v0  ;;  %v2649_v13 = vmul.f32 %v7890_v44, %v9538_v16  ;;  %v9951_v15 = vsub.f32 %v13810_v24, %v1327_v1  ;;  %v9960_v34 = vmul.f32 %v7892_v49, %v9745_v57  ;;  %v7893_v0 = vld [vmem:[%s8287_s28 + $0x1d8] sm:$0xff]  ;;  %v2963_v44 = vpack.c.bf16 %v2648_v21, %v2647_v56  ;;  %v7894_v1 = vld [vmem:[%s8287_s28 + $0x1f0] sm:$0xff] }
 0x210   : > { %1464 = vadd.xlane.f32.xlu1 %v1463_v38  ;;  %1467 = vadd.xlane.f32.xlu0 %v1466_v29  ;;  %v1297_v8 = vpop.xlane.xlu1 %1296  ;;  %v9954_v38 = vsub.f32 %v13811_v22, %v1328_v43  ;;  %v9964_v36 = vmul.f32 %v7893_v0, %v9754_v6  ;;  %v1475_v43 = vsel %vm1201_vm1, %v1389_v45, 0.0  ;;  %v9971_v24 = vmul.f32 %v7894_v1, %v9798_v10  ;;  %v7895_v22 = vld [vmem:[%s8287_s28 + $0x1f8] sm:$0xff]  ;;  %v13812_v0 = vld [vmem:[#allocation57_spill] sm:$0xff] }
 0x211   : > { %v1329_v29 = vmul.f32 0.03125, %v1297_v8  ;;  %v2964_v7 = vpack.c.bf16 %v2650_v5, %v2649_v13  ;;  %v9975_v49 = vmul.f32 %v7895_v22, %v9803_v9  ;;  %v1478_v21 = vsel %vm1201_vm1, %v1390_v4, 0.0  ;;  %v7896_v45 = vld [vmem:[%s8287_s28 + $0x178] sm:$0xff]  ;;  %v7897_v4 = vld [vmem:[%s8287_s28 + $0x188] sm:$0xff] }
 0x212   : > { %v1391_v13 = vmul.f32 %v9951_v15, %v9951_v15  ;;  %v1392_v5 = vmul.f32 %v9954_v38, %v9954_v38  ;;  %v2654_v1 = vmul.f32 %v7897_v4, %v9601_v32  ;;  %v7901_v8 = vld [vmem:[%s8287_s28 + $0x2a8] sm:$0xff] }
 0x213   : > { %v9978_v56 = vsub.f32 %v13812_v0, %v1329_v29  ;;  %v2652_v29 = vmul.f32 %v7896_v45, %v9571_v2 }
 0x214   : > { %1470 = vadd.xlane.f32.xlu1 %v1469_v52  ;;  %1473 = vadd.xlane.f32.xlu0 %v1472_v3  ;;  %v7322_v3 = vld [vmem:[%s13202_s6] sm:$0xff]   ;;  %v1484_v22 = vsel %vm1201_vm1, %v1392_v5, 0.0  ;;  %v7898_v52 = vld [vmem:[%s8287_s28 + $0x170] sm:$0xff] }
 0x215   : > { %v1393_v0 = vmul.f32 %v9978_v56, %v9978_v56  ;;  %7021 = vmatprep.subr.bf16.mxu0 %v7322_v3 }
 0x216   : > { %7100 = vmatmul.mubr.msk.bf16.gmra.mrb[40].mxu1 %vm2048_vm0, %v2963_v44  ;;  %v1481_v44 = vsel %vm1201_vm1, %v1391_v13, 0.0  ;;  %7022 = vmatpush3.bf16.msra.mxu0 %v7322_v3 }
 0x217   : > { %7103 = vmatprep.mubr.msk.bf16.mxu1 %vm2048_vm0, %v2964_v7  ;;  %v2651_v7 = vmul.f32 %v7898_v52, %v9562_v31  ;;  %v1487_v4 = vsel %vm1201_vm1, %v1393_v0, 0.0  ;;  %v7900_v52 = vld [vmem:[%s8287_s28 + $0x2a0] sm:$0xff]  ;;  %v7904_v0 = vld [vmem:[%s8287_s28 + $0x198] sm:$0xff] }
 0x218   : > { %1476 = vadd.xlane.f32.xlu1 %v1475_v43  ;;  %1479 = vadd.xlane.f32.xlu0 %v1478_v21  ;;  %v7323_v43 = vld [vmem:[%s13202_s6 + $0x8] sm:$0xff]   ;;  %v7899_v21 = vld [vmem:[%s8287_s28 + $0x180] sm:$0xff]  ;;  %v10011_v3 = vmul.f32 %v7900_v52, %v9660_v11  ;;  %v2656_v11 = vmul.f32 %v7904_v0, %v9633_v62  ;;  %v7908_v52 = vld [vmem:[%s8287_s28 + $0x2d8] sm:$0xff] }
 0x219   : > { %v2653_v13 = vmul.f32 %v7899_v21, %v9597_v28  ;;  %v2965_v5 = vpack.c.bf16 %v2652_v29, %v2651_v7  ;;  %7023 = vmatprep.subr.bf16.mxu0 %v7323_v43  ;;  %v10015_v21 = vmul.f32 %v7901_v8, %v9663_v18  ;;  %v7902_v29 = vld [vmem:[%s8287_s28 + $0x2b0] sm:$0xff]  ;;  %v7905_v7 = vld [vmem:[%s8287_s28 + $0x2c0] sm:$0xff]  ;;  %v7906_v8 = vld [vmem:[%s8287_s28 + $0x2c8] sm:$0xff] }
 0x21a   : > { %v10030_v18 = vmul.f32 %v7905_v7, %v9721_v50  ;;  %v7910_v7 = vld [vmem:[%s8287_s28 + $0x2e8] sm:$0xff]  ;;  %7024 = vmatpush3.bf16.msra.mxu0 %v7323_v43 }
 0x21b   : > { %v2966_v45 = vpack.c.bf16 %v2654_v1, %v2653_v13  ;;  %v7903_v1 = vld [vmem:[%s8287_s28 + $0x2b8] sm:$0xff]  ;;  %v7907_v13 = vld [vmem:[%s8287_s28 + $0x2d0] sm:$0xff]  ;;  %v7914_v43 = vld [vmem:[%s8287_s28 + $0x1c8] sm:$0xff] }
 0x21c   : > { %1482 = vadd.xlane.f32.xlu1 %v1481_v44  ;;  %1485 = vadd.xlane.f32.xlu0 %v1484_v22  ;;  %v10019_v44 = vmul.f32 %v7902_v29, %v9694_v59  ;;  %v10023_v22 = vmul.f32 %v7903_v1, %v9704_v14  ;;  %v10034_v59 = vmul.f32 %v7906_v8, %v9730_v27  ;;  %v7909_v1 = vld [vmem:[%s8287_s28 + $0x2e0] sm:$0xff]  ;;  %v7911_v8 = vld [vmem:[%s8287_s28 + $0x2f0] sm:$0xff] }
 0x21d   : > { %v10038_v14 = vmul.f32 %v7907_v13, %v9745_v57  ;;  %v10046_v29 = vmul.f32 %v7908_v52, %v9754_v6  ;;  %v10050_v0 = vmul.f32 %v7909_v1, %v9771_v58  ;;  %v10060_v13 = vmul.f32 %v7911_v8, %v9798_v10  ;;  %v7913_v52 = vld [vmem:[%s8287_s28 + $0x190] sm:$0xff] }
 0x21e   : > { %7104 = vmatmul.mubr.msk.bf16.gmra.mrb[44].mxu1 %vm2048_vm0, %v2965_v5  ;;  %v2984_v5 = vpack.c.bf16 %v10015_v21, %v10011_v3  ;;  %v2655_v1 = vmul.f32 %v7913_v52, %v9620_v23  ;;  %v7915_v52 = vld [vmem:[%s8287_s28 + $0x1c0] sm:$0xff]  ;;  %v13814_v10 = vpack.c.bf16 %v9935_v35, %v9931_v60  ;;  %v7918_v60 = vld [vmem:[%s8287_s28 + $0x208] sm:$0xff] }
 0x21f   : > { %7107 = vmatprep.mubr.msk.bf16.mxu1 %vm2048_vm0, %v2966_v45  ;;  %v7912_v45 = vld [vmem:[%s8287_s28 + $0x2f8] sm:$0xff]  ;;  %v2661_v57 = vmul.f32 %v7915_v52, %v9721_v50  ;;  %v13815_v50 = vpack.c.bf16 %v9964_v36, %v9960_v34  ;;  %v2670_v35 = vmul.f32 %v7918_v60, %v9415_v17  ;;  %v7925_v52 = vld [vmem:[%s8287_s28 + $0x248] sm:$0xff] }
 0x220   : > { %1488 = vadd.xlane.f32.xlu1 %v1487_v4  ;;  %v10056_v4 = vmul.f32 %v7910_v7, %v9777_v63  ;;  %v10064_v6 = vmul.f32 %v7912_v45, %v9803_v9  ;;  %v2967_v8 = vpack.c.bf16 %v2656_v11, %v2655_v1  ;;  %v13813_v9 = vpack.c.bf16 %v9927_v47, %v9923_v41  ;;  %v7916_v47 = vld [vmem:[%s8287_s28 + $0x1e8] sm:$0xff]  ;;  %v7917_v11 = vld [vmem:[%s8287_s28 + $0x1e0] sm:$0xff]  ;;  %v7920_v36 = vld [vmem:[%s8287_s28 + $0x218] sm:$0xff] }
 0x221   : > { %v2662_v45 = vmul.f32 %v7914_v43, %v9730_v27  ;;  %v2666_v41 = vmul.f32 %v7916_v47, %v9777_v63  ;;  %v2665_v27 = vmul.f32 %v7917_v11, %v9771_v58  ;;  %v13816_v58 = vpack.c.bf16 %v9975_v49, %v9971_v24 }
 0x222   : > { %v2672_v34 = vmul.f32 %v7920_v36, %v9432_v37  ;;  %v7934_v36 = vld [vmem:[%s8287_s28 + $0x270] sm:$0xff] }
 0x223   : > { %v2970_v7 = vpack.c.bf16 %v2662_v45, %v2661_v57  ;;  %v2972_v1 = vpack.c.bf16 %v2666_v41, %v2665_v27  ;;  %v7919_v57 = vld [vmem:[%s8287_s28 + $0x200] sm:$0xff]  ;;  %v7924_v45 = vld [vmem:[%s8287_s28 + $0x238] sm:$0xff] }
 0x224   : > { %v2676_v37 = vmul.f32 %v7924_v45, %v9474_v33 }
 0x226   : > { %7108 = vmatmul.mubr.msk.bf16.gmra.mrb[48].mxu1 %vm2048_vm0, %v2967_v8  ;;  %v7922_v8 = vld [vmem:[%s8287_s28 + $0x210] sm:$0xff] }
 0x227   : > { %7111 = vmatprep.mubr.msk.bf16.mxu1 %vm2048_vm0, %v13813_v9  ;;  %v7923_v9 = vld [vmem:[%s8287_s28 + $0x220] sm:$0xff] }
 0x228   : > { %v2673_v43 = vmul.f32 %v7923_v9, %v9446_v48  ;;  %v7927_v48 = vld [vmem:[%s8287_s28 + $0x240] sm:$0xff]  ;;  %v7937_v9 = vld [vmem:[%s8287_s28 + $0x290] sm:$0xff] }
 0x229   : > { %v2677_v41 = vmul.f32 %v7927_v48, %v9494_v46  ;;  %v7931_v46 = vld [vmem:[%s8287_s28 + $0x260] sm:$0xff] }
 0x22e   : > { %7112 = vmatmul.mubr.msk.bf16.gmra.mrb[52].mxu1 %vm2048_vm0, %v13814_v10  ;;  %v7921_v10 = vld [vmem:[%s8287_s28 + $0x228] sm:$0xff] }
 0x22f   : > { %7115 = vmatprep.mubr.msk.bf16.mxu1 %vm2048_vm0, %v2970_v7  ;;  %v2669_v7 = vmul.f32 %v7919_v57, %v13787_v39  ;;  %v2674_v17 = vmul.f32 %v7921_v10, %v9451_v30  ;;  %v2671_v39 = vmul.f32 %v7922_v8, %v13794_v42  ;;  %v2678_v30 = vmul.f32 %v7925_v52, %v9497_v53  ;;  %v7926_v42 = vld [vmem:[%s8287_s28 + $0x230] sm:$0xff]  ;;  %v7936_v8 = vld [vmem:[%s8287_s28 + $0x298] sm:$0xff] }
 0x230   : > { %v2675_v47 = vmul.f32 %v7926_v42, %v9465_v25  ;;  %v7930_v25 = vld [vmem:[%s8287_s28 + $0x250] sm:$0xff] }
 0x231   : > { %v2974_v63 = vpack.c.bf16 %v2670_v35, %v2669_v7  ;;  %v2975_v24 = vpack.c.bf16 %v2672_v34, %v2671_v39  ;;  %v2976_v49 = vpack.c.bf16 %v2674_v17, %v2673_v43  ;;  %v2978_v27 = vpack.c.bf16 %v2678_v30, %v2677_v41  ;;  %v7935_v34 = vld [vmem:[%s8287_s28 + $0x280] sm:$0xff] }
 0x232   : > { %v2977_v11 = vpack.c.bf16 %v2676_v37, %v2675_v47  ;;  %v2679_v60 = vmul.f32 %v7930_v25, %v9514_v19  ;;  %v2681_v35 = vmul.f32 %v7931_v46, %v9538_v16  ;;  %v2683_v19 = vmul.f32 %v7934_v36, %v9562_v31  ;;  %v7938_v36 = vld [vmem:[%s8722_s16] sm:$0xff] }
 0x233   : > { %v2685_v16 = vmul.f32 %v7935_v34, %v9597_v28  ;;  %v2688_v39 = vmul.f32 %v7936_v8, %v9633_v62  ;;  %v13818_v62 = vpack.c.bf16 %v10034_v59, %v10030_v18  ;;  %v13820_v59 = vpack.c.bf16 %v10056_v4, %v10050_v0 }
 0x236   : > { %7116 = vmatmul.mubr.msk.bf16.gmra.mrb[56].mxu1 %vm2048_vm0, %v13815_v50  ;;  %v7929_v50 = vld [vmem:[%s8287_s28 + $0x268] sm:$0xff] }
 0x237   : > { %7119 = vmatprep.mubr.msk.bf16.mxu1 %vm2048_vm0, %v2972_v1  ;;  %v7928_v1 = vld [vmem:[%s8287_s28 + $0x258] sm:$0xff]  ;;  %v2682_v53 = vmul.f32 %v7929_v50, %v9547_v54 }
 0x238   : > { %v2680_v33 = vmul.f32 %v7928_v1, %v9522_v61 }
 0x239   : > { %v2980_v7 = vpack.c.bf16 %v2682_v53, %v2681_v35  ;;  %v10180_v53 = vld [vmem:[%s13199_s3] ss:$0 sm:$0xff]  ;;  %v13821_v35 = vpack.c.bf16 %v10064_v6, %v10060_v13 }
 0x23a   : > { %v2979_v57 = vpack.c.bf16 %v2680_v33, %v2679_v60 }
 0x23e   : > { %7120 = vmatmul.mubr.msk.bf16.gmra.mrb[60].mxu1 %vm2048_vm0, %v13816_v58  ;;  %v7933_v58 = vld [vmem:[%s8287_s28 + $0x288] sm:$0xff] }
 0x23f   : > { %7123 = vmatprep.mubr.msk.bf16.mxu1 %vm2048_vm0, %v2974_v63  ;;  %v7932_v63 = vld [vmem:[%s8287_s28 + $0x278] sm:$0xff]  ;;  %v2686_v54 = vmul.f32 %v7933_v58, %v9601_v32  ;;  %v13817_v32 = vpack.c.bf16 %v10023_v22, %v10019_v44  ;;  %v13819_v22 = vpack.c.bf16 %v10046_v29, %v10038_v14  ;;  %v10174_v14 = vld [vmem:[%s13198_s2] ss:$0 sm:$0xff]  ;;  %s12995_s28 = scalar_lea.vmem (%p8075_p5), %s13211_s15, %s6883_s18 }
 0x240   : > { %v2684_v61 = vmul.f32 %v7932_v63, %v9571_v2  ;;  %v2687_v2 = vmul.f32 %v7937_v9, %v9620_v23 }
 0x241   : > { %v2982_v17 = vpack.c.bf16 %v2686_v54, %v2685_v16 }
 0x242   : > { %v2981_v10 = vpack.c.bf16 %v2684_v61, %v2683_v19  ;;  %v2983_v43 = vpack.c.bf16 %v2688_v39, %v2687_v2  ;;  %v13822_v19 = vld [vmem:[#allocation111_spill] sm:$0xff] }
 0x243   : > { %v1726_v34 = vmul.f32 %v7938_v36, %v13822_v19 }
 0x246   : > { %7124 = vmatmul.mubr.msk.bf16.gmra.mrb[64].mxu1 %vm2048_vm0, %v2975_v24 }
 0x247   : > { %7127 = vmatprep.mubr.msk.bf16.mxu1 %vm2048_vm0, %v2976_v49 }
 0x24e   : > { %7128 = vmatmul.mubr.msk.bf16.gmra.mrb[68].mxu1 %vm2048_vm0, %v2977_v11 }
 0x24f   : > { %7131 = vmatprep.mubr.msk.bf16.mxu1 %vm2048_vm0, %v2978_v27 }
 0x256   : > { %7132 = vmatmul.mubr.msk.bf16.gmra.mrb[72].mxu1 %vm2048_vm0, %v2979_v57 }
 0x257   : > { %7135 = vmatprep.mubr.msk.bf16.mxu1 %vm2048_vm0, %v2980_v7 }
 0x25e   : > { %7136 = vmatmul.mubr.msk.bf16.gmra.mrb[76].mxu1 %vm2048_vm0, %v2981_v10 }
 0x25f   : > { %7139 = vmatprep.mubr.msk.bf16.mxu1 %vm2048_vm0, %v2982_v17 }
 0x266   : > { %7140 = vmatmul.mubr.msk.bf16.gmra.mrb[80].mxu1 %vm2048_vm0, %v2983_v43  ;;  %v7939_v43 = vld [vmem:[%s8722_s16 + $0x8] sm:$0xff] }
 0x267   : > { %7143 = vmatprep.mubr.msk.bf16.mxu1 %vm2048_vm0, %v2984_v5 }
 0x26b   : > { %v1396_v31 = vpop.xlane.xlu0 %1395 }
 0x26c   : > { %v1490_v28 = vmul.f32 0.03125, %v1396_v31  ;;  %v13823_v31 = vld [vmem:[#allocation112_spill] sm:$0xff] }
 0x26e   : > { %7144 = vmatmul.mubr.msk.bf16.gmra.mrb[84].mxu1 %vm2048_vm0, %v13817_v32  ;;  %v1522_v24 = vadd.f32 1e-05, %v1490_v28  ;;  %v1727_v28 = vmul.f32 %v7939_v43, %v13823_v31 }
 0x26f   : > { %7147 = vmatprep.mubr.msk.bf16.mxu1 %vm2048_vm0, %v13818_v62  ;;  %v1399_v23 = vpop.xlane.xlu1 %1398 }
 0x270   : > { %7522 = vrsqrt.f32 %v1522_v24  ;;  %v1491_v49 = vmul.f32 0.03125, %v1399_v23  ;;  %v1402_v45 = vpop.xlane.xlu0 %1401 }
 0x271   : > { %v1492_v3 = vmul.f32 0.03125, %v1402_v45 }
 0x272   : > { %v1523_v21 = vadd.f32 1e-05, %v1491_v49 }
 0x273   : > { %v1524_v5 = vadd.f32 1e-05, %v1492_v3  ;;  %v1405_v37 = vpop.xlane.xlu1 %1404 }
 0x274   : > { %7524 = vrsqrt.f32 %v1523_v21  ;;  %v1493_v52 = vmul.f32 0.03125, %v1405_v37  ;;  %v1408_v30 = vpop.xlane.xlu0 %1407 }
 0x275   : > { %7526 = vrsqrt.f32 %v1524_v5  ;;  %v1494_v44 = vmul.f32 0.03125, %v1408_v30 }
 0x276   : > { %7148 = vmatmul.mubr.msk.bf16.gmra.mrb[88].mxu1 %vm2048_vm0, %v13819_v22  ;;  %v1525_v18 = vadd.f32 1e-05, %v1493_v52 }
 0x277   : > { %7151 = vmatprep.mubr.msk.bf16.mxu1 %vm2048_vm0, %v13820_v59  ;;  %v1526_v42 = vadd.f32 1e-05, %v1494_v44  ;;  %v13824_v44 = vld [vmem:[#allocation77_spill] sm:$0xff] }
 0x278   : > { %v1411_v47 = vpop.xlane.xlu1 %1410  ;;  %7528 = vrsqrt.f32 %v1525_v18  ;;  %v1414_v41 = vpop.xlane.xlu0 %1413 }
 0x279   : > { %v1495_v48 = vmul.f32 0.03125, %v1411_v47  ;;  %7530 = vrsqrt.f32 %v1526_v42  ;;  %v1496_v11 = vmul.f32 0.03125, %v1414_v41  ;;  %v13825_v42 = vld [vmem:[#allocation63_spill] sm:$0xff] }
 0x27a   : > { %v7523_v27 = vpop.eup %7522 }
 0x27b   : > { %v1527_v1 = vadd.f32 1e-05, %v1495_v48  ;;  %v1528_v29 = vadd.f32 1e-05, %v1496_v11  ;;  %v1586_v0 = vmul.f32 %v7523_v27, %v9587_v55 }
 0x27c   : > { %v1417_v33 = vpop.xlane.xlu1 %1416 }
 0x27d   : > { %7532 = vrsqrt.f32 %v1527_v1  ;;  %v1497_v4 = vmul.f32 0.03125, %v1417_v33  ;;  %v1420_v50 = vpop.xlane.xlu0 %1419  ;;  %v1624_v60 = vmul.f32 %v10174_v14, %v1586_v0 }
 0x27e   : > { %7534 = vrsqrt.f32 %v1528_v29  ;;  %v1498_v25 = vmul.f32 0.03125, %v1420_v50  ;;  %v7525_v46 = vpop.eup %7524  ;;  %7152 = vmatmul.mubr.msk.bf16.gmra.mrb[92].mxu1 %vm2048_vm0, %v13821_v35  ;;  %v13827_v35 = vld [vmem:[#allocation79_spill] sm:$0xff] }
 0x27f   : > { %v1529_v55 = vadd.f32 1e-05, %v1497_v4  ;;  %v7527_v57 = vpop.eup %7526  ;;  %v1587_v63 = vmul.f32 %v7525_v46, %v9604_v20  ;;  %v1662_v61 = vadd.f32 %v10180_v53, %v1624_v60 }
 0x280   : > { %v1530_v7 = vadd.f32 1e-05, %v1498_v25  ;;  %v1588_v58 = vmul.f32 %v7527_v57, %v9614_v12  ;;  %v1423_v54 = vpop.xlane.xlu1 %1422  ;;  %v13828_v57 = vld [vmem:[#allocation38_spill] sm:$0xff] }
 0x281   : > { %7536 = vrsqrt.f32 %v1529_v55  ;;  %v1499_v16 = vmul.f32 0.03125, %v1423_v54  ;;  %v1426_v13 = vpop.xlane.xlu0 %1425  ;;  %v1625_v6 = vmul.f32 %v10174_v14, %v1587_v63  ;;  %v1694_v10 = vmax.f32 %v1662_v61, 0.0  ;;  %v13829_v63 = vld [vmem:[#allocation40_spill] sm:$0xff] }
 0x282   : > { %7538 = vrsqrt.f32 %v1530_v7  ;;  %v7529_v17 = vpop.eup %7528  ;;  %v1500_v8 = vmul.f32 0.03125, %v1426_v13  ;;  %v1626_v20 = vmul.f32 %v10174_v14, %v1588_v58 }
 0x283   : > { %v7531_v39 = vpop.eup %7530  ;;  %v1589_v9 = vmul.f32 %v7529_v17, %v9623_v26  ;;  %v1531_v12 = vadd.f32 1e-05, %v1499_v16  ;;  %v1663_v2 = vadd.f32 %v10180_v53, %v1625_v6  ;;  %v1758_v3 = vmul.f32 %v1726_v34, %v1694_v10  ;;  %v13832_v16 = vld [vmem:[#allocation66_spill] sm:$0xff] }
 0x284   : > { %v1590_v32 = vmul.f32 %v7531_v39, %v9640_v51  ;;  %v1532_v24 = vadd.f32 1e-05, %v1500_v8  ;;  %v1664_v62 = vadd.f32 %v10180_v53, %v1626_v20 }
 0x285   : > { %7540 = vrsqrt.f32 %v1531_v12  ;;  %v1429_v23 = vpop.xlane.xlu1 %1428  ;;  %v1432_v49 = vpop.xlane.xlu0 %1431  ;;  %v1695_v45 = vmax.f32 %v1663_v2, 0.0  ;;  %v1627_v21 = vmul.f32 %v10174_v14, %v1589_v9 }
 0x286   : > { %7542 = vrsqrt.f32 %v1532_v24  ;;  %v1501_v26 = vmul.f32 0.03125, %v1429_v23  ;;  %v1502_v37 = vmul.f32 0.03125, %v1432_v49  ;;  %v1696_v52 = vmax.f32 %v1664_v62, 0.0  ;;  %v13835_v23 = vld [vmem:[#allocation42_spill] sm:$0xff] }
 0x287   : > { %v7533_v5 = vpop.eup %7532  ;;  %v1759_v18 = vmul.f32 %v1727_v28, %v1695_v45  ;;  %v1665_v51 = vadd.f32 %v10180_v53, %v1627_v21  ;;  %v1628_v59 = vmul.f32 %v10174_v14, %v1590_v32  ;;  %v13834_v32 = vld [vmem:[#allocation83_spill] sm:$0xff] }
 0x288   : > { %v7535_v30 = vpop.eup %7534  ;;  %v1591_v22 = vmul.f32 %v7533_v5, %v13824_v44  ;;  %v1533_v48 = vadd.f32 1e-05, %v1501_v26  ;;  %v1534_v41 = vadd.f32 1e-05, %v1502_v37  ;;  %v1760_v7 = vmul.f32 %v13828_v57, %v1696_v52  ;;  %v13836_v26 = vld [vmem:[#allocation44_spill] sm:$0xff] }
 0x289   : > { %v1592_v47 = vmul.f32 %v7535_v30, %v13825_v42  ;;  %v1435_v11 = vpop.xlane.xlu1 %1434  ;;  %v1438_v27 = vpop.xlane.xlu0 %1437  ;;  %v2701_v1 = vpack.c.bf16 %v1759_v18, %v1758_v3  ;;  %v1697_v29 = vmax.f32 %v1665_v51, 0.0  ;;  %v1666_v0 = vadd.f32 %v10180_v53, %v1628_v59  ;;  %v13837_v51 = vld [vmem:[#allocation69_spill] sm:$0xff] }
 0x28a   : > { %v1629_v33 = vmul.f32 %v10174_v14, %v1591_v22  ;;  %7544 = vrsqrt.f32 %v1533_v48  ;;  %v1503_v50 = vmul.f32 0.03125, %v1435_v11  ;;  %v1504_v25 = vmul.f32 0.03125, %v1438_v27  ;;  %v10207_v60 = vpop.f32.mrb[0].mxu1 }
 0x28b   : > { %v7537_v4 = vpop.eup %7536  ;;  %13826 = vst [vmem:[#allocation6_spill] sm:$0xff] %v10207_v60  ;;  %7546 = vrsqrt.f32 %v1534_v41  ;;  %7025 = vmatprep.mubr.msk.bf16.mxu0 %vm1201_vm1, %v2701_v1  ;;  %v1761_v61 = vmul.f32 %v13829_v63, %v1697_v29  ;;  %v10213_v58 = vpop.f32.mrb[1].mxu1  ;;  %v1630_v34 = vmul.f32 %v10174_v14, %v1592_v47  ;;  %v1698_v20 = vmax.f32 %v1666_v0, 0.0 }
 0x28c   : > { %v7539_v46 = vpop.eup %7538  ;;  %v1593_v55 = vmul.f32 %v7537_v4, %v13827_v35  ;;  %13830 = vst [vmem:[#allocation5_spill] sm:$0xff] %v10213_v58  ;;  %v1535_v54 = vadd.f32 1e-05, %v1503_v50  ;;  %v1536_v36 = vadd.f32 1e-05, %v1504_v25  ;;  %v10215_v19 = vpop.f32.mrb[2].mxu1  ;;  %v1667_v8 = vadd.f32 %v10180_v53, %v1629_v33 }
 0x28d   : > { %13831 = vst [vmem:[#allocation7_spill] sm:$0xff] %v10215_v19  ;;  %v1594_v13 = vmul.f32 %v7539_v46, %v13832_v16  ;;  %v1441_v6 = vpop.xlane.xlu1 %1440  ;;  %v1444_v10 = vpop.xlane.xlu0 %1443  ;;  %v2702_v17 = vpack.c.bf16 %v1761_v61, %v1760_v7  ;;  %v1762_v49 = vmul.f32 %v13835_v23, %v1698_v20  ;;  %v1668_v45 = vadd.f32 %v10180_v53, %v1630_v34  ;;  %v13838_v33 = vld [vmem:[#allocation85_spill] sm:$0xff]  ;;  %v13839_v25 = vld [vmem:[#allocation46_spill] sm:$0xff] }
 0x28e   : > { %7548 = vrsqrt.f32 %v1535_v54  ;;  %v1505_v39 = vmul.f32 0.03125, %v1441_v6  ;;  %v1506_v9 = vmul.f32 0.03125, %v1444_v10  ;;  %v10220_v12 = vpop.f32.mrb[3].mxu1  ;;  %v1631_v2 = vmul.f32 %v10174_v14, %v1593_v55  ;;  %v13840_v35 = vld [vmem:[#allocation50_spill] sm:$0xff]  ;;  %v13843_v6 = vld [vmem:[#allocation72_spill] sm:$0xff] }
 0x28f   : > { %13833 = vst [vmem:[#allocation8_spill] sm:$0xff] %v10220_v12  ;;  %v7541_v43 = vpop.eup %7540  ;;  %7550 = vrsqrt.f32 %v1536_v36  ;;  %7026 = vmatmul.mubr.msk.bf16.vlgmr.msra.gmra.mrb[0].mxu0 %vm1201_vm1, %v2702_v17  ;;  %v1699_v31 = vmax.f32 %v1667_v8, 0.0  ;;  %v1632_v30 = vmul.f32 %v10174_v14, %v1594_v13  ;;  %v1700_v18 = vmax.f32 %v1668_v45, 0.0 }
 0x290   : > { %v7543_v28 = vpop.eup %7542  ;;  %v1595_v24 = vmul.f32 %v7541_v43, %v13834_v32  ;;  %v1537_v62 = vadd.f32 1e-05, %v1505_v39  ;;  %v1538_v3 = vadd.f32 1e-05, %v1506_v9  ;;  %v1669_v52 = vadd.f32 %v10180_v53, %v1631_v2  ;;  %v13845_v9 = vld [vmem:[#allocation75_spill] sm:$0xff] }
 0x291   : > { %v1447_v21 = vpop.xlane.xlu1 %1446  ;;  %v1450_v5 = vpop.xlane.xlu0 %1449  ;;  %v1763_v37 = vmul.f32 %v13836_v26, %v1699_v31  ;;  %v1596_v59 = vmul.f32 %v7543_v28, %v13837_v51  ;;  %v1670_v1 = vadd.f32 %v10180_v53, %v1632_v30  ;;  %v1764_v46 = vmul.f32 %v13839_v25, %v1700_v18 }
 0x292   : > { %7552 = vrsqrt.f32 %v1537_v62  ;;  %v1507_v44 = vmul.f32 0.03125, %v1447_v21  ;;  %v1508_v22 = vmul.f32 0.03125, %v1450_v5  ;;  %v1701_v47 = vmax.f32 %v1669_v52, 0.0 }
 0x293   : > { %v2703_v42 = vpack.c.bf16 %v1763_v37, %v1762_v49  ;;  %v1633_v48 = vmul.f32 %v10174_v14, %v1595_v24  ;;  %7554 = vrsqrt.f32 %v1538_v3  ;;  %v1702_v34 = vmax.f32 %v1670_v1, 0.0  ;;  %v13847_v49 = vld [vmem:[#allocation52_spill] sm:$0xff] }
 0x294   : > { %v7545_v41 = vpop.eup %7544  ;;  %v1539_v11 = vadd.f32 1e-05, %v1507_v44  ;;  %v1540_v27 = vadd.f32 1e-05, %v1508_v22  ;;  %v1765_v55 = vmul.f32 %v13840_v35, %v1701_v47  ;;  %v1634_v16 = vmul.f32 %v10174_v14, %v1596_v59  ;;  %v13848_v3 = vld [vmem:[#allocation56_spill] sm:$0xff]  ;;  %v13849_v22 = vld [vmem:[#allocation78_spill] sm:$0xff] }
 0x295   : > { %v7547_v29 = vpop.eup %7546  ;;  %v1597_v0 = vmul.f32 %v7545_v41, %v13838_v33  ;;  %v1453_v4 = vpop.xlane.xlu1 %1452  ;;  %7029 = vmatprep.mubr.msk.bf16.mxu0 %vm1201_vm1, %v2703_v42  ;;  %v1671_v57 = vadd.f32 %v10180_v53, %v1633_v48  ;;  %v1766_v45 = vmul.f32 %v13847_v49, %v1702_v34 }
 0x296   : > { %v1456_v50 = vpop.xlane.xlu0 %1455  ;;  %v1509_v7 = vmul.f32 0.03125, %v1453_v4  ;;  %v10238_v61 = vpop.f32.mrb[4].mxu1  ;;  %7556 = vrsqrt.f32 %v1539_v11  ;;  %v2704_v54 = vpack.c.bf16 %v1765_v55, %v1764_v46  ;;  %v1598_v10 = vmul.f32 %v7547_v29, %v13843_v6  ;;  %v13851_v55 = vld [vmem:[#allocation58_spill] sm:$0xff] }
 0x297   : > { %v1510_v63 = vmul.f32 0.03125, %v1456_v50  ;;  %13841 = vst [vmem:[#allocation9_spill] sm:$0xff] %v10238_v61  ;;  %v10240_v36 = vpop.f32.mrb[5].mxu1  ;;  %7558 = vrsqrt.f32 %v1540_v27  ;;  %v1703_v20 = vmax.f32 %v1671_v57, 0.0  ;;  %v1635_v28 = vmul.f32 %v10174_v14, %v1597_v0  ;;  %v13850_v27 = vld [vmem:[#allocation81_spill] sm:$0xff] }
 0x298   : > { %13842 = vst [vmem:[#allocation10_spill] sm:$0xff] %v10240_v36  ;;  %v7549_v13 = vpop.eup %7548  ;;  %v1541_v17 = vadd.f32 1e-05, %v1509_v7  ;;  %v10244_v8 = vpop.f32.mrb[6].mxu1  ;;  %7030 = vmatmul.mubr.msk.bf16.gmra.mrb[4].mxu0 %vm1201_vm1, %v2704_v54  ;;  %v1672_v5 = vadd.f32 %v10180_v53, %v1634_v16  ;;  %v1636_v44 = vmul.f32 %v10174_v14, %v1598_v10  ;;  %v13852_v7 = vld [vmem:[#allocation62_spill] sm:$0xff] }
 0x299   : > { %13844 = vst [vmem:[#allocation11_spill] sm:$0xff] %v10244_v8  ;;  %v7551_v39 = vpop.eup %7550  ;;  %v1599_v2 = vmul.f32 %v7549_v13, %v13845_v9  ;;  %v1459_v43 = vpop.xlane.xlu1 %1458  ;;  %v1542_v32 = vadd.f32 1e-05, %v1510_v63  ;;  %v1767_v21 = vmul.f32 %v13848_v3, %v1703_v20  ;;  %v1673_v30 = vadd.f32 %v10180_v53, %v1635_v28  ;;  %v13857_v28 = vld [vmem:[#allocation84_spill] sm:$0xff]  ;;  %v13859_v3 = vld [vmem:[#allocation87_spill] sm:$0xff] }
 0x29a   : > { %v1462_v31 = vpop.xlane.xlu0 %1461  ;;  %v1511_v24 = vmul.f32 0.03125, %v1459_v43  ;;  %v10249_v23 = vpop.f32.mrb[7].mxu1  ;;  %7560 = vrsqrt.f32 %v1541_v17  ;;  %v1600_v18 = vmul.f32 %v7551_v39, %v13849_v22  ;;  %v1704_v47 = vmax.f32 %v1672_v5, 0.0  ;;  %v13856_v43 = vld [vmem:[#allocation94_spill] sm:$0xff]  ;;  %v13861_v22 = vld [vmem:[#allocation68_spill] sm:$0xff] }
 0x29b   : > { %v1512_v62 = vmul.f32 0.03125, %v1462_v31  ;;  %13846 = vst [vmem:[#allocation12_spill] sm:$0xff] %v10249_v23  ;;  %v2705_v59 = vpack.c.bf16 %v1767_v21, %v1766_v45  ;;  %v1637_v48 = vmul.f32 %v10174_v14, %v1599_v2  ;;  %7562 = vrsqrt.f32 %v1542_v32 }
 0x29c   : > { %v7553_v26 = vpop.eup %7552  ;;  %v1543_v37 = vadd.f32 1e-05, %v1511_v24  ;;  %v1705_v29 = vmax.f32 %v1673_v30, 0.0  ;;  %v1674_v33 = vadd.f32 %v10180_v53, %v1636_v44  ;;  %v1768_v57 = vmul.f32 %v13851_v55, %v1704_v47  ;;  %v13860_v30 = vld [vmem:[#allocation64_spill] sm:$0xff]  ;;  %v13863_v55 = vld [vmem:[#allocation70_spill] sm:$0xff] }
 0x29d   : > { %v1544_v52 = vadd.f32 1e-05, %v1512_v62  ;;  %v1465_v51 = vpop.xlane.xlu1 %1464  ;;  %v1601_v1 = vmul.f32 %v7553_v26, %v13850_v27  ;;  %7033 = vmatprep.mubr.msk.bf16.mxu0 %vm1201_vm1, %v2705_v59  ;;  %v7555_v0 = vpop.eup %7554  ;;  %v1675_v50 = vadd.f32 %v10180_v53, %v1637_v48  ;;  %v1638_v34 = vmul.f32 %v10174_v14, %v1600_v18 }
 0x29e   : > { %v1468_v42 = vpop.xlane.xlu0 %1467  ;;  %v1513_v41 = vmul.f32 0.03125, %v1465_v51  ;;  %7564 = vrsqrt.f32 %v1543_v37  ;;  %v1769_v63 = vmul.f32 %v13852_v7, %v1705_v29  ;;  %v1706_v17 = vmax.f32 %v1674_v33, 0.0  ;;  %v13862_v33 = vld [vmem:[#allocation99_spill] sm:$0xff] }
 0x29f   : > { %v1514_v11 = vmul.f32 0.03125, %v1468_v42  ;;  %7566 = vrsqrt.f32 %v1544_v52  ;;  %v1639_v2 = vmul.f32 %v10174_v14, %v1601_v1  ;;  %v1602_v31 = vmul.f32 %v7555_v0, %v13856_v43  ;;  %v13867_v43 = vld [vmem:[#allocation91_spill] sm:$0xff] }
 0x2a0   : > { %v1545_v4 = vadd.f32 1e-05, %v1513_v41  ;;  %v7557_v25 = vpop.eup %7556  ;;  %v2706_v20 = vpack.c.bf16 %v1769_v63, %v1768_v57  ;;  %v1707_v49 = vmax.f32 %v1675_v50, 0.0  ;;  %v1676_v37 = vadd.f32 %v10180_v53, %v1638_v34  ;;  %v13864_v34 = vld [vmem:[#allocation74_spill] sm:$0xff] }
 0x2a1   : > { %v1546_v46 = vadd.f32 1e-05, %v1514_v11  ;;  %v1471_v35 = vpop.xlane.xlu1 %1470  ;;  %v10264_v54 = vpop.f32.mrb[8].mxu1  ;;  %v1603_v32 = vmul.f32 %v7557_v25, %v13857_v28  ;;  %v1770_v44 = vmul.f32 %v13860_v30, %v1706_v17  ;;  %v1677_v42 = vadd.f32 %v10180_v53, %v1639_v2 }
 0x2a2   : > { %13853 = vst [vmem:[#allocation13_spill] sm:$0xff] %v10264_v54  ;;  %v7559_v16 = vpop.eup %7558  ;;  %7568 = vrsqrt.f32 %v1545_v4  ;;  %v1515_v13 = vmul.f32 0.03125, %v1471_v35  ;;  %v1474_v6 = vpop.xlane.xlu0 %1473  ;;  %7034 = vmatmul.mubr.msk.bf16.gmra.mrb[8].mxu0 %vm1201_vm1, %v2706_v20  ;;  %v1771_v18 = vmul.f32 %v13861_v22, %v1707_v49  ;;  %v1708_v47 = vmax.f32 %v1676_v37, 0.0  ;;  %v13869_v49 = vld [vmem:[#allocation93_spill] sm:$0xff] }
 0x2a3   : > { %v10267_v10 = vpop.f32.mrb[9].mxu1  ;;  %v1516_v39 = vmul.f32 0.03125, %v1474_v6  ;;  %v1604_v21 = vmul.f32 %v7559_v16, %v13859_v3  ;;  %7570 = vrsqrt.f32 %v1546_v46  ;;  %v1640_v27 = vmul.f32 %v10174_v14, %v1602_v31 }
 0x2a4   : > { %13854 = vst [vmem:[#allocation14_spill] sm:$0xff] %v10267_v10  ;;  %v10269_v9 = vpop.f32.mrb[10].mxu1  ;;  %v1547_v24 = vadd.f32 1e-05, %v1515_v13  ;;  %v7561_v45 = vpop.eup %7560  ;;  %v2707_v11 = vpack.c.bf16 %v1771_v18, %v1770_v44  ;;  %v1641_v1 = vmul.f32 %v10174_v14, %v1603_v32  ;;  %v1709_v25 = vmax.f32 %v1677_v42, 0.0  ;;  %v13872_v18 = vld [vmem:[#allocation96_spill] sm:$0xff] }
 0x2a5   : > { %13855 = vst [vmem:[#allocation109_spill] sm:$0xff] %v10269_v9  ;;  %v10274_v62 = vpop.f32.mrb[11].mxu1  ;;  %v1548_v5 = vadd.f32 1e-05, %v1516_v39  ;;  %v1477_v26 = vpop.xlane.xlu1 %1476  ;;  %v1605_v0 = vmul.f32 %v7561_v45, %v13862_v33  ;;  %v1772_v57 = vmul.f32 %v13863_v55, %v1708_v47  ;;  %v1678_v63 = vadd.f32 %v10180_v53, %v1640_v27  ;;  %v13866_v39 = vld [vmem:[#allocation89_spill] sm:$0xff]  ;;  %v13873_v27 = vld [vmem:[#allocation76_spill] sm:$0xff] }
 0x2a6   : > { %13858 = vst [vmem:[#allocation15_spill] sm:$0xff] %v10274_v62  ;;  %7572 = vrsqrt.f32 %v1547_v24  ;;  %v1517_v52 = vmul.f32 0.03125, %v1477_v26  ;;  %v1480_v51 = vpop.xlane.xlu0 %1479  ;;  %v7563_v48 = vpop.eup %7562  ;;  %7037 = vmatprep.mubr.msk.bf16.mxu0 %vm1201_vm1, %v2707_v11  ;;  %v1773_v16 = vmul.f32 %v13864_v34, %v1709_v25  ;;  %v1679_v17 = vadd.f32 %v10180_v53, %v1641_v1  ;;  %v13875_v25 = vld [vmem:[#allocation98_spill] sm:$0xff] }
 0x2a7   : > { %7574 = vrsqrt.f32 %v1548_v5  ;;  %v1518_v59 = vmul.f32 0.03125, %v1480_v51  ;;  %v1606_v2 = vmul.f32 %v7563_v48, %v13866_v39  ;;  %v1642_v24 = vmul.f32 %v10174_v14, %v1604_v21 }
 0x2a8   : > { %v1549_v41 = vadd.f32 1e-05, %v1517_v52  ;;  %v7565_v29 = vpop.eup %7564  ;;  %v2708_v3 = vpack.c.bf16 %v1773_v16, %v1772_v57  ;;  %v1710_v52 = vmax.f32 %v1678_v63, 0.0  ;;  %v1643_v47 = vmul.f32 %v10174_v14, %v1605_v0  ;;  %v13876_v16 = vld [vmem:[#allocation104_spill] sm:$0xff] }
 0x2a9   : > { %v1550_v4 = vadd.f32 1e-05, %v1518_v59  ;;  %v1483_v50 = vpop.xlane.xlu1 %1482  ;;  %v7567_v46 = vpop.eup %7566  ;;  %v1607_v31 = vmul.f32 %v7565_v29, %v13867_v43  ;;  %v1711_v59 = vmax.f32 %v1679_v17, 0.0  ;;  %v1680_v48 = vadd.f32 %v10180_v53, %v1642_v24  ;;  %v13874_v29 = vld [vmem:[#allocation80_spill] sm:$0xff]  ;;  %v13877_v17 = vld [vmem:[#allocation105_spill] sm:$0xff] }
 0x2aa   : > { %7576 = vrsqrt.f32 %v1549_v41  ;;  %v1519_v35 = vmul.f32 0.03125, %v1483_v50  ;;  %v1486_v7 = vpop.xlane.xlu0 %1485  ;;  %v1608_v45 = vmul.f32 %v7567_v46, %v13869_v49  ;;  %7038 = vmatmul.mubr.msk.bf16.gmra.mrb[12].mxu0 %vm1201_vm1, %v2708_v3  ;;  %v1644_v41 = vmul.f32 %v10174_v14, %v1606_v2 }
 0x2ab   : > { %7578 = vrsqrt.f32 %v1550_v4  ;;  %v10289_v13 = vpop.f32.mrb[12].mxu1  ;;  %v1520_v6 = vmul.f32 0.03125, %v1486_v7  ;;  %v1774_v1 = vmul.f32 %v13873_v27, %v1710_v52  ;;  %v1775_v33 = vmul.f32 %v13874_v29, %v1711_v59  ;;  %v13881_v52 = vld [vmem:[#allocation86_spill] sm:$0xff] }
 0x2ac   : > { %13865 = vst [vmem:[#allocation16_spill] sm:$0xff] %v10289_v13  ;;  %v7569_v20 = vpop.eup %7568  ;;  %v1551_v28 = vadd.f32 1e-05, %v1519_v35  ;;  %v10294_v32 = vpop.f32.mrb[13].mxu1  ;;  %v1645_v4 = vmul.f32 %v10174_v14, %v1607_v31  ;;  %v1646_v50 = vmul.f32 %v10174_v14, %v1608_v45  ;;  %v1681_v35 = vadd.f32 %v10180_v53, %v1643_v47  ;;  %v13878_v31 = vld [vmem:[#allocation82_spill] sm:$0xff] }
 0x2ad   : > { %13868 = vst [vmem:[#allocation110_spill] sm:$0xff] %v10294_v32  ;;  %v1552_v5 = vadd.f32 1e-05, %v1520_v6  ;;  %v10298_v26 = vpop.f32.mrb[14].mxu1  ;;  %v1489_v37 = vpop.xlane.xlu1 %1488  ;;  %v1609_v51 = vmul.f32 %v7569_v20, %v13872_v18  ;;  %v1712_v55 = vmax.f32 %v1680_v48, 0.0  ;;  %v2709_v0 = vpack.c.bf16 %v1775_v33, %v1774_v1  ;;  %v13885_v48 = vld [vmem:[#allocation90_spill] sm:$0xff] }
 0x2ae   : > { %13870 = vst [vmem:[#allocation17_spill] sm:$0xff] %v10298_v26  ;;  %7580 = vrsqrt.f32 %v1551_v28  ;;  %v10300_v30 = vpop.f32.mrb[15].mxu1  ;;  %v1521_v44 = vmul.f32 0.03125, %v1489_v37  ;;  %v7571_v22 = vpop.eup %7570  ;;  %v1682_v57 = vadd.f32 %v10180_v53, %v1644_v41  ;;  %v1683_v7 = vadd.f32 %v10180_v53, %v1645_v4 }
 0x2af   : > { %13871 = vst [vmem:[#allocation18_spill] sm:$0xff] %v10300_v30  ;;  %7582 = vrsqrt.f32 %v1552_v5  ;;  %v1610_v46 = vmul.f32 %v7571_v22, %v13875_v25  ;;  %v1647_v63 = vmul.f32 %v10174_v14, %v1609_v51  ;;  %v1713_v39 = vmax.f32 %v1681_v35, 0.0  ;;  %7041 = vmatprep.mubr.msk.bf16.mxu0 %vm1201_vm1, %v2709_v0  ;;  %v13880_v5 = vld [vmem:[#allocation4_spill] sm:$0xff] }
 0x2b0   : > { %v7573_v21 = vpop.eup %7572  ;;  %v1553_v42 = vadd.f32 1e-05, %v1521_v44  ;;  %v1684_v2 = vadd.f32 %v10180_v53, %v1646_v50  ;;  %v1776_v28 = vmul.f32 %v13878_v31, %v1712_v55  ;;  %v1714_v49 = vmax.f32 %v1682_v57, 0.0 }
 0x2b1   : > { %v7575_v11 = vpop.eup %7574  ;;  %v1611_v6 = vmul.f32 %v7573_v21, %v13876_v16  ;;  %v1715_v45 = vmax.f32 %v1683_v7, 0.0  ;;  %v1685_v3 = vadd.f32 %v10180_v53, %v1647_v63  ;;  %v1777_v44 = vmul.f32 %v13881_v52, %v1713_v39 }
 0x2b2   : > { %7584 = vrsqrt.f32 %v1553_v42  ;;  %v1612_v20 = vmul.f32 %v7575_v11, %v13877_v17  ;;  %v1716_v18 = vmax.f32 %v1684_v2, 0.0  ;;  %v1648_v51 = vmul.f32 %v10174_v14, %v1610_v46  ;;  %v13884_v42 = vld [vmem:[#allocation88_spill] sm:$0xff] }
 0x2b3   : > { %v1778_v47 = vmul.f32 %v13884_v42, %v1714_v49  ;;  %v1779_v41 = vmul.f32 %v13885_v48, %v1715_v45  ;;  %v1717_v11 = vmax.f32 %v1685_v3, 0.0  ;;  %v2710_v1 = vpack.c.bf16 %v1777_v44, %v1776_v28  ;;  %v13887_v46 = vld [vmem:[#allocation92_spill] sm:$0xff]  ;;  %v13889_v45 = vld [vmem:[#allocation97_spill] sm:$0xff] }
 0x2b4   : > { %v7577_v34 = vpop.eup %7576  ;;  %v1649_v33 = vmul.f32 %v10174_v14, %v1611_v6  ;;  %v1780_v35 = vmul.f32 %v13887_v46, %v1716_v18  ;;  %v1686_v57 = vadd.f32 %v10180_v53, %v1648_v51  ;;  %v1650_v63 = vmul.f32 %v10174_v14, %v1612_v20 }
 0x2b5   : > { %v7579_v43 = vpop.eup %7578  ;;  %v10321_v24 = vpop.f32.mrb[16].mxu1  ;;  %v1613_v37 = vmul.f32 %v7577_v34, %v13880_v5  ;;  %v2711_v25 = vpack.c.bf16 %v1779_v41, %v1778_v47  ;;  %7042 = vmatmul.mubr.msk.bf16.gmra.mrb[16].mxu0 %vm1201_vm1, %v2710_v1  ;;  %v13890_v5 = vld [vmem:[#allocation100_spill] sm:$0xff]  ;;  %v13893_v41 = vld [vmem:[#allocation101_spill] sm:$0xff] }
 0x2b6   : > { %13879 = vst [vmem:[#allocation19_spill] sm:$0xff] %v10321_v24  ;;  %v10326_v22 = vpop.f32.mrb[17].mxu1  ;;  %v1614_v59 = vmul.f32 %v7579_v43, %v9918_v40  ;;  %v13888_v40 = vld [vmem:[#allocation95_spill] sm:$0xff]  ;;  %v1687_v7 = vadd.f32 %v10180_v53, %v1649_v33  ;;  %v1718_v39 = vmax.f32 %v1686_v57, 0.0  ;;  %v1688_v2 = vadd.f32 %v10180_v53, %v1650_v63 }
 0x2b7   : > { %13882 = vst [vmem:[#allocation20_spill] sm:$0xff] %v10326_v22  ;;  %v10330_v21 = vpop.f32.mrb[18].mxu1  ;;  %v1781_v55 = vmul.f32 %v13888_v40, %v1717_v11  ;;  %7045 = vmatprep.mubr.msk.bf16.mxu0 %vm1201_vm1, %v2711_v25  ;;  %v13895_v33 = vld [vmem:[#allocation103_spill] sm:$0xff] }
 0x2b8   : > { %13883 = vst [vmem:[#allocation21_spill] sm:$0xff] %v10330_v21  ;;  %v7581_v27 = vpop.eup %7580  ;;  %v10334_v29 = vpop.f32.mrb[19].mxu1  ;;  %v1652_v16 = vmul.f32 %v10174_v14, %v1614_v59  ;;  %v1782_v3 = vmul.f32 %v13889_v45, %v1718_v39  ;;  %v1720_v52 = vmax.f32 %v1688_v2, 0.0 }
 0x2b9   : > { %13886 = vst [vmem:[#allocation22_spill] sm:$0xff] %v10334_v29  ;;  %v7583_v4 = vpop.eup %7582  ;;  %v1615_v50 = vmul.f32 %v7581_v27, %v9951_v15  ;;  %v2712_v34 = vpack.c.bf16 %v1781_v55, %v1780_v35  ;;  %v1651_v15 = vmul.f32 %v10174_v14, %v1613_v37  ;;  %v13894_v27 = vld [vmem:[#allocation102_spill] sm:$0xff] }
 0x2ba   : > { %v1616_v0 = vmul.f32 %v7583_v4, %v9954_v38  ;;  %v1719_v38 = vmax.f32 %v1687_v7, 0.0  ;;  %v1690_v28 = vadd.f32 %v10180_v53, %v1652_v16  ;;  %v1784_v11 = vmul.f32 %v13893_v41, %v1720_v52  ;;  %v13899_v7 = vld [vmem:[#allocation107_spill] sm:$0xff] }
 0x2bb   : > { %v1653_v6 = vmul.f32 %v10174_v14, %v1615_v50  ;;  %v1689_v20 = vadd.f32 %v10180_v53, %v1651_v15  ;;  %v13896_v50 = vld [vmem:[#allocation106_spill] sm:$0xff]  ;;  %v13900_v15 = vld [vmem:[#allocation108_spill] sm:$0xff]  ;;  %v4281_v52 = vmul.f32 %v10215_v19, %v10215_v19 }
 0x2bc   : > { %v7585_v17 = vpop.eup %7584  ;;  %v1654_v43 = vmul.f32 %v10174_v14, %v1616_v0  ;;  %v1783_v37 = vmul.f32 %v13890_v5, %v1719_v38  ;;  %v1722_v51 = vmax.f32 %v1690_v28, 0.0  ;;  %v4280_v28 = vmul.f32 %v10207_v60, %v10207_v60 }
 0x2bd   : > { %v1617_v31 = vmul.f32 %v7585_v17, %v9978_v56  ;;  %v1691_v49 = vadd.f32 %v10180_v53, %v1653_v6  ;;  %v1721_v18 = vmax.f32 %v1689_v20, 0.0  ;;  %7046 = vmatmul.mubr.msk.bf16.gmra.mrb[20].mxu0 %vm1201_vm1, %v2712_v34 }
 0x2be   : > { %v1692_v44 = vadd.f32 %v10180_v53, %v1654_v43  ;;  %v2713_v56 = vpack.c.bf16 %v1783_v37, %v1782_v3  ;;  %v1786_v4 = vmul.f32 %v13895_v33, %v1722_v51  ;;  %v4278_v3 = vmul.f32 %v10213_v58, %v10213_v58 }
 0x2bf   : > { %v1723_v59 = vmax.f32 %v1691_v49, 0.0  ;;  %v1655_v42 = vmul.f32 %v10174_v14, %v1617_v31  ;;  %v1785_v1 = vmul.f32 %v13894_v27, %v1721_v18 }
 0x2c0   : > { %v10359_v47 = vpop.f32.mrb[20].mxu1  ;;  %v1724_v14 = vmax.f32 %v1692_v44, 0.0  ;;  %7049 = vmatprep.mubr.msk.bf16.mxu0 %vm1201_vm1, %v2713_v56 }
 0x2c1   : > { %13891 = vst [vmem:[#allocation23_spill] sm:$0xff] %v10359_v47  ;;  %v10361_v48 = vpop.f32.mrb[21].mxu1  ;;  %v1787_v25 = vmul.f32 %v13896_v50, %v1723_v59  ;;  %v1693_v35 = vadd.f32 %v10180_v53, %v1655_v42  ;;  %v2714_v55 = vpack.c.bf16 %v1785_v1, %v1784_v11  ;;  %v4279_v59 = vmul.f32 %v10220_v12, %v10220_v12 }
 0x2c2   : > { %13892 = vst [vmem:[#allocation24_spill] sm:$0xff] %v10361_v48  ;;  %v10368_v46 = vpop.f32.mrb[22].mxu1  ;;  %v1788_v63 = vmul.f32 %v13899_v7, %v1724_v14  ;;  %v4284_v1 = vmul.f32 %v10238_v61, %v10238_v61  ;;  %v4282_v50 = vmul.f32 %v10240_v36, %v10240_v36  ;;  %v4285_v14 = vmul.f32 %v10244_v8, %v10244_v8 }
 0x2c3   : > { %13897 = vst [vmem:[#allocation25_spill] sm:$0xff] %v10368_v46  ;;  %v10371_v40 = vpop.f32.mrb[23].mxu1  ;;  %v2715_v0 = vpack.c.bf16 %v1787_v25, %v1786_v4  ;;  %v1725_v57 = vmax.f32 %v1693_v35, 0.0  ;;  %v4283_v7 = vmul.f32 %v10249_v23, %v10249_v23 }
 0x2c4   : > { %13898 = vst [vmem:[#allocation26_spill] sm:$0xff] %v10371_v40 }
 0x2c5   : > { %v1789_v16 = vmul.f32 %v13900_v15, %v1725_v57  ;;  %7050 = vmatmul.mubr.msk.bf16.gmra.mrb[24].mxu0 %vm1201_vm1, %v2714_v55 }
 0x2c6   : > { %7053 = vmatprep.mubr.msk.bf16.mxu0 %vm1201_vm1, %v2715_v0 }
 0x2c7   : > { %v2716_v17 = vpack.c.bf16 %v1789_v16, %v1788_v63 }
 0x2c9   : > { %v10376_v6 = vpop.f32.mrb[24].mxu1 }
 0x2ca   : > { %13901 = vst [vmem:[#allocation27_spill] sm:$0xff] %v10376_v6  ;;  %v10378_v34 = vpop.f32.mrb[25].mxu1 }
 0x2cb   : > { %13902 = vst [vmem:[#allocation28_spill] sm:$0xff] %v10378_v34  ;;  %v10381_v53 = vpop.f32.mrb[26].mxu1 }
 0x2cc   : > { %13903 = vst [vmem:[#allocation29_spill] sm:$0xff] %v10381_v53  ;;  %v10383_v39 = vpop.f32.mrb[27].mxu1 }
 0x2cd   : > { %13904 = vst [vmem:[#allocation30_spill] sm:$0xff] %v10383_v39  ;;  %7054 = vmatmul.mubr.msk.bf16.gmra.mrb[28].mxu0 %vm1201_vm1, %v2716_v17 }
 0x2d1   : > { %v10386_v38 = vpop.f32.mrb[28].mxu1 }
 0x2d2   : > { %13905 = vst [vmem:[#allocation31_spill] sm:$0xff] %v10386_v38  ;;  %v10389_v2 = vpop.f32.mrb[29].mxu1 }
 0x2d3   : > { %13906 = vst [vmem:[#allocation36_spill] sm:$0xff] %v10389_v2  ;;  %v10391_v43 = vpop.f32.mrb[30].mxu1 }
 0x2d4   : > { %13907 = vst [vmem:[#allocation32_spill] sm:$0xff] %v10391_v43  ;;  %v10393_v31 = vpop.f32.mrb[31].mxu1 }
 0x2d5   : > { %13908 = vst [vmem:[#allocation33_spill] sm:$0xff] %v10393_v31 }
 0x2d9   : > { %v10395_v20 = vpop.f32.mrb[32].mxu1 }
 0x2da   : > { %13909 = vst [vmem:[#allocation47_spill] sm:$0xff] %v10395_v20  ;;  %v4312_v49 = vmul.f32 %v10395_v20, %v10395_v20  ;;  %v10401_v45 = vpop.f32.mrb[33].mxu1 }
 0x2db   : > { %13910 = vst [vmem:[#allocation37_spill] sm:$0xff] %v10401_v45  ;;  %v4310_v5 = vmul.f32 %v10401_v45, %v10401_v45  ;;  %v10407_v37 = vpop.f32.mrb[34].mxu1 }
 0x2dc   : > { %13911 = vst [vmem:[#allocation34_spill] sm:$0xff] %v10407_v37  ;;  %v10411_v44 = vadd.f32 %v4312_v49, %v4280_v28  ;;  %v4313_v18 = vmul.f32 %v10407_v37, %v10407_v37  ;;  %v10415_v51 = vpop.f32.mrb[35].mxu1  ;;  %v4288_v49 = vmul.f32 %v10264_v54, %v10264_v54 }
 0x2dd   : > { %13912 = vst [vmem:[#allocation35_spill] sm:$0xff] %v10415_v51  ;;  %v10419_v42 = vadd.f32 %v4310_v5, %v4278_v3  ;;  %v4311_v56 = vmul.f32 %v10415_v51, %v10415_v51 }
 0x2de   : > { %v10423_v41 = vadd.f32 %v4313_v18, %v4281_v52  ;;  %v4286_v52 = vmul.f32 %v10267_v10, %v10267_v10 }
 0x2df   : > { %v10425_v11 = vadd.f32 %v4311_v56, %v4279_v59  ;;  %v4289_v56 = vmul.f32 %v10269_v9, %v10269_v9 }
 0x2e1   : > { %v10427_v27 = vpop.f32.mrb[36].mxu1 }
 0x2e2   : > { %13913 = vst [vmem:[#allocation49_spill] sm:$0xff] %v10427_v27  ;;  %v4316_v33 = vmul.f32 %v10427_v27, %v10427_v27  ;;  %v10433_v4 = vpop.f32.mrb[37].mxu1 }
 0x2e3   : > { %13914 = vst [vmem:[#allocation39_spill] sm:$0xff] %v10433_v4  ;;  %v4314_v25 = vmul.f32 %v10433_v4, %v10433_v4  ;;  %v10439_v35 = vpop.f32.mrb[38].mxu1 }
 0x2e4   : > { %13915 = vst [vmem:[#allocation73_spill] sm:$0xff] %v10439_v35  ;;  %v10443_v55 = vadd.f32 %v4316_v33, %v4284_v1  ;;  %v4317_v0 = vmul.f32 %v10439_v35, %v10439_v35  ;;  %v10447_v57 = vpop.f32.mrb[39].mxu1 }
 0x2e5   : > { %13916 = vst [vmem:[#allocation53_spill] sm:$0xff] %v10447_v57  ;;  %v10451_v63 = vadd.f32 %v4314_v25, %v4282_v50  ;;  %v4315_v15 = vmul.f32 %v10447_v57, %v10447_v57  ;;  %v4287_v25 = vmul.f32 %v10274_v62, %v10274_v62 }
 0x2e6   : > { %v10455_v16 = vadd.f32 %v4317_v0, %v4285_v14 }
 0x2e7   : > { %v10457_v17 = vadd.f32 %v4315_v15, %v4283_v7 }
 0x2e9   : > { %v10459_v28 = vpop.f32.mrb[40].mxu1 }
 0x2ea   : > { %13917 = vst [vmem:[#allocation41_spill] sm:$0xff] %v10459_v28  ;;  %v4320_v3 = vmul.f32 %v10459_v28, %v10459_v28  ;;  %v10465_v5 = vpop.f32.mrb[41].mxu1 }
 0x2eb   : > { %13918 = vst [vmem:[#allocation55_spill] sm:$0xff] %v10465_v5  ;;  %v4318_v18 = vmul.f32 %v10465_v5, %v10465_v5  ;;  %v10471_v59 = vpop.f32.mrb[42].mxu1 }
 0x2ec   : > { %13919 = vst [vmem:[#allocation60_spill] sm:$0xff] %v10471_v59  ;;  %v10475_v1 = vadd.f32 %v4320_v3, %v4288_v49  ;;  %v4321_v33 = vmul.f32 %v10471_v59, %v10471_v59  ;;  %v10479_v50 = vpop.f32.mrb[43].mxu1  ;;  %v4292_v49 = vmul.f32 %v10289_v13, %v10289_v13 }
 0x2ed   : > { %13920 = vst [vmem:[#allocation43_spill] sm:$0xff] %v10479_v50  ;;  %v10483_v14 = vadd.f32 %v4318_v18, %v4286_v52  ;;  %v4319_v0 = vmul.f32 %v10479_v50, %v10479_v50  ;;  %v4290_v52 = vmul.f32 %v10294_v32, %v10294_v32 }
 0x2ee   : > { %v10487_v7 = vadd.f32 %v4321_v33, %v4289_v56  ;;  %v4293_v33 = vmul.f32 %v10298_v26, %v10298_v26 }
 0x2ef   : > { %v10489_v15 = vadd.f32 %v4319_v0, %v4287_v25 }
 0x2f1   : > { %v10491_v28 = vpop.f32.mrb[44].mxu1 }
 0x2f2   : > { %13921 = vst [vmem:[#allocation59_spill] sm:$0xff] %v10491_v28  ;;  %v4324_v3 = vmul.f32 %v10491_v28, %v10491_v28  ;;  %v10497_v59 = vpop.f32.mrb[45].mxu1  ;;  %v4291_v28 = vmul.f32 %v10300_v30, %v10300_v30 }
 0x2f3   : > { %13922 = vst [vmem:[#allocation45_spill] sm:$0xff] %v10497_v59  ;;  %v4322_v18 = vmul.f32 %v10497_v59, %v10497_v59  ;;  %v10503_v56 = vpop.f32.mrb[46].mxu1 }
 0x2f4   : > { %13923 = vst [vmem:[#allocation61_spill] sm:$0xff] %v10503_v56  ;;  %v10507_v25 = vadd.f32 %v4324_v3, %v4292_v49  ;;  %v4325_v0 = vmul.f32 %v10503_v56, %v10503_v56  ;;  %v10511_v50 = vpop.f32.mrb[47].mxu1  ;;  %v4296_v49 = vmul.f32 %v10321_v24, %v10321_v24 }
 0x2f5   : > { %13924 = vst [vmem:[#allocation48_spill] sm:$0xff] %v10511_v50  ;;  %v10515_v5 = vadd.f32 %v4322_v18, %v4290_v52  ;;  %v4323_v59 = vmul.f32 %v10511_v50, %v10511_v50  ;;  %v4294_v52 = vmul.f32 %v10326_v22, %v10326_v22 }
 0x2f6   : > { %v10519_v35 = vadd.f32 %v4325_v0, %v4293_v33 }
 0x2f7   : > { %v10521_v27 = vadd.f32 %v4323_v59, %v4291_v28  ;;  %v4297_v28 = vmul.f32 %v10330_v21, %v10330_v21 }
 0x2f9   : > { %v10523_v57 = vpop.f32.mrb[48].mxu1 }
 0x2fa   : > { %13925 = vst [vmem:[#allocation65_spill] sm:$0xff] %v10523_v57  ;;  %v4328_v3 = vmul.f32 %v10523_v57, %v10523_v57  ;;  %v10529_v56 = vpop.f32.mrb[49].mxu1  ;;  %v4295_v57 = vmul.f32 %v10334_v29, %v10334_v29 }
 0x2fb   : > { %13926 = vst [vmem:[#allocation51_spill] sm:$0xff] %v10529_v56  ;;  %v4326_v18 = vmul.f32 %v10529_v56, %v10529_v56  ;;  %v10535_v33 = vpop.f32.mrb[50].mxu1 }
 0x2fc   : > { %13927 = vst [vmem:[#allocation67_spill] sm:$0xff] %v10535_v33  ;;  %v10539_v59 = vadd.f32 %v4328_v3, %v4296_v49  ;;  %v4329_v0 = vmul.f32 %v10535_v33, %v10535_v33  ;;  %v10543_v50 = vpop.f32.mrb[51].mxu1  ;;  %v4300_v49 = vmul.f32 %v10359_v47, %v10359_v47 }
 0x2fd   : > { %13928 = vst [vmem:[#allocation54_spill] sm:$0xff] %v10543_v50  ;;  %v10547_v4 = vadd.f32 %v4326_v18, %v4294_v52  ;;  %v4327_v56 = vmul.f32 %v10543_v50, %v10543_v50  ;;  %v4298_v52 = vmul.f32 %v10361_v48, %v10361_v48 }
 0x2fe   : > { %v10551_v37 = vadd.f32 %v4329_v0, %v4297_v28 }
 0x2ff   : > { %v10553_v20 = vadd.f32 %v4327_v56, %v4295_v57  ;;  %v4301_v57 = vmul.f32 %v10368_v46, %v10368_v46 }
 0x301   : > { %v10555_v51 = vpop.f32.mrb[52].mxu1 }
 0x302   : > { %13929 = vst [vmem:[#allocation71_spill] sm:$0xff] %v10555_v51  ;;  %v4332_v3 = vmul.f32 %v10555_v51, %v10555_v51  ;;  %v10561_v33 = vpop.f32.mrb[53].mxu1  ;;  %v4299_v51 = vmul.f32 %v10371_v40, %v10371_v40 }
 0x303   : > { %13930 = vst [vmem:[#allocation57_spill] sm:$0xff] %v10561_v33  ;;  %v4330_v18 = vmul.f32 %v10561_v33, %v10561_v33  ;;  %v10567_v28 = vpop.f32.mrb[54].mxu1 }
 0x304   : > { %13931 = vst [vmem:[#allocation111_spill] sm:$0xff] %v10567_v28  ;;  %v10571_v56 = vadd.f32 %v4332_v3, %v4300_v49  ;;  %v4333_v0 = vmul.f32 %v10567_v28, %v10567_v28  ;;  %v10575_v50 = vpop.f32.mrb[55].mxu1  ;;  %v4304_v49 = vmul.f32 %v10376_v6, %v10376_v6 }
 0x305   : > { %13932 = vst [vmem:[#allocation112_spill] sm:$0xff] %v10575_v50  ;;  %v10579_v45 = vadd.f32 %v4330_v18, %v4298_v52  ;;  %v4331_v33 = vmul.f32 %v10575_v50, %v10575_v50  ;;  %v4302_v52 = vmul.f32 %v10378_v34, %v10378_v34 }
 0x306   : > { %v10583_v47 = vadd.f32 %v4333_v0, %v4301_v57 }
 0x307   : > { %v10585_v48 = vadd.f32 %v4331_v33, %v4299_v51  ;;  %v4305_v51 = vmul.f32 %v10381_v53, %v10381_v53 }
 0x309   : > { %v10587_v46 = vpop.f32.mrb[56].mxu1 }
 0x30a   : > { %13933 = vst [vmem:[#allocation77_spill] sm:$0xff] %v10587_v46  ;;  %v4336_v3 = vmul.f32 %v10587_v46, %v10587_v46  ;;  %v10593_v28 = vpop.f32.mrb[57].mxu1  ;;  %v4303_v46 = vmul.f32 %v10383_v39, %v10383_v39 }
 0x30b   : > { %13934 = vst [vmem:[#allocation63_spill] sm:$0xff] %v10593_v28  ;;  %v4334_v18 = vmul.f32 %v10593_v28, %v10593_v28  ;;  %v10599_v57 = vpop.f32.mrb[58].mxu1 }
 0x30c   : > { %13935 = vst [vmem:[#allocation79_spill] sm:$0xff] %v10599_v57  ;;  %v10603_v33 = vadd.f32 %v4336_v3, %v4304_v49  ;;  %v4337_v0 = vmul.f32 %v10599_v57, %v10599_v57  ;;  %v10607_v50 = vpop.f32.mrb[59].mxu1  ;;  %v4308_v49 = vmul.f32 %v10386_v38, %v10386_v38 }
 0x30d   : > { %13936 = vst [vmem:[#allocation38_spill] sm:$0xff] %v10607_v50  ;;  %v10611_v6 = vadd.f32 %v4334_v18, %v4302_v52  ;;  %v4335_v28 = vmul.f32 %v10607_v50, %v10607_v50  ;;  %v4306_v52 = vmul.f32 %v10389_v2, %v10389_v2 }
 0x30e   : > { %v10615_v34 = vadd.f32 %v4337_v0, %v4305_v51 }
 0x30f   : > { %v10617_v40 = vadd.f32 %v4335_v28, %v4303_v46  ;;  %v4309_v46 = vmul.f32 %v10391_v43, %v10391_v43 }
 0x311   : > { %v10619_v53 = vpop.f32.mrb[60].mxu1 }
 0x312   : > { %13937 = vst [vmem:[#allocation40_spill] sm:$0xff] %v10619_v53  ;;  %v4340_v3 = vmul.f32 %v10619_v53, %v10619_v53  ;;  %v10625_v57 = vpop.f32.mrb[61].mxu1  ;;  %v4307_v53 = vmul.f32 %v10393_v31, %v10393_v31 }
 0x313   : > { %13938 = vst [vmem:[#allocation66_spill] sm:$0xff] %v10625_v57  ;;  %v4338_v18 = vmul.f32 %v10625_v57, %v10625_v57  ;;  %v10631_v51 = vpop.f32.mrb[62].mxu1 }
 0x314   : > { %13939 = vst [vmem:[#allocation83_spill] sm:$0xff] %v10631_v51  ;;  %v10635_v28 = vadd.f32 %v4340_v3, %v4308_v49  ;;  %v4341_v0 = vmul.f32 %v10631_v51, %v10631_v51  ;;  %v10639_v50 = vpop.f32.mrb[63].mxu1 }
 0x315   : > { %13940 = vst [vmem:[#allocation42_spill] sm:$0xff] %v10639_v50  ;;  %v10643_v38 = vadd.f32 %v4338_v18, %v4306_v52  ;;  %v4339_v57 = vmul.f32 %v10639_v50, %v10639_v50 }
 0x316   : > { %v10647_v2 = vadd.f32 %v4341_v0, %v4309_v46 }
 0x317   : > { %v10649_v39 = vadd.f32 %v4339_v57, %v4307_v53 }
 0x319   : > { %v10651_v43 = vpop.f32.mrb[64].mxu1 }
 0x31a   : > { %13941 = vst [vmem:[#allocation44_spill] sm:$0xff] %v10651_v43  ;;  %v4376_v49 = vmul.f32 %v10651_v43, %v10651_v43  ;;  %v10655_v3 = vpop.f32.mrb[65].mxu1 }
 0x31b   : > { %13942 = vst [vmem:[#allocation69_spill] sm:$0xff] %v10655_v3  ;;  %v4374_v51 = vmul.f32 %v10655_v3, %v10655_v3  ;;  %v10659_v31 = vpop.f32.mrb[66].mxu1 }
 0x31c   : > { %13943 = vst [vmem:[#allocation85_spill] sm:$0xff] %v10659_v31  ;;  %v4408_v52 = vadd.f32 %v4376_v49, %v10411_v44  ;;  %v4377_v18 = vmul.f32 %v10659_v31, %v10659_v31  ;;  %v10664_v46 = vpop.f32.mrb[67].mxu1 }
 0x31d   : > { %13944 = vst [vmem:[#allocation46_spill] sm:$0xff] %v10664_v46  ;;  %v4406_v53 = vadd.f32 %v4374_v51, %v10419_v42  ;;  %v4375_v57 = vmul.f32 %v10664_v46, %v10664_v46 }
 0x31e   : > { %v4440_v0 = vadd.f32 1e-12, %v4408_v52  ;;  %v4409_v43 = vadd.f32 %v4377_v18, %v10423_v41 }
 0x31f   : > { %v4438_v50 = vadd.f32 1e-12, %v4406_v53  ;;  %v4407_v3 = vadd.f32 %v4375_v57, %v10425_v11 }
 0x320   : > { %7586 = vrsqrt.f32 %v4440_v0  ;;  %v4441_v21 = vadd.f32 1e-12, %v4409_v43 }
 0x321   : > { %7588 = vrsqrt.f32 %v4438_v50  ;;  %v4439_v44 = vadd.f32 1e-12, %v4407_v3  ;;  %v10671_v49 = vpop.f32.mrb[68].mxu1 }
 0x322   : > { %13945 = vst [vmem:[#allocation50_spill] sm:$0xff] %v10671_v49  ;;  %7590 = vrsqrt.f32 %v4441_v21  ;;  %v4380_v31 = vmul.f32 %v10671_v49, %v10671_v49  ;;  %v10675_v42 = vpop.f32.mrb[69].mxu1 }
 0x323   : > { %13946 = vst [vmem:[#allocation72_spill] sm:$0xff] %v10675_v42  ;;  %7592 = vrsqrt.f32 %v4439_v44  ;;  %v4378_v51 = vmul.f32 %v10675_v42, %v10675_v42  ;;  %v10679_v41 = vpop.f32.mrb[70].mxu1 }
 0x324   : > { %13947 = vst [vmem:[#allocation75_spill] sm:$0xff] %v10679_v41  ;;  %v4412_v11 = vadd.f32 %v4380_v31, %v10443_v55  ;;  %v4381_v43 = vmul.f32 %v10679_v41, %v10679_v41  ;;  %v10684_v3 = vpop.f32.mrb[71].mxu1 }
 0x325   : > { %13948 = vst [vmem:[#allocation52_spill] sm:$0xff] %v10684_v3  ;;  %v4410_v52 = vadd.f32 %v4378_v51, %v10451_v63  ;;  %v4379_v18 = vmul.f32 %v10684_v3, %v10684_v3 }
 0x326   : > { %v4444_v53 = vadd.f32 1e-12, %v4412_v11  ;;  %v4413_v57 = vadd.f32 %v4381_v43, %v10455_v16 }
 0x327   : > { %v4442_v49 = vadd.f32 1e-12, %v4410_v52  ;;  %v4411_v42 = vadd.f32 %v4379_v18, %v10457_v17 }
 0x328   : > { %7594 = vrsqrt.f32 %v4444_v53  ;;  %v10691_v46 = vadd.f32 1e-12, %v4413_v57 }
 0x329   : > { %7596 = vrsqrt.f32 %v4442_v49  ;;  %v4443_v31 = vadd.f32 1e-12, %v4411_v42  ;;  %v10693_v55 = vpop.f32.mrb[72].mxu1 }
 0x32a   : > { %13949 = vst [vmem:[#allocation56_spill] sm:$0xff] %v10693_v55  ;;  %v10695_v41 = vpop.eup %7586  ;;  %7598 = vrsqrt.f32 %v10691_v46  ;;  %v4384_v63 = vmul.f32 %v10693_v55, %v10693_v55  ;;  %v10700_v51 = vpop.f32.mrb[73].mxu1 }
 0x32b   : > { %13950 = vst [vmem:[#allocation78_spill] sm:$0xff] %v10695_v41  ;;  %13951 = vst [vmem:[#allocation81_spill] sm:$0xff] %v10700_v51  ;;  %v10702_v16 = vpop.eup %7588  ;;  %7600 = vrsqrt.f32 %v4443_v31  ;;  %v4382_v17 = vmul.f32 %v10700_v51, %v10700_v51  ;;  %v10706_v11 = vpop.f32.mrb[74].mxu1  ;;  %v10724_v24 = vmul.f32 %v10695_v41, %v4440_v0 }
 0x32c   : > { %13952 = vst [vmem:[#allocation58_spill] sm:$0xff] %v10702_v16  ;;  %13953 = vst [vmem:[#allocation62_spill] sm:$0xff] %v10706_v11  ;;  %v10708_v42 = vpop.eup %7590  ;;  %v4416_v43 = vadd.f32 %v4384_v63, %v10475_v1  ;;  %v4385_v52 = vmul.f32 %v10706_v11, %v10706_v11  ;;  %v10713_v18 = vpop.f32.mrb[75].mxu1  ;;  %v10716_v57 = vmul.f32 %v10702_v16, %v4438_v50 }
 0x32d   : > { %13954 = vst [vmem:[#allocation94_spill] sm:$0xff] %v10708_v42  ;;  %13955 = vst [vmem:[#allocation84_spill] sm:$0xff] %v10713_v18  ;;  %v10718_v55 = vpop.eup %7592  ;;  %v4414_v3 = vadd.f32 %v4382_v17, %v10483_v14  ;;  %v4383_v51 = vmul.f32 %v10713_v18, %v10713_v18  ;;  %v10741_v17 = vmul.f32 %v10708_v42, %v4441_v21 }
 0x32e   : > { %13956 = vst [vmem:[#allocation87_spill] sm:$0xff] %v10718_v55  ;;  %v10726_v29 = vadd.f32 1e-12, %v4416_v43  ;;  %v4417_v1 = vadd.f32 %v4385_v52, %v10487_v7  ;;  %v4536_v63 = vsel %vm1201_vm1, %v10716_v57, 0.0  ;;  %v10732_v50 = vmul.f32 %v10718_v55, %v4439_v44 }
 0x32f   : > { %v4446_v11 = vadd.f32 1e-12, %v4414_v3  ;;  %v4415_v22 = vadd.f32 %v4383_v51, %v10489_v15  ;;  %4537 = vadd.xlane.f32.xlu0 %v4536_v63  ;;  %v4542_v43 = vsel %vm1201_vm1, %v10724_v24, 0.0  ;;  %v4545_v18 = vsel %vm1201_vm1, %v10741_v17, 0.0 }
 0x330   : > { %7602 = vrsqrt.f32 %v10726_v29  ;;  %v10736_v14 = vadd.f32 1e-12, %v4417_v1  ;;  %v4539_v0 = vsel %vm1201_vm1, %v10732_v50, 0.0 }
 0x331   : > { %7604 = vrsqrt.f32 %v4446_v11  ;;  %v10743_v7 = vadd.f32 1e-12, %v4415_v22  ;;  %4540 = vadd.xlane.f32.xlu1 %v4539_v0  ;;  %v10745_v44 = vpop.f32.mrb[76].mxu1 }
 0x332   : > { %13957 = vst [vmem:[#allocation64_spill] sm:$0xff] %v10745_v44  ;;  %v10747_v3 = vpop.eup %7594  ;;  %7606 = vrsqrt.f32 %v10736_v14  ;;  %v4388_v15 = vmul.f32 %v10745_v44, %v10745_v44  ;;  %v10752_v51 = vpop.f32.mrb[77].mxu1 }
 0x333   : > { %13958 = vst [vmem:[#allocation68_spill] sm:$0xff] %v10747_v3  ;;  %13959 = vst [vmem:[#allocation99_spill] sm:$0xff] %v10752_v51  ;;  %v10756_v21 = vpop.eup %7596  ;;  %7608 = vrsqrt.f32 %v10743_v7  ;;  %v4386_v22 = vmul.f32 %v10752_v51, %v10752_v51  ;;  %v10761_v52 = vpop.f32.mrb[78].mxu1  ;;  %4543 = vadd.xlane.f32.xlu0 %v4542_v43 }
 0x334   : > { %13960 = vst [vmem:[#allocation70_spill] sm:$0xff] %v10756_v21  ;;  %13961 = vst [vmem:[#allocation74_spill] sm:$0xff] %v10761_v52  ;;  %v10763_v1 = vpop.eup %7598  ;;  %v4420_v63 = vadd.f32 %v4388_v15, %v10507_v25  ;;  %v4389_v0 = vmul.f32 %v10761_v52, %v10761_v52  ;;  %v10768_v44 = vpop.f32.mrb[79].mxu1  ;;  %v10773_v26 = vmul.f32 %v10756_v21, %v4442_v49 }
 0x335   : > { %13962 = vst [vmem:[#allocation89_spill] sm:$0xff] %v10763_v1  ;;  %13963 = vst [vmem:[#allocation91_spill] sm:$0xff] %v10768_v44  ;;  %v10775_v13 = vpop.eup %7600  ;;  %v4418_v51 = vadd.f32 %v4386_v22, %v10515_v5  ;;  %v4387_v43 = vmul.f32 %v10768_v44, %v10768_v44  ;;  %4546 = vadd.xlane.f32.xlu1 %v4545_v18  ;;  %v10781_v25 = vmul.f32 %v10747_v3, %v4444_v53 }
 0x336   : > { %13964 = vst [vmem:[#allocation93_spill] sm:$0xff] %v10775_v13  ;;  %v10783_v15 = vadd.f32 1e-12, %v4420_v63  ;;  %v4421_v52 = vadd.f32 %v4389_v0, %v10519_v35  ;;  %v4548_v30 = vsel %vm1201_vm1, %v10773_v26, 0.0  ;;  %v10789_v49 = vmul.f32 %v10775_v13, %v4443_v31 }
 0x337   : > { %v4450_v32 = vadd.f32 1e-12, %v4418_v51  ;;  %v4419_v5 = vadd.f32 %v4387_v43, %v10521_v27  ;;  %4549 = vadd.xlane.f32.xlu0 %v4548_v30  ;;  %v10799_v35 = vmul.f32 %v10763_v1, %v10691_v46 }
 0x338   : > { %7610 = vrsqrt.f32 %v10783_v15  ;;  %v10793_v18 = vadd.f32 1e-12, %v4421_v52  ;;  %v4551_v53 = vsel %vm1201_vm1, %v10789_v49, 0.0  ;;  %v4554_v52 = vsel %vm1201_vm1, %v10781_v25, 0.0 }
 0x339   : > { %7612 = vrsqrt.f32 %v4450_v32  ;;  %v10801_v22 = vadd.f32 1e-12, %v4419_v5  ;;  %4552 = vadd.xlane.f32.xlu1 %v4551_v53  ;;  %v10803_v31 = vpop.f32.mrb[80].mxu1  ;;  %v4557_v44 = vsel %vm1201_vm1, %v10799_v35, 0.0 }
 0x33a   : > { %13965 = vst [vmem:[#allocation96_spill] sm:$0xff] %v10803_v31  ;;  %v10805_v51 = vpop.eup %7602  ;;  %7614 = vrsqrt.f32 %v10793_v18  ;;  %v4392_v30 = vmul.f32 %v10803_v31, %v10803_v31  ;;  %v10810_v27 = vpop.f32.mrb[81].mxu1 }
 0x33b   : > { %13966 = vst [vmem:[#allocation76_spill] sm:$0xff] %v10805_v51  ;;  %13967 = vst [vmem:[#allocation80_spill] sm:$0xff] %v10810_v27  ;;  %v10814_v46 = vpop.eup %7604  ;;  %7616 = vrsqrt.f32 %v10801_v22  ;;  %v4390_v63 = vmul.f32 %v10810_v27, %v10810_v27  ;;  %v10819_v0 = vpop.f32.mrb[82].mxu1  ;;  %4555 = vadd.xlane.f32.xlu0 %v4554_v52 }
 0x33c   : > { %13968 = vst [vmem:[#allocation98_spill] sm:$0xff] %v10814_v46  ;;  %13969 = vst [vmem:[#allocation104_spill] sm:$0xff] %v10819_v0  ;;  %v10821_v43 = vpop.eup %7606  ;;  %v4424_v5 = vadd.f32 %v4392_v30, %v10539_v59  ;;  %v4393_v53 = vmul.f32 %v10819_v0, %v10819_v0  ;;  %v10826_v31 = vpop.f32.mrb[83].mxu1  ;;  %v10831_v9 = vmul.f32 %v10814_v46, %v4446_v11 }
 0x33d   : > { %13970 = vst [vmem:[#allocation105_spill] sm:$0xff] %v10821_v43  ;;  %13971 = vst [vmem:[#allocation82_spill] sm:$0xff] %v10826_v31  ;;  %v10833_v54 = vpop.eup %7608  ;;  %v4422_v27 = vadd.f32 %v4390_v63, %v10547_v4  ;;  %v4391_v52 = vmul.f32 %v10826_v31, %v10826_v31  ;;  %4558 = vadd.xlane.f32.xlu1 %v4557_v44  ;;  %v10840_v59 = vmul.f32 %v10805_v51, %v10726_v29 }
 0x33e   : > { %13972 = vst [vmem:[#allocation4_spill] sm:$0xff] %v10833_v54  ;;  %v10842_v30 = vadd.f32 1e-12, %v4424_v5  ;;  %v4425_v0 = vadd.f32 %v4393_v53, %v10551_v37  ;;  %v4560_v11 = vsel %vm1201_vm1, %v10831_v9, 0.0  ;;  %v10849_v62 = vmul.f32 %v10833_v54, %v10743_v7 }
 0x33f   : > { %v4454_v4 = vadd.f32 1e-12, %v4422_v27  ;;  %v4423_v63 = vadd.f32 %v4391_v52, %v10553_v20  ;;  %4561 = vadd.xlane.f32.xlu0 %v4560_v11  ;;  %v10859_v37 = vmul.f32 %v10821_v43, %v10736_v14  ;;  %v4566_v53 = vsel %vm1201_vm1, %v10840_v59, 0.0 }
 0x340   : > { %7618 = vrsqrt.f32 %v10842_v30  ;;  %v10853_v44 = vadd.f32 1e-12, %v4425_v0  ;;  %v4563_v29 = vsel %vm1201_vm1, %v10849_v62, 0.0 }
 0x341   : > { %7620 = vrsqrt.f32 %v4454_v4  ;;  %v10861_v5 = vadd.f32 1e-12, %v4423_v63  ;;  %4564 = vadd.xlane.f32.xlu1 %v4563_v29  ;;  %v10863_v7 = vpop.f32.mrb[84].mxu1  ;;  %v4569_v43 = vsel %vm1201_vm1, %v10859_v37, 0.0 }
 0x342   : > { %13973 = vst [vmem:[#allocation86_spill] sm:$0xff] %v10863_v7  ;;  %v10865_v27 = vpop.eup %7610  ;;  %7622 = vrsqrt.f32 %v10853_v44  ;;  %v4396_v20 = vmul.f32 %v10863_v7, %v10863_v7  ;;  %v10870_v0 = vpop.f32.mrb[85].mxu1 }
 0x343   : > { %13974 = vst [vmem:[#allocation88_spill] sm:$0xff] %v10865_v27  ;;  %13975 = vst [vmem:[#allocation90_spill] sm:$0xff] %v10870_v0  ;;  %v10874_v14 = vpop.eup %7612  ;;  %7624 = vrsqrt.f32 %v10861_v5  ;;  %v4394_v52 = vmul.f32 %v10870_v0, %v10870_v0  ;;  %v10879_v11 = vpop.f32.mrb[86].mxu1  ;;  %4567 = vadd.xlane.f32.xlu0 %v4566_v53 }
 0x344   : > { %13976 = vst [vmem:[#allocation92_spill] sm:$0xff] %v10874_v14  ;;  %13977 = vst [vmem:[#allocation95_spill] sm:$0xff] %v10879_v11  ;;  %v10881_v63 = vpop.eup %7614  ;;  %v4428_v29 = vadd.f32 %v4396_v20, %v10571_v56  ;;  %v4397_v7 = vmul.f32 %v10879_v11, %v10879_v11  ;;  %v10886_v31 = vpop.f32.mrb[87].mxu1  ;;  %v10891_v51 = vmul.f32 %v10874_v14, %v4450_v32 }
 0x345   : > { %13978 = vst [vmem:[#allocation97_spill] sm:$0xff] %v10881_v63  ;;  %13979 = vst [vmem:[#allocation100_spill] sm:$0xff] %v10886_v31  ;;  %v10893_v10 = vpop.eup %7616  ;;  %v4426_v0 = vadd.f32 %v4394_v52, %v10579_v45  ;;  %v4395_v53 = vmul.f32 %v10886_v31, %v10886_v31  ;;  %4570 = vadd.xlane.f32.xlu1 %v4569_v43  ;;  %v10900_v56 = vmul.f32 %v10865_v27, %v10783_v15 }
 0x346   : > { %13980 = vst [vmem:[#allocation101_spill] sm:$0xff] %v10893_v10  ;;  %v10902_v20 = vadd.f32 1e-12, %v4428_v29  ;;  %v4429_v11 = vadd.f32 %v4397_v7, %v10583_v47  ;;  %v4572_v32 = vsel %vm1201_vm1, %v10891_v51, 0.0  ;;  %v10909_v14 = vmul.f32 %v10893_v10, %v10801_v22 }
 0x347   : > { %v4458_v45 = vadd.f32 1e-12, %v4426_v0  ;;  %v4427_v52 = vadd.f32 %v4395_v53, %v10585_v48  ;;  %4573 = vadd.xlane.f32.xlu0 %v4572_v32  ;;  %v10919_v47 = vmul.f32 %v10881_v63, %v10793_v18  ;;  %v4578_v29 = vsel %vm1201_vm1, %v10900_v56, 0.0 }
 0x348   : > { %7626 = vrsqrt.f32 %v10902_v20  ;;  %v10913_v43 = vadd.f32 1e-12, %v4429_v11  ;;  %v4575_v15 = vsel %vm1201_vm1, %v10909_v14, 0.0 }
 0x349   : > { %7628 = vrsqrt.f32 %v4458_v45  ;;  %v10921_v7 = vadd.f32 1e-12, %v4427_v52  ;;  %4576 = vadd.xlane.f32.xlu1 %v4575_v15  ;;  %v10923_v22 = vpop.f32.mrb[88].mxu1  ;;  %v4581_v63 = vsel %vm1201_vm1, %v10919_v47, 0.0 }
 0x34a   : > { %13981 = vst [vmem:[#allocation102_spill] sm:$0xff] %v10923_v22  ;;  %v10925_v0 = vpop.eup %7618  ;;  %7630 = vrsqrt.f32 %v10913_v43  ;;  %v4400_v48 = vmul.f32 %v10923_v22, %v10923_v22  ;;  %v10930_v11 = vpop.f32.mrb[89].mxu1 }
 0x34b   : > { %13982 = vst [vmem:[#allocation103_spill] sm:$0xff] %v10925_v0  ;;  %13983 = vst [vmem:[#allocation106_spill] sm:$0xff] %v10930_v11  ;;  %v10934_v18 = vpop.eup %7620  ;;  %7632 = vrsqrt.f32 %v10921_v7  ;;  %v4398_v53 = vmul.f32 %v10930_v11, %v10930_v11  ;;  %v10939_v32 = vpop.f32.mrb[90].mxu1  ;;  %4579 = vadd.xlane.f32.xlu0 %v4578_v29 }
 0x34c   : > { %13984 = vst [vmem:[#allocation107_spill] sm:$0xff] %v10934_v18  ;;  %13985 = vst [vmem:[#allocation108_spill] sm:$0xff] %v10939_v32  ;;  %v10941_v52 = vpop.eup %7622  ;;  %v4432_v15 = vadd.f32 %v4400_v48, %v10603_v33  ;;  %v4401_v22 = vmul.f32 %v10939_v32, %v10939_v32  ;;  %v10946_v31 = vpop.f32.mrb[91].mxu1  ;;  %v10951_v27 = vmul.f32 %v10934_v18, %v4454_v4 }
 0x34d   : > { %13986 = vst [vmem:[#allocation113_spill] sm:$0xff] %v10941_v52  ;;  %13987 = vst [vmem:[#allocation114_spill] sm:$0xff] %v10946_v31  ;;  %v10953_v10 = vpop.eup %7624  ;;  %v4430_v11 = vadd.f32 %v4398_v53, %v10611_v6  ;;  %v4399_v29 = vmul.f32 %v10946_v31, %v10946_v31  ;;  %4582 = vadd.xlane.f32.xlu1 %v4581_v63  ;;  %v10960_v33 = vmul.f32 %v10925_v0, %v10842_v30 }
 0x34e   : > { %13988 = vst [vmem:[#allocation115_spill] sm:$0xff] %v10953_v10  ;;  %v10962_v48 = vadd.f32 1e-12, %v4432_v15  ;;  %v4433_v32 = vadd.f32 %v4401_v22, %v10615_v34  ;;  %v4584_v4 = vsel %vm1201_vm1, %v10951_v27, 0.0  ;;  %v10969_v18 = vmul.f32 %v10953_v10, %v10861_v5 }
 0x34f   : > { %v4462_v6 = vadd.f32 1e-12, %v4430_v11  ;;  %v4431_v53 = vadd.f32 %v4399_v29, %v10617_v40  ;;  %4585 = vadd.xlane.f32.xlu0 %v4584_v4  ;;  %v10977_v34 = vmul.f32 %v10941_v52, %v10853_v44 }
 0x350   : > { %7634 = vrsqrt.f32 %v10962_v48  ;;  %v4465_v63 = vadd.f32 1e-12, %v4433_v32  ;;  %v4587_v30 = vsel %vm1201_vm1, %v10969_v18, 0.0  ;;  %v4590_v32 = vsel %vm1201_vm1, %v10960_v33, 0.0 }
 0x351   : > { %7636 = vrsqrt.f32 %v4462_v6  ;;  %v4463_v22 = vadd.f32 1e-12, %v4431_v53  ;;  %4588 = vadd.xlane.f32.xlu1 %v4587_v30  ;;  %v10979_v15 = vpop.f32.mrb[92].mxu1  ;;  %v4593_v52 = vsel %vm1201_vm1, %v10977_v34, 0.0 }
 0x352   : > { %13989 = vst [vmem:[#allocation116_spill] sm:$0xff] %v10979_v15  ;;  %v10981_v5 = vpop.eup %7626  ;;  %7638 = vrsqrt.f32 %v4465_v63  ;;  %v4404_v40 = vmul.f32 %v10979_v15, %v10979_v15  ;;  %v10985_v11 = vpop.f32.mrb[93].mxu1 }
 0x353   : > { %13990 = vst [vmem:[#allocation117_spill] sm:$0xff] %v10981_v5  ;;  %13991 = vst [vmem:[#allocation118_spill] sm:$0xff] %v10985_v11  ;;  %v10989_v29 = vpop.eup %7628  ;;  %7640 = vrsqrt.f32 %v4463_v22  ;;  %v4402_v44 = vmul.f32 %v10985_v11, %v10985_v11  ;;  %v10993_v4 = vpop.f32.mrb[94].mxu1  ;;  %4591 = vadd.xlane.f32.xlu0 %v4590_v32 }
 0x354   : > { %13992 = vst [vmem:[#allocation119_spill] sm:$0xff] %v10989_v29  ;;  %13993 = vst [vmem:[#allocation120_spill] sm:$0xff] %v10993_v4  ;;  %v10995_v53 = vpop.eup %7630  ;;  %v4436_v30 = vadd.f32 %v4404_v40, %v10635_v28  ;;  %v4405_v15 = vmul.f32 %v10993_v4, %v10993_v4  ;;  %v11000_v31 = vpop.f32.mrb[95].mxu1  ;;  %v11005_v0 = vmul.f32 %v10989_v29, %v4458_v45 }
 0x355   : > { %13994 = vst [vmem:[#allocation121_spill] sm:$0xff] %v10995_v53  ;;  %13995 = vst [vmem:[#allocation122_spill] sm:$0xff] %v11000_v31  ;;  %v11007_v10 = vpop.eup %7632  ;;  %v4434_v11 = vadd.f32 %v4402_v44, %v10643_v38  ;;  %v4403_v32 = vmul.f32 %v11000_v31, %v11000_v31  ;;  %4594 = vadd.xlane.f32.xlu1 %v4593_v52  ;;  %v11014_v28 = vmul.f32 %v10981_v5, %v10902_v20 }
 0x356   : > { %13996 = vst [vmem:[#allocation123_spill] sm:$0xff] %v11007_v10  ;;  %v4468_v40 = vadd.f32 1e-12, %v4436_v30  ;;  %v4437_v4 = vadd.f32 %v4405_v15, %v10647_v2  ;;  %v4596_v54 = vsel %vm1201_vm1, %v11005_v0, 0.0  ;;  %v11021_v45 = vmul.f32 %v11007_v10, %v10921_v7 }
 0x357   : > { %v4466_v29 = vadd.f32 1e-12, %v4434_v11  ;;  %v4435_v38 = vadd.f32 %v4403_v32, %v10649_v39  ;;  %4597 = vadd.xlane.f32.xlu0 %v4596_v54  ;;  %v11028_v44 = vmul.f32 %v10995_v53, %v10913_v43  ;;  %v4602_v7 = vsel %vm1201_vm1, %v11014_v28, 0.0 }
 0x358   : > { %7642 = vrsqrt.f32 %v4468_v40  ;;  %v4469_v52 = vadd.f32 1e-12, %v4437_v4  ;;  %v4599_v20 = vsel %vm1201_vm1, %v11021_v45, 0.0 }
 0x359   : > { %7644 = vrsqrt.f32 %v4466_v29  ;;  %v4467_v2 = vadd.f32 1e-12, %v4435_v38  ;;  %4600 = vadd.xlane.f32.xlu1 %v4599_v20  ;;  %v4605_v11 = vsel %vm1201_vm1, %v11028_v44, 0.0 }
 0x35a   : > { %v11030_v15 = vpop.eup %7634  ;;  %7646 = vrsqrt.f32 %v4469_v52 }
 0x35b   : > { %13997 = vst [vmem:[#allocation124_spill] sm:$0xff] %v11030_v15  ;;  %v11034_v39 = vpop.eup %7636  ;;  %7648 = vrsqrt.f32 %v4467_v2  ;;  %4603 = vadd.xlane.f32.xlu0 %v4602_v7  ;;  %v11052_v38 = vmul.f32 %v11030_v15, %v10962_v48 }
 0x35c   : > { %13998 = vst [vmem:[#allocation125_spill] sm:$0xff] %v11034_v39  ;;  %v11036_v54 = vpop.eup %7638  ;;  %v11041_v43 = vmul.f32 %v11034_v39, %v4462_v6 }
 0x35d   : > { %13999 = vst [vmem:[#allocation126_spill] sm:$0xff] %v11036_v54  ;;  %v11043_v4 = vpop.eup %7640  ;;  %4606 = vadd.xlane.f32.xlu1 %v4605_v11  ;;  %v11057_v6 = vmul.f32 %v11036_v54, %v4465_v63  ;;  %v4614_v11 = vsel %vm1201_vm1, %v11052_v38, 0.0 }
 0x35e   : > { %14000 = vst [vmem:[#allocation127_spill] sm:$0xff] %v11043_v4  ;;  %v4608_v30 = vsel %vm1201_vm1, %v11041_v43, 0.0  ;;  %v11048_v32 = vmul.f32 %v11043_v4, %v4463_v22 }
 0x35f   : > { %4609 = vadd.xlane.f32.xlu0 %v4608_v30  ;;  %v4617_v30 = vsel %vm1201_vm1, %v11057_v6, 0.0 }
 0x360   : > { %v4611_v20 = vsel %vm1201_vm1, %v11048_v32, 0.0 }
 0x361   : > { %4612 = vadd.xlane.f32.xlu1 %v4611_v20 }
 0x362   : > { %v11059_v7 = vpop.eup %7642  ;;  %v7027_v31 = vpop.f32.mrb[0].mxu0 }
 0x363   : > { %14001 = vst [vmem:[#allocation128_spill] sm:$0xff] %v11059_v7  ;;  %v11063_v22 = vpop.eup %7644  ;;  %4615 = vadd.xlane.f32.xlu0 %v4614_v11  ;;  %v3561_v4 = vmul.f32 %v7027_v31, %v7027_v31  ;;  %v2815_v48 = vpop.f32.mrb[1].mxu0  ;;  %v11075_v53 = vmul.f32 %v11059_v7, %v4468_v40 }
 0x364   : > { %14002 = vst [vmem:[#allocation129_spill] sm:$0xff] %v11063_v22  ;;  %v11065_v15 = vpop.eup %7646  ;;  %v11070_v63 = vmul.f32 %v11063_v22, %v4466_v29  ;;  %v3559_v20 = vmul.f32 %v2815_v48, %v2815_v48  ;;  %v7028_v54 = vpop.f32.mrb[2].mxu0 }
 0x365   : > { %14003 = vst [vmem:[#allocation130_spill] sm:$0xff] %v11065_v15  ;;  %v11072_v39 = vpop.eup %7648  ;;  %4618 = vadd.xlane.f32.xlu1 %v4617_v30  ;;  %v3593_v5 = vadd.f32 1e-12, %v3561_v4  ;;  %v3562_v11 = vmul.f32 %v7028_v54, %v7028_v54  ;;  %v2818_v10 = vpop.f32.mrb[3].mxu0  ;;  %v11085_v40 = vmul.f32 %v11065_v15, %v4469_v52  ;;  %v4626_v7 = vsel %vm1201_vm1, %v11075_v53, 0.0 }
 0x366   : > { %14004 = vst [vmem:[#allocation131_spill] sm:$0xff] %v11072_v39  ;;  %v4620_v46 = vsel %vm1201_vm1, %v11070_v63, 0.0  ;;  %v11080_v8 = vmul.f32 %v11072_v39, %v4467_v2  ;;  %v3591_v61 = vadd.f32 1e-12, %v3559_v20  ;;  %v3560_v29 = vmul.f32 %v2818_v10, %v2818_v10 }
 0x367   : > { %4621 = vadd.xlane.f32.xlu0 %v4620_v46  ;;  %7650 = vrsqrt.f32 %v3593_v5  ;;  %v3594_v22 = vadd.f32 1e-12, %v3562_v11  ;;  %v4629_v46 = vsel %vm1201_vm1, %v11085_v40, 0.0 }
 0x368   : > { %v4623_v30 = vsel %vm1201_vm1, %v11080_v8, 0.0  ;;  %7652 = vrsqrt.f32 %v3591_v61  ;;  %v3592_v4 = vadd.f32 1e-12, %v3560_v29 }
 0x369   : > { %4624 = vadd.xlane.f32.xlu1 %v4623_v30  ;;  %7654 = vrsqrt.f32 %v3594_v22 }
 0x36a   : > { %7656 = vrsqrt.f32 %v3592_v4 }
 0x36b   : > { %4627 = vadd.xlane.f32.xlu0 %v4626_v7  ;;  %v7031_v2 = vpop.f32.mrb[4].mxu0 }
 0x36c   : > { %v3565_v20 = vmul.f32 %v7031_v2, %v7031_v2  ;;  %v2831_v11 = vpop.f32.mrb[5].mxu0 }
 0x36d   : > { %4630 = vadd.xlane.f32.xlu1 %v4629_v46  ;;  %v3563_v39 = vmul.f32 %v2831_v11, %v2831_v11  ;;  %v7032_v1 = vpop.f32.mrb[6].mxu0 }
 0x36e   : > { %v11091_v52 = vadd.f32 1e-12, %v3565_v20  ;;  %v3566_v15 = vmul.f32 %v7032_v1, %v7032_v1  ;;  %v2834_v29 = vpop.f32.mrb[7].mxu0 }
 0x36f   : > { %v3595_v30 = vadd.f32 1e-12, %v3563_v39  ;;  %v3564_v3 = vmul.f32 %v2834_v29, %v2834_v29 }
 0x370   : > { %7658 = vrsqrt.f32 %v11091_v52  ;;  %v11094_v36 = vadd.f32 1e-12, %v3566_v15 }
 0x371   : > { %v7651_v23 = vpop.eup %7650  ;;  %7660 = vrsqrt.f32 %v3595_v30  ;;  %v3596_v46 = vadd.f32 1e-12, %v3564_v3 }
 0x372   : > { %v7653_v7 = vpop.eup %7652  ;;  %v11096_v13 = vmul.f32 %v7651_v23, %v7027_v31  ;;  %7662 = vrsqrt.f32 %v11094_v36  ;;  %v11111_v3 = vmul.f32 %v7651_v23, %v3593_v5 }
 0x373   : > { %v7655_v21 = vpop.eup %7654  ;;  %v11098_v12 = vmul.f32 %v7653_v7, %v2815_v48  ;;  %v11101_v20 = vmul.f32 %v7653_v7, %v3591_v61  ;;  %7664 = vrsqrt.f32 %v3596_v46 }
 0x374   : > { %14005 = vst [vmem:[#allocation132_spill] sm:$0xff] %v11096_v13  ;;  %v7657_v39 = vpop.eup %7656  ;;  %v11103_v58 = vmul.f32 %v7655_v21, %v7028_v54  ;;  %14011 = vst [vmem:[#allocation138_spill] sm:$0xff] %v11111_v3  ;;  %v11115_v13 = vmul.f32 %v7655_v21, %v3594_v22 }
 0x375   : > { %14006 = vst [vmem:[#allocation133_spill] sm:$0xff] %v11098_v12  ;;  %14007 = vst [vmem:[#allocation134_spill] sm:$0xff] %v11101_v20  ;;  %v11105_v19 = vmul.f32 %v7657_v39, %v2818_v10  ;;  %v3690_v31 = vsel %vm3689_vm2, %v11101_v20, 0.0  ;;  %v11109_v15 = vmul.f32 %v7657_v39, %v3592_v4  ;;  %v7035_v61 = vpop.f32.mrb[8].mxu0  ;;  %v3696_v10 = vsel %vm3689_vm2, %v11111_v3, 0.0 }
 0x376   : > { %14008 = vst [vmem:[#allocation135_spill] sm:$0xff] %v11103_v58  ;;  %3691 = vadd.xlane.f32.xlu0 %v3690_v31  ;;  %14012 = vst [vmem:[#allocation139_spill] sm:$0xff] %v11115_v13  ;;  %v3569_v54 = vmul.f32 %v7035_v61, %v7035_v61  ;;  %v2847_v7 = vpop.f32.mrb[9].mxu0  ;;  %v3699_v21 = vsel %vm3689_vm2, %v11115_v13, 0.0 }
 0x377   : > { %14009 = vst [vmem:[#allocation136_spill] sm:$0xff] %v11105_v19  ;;  %14010 = vst [vmem:[#allocation137_spill] sm:$0xff] %v11109_v15  ;;  %v3693_v48 = vsel %vm3689_vm2, %v11109_v15, 0.0  ;;  %v3567_v58 = vmul.f32 %v2847_v7, %v2847_v7  ;;  %v7036_v19 = vpop.f32.mrb[10].mxu0 }
 0x378   : > { %3694 = vadd.xlane.f32.xlu1 %v3693_v48  ;;  %v11121_v23 = vadd.f32 1e-12, %v3569_v54  ;;  %v3570_v5 = vmul.f32 %v7036_v19, %v7036_v19  ;;  %v2850_v39 = vpop.f32.mrb[11].mxu0 }
 0x379   : > { %v11128_v48 = vadd.f32 1e-12, %v3567_v58  ;;  %v3568_v12 = vmul.f32 %v2850_v39, %v2850_v39 }
 0x37a   : > { %3697 = vadd.xlane.f32.xlu0 %v3696_v10  ;;  %v11119_v4 = vpop.eup %7658  ;;  %7666 = vrsqrt.f32 %v11121_v23  ;;  %v11135_v54 = vadd.f32 1e-12, %v3570_v5 }
 0x37b   : > { %v7661_v22 = vpop.eup %7660  ;;  %v11126_v31 = vmul.f32 %v11119_v4, %v7031_v2  ;;  %7668 = vrsqrt.f32 %v11128_v48  ;;  %v11143_v58 = vadd.f32 1e-12, %v3568_v12 }
 0x37c   : > { %3700 = vadd.xlane.f32.xlu1 %v3699_v21  ;;  %v11130_v55 = vpop.eup %7662  ;;  %v11132_v10 = vmul.f32 %v7661_v22, %v2831_v11  ;;  %14015 = vst [vmem:[#allocation142_spill] sm:$0xff] %v11135_v54  ;;  %v11137_v16 = vmul.f32 %v7661_v22, %v3595_v30  ;;  %7670 = vrsqrt.f32 %v11135_v54 }
 0x37d   : > { %14013 = vst [vmem:[#allocation140_spill] sm:$0xff] %v11126_v31  ;;  %v7665_v60 = vpop.eup %7664  ;;  %v11140_v42 = vmul.f32 %v11130_v55, %v7032_v1  ;;  %7672 = vrsqrt.f32 %v11143_v58  ;;  %v7039_v30 = vpop.f32.mrb[12].mxu0 }
 0x37e   : > { %14014 = vst [vmem:[#allocation141_spill] sm:$0xff] %v11132_v10  ;;  %14016 = vst [vmem:[#allocation143_spill] sm:$0xff] %v11137_v16  ;;  %v11145_v2 = vmul.f32 %v7665_v60, %v2834_v29  ;;  %v3702_v11 = vsel %vm3689_vm2, %v11137_v16, 0.0  ;;  %v11150_v21 = vmul.f32 %v7665_v60, %v3596_v46  ;;  %v3573_v5 = vmul.f32 %v7039_v30, %v7039_v30  ;;  %v2863_v12 = vpop.f32.mrb[13].mxu0 }
 0x37f   : > { %14017 = vst [vmem:[#allocation144_spill] sm:$0xff] %v11140_v42  ;;  %3703 = vadd.xlane.f32.xlu0 %v3702_v11  ;;  %v3571_v22 = vmul.f32 %v2863_v12, %v2863_v12  ;;  %v7040_v29 = vpop.f32.mrb[14].mxu0 }
 0x380   : > { %14018 = vst [vmem:[#allocation145_spill] sm:$0xff] %v11145_v2  ;;  %14019 = vst [vmem:[#allocation146_spill] sm:$0xff] %v11150_v21  ;;  %v3705_v1 = vsel %vm3689_vm2, %v11150_v21, 0.0  ;;  %v11155_v42 = vadd.f32 1e-12, %v3573_v5  ;;  %v3574_v31 = vmul.f32 %v7040_v29, %v7040_v29  ;;  %v2866_v2 = vpop.f32.mrb[15].mxu0 }
 0x381   : > { %3706 = vadd.xlane.f32.xlu1 %v3705_v1  ;;  %v11157_v10 = vadd.f32 1e-12, %v3571_v22  ;;  %v3572_v60 = vmul.f32 %v2866_v2, %v2866_v2 }
 0x382   : > { %14020 = vst [vmem:[#allocation147_spill] sm:$0xff] %v11155_v42  ;;  %7674 = vrsqrt.f32 %v11155_v42  ;;  %v11162_v11 = vadd.f32 1e-12, %v3574_v31 }
 0x383   : > { %14021 = vst [vmem:[#allocation148_spill] sm:$0xff] %v11157_v10  ;;  %7676 = vrsqrt.f32 %v11157_v10  ;;  %v11170_v5 = vadd.f32 1e-12, %v3572_v60 }
 0x384   : > { %v11159_v46 = vpop.eup %7666  ;;  %14022 = vst [vmem:[#allocation149_spill] sm:$0xff] %v11162_v11  ;;  %7678 = vrsqrt.f32 %v11162_v11 }
 0x385   : > { %v11164_v41 = vpop.eup %7668  ;;  %v11167_v1 = vmul.f32 %v11159_v46, %v7035_v61  ;;  %14024 = vst [vmem:[#allocation151_spill] sm:$0xff] %v11170_v5  ;;  %7680 = vrsqrt.f32 %v11170_v5 }
 0x386   : > { %v11172_v21 = vpop.eup %7670  ;;  %v11175_v22 = vmul.f32 %v11164_v41, %v2847_v7 }
 0x387   : > { %14023 = vst [vmem:[#allocation150_spill] sm:$0xff] %v11167_v1  ;;  %14025 = vst [vmem:[#allocation152_spill] sm:$0xff] %v11172_v21  ;;  %v11178_v16 = vpop.eup %7672  ;;  %v11181_v31 = vmul.f32 %v11172_v21, %v7036_v19 }
 0x388   : > { %14026 = vst [vmem:[#allocation153_spill] sm:$0xff] %v11175_v22  ;;  %v11185_v61 = vmul.f32 %v11178_v16, %v2850_v39  ;;  %v7043_v1 = vpop.f32.mrb[16].mxu0 }
 0x389   : > { %14027 = vst [vmem:[#allocation154_spill] sm:$0xff] %v11181_v31  ;;  %v3577_v60 = vmul.f32 %v7043_v1, %v7043_v1  ;;  %v2879_v13 = vpop.f32.mrb[17].mxu0 }
 0x38a   : > { %14028 = vst [vmem:[#allocation155_spill] sm:$0xff] %v11185_v61  ;;  %v3575_v3 = vmul.f32 %v2879_v13, %v2879_v13  ;;  %v7044_v15 = vpop.f32.mrb[18].mxu0 }
 0x38b   : > { %v11187_v20 = vadd.f32 1e-12, %v3577_v60  ;;  %v3578_v7 = vmul.f32 %v7044_v15, %v7044_v15  ;;  %v2882_v22 = vpop.f32.mrb[19].mxu0 }
 0x38c   : > { %v11189_v11 = vpop.eup %7674  ;;  %v11191_v42 = vadd.f32 1e-12, %v3575_v3  ;;  %v3576_v19 = vmul.f32 %v2882_v22, %v2882_v22 }
 0x38d   : > { %14029 = vst [vmem:[#allocation156_spill] sm:$0xff] %v11187_v20  ;;  %14030 = vst [vmem:[#allocation157_spill] sm:$0xff] %v11189_v11  ;;  %v11193_v31 = vpop.eup %7676  ;;  %v11196_v5 = vmul.f32 %v11189_v11, %v7039_v30  ;;  %7682 = vrsqrt.f32 %v11187_v20  ;;  %v11199_v39 = vadd.f32 1e-12, %v3578_v7 }
 0x38e   : > { %14031 = vst [vmem:[#allocation158_spill] sm:$0xff] %v11191_v42  ;;  %14032 = vst [vmem:[#allocation159_spill] sm:$0xff] %v11193_v31  ;;  %v11201_v61 = vpop.eup %7678  ;;  %v11204_v60 = vmul.f32 %v11193_v31, %v2863_v12  ;;  %7684 = vrsqrt.f32 %v11191_v42  ;;  %v11207_v10 = vadd.f32 1e-12, %v3576_v19 }
 0x38f   : > { %14033 = vst [vmem:[#allocation160_spill] sm:$0xff] %v11196_v5  ;;  %14034 = vst [vmem:[#allocation161_spill] sm:$0xff] %v11199_v39  ;;  %v11209_v3 = vpop.eup %7680  ;;  %v11212_v21 = vmul.f32 %v11201_v61, %v7040_v29  ;;  %7686 = vrsqrt.f32 %v11199_v39 }
 0x390   : > { %14035 = vst [vmem:[#allocation162_spill] sm:$0xff] %v11201_v61  ;;  %14036 = vst [vmem:[#allocation163_spill] sm:$0xff] %v11204_v60  ;;  %v11216_v30 = vmul.f32 %v11209_v3, %v2866_v2  ;;  %7688 = vrsqrt.f32 %v11207_v10  ;;  %v7047_v7 = vpop.f32.mrb[20].mxu0 }
 0x391   : > { %14037 = vst [vmem:[#allocation164_spill] sm:$0xff] %v11207_v10  ;;  %14038 = vst [vmem:[#allocation165_spill] sm:$0xff] %v11209_v3  ;;  %v3581_v5 = vmul.f32 %v7047_v7, %v7047_v7  ;;  %v2895_v12 = vpop.f32.mrb[21].mxu0 }
 0x392   : > { %14039 = vst [vmem:[#allocation166_spill] sm:$0xff] %v11212_v21  ;;  %14040 = vst [vmem:[#allocation167_spill] sm:$0xff] %v11216_v30  ;;  %v3579_v60 = vmul.f32 %v2895_v12, %v2895_v12  ;;  %v7048_v20 = vpop.f32.mrb[22].mxu0 }
 0x393   : > { %v11219_v42 = vadd.f32 1e-12, %v3581_v5  ;;  %v3582_v19 = vmul.f32 %v7048_v20, %v7048_v20  ;;  %v2898_v11 = vpop.f32.mrb[23].mxu0 }
 0x394   : > { %v11221_v31 = vadd.f32 1e-12, %v3579_v60  ;;  %v3580_v29 = vmul.f32 %v2898_v11, %v2898_v11 }
 0x395   : > { %14041 = vst [vmem:[#allocation168_spill] sm:$0xff] %v11219_v42  ;;  %7690 = vrsqrt.f32 %v11219_v42  ;;  %v11224_v21 = vadd.f32 1e-12, %v3582_v19 }
 0x396   : > { %14042 = vst [vmem:[#allocation169_spill] sm:$0xff] %v11221_v31  ;;  %7692 = vrsqrt.f32 %v11221_v31  ;;  %v11227_v2 = vadd.f32 1e-12, %v3580_v29 }
 0x397   : > { %14043 = vst [vmem:[#allocation170_spill] sm:$0xff] %v11224_v21  ;;  %v11229_v30 = vpop.eup %7682  ;;  %7694 = vrsqrt.f32 %v11224_v21 }
 0x398   : > { %14044 = vst [vmem:[#allocation171_spill] sm:$0xff] %v11227_v2  ;;  %14045 = vst [vmem:[#allocation172_spill] sm:$0xff] %v11229_v30  ;;  %v11232_v39 = vpop.eup %7684  ;;  %v11235_v5 = vmul.f32 %v11229_v30, %v7043_v1  ;;  %7696 = vrsqrt.f32 %v11227_v2  ;;  %v7051_v60 = vpop.f32.mrb[24].mxu0 }
 0x399   : > { %14046 = vst [vmem:[#allocation173_spill] sm:$0xff] %v11232_v39  ;;  %v11238_v10 = vpop.eup %7686  ;;  %v11241_v19 = vmul.f32 %v11232_v39, %v2879_v13  ;;  %v3585_v42 = vmul.f32 %v7051_v60, %v7051_v60  ;;  %v2911_v29 = vpop.f32.mrb[25].mxu0 }
 0x39a   : > { %14047 = vst [vmem:[#allocation174_spill] sm:$0xff] %v11235_v5  ;;  %14048 = vst [vmem:[#allocation175_spill] sm:$0xff] %v11238_v10  ;;  %v11243_v31 = vpop.eup %7688  ;;  %v11246_v61 = vmul.f32 %v11238_v10, %v7044_v15  ;;  %v3583_v21 = vmul.f32 %v2911_v29, %v2911_v29  ;;  %v7052_v3 = vpop.f32.mrb[26].mxu0 }
 0x39b   : > { %14049 = vst [vmem:[#allocation176_spill] sm:$0xff] %v11241_v19  ;;  %14050 = vst [vmem:[#allocation177_spill] sm:$0xff] %v11243_v31  ;;  %v11249_v1 = vmul.f32 %v11243_v31, %v2882_v22  ;;  %v11251_v5 = vadd.f32 1e-12, %v3585_v42  ;;  %v3586_v2 = vmul.f32 %v7052_v3, %v7052_v3  ;;  %v2914_v30 = vpop.f32.mrb[27].mxu0 }
 0x39c   : > { %14051 = vst [vmem:[#allocation178_spill] sm:$0xff] %v11246_v61  ;;  %v11253_v54 = vadd.f32 1e-12, %v3583_v21  ;;  %v3584_v13 = vmul.f32 %v2914_v30, %v2914_v30 }
 0x39d   : > { %14052 = vst [vmem:[#allocation179_spill] sm:$0xff] %v11249_v1  ;;  %14053 = vst [vmem:[#allocation180_spill] sm:$0xff] %v11251_v5  ;;  %7698 = vrsqrt.f32 %v11251_v5  ;;  %v11256_v19 = vadd.f32 1e-12, %v3586_v2 }
 0x39e   : > { %14054 = vst [vmem:[#allocation181_spill] sm:$0xff] %v11253_v54  ;;  %7700 = vrsqrt.f32 %v11253_v54  ;;  %v11259_v15 = vadd.f32 1e-12, %v3584_v13 }
 0x39f   : > { %14055 = vst [vmem:[#allocation182_spill] sm:$0xff] %v11256_v19  ;;  %v11261_v61 = vpop.eup %7690  ;;  %7702 = vrsqrt.f32 %v11256_v19 }
 0x3a0   : > { %14056 = vst [vmem:[#allocation183_spill] sm:$0xff] %v11259_v15  ;;  %14057 = vst [vmem:[#allocation184_spill] sm:$0xff] %v11261_v61  ;;  %v11264_v22 = vpop.eup %7692  ;;  %v11267_v42 = vmul.f32 %v11261_v61, %v7047_v7  ;;  %7704 = vrsqrt.f32 %v11259_v15  ;;  %v7055_v21 = vpop.f32.mrb[28].mxu0 }
 0x3a1   : > { %v11270_v1 = vpop.eup %7694  ;;  %v11273_v2 = vmul.f32 %v11264_v22, %v2895_v12  ;;  %v3589_v5 = vmul.f32 %v7055_v21, %v7055_v21  ;;  %v2927_v13 = vpop.f32.mrb[29].mxu0 }
 0x3a2   : > { %14058 = vst [vmem:[#allocation185_spill] sm:$0xff] %v11267_v42  ;;  %v11275_v54 = vpop.eup %7696  ;;  %v11278_v10 = vmul.f32 %v11270_v1, %v7048_v20  ;;  %v3587_v19 = vmul.f32 %v2927_v13, %v2927_v13  ;;  %v7056_v31 = vpop.f32.mrb[30].mxu0 }
 0x3a3   : > { %14059 = vst [vmem:[#allocation186_spill] sm:$0xff] %v11273_v2  ;;  %v11281_v7 = vmul.f32 %v11275_v54, %v2898_v11  ;;  %v11283_v42 = vadd.f32 1e-12, %v3589_v5  ;;  %v3590_v15 = vmul.f32 %v7056_v31, %v7056_v31  ;;  %v2930_v61 = vpop.f32.mrb[31].mxu0 }
 0x3a4   : > { %14060 = vst [vmem:[#allocation187_spill] sm:$0xff] %v11278_v10  ;;  %v11285_v39 = vadd.f32 1e-12, %v3587_v19  ;;  %v3588_v12 = vmul.f32 %v2930_v61, %v2930_v61 }
 0x3a5   : > { %14061 = vst [vmem:[#allocation188_spill] sm:$0xff] %v11281_v7  ;;  %14062 = vst [vmem:[#allocation189_spill] sm:$0xff] %v11283_v42  ;;  %7706 = vrsqrt.f32 %v11283_v42  ;;  %v11288_v2 = vadd.f32 1e-12, %v3590_v15 }
 0x3a6   : > { %14063 = vst [vmem:[#allocation190_spill] sm:$0xff] %v11285_v39  ;;  %7708 = vrsqrt.f32 %v11285_v39  ;;  %v11291_v20 = vadd.f32 1e-12, %v3588_v12 }
 0x3a7   : > { %14064 = vst [vmem:[#allocation191_spill] sm:$0xff] %v11288_v2  ;;  %v11293_v10 = vpop.eup %7698  ;;  %7710 = vrsqrt.f32 %v11288_v2 }
 0x3a8   : > { %14065 = vst [vmem:[#allocation192_spill] sm:$0xff] %v11291_v20  ;;  %14066 = vst [vmem:[#allocation193_spill] sm:$0xff] %v11293_v10  ;;  %v11296_v11 = vpop.eup %7700  ;;  %v11299_v5 = vmul.f32 %v11293_v10, %v7051_v60  ;;  %7712 = vrsqrt.f32 %v11291_v20 }
 0x3a9   : > { %v11302_v19 = vpop.eup %7702  ;;  %v11305_v15 = vmul.f32 %v11296_v11, %v2911_v29 }
 0x3aa   : > { %14067 = vst [vmem:[#allocation194_spill] sm:$0xff] %v11299_v5  ;;  %14068 = vst [vmem:[#allocation195_spill] sm:$0xff] %v11302_v19  ;;  %v11307_v7 = vpop.eup %7704  ;;  %v11310_v12 = vmul.f32 %v11302_v19, %v7052_v3 }
 0x3ab   : > { %14069 = vst [vmem:[#allocation196_spill] sm:$0xff] %v11305_v15  ;;  %v11313_v42 = vmul.f32 %v11307_v7, %v2914_v30 }
 0x3ac   : > { %14070 = vst [vmem:[#allocation197_spill] sm:$0xff] %v11310_v12 }
 0x3ad   : > { %14071 = vst [vmem:[#allocation198_spill] sm:$0xff] %v11313_v42 }
 0x3af   : > { %v11315_v2 = vpop.eup %7706 }
 0x3b0   : > { %14072 = vst [vmem:[#allocation199_spill] sm:$0xff] %v11315_v2  ;;  %v11317_v39 = vpop.eup %7708  ;;  %v11320_v60 = vmul.f32 %v11315_v2, %v7055_v21 }
 0x3b1   : > { %14073 = vst [vmem:[#allocation200_spill] sm:$0xff] %v11317_v39  ;;  %v11322_v5 = vpop.eup %7710  ;;  %v11325_v29 = vmul.f32 %v11317_v39, %v2927_v13 }
 0x3b2   : > { %14074 = vst [vmem:[#allocation201_spill] sm:$0xff] %v11320_v60  ;;  %v11327_v15 = vpop.eup %7712  ;;  %v11330_v3 = vmul.f32 %v11322_v5, %v7056_v31 }
 0x3b3   : > { %14075 = vst [vmem:[#allocation202_spill] sm:$0xff] %v11325_v29  ;;  %v11333_v30 = vmul.f32 %v11327_v15, %v2930_v61 }
 0x3b4   : > { %14076 = vst [vmem:[#allocation203_spill] sm:$0xff] %v11330_v3 }
 0x3b5   : > { %14077 = vst [vmem:[#allocation204_spill] sm:$0xff] %v11333_v30 }
 0x3bc   : > { %v4538_v12 = vpop.xlane.xlu0 %4537 }
 0x3bd   : > { %v4632_v20 = vmul.f32 0.03125, %v4538_v12 }
 0x3be   : > { %v4541_v42 = vpop.xlane.xlu1 %4540 }
 0x3bf   : > { %v4633_v10 = vmul.f32 0.03125, %v4541_v42  ;;  %v11336_v2 = vsub.f32 %v10716_v57, %v4632_v20 }
 0x3c0   : > { %v4544_v19 = vpop.xlane.xlu0 %4543 }
 0x3c1   : > { %v4634_v21 = vmul.f32 0.03125, %v4544_v19  ;;  %v11342_v31 = vsub.f32 %v10732_v50, %v4633_v10 }
 0x3c2   : > { %v4547_v60 = vpop.xlane.xlu1 %4546 }
 0x3c3   : > { %v11339_v13 = vsub.f32 %v10724_v24, %v4634_v21  ;;  %v4635_v29 = vmul.f32 0.03125, %v4547_v60  ;;  %v4696_v24 = vmul.f32 %v11336_v2, %v11336_v2  ;;  %v4697_v60 = vmul.f32 %v11342_v31, %v11342_v31 }
 0x3c4   : > { %v4550_v39 = vpop.xlane.xlu0 %4549 }
 0x3c5   : > { %v11345_v61 = vsub.f32 %v10741_v17, %v4635_v29  ;;  %v4698_v12 = vmul.f32 %v11339_v13, %v11339_v13  ;;  %v4636_v19 = vmul.f32 0.03125, %v4550_v39  ;;  %v4728_v30 = vsel %vm1201_vm1, %v4696_v24, 0.0 }
 0x3c6   : > { %v4553_v42 = vpop.xlane.xlu1 %4552 }
 0x3c7   : > { %v4734_v3 = vsel %vm1201_vm1, %v4698_v12, 0.0  ;;  %v4699_v57 = vmul.f32 %v11345_v61, %v11345_v61  ;;  %v4637_v50 = vmul.f32 0.03125, %v4553_v42  ;;  %v11358_v39 = vsub.f32 %v10773_v26, %v4636_v19 }
 0x3c8   : > { %4735 = vadd.xlane.f32.xlu0 %v4734_v3  ;;  %v4556_v20 = vpop.xlane.xlu0 %4555 }
 0x3c9   : > { %v4638_v10 = vmul.f32 0.03125, %v4556_v20  ;;  %v4737_v17 = vsel %vm1201_vm1, %v4699_v57, 0.0  ;;  %v11365_v42 = vsub.f32 %v10789_v49, %v4637_v50  ;;  %v4731_v20 = vsel %vm1201_vm1, %v4697_v60, 0.0 }
 0x3ca   : > { %v4559_v29 = vpop.xlane.xlu1 %4558  ;;  %4738 = vadd.xlane.f32.xlu1 %v4737_v17  ;;  %v4700_v49 = vmul.f32 %v11358_v39, %v11358_v39 }
 0x3cb   : > { %v11361_v21 = vsub.f32 %v10781_v25, %v4638_v10  ;;  %v4639_v12 = vmul.f32 0.03125, %v4559_v29  ;;  %v4701_v60 = vmul.f32 %v11365_v42, %v11365_v42 }
 0x3cc   : > { %4729 = vadd.xlane.f32.xlu0 %v4728_v30  ;;  %v4562_v3 = vpop.xlane.xlu0 %4561 }
 0x3cd   : > { %v11368_v57 = vsub.f32 %v10799_v35, %v4639_v12  ;;  %v4702_v26 = vmul.f32 %v11361_v21, %v11361_v21  ;;  %v4640_v25 = vmul.f32 0.03125, %v4562_v3 }
 0x3ce   : > { %v4565_v19 = vpop.xlane.xlu1 %4564  ;;  %4732 = vadd.xlane.f32.xlu1 %v4731_v20 }
 0x3cf   : > { %v4746_v10 = vsel %vm1201_vm1, %v4702_v26, 0.0  ;;  %v4703_v30 = vmul.f32 %v11368_v57, %v11368_v57  ;;  %v4641_v35 = vmul.f32 0.03125, %v4565_v19  ;;  %v11382_v12 = vsub.f32 %v10831_v9, %v4640_v25 }
 0x3d0   : > { %4747 = vadd.xlane.f32.xlu0 %v4746_v10  ;;  %v4568_v24 = vpop.xlane.xlu0 %4567  ;;  %v4740_v26 = vsel %vm1201_vm1, %v4700_v49, 0.0 }
 0x3d1   : > { %v4642_v50 = vmul.f32 0.03125, %v4568_v24  ;;  %v4749_v17 = vsel %vm1201_vm1, %v4703_v30, 0.0  ;;  %v11389_v19 = vsub.f32 %v10849_v62, %v4641_v35  ;;  %v4743_v24 = vsel %vm1201_vm1, %v4701_v60, 0.0 }
 0x3d2   : > { %v4571_v29 = vpop.xlane.xlu1 %4570  ;;  %4750 = vadd.xlane.f32.xlu1 %v4749_v17  ;;  %v4704_v62 = vmul.f32 %v11382_v12, %v11382_v12 }
 0x3d3   : > { %v11385_v3 = vsub.f32 %v10840_v59, %v4642_v50  ;;  %v4643_v20 = vmul.f32 0.03125, %v4571_v29  ;;  %v4705_v29 = vmul.f32 %v11389_v19, %v11389_v19 }
 0x3d4   : > { %4741 = vadd.xlane.f32.xlu0 %v4740_v26  ;;  %v4574_v10 = vpop.xlane.xlu0 %4573 }
 0x3d5   : > { %v11392_v30 = vsub.f32 %v10859_v37, %v4643_v20  ;;  %v4706_v9 = vmul.f32 %v11385_v3, %v11385_v3  ;;  %v4644_v59 = vmul.f32 0.03125, %v4574_v10 }
 0x3d6   : > { %v4577_v25 = vpop.xlane.xlu1 %4576  ;;  %4744 = vadd.xlane.f32.xlu1 %v4743_v24 }
 0x3d7   : > { %v4758_v50 = vsel %vm1201_vm1, %v4706_v9, 0.0  ;;  %v4707_v49 = vmul.f32 %v11392_v30, %v11392_v30  ;;  %v4645_v37 = vmul.f32 0.03125, %v4577_v25  ;;  %v11406_v26 = vsub.f32 %v10891_v51, %v4644_v59 }
 0x3d8   : > { %4759 = vadd.xlane.f32.xlu0 %v4758_v50  ;;  %v4580_v35 = vpop.xlane.xlu0 %4579  ;;  %v4752_v9 = vsel %vm1201_vm1, %v4704_v62, 0.0 }
 0x3d9   : > { %v4646_v17 = vmul.f32 0.03125, %v4580_v35  ;;  %v4761_v60 = vsel %vm1201_vm1, %v4707_v49, 0.0  ;;  %v11413_v25 = vsub.f32 %v10909_v14, %v4645_v37  ;;  %v4755_v35 = vsel %vm1201_vm1, %v4705_v29, 0.0 }
 0x3da   : > { %v4583_v20 = vpop.xlane.xlu1 %4582  ;;  %4762 = vadd.xlane.f32.xlu1 %v4761_v60  ;;  %v4708_v14 = vmul.f32 %v11406_v26, %v11406_v26 }
 0x3db   : > { %v11409_v10 = vsub.f32 %v10900_v56, %v4646_v17  ;;  %v4647_v24 = vmul.f32 0.03125, %v4583_v20  ;;  %v4709_v20 = vmul.f32 %v11413_v25, %v11413_v25 }
 0x3dc   : > { %4753 = vadd.xlane.f32.xlu0 %v4752_v9  ;;  %v4586_v50 = vpop.xlane.xlu0 %4585 }
 0x3dd   : > { %v11416_v49 = vsub.f32 %v10919_v47, %v4647_v24  ;;  %v4710_v51 = vmul.f32 %v11409_v10, %v11409_v10  ;;  %v4648_v56 = vmul.f32 0.03125, %v4586_v50 }
 0x3de   : > { %v4589_v59 = vpop.xlane.xlu1 %4588  ;;  %4756 = vadd.xlane.f32.xlu1 %v4755_v35 }
 0x3df   : > { %v4770_v17 = vsel %vm1201_vm1, %v4710_v51, 0.0  ;;  %v4711_v62 = vmul.f32 %v11416_v49, %v11416_v49  ;;  %v4649_v47 = vmul.f32 0.03125, %v4589_v59  ;;  %v11430_v9 = vsub.f32 %v10951_v27, %v4648_v56 }
 0x3e0   : > { %4771 = vadd.xlane.f32.xlu0 %v4770_v17  ;;  %v4592_v37 = vpop.xlane.xlu0 %4591  ;;  %v4764_v51 = vsel %vm1201_vm1, %v4708_v14, 0.0 }
 0x3e1   : > { %v4650_v60 = vmul.f32 0.03125, %v4592_v37  ;;  %v4773_v29 = vsel %vm1201_vm1, %v4711_v62, 0.0  ;;  %v11437_v59 = vsub.f32 %v10969_v18, %v4649_v47  ;;  %v4767_v37 = vsel %vm1201_vm1, %v4709_v20, 0.0 }
 0x3e2   : > { %v4595_v24 = vpop.xlane.xlu1 %4594  ;;  %4774 = vadd.xlane.f32.xlu1 %v4773_v29  ;;  %v4712_v18 = vmul.f32 %v11430_v9, %v11430_v9 }
 0x3e3   : > { %v11433_v50 = vsub.f32 %v10960_v33, %v4650_v60  ;;  %v4651_v35 = vmul.f32 0.03125, %v4595_v24  ;;  %v4713_v24 = vmul.f32 %v11437_v59, %v11437_v59 }
 0x3e4   : > { %4765 = vadd.xlane.f32.xlu0 %v4764_v51  ;;  %v4598_v17 = vpop.xlane.xlu0 %4597 }
 0x3e5   : > { %v11440_v62 = vsub.f32 %v10977_v34, %v4651_v35  ;;  %v4714_v27 = vmul.f32 %v11433_v50, %v11433_v50  ;;  %v4652_v33 = vmul.f32 0.03125, %v4598_v17 }
 0x3e6   : > { %v4601_v56 = vpop.xlane.xlu1 %4600  ;;  %4768 = vadd.xlane.f32.xlu1 %v4767_v37 }
 0x3e7   : > { %v4782_v60 = vsel %vm1201_vm1, %v4714_v27, 0.0  ;;  %v4715_v14 = vmul.f32 %v11440_v62, %v11440_v62  ;;  %v4653_v34 = vmul.f32 0.03125, %v4601_v56  ;;  %v11454_v51 = vsub.f32 %v11005_v0, %v4652_v33 }
 0x3e8   : > { %4783 = vadd.xlane.f32.xlu0 %v4782_v60  ;;  %v4604_v47 = vpop.xlane.xlu0 %4603  ;;  %v4776_v27 = vsel %vm1201_vm1, %v4712_v18, 0.0 }
 0x3e9   : > { %v4654_v29 = vmul.f32 0.03125, %v4604_v47  ;;  %v4785_v20 = vsel %vm1201_vm1, %v4715_v14, 0.0  ;;  %v11461_v56 = vsub.f32 %v11021_v45, %v4653_v34  ;;  %v4779_v47 = vsel %vm1201_vm1, %v4713_v24, 0.0 }
 0x3ea   : > { %v4607_v35 = vpop.xlane.xlu1 %4606  ;;  %4786 = vadd.xlane.f32.xlu1 %v4785_v20  ;;  %v4716_v45 = vmul.f32 %v11454_v51, %v11454_v51 }
 0x3eb   : > { %v11457_v17 = vsub.f32 %v11014_v28, %v4654_v29  ;;  %v4655_v37 = vmul.f32 0.03125, %v4607_v35  ;;  %v4717_v35 = vmul.f32 %v11461_v56, %v11461_v56 }
 0x3ec   : > { %4777 = vadd.xlane.f32.xlu0 %v4776_v27  ;;  %v4610_v60 = vpop.xlane.xlu0 %4609 }
 0x3ed   : > { %v11464_v14 = vsub.f32 %v11028_v44, %v4655_v37  ;;  %v4718_v0 = vmul.f32 %v11457_v17, %v11457_v17  ;;  %v4656_v28 = vmul.f32 0.03125, %v4610_v60 }
 0x3ee   : > { %v4613_v33 = vpop.xlane.xlu1 %4612  ;;  %4780 = vadd.xlane.f32.xlu1 %v4779_v47 }
 0x3ef   : > { %v4794_v29 = vsel %vm1201_vm1, %v4718_v0, 0.0  ;;  %v4719_v18 = vmul.f32 %v11464_v14, %v11464_v14  ;;  %v4657_v44 = vmul.f32 0.03125, %v4613_v33  ;;  %v11478_v27 = vsub.f32 %v11041_v43, %v4656_v28 }
 0x3f0   : > { %4795 = vadd.xlane.f32.xlu0 %v4794_v29  ;;  %v4616_v34 = vpop.xlane.xlu0 %4615  ;;  %v4788_v0 = vsel %vm1201_vm1, %v4716_v45, 0.0 }
 0x3f1   : > { %v4658_v20 = vmul.f32 0.03125, %v4616_v34  ;;  %v4797_v24 = vsel %vm1201_vm1, %v4719_v18, 0.0  ;;  %v11485_v33 = vsub.f32 %v11048_v32, %v4657_v44  ;;  %v4791_v34 = vsel %vm1201_vm1, %v4717_v35, 0.0 }
 0x3f2   : > { %v4619_v37 = vpop.xlane.xlu1 %4618  ;;  %4798 = vadd.xlane.f32.xlu1 %v4797_v24  ;;  %v4720_v32 = vmul.f32 %v11478_v27, %v11478_v27 }
 0x3f3   : > { %v11481_v60 = vsub.f32 %v11052_v38, %v4658_v20  ;;  %v4659_v47 = vmul.f32 0.03125, %v4619_v37  ;;  %v4721_v37 = vmul.f32 %v11485_v33, %v11485_v33 }
 0x3f4   : > { %4789 = vadd.xlane.f32.xlu0 %v4788_v0  ;;  %v4622_v29 = vpop.xlane.xlu0 %4621 }
 0x3f5   : > { %v11488_v18 = vsub.f32 %v11057_v6, %v4659_v47  ;;  %v4722_v43 = vmul.f32 %v11481_v60, %v11481_v60  ;;  %v4660_v38 = vmul.f32 0.03125, %v4622_v29 }
 0x3f6   : > { %v4625_v28 = vpop.xlane.xlu1 %4624  ;;  %4792 = vadd.xlane.f32.xlu1 %v4791_v34 }
 0x3f7   : > { %v4806_v20 = vsel %vm1201_vm1, %v4722_v43, 0.0  ;;  %v4723_v45 = vmul.f32 %v11488_v18, %v11488_v18  ;;  %v4661_v6 = vmul.f32 0.03125, %v4625_v28  ;;  %v11502_v0 = vsub.f32 %v11070_v63, %v4660_v38 }
 0x3f8   : > { %4807 = vadd.xlane.f32.xlu0 %v4806_v20  ;;  %v4628_v44 = vpop.xlane.xlu0 %4627  ;;  %v4800_v43 = vsel %vm1201_vm1, %v4720_v32, 0.0 }
 0x3f9   : > { %v4662_v24 = vmul.f32 0.03125, %v4628_v44  ;;  %v4809_v35 = vsel %vm1201_vm1, %v4723_v45, 0.0  ;;  %v11509_v28 = vsub.f32 %v11080_v8, %v4661_v6  ;;  %v4803_v45 = vsel %vm1201_vm1, %v4721_v37, 0.0 }
 0x3fa   : > { %v4631_v47 = vpop.xlane.xlu1 %4630  ;;  %4810 = vadd.xlane.f32.xlu1 %v4809_v35  ;;  %v4724_v38 = vmul.f32 %v11502_v0, %v11502_v0  ;;  %v11528_v6 = vmul.f32 %v11119_v4, %v11091_v52  ;;  %v11536_v37 = vmul.f32 %v11130_v55, %v11094_v36  ;;  %v11542_v52 = vmul.f32 %v11164_v41, %v11128_v48  ;;  %v7325_v4 = vld [vmem:[%s13209_s13 + $0x8] sm:$0xff]  }
 0x3fb   : > { %v11505_v29 = vsub.f32 %v11075_v53, %v4662_v24  ;;  %v4663_v34 = vmul.f32 0.03125, %v4631_v47  ;;  %v7324_v24 = vld [vmem:[%s13209_s13] sm:$0xff]   ;;  %v11551_v36 = vmul.f32 %v11178_v16, %v11143_v58  ;;  %v11557_v41 = vmul.f32 %v11159_v46, %v11121_v23 }
 0x3fc   : > { %4801 = vadd.xlane.f32.xlu0 %v4800_v43  ;;  %v4812_v32 = vsel %vm1201_vm1, %v4724_v38, 0.0  ;;  %7195 = vmatprep.subr.bf16.mxu0 %v7324_v24  ;;  %v3708_v47 = vsel %vm3689_vm2, %v11528_v6, 0.0  ;;  %v3714_v55 = vsel %vm3689_vm2, %v11542_v52, 0.0  ;;  %v14078_v43 = vld [vmem:[#allocation142_spill] sm:$0xff]  ;;  %v14080_v58 = vld [vmem:[#allocation148_spill] sm:$0xff]  ;;  %v14082_v38 = vld [vmem:[#allocation151_spill] sm:$0xff] }
 0x3fd   : > { %v11512_v20 = vsub.f32 %v11085_v40, %v4663_v34  ;;  %v4726_v44 = vmul.f32 %v11505_v29, %v11505_v29  ;;  %v4725_v40 = vmul.f32 %v11509_v28, %v11509_v28  ;;  %7196 = vmatpush3.bf16.msra.mxu0 %v7324_v24  ;;  %v3711_v34 = vsel %vm3689_vm2, %v11536_v37, 0.0  ;;  %v7326_v23 = vld [vmem:[%s13208_s12] sm:$0xff]   ;;  %v14084_v24 = vld [vmem:[#allocation147_spill] sm:$0xff] }
 0x3fe   : > { %4804 = vadd.xlane.f32.xlu1 %v4803_v45  ;;  %7197 = vmatprep.subr.bf16.mxu0 %v7325_v4  ;;  %v3717_v48 = vsel %vm3689_vm2, %v11551_v36, 0.0  ;;  %v14079_v45 = vld [vmem:[#allocation152_spill] sm:$0xff]  ;;  %v3720_v16 = vsel %vm3689_vm2, %v11557_v41, 0.0 }
 0x3ff   : > { %v4818_v63 = vsel %vm1201_vm1, %v4726_v44, 0.0  ;;  %v4727_v53 = vmul.f32 %v11512_v20, %v11512_v20  ;;  %v4815_v35 = vsel %vm1201_vm1, %v4725_v40, 0.0  ;;  %v11563_v44 = vmul.f32 %v14079_v45, %v14078_v43  ;;  %7155 = vmatprep.subr.bf16.mxu1 %v7326_v23  ;;  %v14088_v45 = vld [vmem:[#allocation158_spill] sm:$0xff] }
 0x400   : > { %4819 = vadd.xlane.f32.xlu0 %v4818_v63  ;;  %v14081_v63 = vld [vmem:[#allocation159_spill] sm:$0xff]  ;;  %7156 = vmatpush3.bf16.msra.mxu1 %v7326_v23  ;;  %v14090_v23 = vld [vmem:[#allocation164_spill] sm:$0xff] }
 0x401   : > { %v4821_v8 = vsel %vm1201_vm1, %v4727_v53, 0.0  ;;  %7198 = vmatpush3.bf16.msra.mxu0 %v7325_v4  ;;  %v11569_v53 = vmul.f32 %v14081_v63, %v14080_v58  ;;  %v3723_v46 = vsel %vm3689_vm2, %v11563_v44, 0.0 }
 0x402   : > { %4822 = vadd.xlane.f32.xlu1 %v4821_v8  ;;  %v14083_v8 = vld [vmem:[#allocation165_spill] sm:$0xff] }
 0x403   : > { %v11578_v40 = vmul.f32 %v14083_v8, %v14082_v38 }
 0x404   : > { %4813 = vadd.xlane.f32.xlu0 %v4812_v32  ;;  %v3726_v32 = vsel %vm3689_vm2, %v11569_v53, 0.0 }
 0x405   : > { %v3729_v4 = vsel %vm3689_vm2, %v11578_v40, 0.0 }
 0x406   : > { %4816 = vadd.xlane.f32.xlu1 %v4815_v35  ;;  %v14085_v35 = vld [vmem:[#allocation157_spill] sm:$0xff] }
 0x408   : > { %3709 = vadd.xlane.f32.xlu0 %v3708_v47  ;;  %v11584_v47 = vmul.f32 %v14085_v35, %v14084_v24  ;;  %v14094_v24 = vld [vmem:[#allocation172_spill] sm:$0xff] }
 0x40a   : > { %3712 = vadd.xlane.f32.xlu1 %v3711_v34  ;;  %v14086_v34 = vld [vmem:[#allocation149_spill] sm:$0xff]  ;;  %v3732_v43 = vsel %vm3689_vm2, %v11584_v47, 0.0 }
 0x40c   : > { %3715 = vadd.xlane.f32.xlu0 %v3714_v55  ;;  %v14087_v55 = vld [vmem:[#allocation162_spill] sm:$0xff] }
 0x40e   : > { %3718 = vadd.xlane.f32.xlu1 %v3717_v48  ;;  %v11590_v48 = vmul.f32 %v14087_v55, %v14086_v34  ;;  %v14096_v34 = vld [vmem:[#allocation161_spill] sm:$0xff]  ;;  %v14097_v55 = vld [vmem:[#allocation175_spill] sm:$0xff] }
 0x410   : > { %3721 = vadd.xlane.f32.xlu0 %v3720_v16  ;;  %v14089_v16 = vld [vmem:[#allocation173_spill] sm:$0xff]  ;;  %v3735_v63 = vsel %vm3689_vm2, %v11590_v48, 0.0 }
 0x411   : > { %v11596_v58 = vmul.f32 %v14089_v16, %v14088_v45  ;;  %v14099_v16 = vld [vmem:[#allocation169_spill] sm:$0xff] }
 0x412   : > { %3724 = vadd.xlane.f32.xlu1 %v3723_v46  ;;  %v14091_v46 = vld [vmem:[#allocation177_spill] sm:$0xff] }
 0x413   : > { %v11602_v38 = vmul.f32 %v14091_v46, %v14090_v23  ;;  %v3738_v8 = vsel %vm3689_vm2, %v11596_v58, 0.0  ;;  %v14101_v46 = vld [vmem:[#allocation171_spill] sm:$0xff] }
 0x414   : > { %3727 = vadd.xlane.f32.xlu0 %v3726_v32  ;;  %v14093_v32 = vld [vmem:[#allocation156_spill] sm:$0xff] }
 0x415   : > { %14092 = vst [vmem:[#allocation142_spill] sm:$0xff] %v11602_v38  ;;  %v11608_v35 = vmul.f32 %v14094_v24, %v14093_v32  ;;  %v14103_v24 = vld [vmem:[#allocation168_spill] sm:$0xff] }
 0x416   : > { %3730 = vadd.xlane.f32.xlu1 %v3729_v4  ;;  %v3741_v4 = vsel %vm3689_vm2, %v11602_v38, 0.0 }
 0x417   : > { %14095 = vst [vmem:[#allocation152_spill] sm:$0xff] %v11608_v35  ;;  %v3744_v45 = vsel %vm3689_vm2, %v11608_v35, 0.0 }
 0x418   : > { %3733 = vadd.xlane.f32.xlu0 %v3732_v43  ;;  %v11614_v43 = vmul.f32 %v14097_v55, %v14096_v34  ;;  %v14106_v55 = vld [vmem:[#allocation170_spill] sm:$0xff] }
 0x41a   : > { %3736 = vadd.xlane.f32.xlu1 %v3735_v63  ;;  %14098 = vst [vmem:[#allocation148_spill] sm:$0xff] %v11614_v43  ;;  %v11620_v63 = vmul.f32 %v11264_v22, %v14099_v16  ;;  %v3747_v23 = vsel %vm3689_vm2, %v11614_v43, 0.0  ;;  %v14108_v16 = vld [vmem:[#allocation181_spill] sm:$0xff] }
 0x41c   : > { %3739 = vadd.xlane.f32.xlu0 %v3738_v8  ;;  %14100 = vst [vmem:[#allocation159_spill] sm:$0xff] %v11620_v63  ;;  %v11626_v8 = vmul.f32 %v11275_v54, %v14101_v46  ;;  %v3750_v32 = vsel %vm3689_vm2, %v11620_v63, 0.0  ;;  %v3692_v46 = vpop.xlane.xlu0 %3691 }
 0x41e   : > { %3742 = vadd.xlane.f32.xlu1 %v3741_v4  ;;  %14102 = vst [vmem:[#allocation151_spill] sm:$0xff] %v11626_v8  ;;  %v14104_v4 = vld [vmem:[#allocation184_spill] sm:$0xff]  ;;  %v3753_v22 = vsel %vm3689_vm2, %v11626_v8, 0.0  ;;  %v3695_v8 = vpop.xlane.xlu1 %3694 }
 0x41f   : > { %v11632_v34 = vmul.f32 %v14104_v4, %v14103_v24  ;;  %v14110_v24 = vld [vmem:[#allocation183_spill] sm:$0xff] }
 0x420   : > { %3745 = vadd.xlane.f32.xlu0 %v3744_v45  ;;  %v11638_v45 = vmul.f32 %v11270_v1, %v14106_v55  ;;  %v11650_v4 = vmul.f32 %v11307_v7, %v14110_v24  ;;  %v14113_v55 = vld [vmem:[#allocation193_spill] sm:$0xff]  ;;  %v3698_v63 = vpop.xlane.xlu0 %3697  ;;  %v3786_v7 = vmul.f32 0.015625, %v3692_v46  ;;  %v14118_v24 = vld [vmem:[#allocation190_spill] sm:$0xff] }
 0x421   : > { %14105 = vst [vmem:[#allocation165_spill] sm:$0xff] %v11632_v34  ;;  %v3756_v54 = vsel %vm3689_vm2, %v11632_v34, 0.0 }
 0x422   : > { %3748 = vadd.xlane.f32.xlu1 %v3747_v23  ;;  %14107 = vst [vmem:[#allocation147_spill] sm:$0xff] %v11638_v45  ;;  %v11644_v23 = vmul.f32 %v11296_v11, %v14108_v16  ;;  %14111 = vst [vmem:[#allocation149_spill] sm:$0xff] %v11650_v4  ;;  %v3765_v11 = vsel %vm3689_vm2, %v11650_v4, 0.0  ;;  %v14116_v16 = vld [vmem:[#allocation195_spill] sm:$0xff]  ;;  %v14121_v4 = vld [vmem:[#allocation192_spill] sm:$0xff] }
 0x424   : > { %3751 = vadd.xlane.f32.xlu0 %v3750_v32  ;;  %14109 = vst [vmem:[#allocation157_spill] sm:$0xff] %v11644_v23  ;;  %v3759_v32 = vsel %vm3689_vm2, %v11638_v45, 0.0  ;;  %v3762_v1 = vsel %vm3689_vm2, %v11644_v23, 0.0  ;;  %v14119_v23 = vld [vmem:[#allocation200_spill] sm:$0xff] }
 0x425   : > { %v11668_v43 = vmul.f32 %v14119_v23, %v14118_v24  ;;  %v14125_v23 = vld [vmem:[#allocation189_spill] sm:$0xff]  ;;  %v14126_v24 = vld [vmem:[#allocation199_spill] sm:$0xff] }
 0x426   : > { %3754 = vadd.xlane.f32.xlu1 %v3753_v22  ;;  %v14112_v22 = vld [vmem:[#allocation180_spill] sm:$0xff]  ;;  %v11683_v35 = vmul.f32 %v14126_v24, %v14125_v23  ;;  %v14134_v24 = vld [vmem:[#allocation139_spill] sm:$0xff] }
 0x427   : > { %v11656_v34 = vmul.f32 %v14113_v55, %v14112_v22  ;;  %14120 = vst [vmem:[#allocation173_spill] sm:$0xff] %v11668_v43  ;;  %v3701_v22 = vpop.xlane.xlu1 %3700 }
 0x428   : > { %3757 = vadd.xlane.f32.xlu0 %v3756_v54  ;;  %v14115_v54 = vld [vmem:[#allocation182_spill] sm:$0xff]  ;;  %14127 = vst [vmem:[#allocation156_spill] sm:$0xff] %v11683_v35  ;;  %v3789_v38 = vmul.f32 0.015625, %v3701_v22  ;;  %v7327_v22 = vld [vmem:[%s13208_s12 + $0x8] sm:$0xff]  }
 0x429   : > { %14114 = vst [vmem:[#allocation162_spill] sm:$0xff] %v11656_v34  ;;  %v11662_v45 = vmul.f32 %v14116_v16, %v14115_v54  ;;  %v11674_v54 = vmul.f32 %v11327_v15, %v14121_v4  ;;  %v3788_v16 = vmul.f32 0.015625, %v3698_v63  ;;  %v14130_v4 = vld [vmem:[#allocation191_spill] sm:$0xff]  ;;  %7157 = vmatprep.subr.bf16.mxu1 %v7327_v22 }
 0x42a   : > { %3760 = vadd.xlane.f32.xlu1 %v3759_v32  ;;  %v3768_v32 = vsel %vm3689_vm2, %v11656_v34, 0.0  ;;  %v3774_v34 = vsel %vm3689_vm2, %v11668_v43, 0.0  ;;  %7158 = vmatpush3.bf16.msra.mxu1 %v7327_v22 }
 0x42b   : > { %14117 = vst [vmem:[#allocation158_spill] sm:$0xff] %v11662_v45  ;;  %v3771_v55 = vsel %vm3689_vm2, %v11662_v45, 0.0  ;;  %14122 = vst [vmem:[#allocation164_spill] sm:$0xff] %v11674_v54  ;;  %v3777_v15 = vsel %vm3689_vm2, %v11674_v54, 0.0  ;;  %v3707_v63 = vpop.xlane.xlu1 %3706  ;;  %v14144_v54 = vld [vmem:[#allocation58_spill] sm:$0xff] }
 0x42c   : > { %3763 = vadd.xlane.f32.xlu0 %v3762_v1  ;;  %v3787_v1 = vmul.f32 0.015625, %v3695_v8  ;;  %v3704_v8 = vpop.xlane.xlu0 %3703 }
 0x42d   : > { %v3790_v23 = vmul.f32 0.015625, %v3704_v8 }
 0x42e   : > { %3766 = vadd.xlane.f32.xlu1 %v3765_v11  ;;  %v14123_v11 = vld [vmem:[#allocation134_spill] sm:$0xff] }
 0x42f   : > { %v11677_v46 = vsub.f32 %v14123_v11, %v3786_v7  ;;  %v11692_v7 = vmul.f32 %v11322_v5, %v14130_v4  ;;  %v11705_v5 = vsub.f32 %v14134_v24, %v3789_v38  ;;  %v14138_v38 = vld [vmem:[#allocation146_spill] sm:$0xff] }
 0x430   : > { %3769 = vadd.xlane.f32.xlu0 %v3768_v32  ;;  %v14128_v32 = vld [vmem:[#allocation137_spill] sm:$0xff] }
 0x431   : > { %14124 = vst [vmem:[#allocation177_spill] sm:$0xff] %v11677_v46  ;;  %v11686_v45 = vsub.f32 %v14128_v32, %v3787_v1  ;;  %14131 = vst [vmem:[#allocation161_spill] sm:$0xff] %v11692_v7  ;;  %v3850_v1 = vmul.f32 %v11677_v46, %v11677_v46  ;;  %v3791_v32 = vmul.f32 0.015625, %v3707_v63 }
 0x432   : > { %3772 = vadd.xlane.f32.xlu1 %v3771_v55  ;;  %v14132_v55 = vld [vmem:[#allocation138_spill] sm:$0xff]  ;;  %14135 = vst [vmem:[#allocation169_spill] sm:$0xff] %v11705_v5 }
 0x433   : > { %14129 = vst [vmem:[#allocation172_spill] sm:$0xff] %v11686_v45  ;;  %v11695_v11 = vsub.f32 %v14132_v55, %v3788_v16  ;;  %v3783_v16 = vsel %vm3689_vm2, %v11692_v7, 0.0  ;;  %v3851_v8 = vmul.f32 %v11686_v45, %v11686_v45  ;;  %v3882_v55 = vsel %vm3689_vm2, %v3850_v1, 0.0 }
 0x434   : > { %3775 = vadd.xlane.f32.xlu0 %v3774_v34  ;;  %v3780_v34 = vsel %vm3689_vm2, %v11683_v35, 0.0  ;;  %v11718_v63 = vsub.f32 %v14138_v38, %v3791_v32  ;;  %v3853_v45 = vmul.f32 %v11705_v5, %v11705_v5 }
 0x435   : > { %14133 = vst [vmem:[#allocation175_spill] sm:$0xff] %v11695_v11  ;;  %v3885_v24 = vsel %vm3689_vm2, %v3851_v8, 0.0 }
 0x436   : > { %3778 = vadd.xlane.f32.xlu1 %v3777_v15  ;;  %v14136_v15 = vld [vmem:[#allocation143_spill] sm:$0xff]  ;;  %14139 = vst [vmem:[#allocation168_spill] sm:$0xff] %v11718_v63  ;;  %v3891_v1 = vsel %vm3689_vm2, %v3853_v45, 0.0  ;;  %v3855_v22 = vmul.f32 %v11718_v63, %v11718_v63 }
 0x437   : > { %v11712_v4 = vsub.f32 %v14136_v15, %v3790_v23 }
 0x438   : > { %3781 = vadd.xlane.f32.xlu0 %v3780_v34  ;;  %v3852_v34 = vmul.f32 %v11695_v11, %v11695_v11  ;;  %v3897_v8 = vsel %vm3689_vm2, %v3855_v22, 0.0 }
 0x439   : > { %14137 = vst [vmem:[#allocation171_spill] sm:$0xff] %v11712_v4  ;;  %v3854_v23 = vmul.f32 %v11712_v4, %v11712_v4 }
 0x43a   : > { %3784 = vadd.xlane.f32.xlu1 %v3783_v16  ;;  %v3888_v16 = vsel %vm3689_vm2, %v3852_v34, 0.0 }
 0x43b   : > { %v3894_v32 = vsel %vm3689_vm2, %v3854_v23, 0.0 }
 0x43c   : > { %3883 = vadd.xlane.f32.xlu0 %v3882_v55 }
 0x43e   : > { %3886 = vadd.xlane.f32.xlu1 %v3885_v24 }
 0x440   : > { %3889 = vadd.xlane.f32.xlu0 %v3888_v16 }
 0x442   : > { %3892 = vadd.xlane.f32.xlu1 %v3891_v1 }
 0x444   : > { %3895 = vadd.xlane.f32.xlu0 %v3894_v32 }
 0x446   : > { %3898 = vadd.xlane.f32.xlu1 %v3897_v8 }
 0x455   : > { %v4736_v15 = vpop.xlane.xlu0 %4735 }
 0x456   : > { %v4826_v55 = vmul.f32 0.03125, %v4736_v15 }
 0x457   : > { %v4739_v38 = vpop.xlane.xlu1 %4738 }
 0x458   : > { %v4858_v34 = vadd.f32 1e-05, %v4826_v55  ;;  %v4827_v24 = vmul.f32 0.03125, %v4739_v38 }
 0x459   : > { %v4730_v5 = vpop.xlane.xlu0 %4729 }
 0x45a   : > { %7714 = vrsqrt.f32 %v4858_v34  ;;  %v4859_v16 = vadd.f32 1e-05, %v4827_v24  ;;  %v4824_v4 = vmul.f32 0.03125, %v4730_v5  ;;  %v11734_v5 = vld [vmem:[%s13206_s10] ss:$0 sm:$0xff] }
 0x45b   : > { %v4733_v45 = vpop.xlane.xlu1 %4732 }
 0x45c   : > { %7716 = vrsqrt.f32 %v4859_v16  ;;  %v4856_v11 = vadd.f32 1e-05, %v4824_v4  ;;  %v4825_v63 = vmul.f32 0.03125, %v4733_v45 }
 0x45d   : > { %v4748_v1 = vpop.xlane.xlu0 %4747 }
 0x45e   : > { %7718 = vrsqrt.f32 %v4856_v11  ;;  %v4857_v23 = vadd.f32 1e-05, %v4825_v63  ;;  %v4830_v32 = vmul.f32 0.03125, %v4748_v1 }
 0x45f   : > { %v4751_v46 = vpop.xlane.xlu1 %4750 }
 0x460   : > { %7720 = vrsqrt.f32 %v4857_v23  ;;  %v4862_v22 = vadd.f32 1e-05, %v4830_v32  ;;  %v4831_v8 = vmul.f32 0.03125, %v4751_v46  ;;  %v11740_v46 = vld [vmem:[%s13207_s11] ss:$0 sm:$0xff] }
 0x461   : > { %v4742_v15 = vpop.xlane.xlu0 %4741 }
 0x462   : > { %7722 = vrsqrt.f32 %v4862_v22  ;;  %v4863_v55 = vadd.f32 1e-05, %v4831_v8  ;;  %v4828_v38 = vmul.f32 0.03125, %v4742_v15 }
 0x463   : > { %v4745_v7 = vpop.xlane.xlu1 %4744 }
 0x464   : > { %v7715_v34 = vpop.eup %7714  ;;  %7724 = vrsqrt.f32 %v4863_v55  ;;  %v4860_v4 = vadd.f32 1e-05, %v4828_v38  ;;  %v4829_v11 = vmul.f32 0.03125, %v4745_v7 }
 0x465   : > { %v4922_v63 = vmul.f32 %v7715_v34, %v11339_v13  ;;  %v4760_v24 = vpop.xlane.xlu0 %4759 }
 0x466   : > { %v7717_v16 = vpop.eup %7716  ;;  %7726 = vrsqrt.f32 %v4860_v4  ;;  %v4861_v45 = vadd.f32 1e-05, %v4829_v11  ;;  %v4834_v1 = vmul.f32 0.03125, %v4760_v24 }
 0x467   : > { %v4960_v23 = vmul.f32 %v11734_v5, %v4922_v63  ;;  %v4923_v32 = vmul.f32 %v7717_v16, %v11345_v61  ;;  %v4763_v22 = vpop.xlane.xlu1 %4762  ;;  %v7328_v61 = vld [vmem:[%s13208_s12 + $0x10] sm:$0xff]  }
 0x468   : > { %v7719_v8 = vpop.eup %7718  ;;  %7728 = vrsqrt.f32 %v4861_v45  ;;  %v4866_v7 = vadd.f32 1e-05, %v4834_v1  ;;  %v4835_v15 = vmul.f32 0.03125, %v4763_v22  ;;  %7159 = vmatprep.subr.bf16.mxu1 %v7328_v61  ;;  %v14140_v22 = vld [vmem:[#allocation78_spill] sm:$0xff] }
 0x469   : > { %v4998_v13 = vadd.f32 %v11740_v46, %v4960_v23  ;;  %v4961_v55 = vmul.f32 %v11734_v5, %v4923_v32  ;;  %v4920_v38 = vmul.f32 %v7719_v8, %v11336_v2  ;;  %v4754_v34 = vpop.xlane.xlu0 %4753  ;;  %7160 = vmatpush3.bf16.msra.mxu1 %v7328_v61 }
 0x46a   : > { %v7721_v35 = vpop.eup %7720  ;;  %7730 = vrsqrt.f32 %v4866_v7  ;;  %v4867_v4 = vadd.f32 1e-05, %v4835_v15  ;;  %v4832_v11 = vmul.f32 0.03125, %v4754_v34 }
 0x46b   : > { %v5030_v63 = vmax.f32 %v4998_v13, 0.0  ;;  %v4999_v24 = vadd.f32 %v11740_v46, %v4961_v55  ;;  %v4958_v16 = vmul.f32 %v11734_v5, %v4920_v38  ;;  %v4921_v45 = vmul.f32 %v7721_v35, %v11342_v31  ;;  %v4757_v1 = vpop.xlane.xlu1 %4756 }
 0x46c   : > { %v7723_v23 = vpop.eup %7722  ;;  %7732 = vrsqrt.f32 %v4867_v4  ;;  %v4864_v2 = vadd.f32 1e-05, %v4832_v11  ;;  %v4833_v32 = vmul.f32 0.03125, %v4757_v1  ;;  %v14141_v4 = vld [vmem:[#allocation94_spill] sm:$0xff] }
 0x46d   : > { %v11754_v8 = vmul.f32 %v14140_v22, %v5030_v63  ;;  %v5031_v7 = vmax.f32 %v4999_v24, 0.0  ;;  %v4959_v15 = vmul.f32 %v11734_v5, %v4921_v45  ;;  %v4926_v13 = vmul.f32 %v7723_v23, %v11361_v21  ;;  %v4772_v34 = vpop.xlane.xlu0 %4771 }
 0x46e   : > { %v7725_v55 = vpop.eup %7724  ;;  %7734 = vrsqrt.f32 %v4864_v2  ;;  %v4865_v38 = vadd.f32 1e-05, %v4833_v32  ;;  %v4838_v31 = vmul.f32 0.03125, %v4772_v34  ;;  %v4996_v35 = vadd.f32 %v11740_v46, %v4958_v16 }
 0x46f   : > { %v11760_v11 = vmul.f32 %v14141_v4, %v5031_v7  ;;  %v4964_v1 = vmul.f32 %v11734_v5, %v4926_v13  ;;  %v4927_v63 = vmul.f32 %v7725_v55, %v11368_v57  ;;  %v4775_v24 = vpop.xlane.xlu1 %4774  ;;  %v4997_v45 = vadd.f32 %v11740_v46, %v4959_v15  ;;  %v14143_v7 = vld [vmem:[#allocation6_spill] sm:$0xff] }
 0x470   : > { %v7727_v22 = vpop.eup %7726  ;;  %7736 = vrsqrt.f32 %v4865_v38  ;;  %v4870_v21 = vadd.f32 1e-05, %v4838_v31  ;;  %v4839_v61 = vmul.f32 0.03125, %v4775_v24  ;;  %v5028_v23 = vmax.f32 %v4996_v35, 0.0  ;;  %v7329_v38 = vld [vmem:[%s13208_s12 + $0x18] sm:$0xff]  }
 0x471   : > { %14142 = vst [vmem:[#allocation184_spill] sm:$0xff] %v11760_v11  ;;  %v4965_v2 = vmul.f32 %v11734_v5, %v4927_v63  ;;  %v4924_v32 = vmul.f32 %v7727_v22, %v11358_v39  ;;  %v4766_v16 = vpop.xlane.xlu0 %4765  ;;  %v5029_v34 = vmax.f32 %v4997_v45, 0.0  ;;  %v5094_v4 = vmul.f32 %v14143_v7, %v11754_v8  ;;  %v14145_v63 = vld [vmem:[#allocation87_spill] sm:$0xff]  ;;  %7161 = vmatprep.subr.bf16.mxu1 %v7329_v38 }
 0x472   : > { %v7729_v13 = vpop.eup %7728  ;;  %7738 = vrsqrt.f32 %v4870_v21  ;;  %v4871_v57 = vadd.f32 1e-05, %v4839_v61  ;;  %v4836_v55 = vmul.f32 0.03125, %v4766_v16  ;;  %v11770_v15 = vmul.f32 %v14144_v54, %v5028_v23  ;;  %v14146_v45 = vld [vmem:[#allocation7_spill] sm:$0xff]  ;;  %v14147_v23 = vld [vmem:[#allocation5_spill] sm:$0xff]  ;;  %7162 = vmatpush3.bf16.msra.mxu1 %v7329_v38 }
 0x473   : > { %v4962_v31 = vmul.f32 %v11734_v5, %v4924_v32  ;;  %v4925_v39 = vmul.f32 %v7729_v13, %v11365_v42  ;;  %v4769_v35 = vpop.xlane.xlu1 %4768  ;;  %v11778_v24 = vmul.f32 %v14145_v63, %v5029_v34  ;;  %v5095_v22 = vmul.f32 %v14146_v45, %v11760_v11  ;;  %v14148_v13 = vld [vmem:[#allocation8_spill] sm:$0xff] }
 0x474   : > { %v7731_v21 = vpop.eup %7730  ;;  %7740 = vrsqrt.f32 %v4871_v57  ;;  %v4868_v61 = vadd.f32 1e-05, %v4836_v55  ;;  %v4837_v54 = vmul.f32 0.03125, %v4769_v35  ;;  %v5092_v16 = vmul.f32 %v11770_v15, %v14147_v23 }
 0x475   : > { %v4963_v7 = vmul.f32 %v11734_v5, %v4925_v39  ;;  %v4930_v32 = vmul.f32 %v7731_v21, %v11385_v3  ;;  %v4784_v42 = vpop.xlane.xlu0 %4783  ;;  %v5093_v34 = vmul.f32 %v11778_v24, %v14148_v13  ;;  %v5446_v63 = vpack.c.bf16 %v5095_v22, %v5094_v4 }
 0x476   : > { %v7733_v43 = vpop.eup %7732  ;;  %7742 = vrsqrt.f32 %v4868_v61  ;;  %v4869_v45 = vadd.f32 1e-05, %v4837_v54  ;;  %v4842_v57 = vmul.f32 0.03125, %v4784_v42  ;;  %v5000_v55 = vadd.f32 %v11740_v46, %v4962_v31 }
 0x477   : > { %v11790_v35 = vmul.f32 %v11734_v5, %v4930_v32  ;;  %v4931_v23 = vmul.f32 %v7733_v43, %v11392_v30  ;;  %v4787_v39 = vpop.xlane.xlu1 %4786  ;;  %v5445_v11 = vpack.c.bf16 %v5093_v34, %v5092_v16  ;;  %v5001_v3 = vadd.f32 %v11740_v46, %v4963_v7  ;;  %v14149_v32 = vld [vmem:[#allocation70_spill] sm:$0xff] }
 0x478   : > { %v7735_v21 = vpop.eup %7734  ;;  %7744 = vrsqrt.f32 %v4869_v45  ;;  %v4874_v13 = vadd.f32 1e-05, %v4842_v57  ;;  %v4843_v4 = vmul.f32 0.03125, %v4787_v39  ;;  %v5032_v38 = vmax.f32 %v5000_v55, 0.0  ;;  %v14150_v57 = vld [vmem:[#allocation93_spill] sm:$0xff] }
 0x479   : > { %v11795_v22 = vmul.f32 %v11734_v5, %v4931_v23  ;;  %v4928_v61 = vmul.f32 %v7735_v21, %v11382_v12  ;;  %7199 = vmatprep.mubr.msk.bf16.mxu0 %vm1201_vm1, %v5445_v11  ;;  %v4778_v31 = vpop.xlane.xlu0 %4777  ;;  %v5033_v54 = vmax.f32 %v5001_v3, 0.0  ;;  %v5002_v30 = vadd.f32 %v11740_v46, %v4964_v1  ;;  %v14151_v3 = vld [vmem:[#allocation10_spill] sm:$0xff] }
 0x47a   : > { %v7737_v43 = vpop.eup %7736  ;;  %7746 = vrsqrt.f32 %v4874_v13  ;;  %v4875_v16 = vadd.f32 1e-05, %v4843_v4  ;;  %v4840_v7 = vmul.f32 0.03125, %v4778_v31  ;;  %7200 = vmatmul.mubr.msk.bf16.vlgmr.msra.gmra.mrb[32].mxu0 %vm1201_vm1, %v5446_v63  ;;  %v11802_v42 = vmul.f32 %v14149_v32, %v5032_v38  ;;  %v14152_v38 = vld [vmem:[#allocation12_spill] sm:$0xff] }
 0x47b   : > { %v4966_v34 = vmul.f32 %v11734_v5, %v4928_v61  ;;  %v4929_v45 = vmul.f32 %v7737_v43, %v11389_v19  ;;  %v4781_v12 = vpop.xlane.xlu1 %4780  ;;  %v11807_v11 = vmul.f32 %v14150_v57, %v5033_v54  ;;  %v5003_v55 = vadd.f32 %v11740_v46, %v4965_v2 }
 0x47c   : > { %v7739_v1 = vpop.eup %7738  ;;  %7748 = vrsqrt.f32 %v4875_v16  ;;  %v4872_v23 = vadd.f32 1e-05, %v4840_v7  ;;  %v4841_v39 = vmul.f32 0.03125, %v4781_v12  ;;  %v5096_v63 = vmul.f32 %v11802_v42, %v14151_v3 }
 0x47d   : > { %v4967_v21 = vmul.f32 %v11734_v5, %v4929_v45  ;;  %v4934_v13 = vmul.f32 %v7739_v1, %v11409_v10  ;;  %v4796_v4 = vpop.xlane.xlu0 %4795  ;;  %v5097_v19 = vmul.f32 %v11807_v11, %v14152_v38  ;;  %v5034_v61 = vmax.f32 %v5002_v30, 0.0  ;;  %v14153_v45 = vld [vmem:[#allocation68_spill] sm:$0xff]  ;;  %v14154_v30 = vld [vmem:[#allocation89_spill] sm:$0xff] }
 0x47e   : > { %v7741_v31 = vpop.eup %7740  ;;  %7750 = vrsqrt.f32 %v4872_v23  ;;  %v4873_v54 = vadd.f32 1e-05, %v4841_v39  ;;  %v4846_v2 = vmul.f32 0.03125, %v4796_v4  ;;  %v5035_v43 = vmax.f32 %v5003_v55, 0.0  ;;  %v14155_v39 = vld [vmem:[#allocation9_spill] sm:$0xff] }
 0x47f   : > { %v11817_v16 = vmul.f32 %v11734_v5, %v4934_v13  ;;  %v4935_v7 = vmul.f32 %v7741_v31, %v11416_v49  ;;  %v4799_v32 = vpop.xlane.xlu1 %4798  ;;  %v5447_v12 = vpack.c.bf16 %v5097_v19, %v5096_v63  ;;  %v11821_v57 = vmul.f32 %v14153_v45, %v5034_v61  ;;  %v14156_v31 = vld [vmem:[#allocation11_spill] sm:$0xff] }
 0x480   : > { %v7743_v10 = vpop.eup %7742  ;;  %7752 = vrsqrt.f32 %v4873_v54  ;;  %v4878_v1 = vadd.f32 1e-05, %v4846_v2  ;;  %v4847_v3 = vmul.f32 0.03125, %v4799_v32  ;;  %v11824_v38 = vmul.f32 %v14154_v30, %v5035_v43 }
 0x481   : > { %v11827_v23 = vmul.f32 %v11734_v5, %v4935_v7  ;;  %v4932_v55 = vmul.f32 %v7743_v10, %v11406_v26  ;;  %7203 = vmatprep.mubr.msk.bf16.mxu0 %vm1201_vm1, %v5447_v12  ;;  %v4790_v49 = vpop.xlane.xlu0 %4789  ;;  %v5098_v63 = vmul.f32 %v14155_v39, %v11821_v57  ;;  %v5004_v13 = vadd.f32 %v11740_v46, %v4966_v34  ;;  %v14157_v39 = vld [vmem:[#allocation98_spill] sm:$0xff] }
 0x482   : > { %v7745_v4 = vpop.eup %7744  ;;  %7754 = vrsqrt.f32 %v4878_v1  ;;  %v4879_v19 = vadd.f32 1e-05, %v4847_v3  ;;  %v4844_v61 = vmul.f32 0.03125, %v4790_v49  ;;  %v5099_v54 = vmul.f32 %v14156_v31, %v11824_v38 }
 0x483   : > { %v4970_v2 = vmul.f32 %v11734_v5, %v4932_v55  ;;  %v4933_v43 = vmul.f32 %v7745_v4, %v11413_v25  ;;  %v4793_v26 = vpop.xlane.xlu1 %4792  ;;  %v5005_v7 = vadd.f32 %v11740_v46, %v4967_v21  ;;  %v5036_v32 = vmax.f32 %v5004_v13, 0.0 }
 0x484   : > { %v7747_v12 = vpop.eup %7746  ;;  %7756 = vrsqrt.f32 %v4879_v19  ;;  %v4876_v45 = vadd.f32 1e-05, %v4844_v61  ;;  %v5448_v10 = vpack.c.bf16 %v5099_v54, %v5098_v63  ;;  %v4845_v34 = vmul.f32 0.03125, %v4793_v26  ;;  %v14158_v19 = vld [vmem:[#allocation4_spill] sm:$0xff]  ;;  %v14159_v54 = vld [vmem:[#allocation14_spill] sm:$0xff] }
 0x485   : > { %v4971_v1 = vmul.f32 %v11734_v5, %v4933_v43  ;;  %v4938_v3 = vmul.f32 %v7747_v12, %v11433_v50  ;;  %v4808_v30 = vpop.xlane.xlu0 %4807  ;;  %v5037_v49 = vmax.f32 %v5005_v7, 0.0  ;;  %v11842_v31 = vmul.f32 %v14157_v39, %v5036_v32 }
 0x486   : > { %v7749_v55 = vpop.eup %7748  ;;  %7758 = vrsqrt.f32 %v4876_v45  ;;  %7204 = vmatmul.mubr.msk.bf16.gmra.mrb[36].mxu0 %vm1201_vm1, %v5448_v10  ;;  %v4877_v25 = vadd.f32 1e-05, %v4845_v34  ;;  %v4850_v21 = vmul.f32 0.03125, %v4808_v30  ;;  %v5006_v13 = vadd.f32 %v11740_v46, %v11790_v35 }
 0x487   : > { %v11848_v63 = vmul.f32 %v11734_v5, %v4938_v3  ;;  %v4939_v4 = vmul.f32 %v7749_v55, %v11440_v62  ;;  %v4811_v50 = vpop.xlane.xlu1 %4810  ;;  %v11852_v61 = vmul.f32 %v14158_v19, %v5037_v49  ;;  %v5100_v43 = vmul.f32 %v11842_v31, %v14159_v54  ;;  %v14160_v62 = vld [vmem:[#allocation15_spill] sm:$0xff] }
 0x488   : > { %v7751_v26 = vpop.eup %7750  ;;  %7760 = vrsqrt.f32 %v4877_v25  ;;  %v4882_v7 = vadd.f32 1e-05, %v4850_v21  ;;  %v4851_v32 = vmul.f32 0.03125, %v4811_v50  ;;  %v5007_v12 = vadd.f32 %v11740_v46, %v11795_v22 }
 0x489   : > { %v11859_v35 = vmul.f32 %v11734_v5, %v4939_v4  ;;  %v4936_v45 = vmul.f32 %v7751_v26, %v11430_v9  ;;  %v5101_v10 = vmul.f32 %v11852_v61, %v14160_v62  ;;  %v4802_v34 = vpop.xlane.xlu0 %4801  ;;  %v5038_v3 = vmax.f32 %v5006_v13, 0.0  ;;  %v14161_v4 = vld [vmem:[#allocation76_spill] sm:$0xff]  ;;  %v14162_v26 = vld [vmem:[#allocation105_spill] sm:$0xff] }
 0x48a   : > { %v7753_v30 = vpop.eup %7752  ;;  %7762 = vrsqrt.f32 %v4882_v7  ;;  %v4883_v49 = vadd.f32 1e-05, %v4851_v32  ;;  %v4848_v39 = vmul.f32 0.03125, %v4802_v34  ;;  %v5039_v55 = vmax.f32 %v5007_v12, 0.0  ;;  %v14164_v34 = vld [vmem:[#allocation109_spill] sm:$0xff] }
 0x48b   : > { %v11865_v25 = vmul.f32 %v11734_v5, %v4936_v45  ;;  %v4937_v22 = vmul.f32 %v7753_v30, %v11437_v59  ;;  %v5449_v21 = vpack.c.bf16 %v5101_v10, %v5100_v43  ;;  %v11869_v50 = vmul.f32 %v14161_v4, %v5038_v3  ;;  %v4805_v9 = vpop.xlane.xlu1 %4804  ;;  %v14163_v59 = vld [vmem:[#allocation13_spill] sm:$0xff] }
 0x48c   : > { %v7755_v19 = vpop.eup %7754  ;;  %7764 = vrsqrt.f32 %v4883_v49  ;;  %v4880_v54 = vadd.f32 1e-05, %v4848_v39  ;;  %v11872_v13 = vmul.f32 %v14162_v26, %v5039_v55  ;;  %v4849_v7 = vmul.f32 0.03125, %v4805_v9 }
 0x48d   : > { %v11875_v32 = vmul.f32 %v11734_v5, %v4937_v22  ;;  %v4942_v12 = vmul.f32 %v7755_v19, %v11457_v17  ;;  %7207 = vmatprep.mubr.msk.bf16.mxu0 %vm1201_vm1, %v5449_v21  ;;  %v5102_v43 = vmul.f32 %v14163_v59, %v11869_v50  ;;  %v4820_v45 = vpop.xlane.xlu0 %4819  ;;  %v5008_v62 = vadd.f32 %v11740_v46, %v4970_v2  ;;  %v14165_v59 = vld [vmem:[#allocation92_spill] sm:$0xff] }
 0x48e   : > { %v7757_v10 = vpop.eup %7756  ;;  %7766 = vrsqrt.f32 %v4880_v54  ;;  %v5103_v3 = vmul.f32 %v14164_v34, %v11872_v13  ;;  %v4881_v30 = vadd.f32 1e-05, %v4849_v7  ;;  %v4854_v49 = vmul.f32 0.03125, %v4820_v45 }
 0x48f   : > { %v11885_v39 = vmul.f32 %v11734_v5, %v4942_v12  ;;  %v4943_v17 = vmul.f32 %v7757_v10, %v11464_v14  ;;  %v4823_v55 = vpop.xlane.xlu1 %4822  ;;  %v5009_v22 = vadd.f32 %v11740_v46, %v4971_v1  ;;  %v5040_v21 = vmax.f32 %v5008_v62, 0.0 }
 0x490   : > { %v7759_v4 = vpop.eup %7758  ;;  %v5450_v9 = vpack.c.bf16 %v5103_v3, %v5102_v43  ;;  %7768 = vrsqrt.f32 %v4881_v30  ;;  %v4886_v2 = vadd.f32 1e-05, %v4854_v49  ;;  %v4855_v19 = vmul.f32 0.03125, %v4823_v55  ;;  %v14167_v30 = vld [vmem:[#allocation110_spill] sm:$0xff] }
 0x491   : > { %v11890_v54 = vmul.f32 %v11734_v5, %v4943_v17  ;;  %v4940_v26 = vmul.f32 %v7759_v4, %v11454_v51  ;;  %v5041_v7 = vmax.f32 %v5009_v22, 0.0  ;;  %v11894_v12 = vmul.f32 %v14165_v59, %v5040_v21  ;;  %v4814_v45 = vpop.xlane.xlu0 %4813  ;;  %v14166_v51 = vld [vmem:[#allocation101_spill] sm:$0xff] }
 0x492   : > { %v7761_v14 = vpop.eup %7760  ;;  %7208 = vmatmul.mubr.msk.bf16.gmra.mrb[40].mxu0 %vm1201_vm1, %v5450_v9  ;;  %7770 = vrsqrt.f32 %v4886_v2  ;;  %v4887_v1 = vadd.f32 1e-05, %v4855_v19  ;;  %v4852_v62 = vmul.f32 0.03125, %v4814_v45  ;;  %v5010_v43 = vadd.f32 %v11740_v46, %v11817_v16  ;;  %v14169_v45 = vld [vmem:[#allocation88_spill] sm:$0xff] }
 0x493   : > { %v11900_v10 = vmul.f32 %v11734_v5, %v4940_v26  ;;  %v4941_v34 = vmul.f32 %v7761_v14, %v11461_v56  ;;  %v11904_v3 = vmul.f32 %v14166_v51, %v5041_v7  ;;  %v5104_v49 = vmul.f32 %v11894_v12, %v14167_v30  ;;  %v4817_v17 = vpop.xlane.xlu1 %4816  ;;  %v14168_v56 = vld [vmem:[#allocation18_spill] sm:$0xff]  ;;  %v14170_v30 = vld [vmem:[#allocation97_spill] sm:$0xff] }
 0x494   : > { %v7763_v55 = vpop.eup %7762  ;;  %7772 = vrsqrt.f32 %v4887_v1  ;;  %v4884_v22 = vadd.f32 1e-05, %v4852_v62  ;;  %v5011_v21 = vadd.f32 %v11740_v46, %v11827_v23  ;;  %v5042_v4 = vmax.f32 %v5010_v43, 0.0 }
 0x495   : > { %v11911_v16 = vmul.f32 %v11734_v5, %v4941_v34  ;;  %v4946_v9 = vmul.f32 %v7763_v55, %v11481_v60  ;;  %v5105_v2 = vmul.f32 %v11904_v3, %v14168_v56  ;;  %v4853_v19 = vmul.f32 0.03125, %v4817_v17  ;;  %v3710_v26 = vpop.xlane.xlu0 %3709  ;;  %v14171_v17 = vld [vmem:[#allocation16_spill] sm:$0xff] }
 0x496   : > { %v7765_v7 = vpop.eup %7764  ;;  %7774 = vrsqrt.f32 %v4884_v22  ;;  %v5043_v59 = vmax.f32 %v5011_v21, 0.0  ;;  %v11917_v14 = vmul.f32 %v14169_v45, %v5042_v4  ;;  %v3792_v1 = vmul.f32 0.015625, %v3710_v26 }
 0x497   : > { %v11920_v23 = vmul.f32 %v11734_v5, %v4946_v9  ;;  %v4947_v62 = vmul.f32 %v7765_v7, %v11488_v18  ;;  %v5451_v43 = vpack.c.bf16 %v5105_v2, %v5104_v49  ;;  %v4885_v34 = vadd.f32 1e-05, %v4853_v19  ;;  %v3713_v60 = vpop.xlane.xlu1 %3712  ;;  %v14173_v19 = vld [vmem:[#allocation17_spill] sm:$0xff] }
 0x498   : > { %v7767_v51 = vpop.eup %7766  ;;  %v11924_v55 = vmul.f32 %v14170_v30, %v5043_v59  ;;  %v5106_v22 = vmul.f32 %v14171_v17, %v11917_v14  ;;  %v11929_v21 = vsub.f32 %v11528_v6, %v3792_v1  ;;  %v3793_v4 = vmul.f32 0.015625, %v3713_v60 }
 0x499   : > { %v11932_v56 = vmul.f32 %v11734_v5, %v4947_v62  ;;  %v4944_v9 = vmul.f32 %v7767_v51, %v11478_v27  ;;  %7211 = vmatprep.mubr.msk.bf16.mxu0 %vm1201_vm1, %v5451_v43  ;;  %7776 = vrsqrt.f32 %v4885_v34  ;;  %v5012_v18 = vadd.f32 %v11740_v46, %v11865_v25  ;;  %v3716_v49 = vpop.xlane.xlu0 %3715 }
 0x49a   : > { %14172 = vst [vmem:[#allocation170_spill] sm:$0xff] %v11929_v21  ;;  %v7769_v2 = vpop.eup %7768  ;;  %v5107_v26 = vmul.f32 %v14173_v19, %v11924_v55  ;;  %v11941_v6 = vsub.f32 %v11536_v37, %v3793_v4  ;;  %v5013_v7 = vadd.f32 %v11740_v46, %v11875_v32  ;;  %v3794_v59 = vmul.f32 0.015625, %v3716_v49  ;;  %v14178_v19 = vld [vmem:[#allocation20_spill] sm:$0xff] }
 0x49b   : > { %v11946_v27 = vmul.f32 %v11734_v5, %v4944_v9  ;;  %v4945_v45 = vmul.f32 %v7769_v2, %v11485_v33  ;;  %v5044_v1 = vmax.f32 %v5012_v18, 0.0  ;;  %v5014_v25 = vadd.f32 %v11740_v46, %v11848_v63  ;;  %v3719_v62 = vpop.xlane.xlu1 %3718  ;;  %v14176_v33 = vld [vmem:[#allocation107_spill] sm:$0xff] }
 0x49c   : > { %14174 = vst [vmem:[#allocation181_spill] sm:$0xff] %v11941_v6  ;;  %v7771_v43 = vpop.eup %7770  ;;  %v5452_v34 = vpack.c.bf16 %v5107_v26, %v5106_v22  ;;  %v5045_v60 = vmax.f32 %v5013_v7, 0.0  ;;  %v11952_v37 = vsub.f32 %v11542_v52, %v3794_v59  ;;  %v5015_v32 = vadd.f32 %v11740_v46, %v11859_v35  ;;  %v14177_v22 = vld [vmem:[#allocation115_spill] sm:$0xff] }
 0x49d   : > { %v11957_v51 = vmul.f32 %v11734_v5, %v4945_v45  ;;  %v4950_v30 = vmul.f32 %v7771_v43, %v11505_v29  ;;  %v11961_v17 = vmul.f32 %v14176_v33, %v5044_v1  ;;  %v5046_v4 = vmax.f32 %v5014_v25, 0.0  ;;  %v3722_v63 = vpop.xlane.xlu0 %3721  ;;  %v14179_v7 = vld [vmem:[#allocation103_spill] sm:$0xff]  ;;  %v14180_v25 = vld [vmem:[#allocation22_spill] sm:$0xff] }
 0x49e   : > { %14175 = vst [vmem:[#allocation183_spill] sm:$0xff] %v11952_v37  ;;  %v7773_v9 = vpop.eup %7772  ;;  %7212 = vmatmul.mubr.msk.bf16.gmra.mrb[44].mxu0 %vm1201_vm1, %v5452_v34  ;;  %v11965_v18 = vmul.f32 %v14177_v22, %v5045_v60  ;;  %v5047_v52 = vmax.f32 %v5015_v32, 0.0  ;;  %v3795_v49 = vmul.f32 0.015625, %v3719_v62  ;;  %v3856_v35 = vmul.f32 %v11929_v21, %v11929_v21  ;;  %v14181_v62 = vld [vmem:[#allocation113_spill] sm:$0xff]  ;;  %v14183_v33 = vld [vmem:[#allocation19_spill] sm:$0xff] }
 0x49f   : > { %v11970_v2 = vmul.f32 %v11734_v5, %v4950_v30  ;;  %v4951_v29 = vmul.f32 %v7773_v9, %v11512_v20  ;;  %v5108_v26 = vmul.f32 %v11961_v17, %v14178_v19  ;;  %v11976_v59 = vmul.f32 %v14179_v7, %v5046_v4  ;;  %v3725_v45 = vpop.xlane.xlu1 %3724 }
 0x4a0   : > { %v7775_v1 = vpop.eup %7774  ;;  %v5109_v43 = vmul.f32 %v11965_v18, %v14180_v25  ;;  %v11981_v34 = vmul.f32 %v14181_v62, %v5047_v52  ;;  %v11984_v60 = vsub.f32 %v11551_v36, %v3795_v49  ;;  %v3900_v32 = vsel %vm3689_vm2, %v3856_v35, 0.0  ;;  %v14184_v52 = vld [vmem:[#allocation21_spill] sm:$0xff] }
 0x4a1   : > { %v11988_v20 = vmul.f32 %v11734_v5, %v4951_v29  ;;  %v4948_v30 = vmul.f32 %v7775_v1, %v11502_v0  ;;  %v5110_v4 = vmul.f32 %v14183_v33, %v11976_v59  ;;  %3901 = vadd.xlane.f32.xlu0 %v3900_v32  ;;  %v3796_v9 = vmul.f32 0.015625, %v3722_v63  ;;  %v3728_v22 = vpop.xlane.xlu0 %3727 }
 0x4a2   : > { %14182 = vst [vmem:[#allocation180_spill] sm:$0xff] %v11984_v60  ;;  %v5453_v19 = vpack.c.bf16 %v5109_v43, %v5108_v26  ;;  %v5111_v7 = vmul.f32 %v14184_v52, %v11981_v34  ;;  %v3797_v25 = vmul.f32 0.015625, %v3725_v45  ;;  %v3857_v36 = vmul.f32 %v11941_v6, %v11941_v6  ;;  %v14188_v52 = vld [vmem:[#allocation123_spill] sm:$0xff] }
 0x4a3   : > { %v7777_v49 = vpop.eup %7776  ;;  %v11998_v35 = vmul.f32 %v11734_v5, %v4948_v30  ;;  %v12001_v0 = vsub.f32 %v11557_v41, %v3796_v9  ;;  %v5016_v29 = vadd.f32 %v11740_v46, %v11900_v10  ;;  %v5017_v63 = vadd.f32 %v11740_v46, %v11911_v16  ;;  %v3731_v26 = vpop.xlane.xlu1 %3730  ;;  %v14187_v9 = vld [vmem:[#allocation119_spill] sm:$0xff] }
 0x4a4   : > { %v4949_v1 = vmul.f32 %v7777_v49, %v11509_v28  ;;  %7215 = vmatprep.mubr.msk.bf16.mxu0 %vm1201_vm1, %v5453_v19  ;;  %v5454_v45 = vpack.c.bf16 %v5111_v7, %v5110_v4  ;;  %v12010_v43 = vsub.f32 %v11563_v44, %v3797_v25  ;;  %v3903_v62 = vsel %vm3689_vm2, %v3857_v36, 0.0 }
 0x4a5   : > { %14185 = vst [vmem:[#allocation193_spill] sm:$0xff] %v12001_v0  ;;  %3904 = vadd.xlane.f32.xlu1 %v3903_v62  ;;  %v5048_v41 = vmax.f32 %v5016_v29, 0.0  ;;  %v5049_v32 = vmax.f32 %v5017_v63, 0.0  ;;  %v3858_v10 = vmul.f32 %v11952_v37, %v11952_v37  ;;  %v3798_v30 = vmul.f32 0.015625, %v3728_v22  ;;  %v3734_v33 = vpop.xlane.xlu0 %3733  ;;  %v14191_v29 = vld [vmem:[#allocation24_spill] sm:$0xff] }
 0x4a6   : > { %14186 = vst [vmem:[#allocation182_spill] sm:$0xff] %v12010_v43  ;;  %v12016_v16 = vmul.f32 %v11734_v5, %v4949_v1  ;;  %7216 = vmatmul.mubr.msk.bf16.gmra.mrb[48].mxu0 %vm1201_vm1, %v5454_v45  ;;  %v5018_v28 = vadd.f32 %v11740_v46, %v11885_v39  ;;  %v5019_v44 = vadd.f32 %v11740_v46, %v11890_v54  ;;  %v3799_v4 = vmul.f32 0.015625, %v3731_v26  ;;  %v14192_v26 = vld [vmem:[#allocation26_spill] sm:$0xff] }
 0x4a7   : > { %v12024_v19 = vmul.f32 %v14187_v9, %v5048_v41  ;;  %v12027_v7 = vmul.f32 %v14188_v52, %v5049_v32  ;;  %v3906_v22 = vsel %vm3689_vm2, %v3858_v10, 0.0  ;;  %v12031_v5 = vsub.f32 %v11569_v53, %v3798_v30  ;;  %v3737_v25 = vpop.xlane.xlu1 %3736  ;;  %v14193_v41 = vld [vmem:[#allocation117_spill] sm:$0xff] }
 0x4a8   : > { %3907 = vadd.xlane.f32.xlu0 %v3906_v22  ;;  %v5050_v36 = vmax.f32 %v5018_v28, 0.0  ;;  %v5051_v49 = vmax.f32 %v5019_v44, 0.0  ;;  %v12034_v39 = vsub.f32 %v11578_v40, %v3799_v4  ;;  %v3859_v54 = vmul.f32 %v11984_v60, %v11984_v60  ;;  %v14194_v10 = vld [vmem:[#allocation121_spill] sm:$0xff]  ;;  %v14196_v22 = vld [vmem:[#allocation23_spill] sm:$0xff] }
 0x4a9   : > { %14189 = vst [vmem:[#allocation195_spill] sm:$0xff] %v12031_v5  ;;  %v5112_v63 = vmul.f32 %v12024_v19, %v14191_v29  ;;  %v5113_v1 = vmul.f32 %v12027_v7, %v14192_v26  ;;  %v3860_v53 = vmul.f32 %v12001_v0, %v12001_v0  ;;  %v3800_v45 = vmul.f32 0.015625, %v3734_v33  ;;  %v3740_v62 = vpop.xlane.xlu0 %3739 }
 0x4aa   : > { %14190 = vst [vmem:[#allocation190_spill] sm:$0xff] %v12034_v39  ;;  %v12045_v32 = vmul.f32 %v14193_v41, %v5050_v36  ;;  %v12048_v40 = vmul.f32 %v14194_v10, %v5051_v49  ;;  %v3909_v30 = vsel %vm3689_vm2, %v3859_v54, 0.0  ;;  %v3801_v28 = vmul.f32 0.015625, %v3737_v25  ;;  %v14197_v49 = vld [vmem:[#allocation25_spill] sm:$0xff] }
 0x4ab   : > { %v5455_v44 = vpack.c.bf16 %v5113_v1, %v5112_v63  ;;  %3910 = vadd.xlane.f32.xlu1 %v3909_v30  ;;  %v3912_v4 = vsel %vm3689_vm2, %v3860_v53, 0.0  ;;  %v12053_v9 = vsub.f32 %v11584_v47, %v3800_v45  ;;  %v3861_v33 = vmul.f32 %v12010_v43, %v12010_v43  ;;  %v3743_v52 = vpop.xlane.xlu1 %3742  ;;  %v14269_v43 = vld [vmem:[#allocation71_spill] sm:$0xff] }
 0x4ac   : > { %v5114_v36 = vmul.f32 %v14196_v22, %v12045_v32  ;;  %v5115_v29 = vmul.f32 %v14197_v49, %v12048_v40  ;;  %3913 = vadd.xlane.f32.xlu0 %v3912_v4  ;;  %v12062_v25 = vsub.f32 %v11590_v48, %v3801_v28  ;;  %v5020_v54 = vadd.f32 %v11740_v46, %v11946_v27  ;;  %v14201_v22 = vld [vmem:[#allocation127_spill] sm:$0xff]  ;;  %v14202_v49 = vld [vmem:[#allocation142_spill] sm:$0xff] }
 0x4ad   : > { %14195 = vst [vmem:[#allocation200_spill] sm:$0xff] %v12053_v9  ;;  %7219 = vmatprep.mubr.msk.bf16.mxu0 %vm1201_vm1, %v5455_v44  ;;  %v3915_v47 = vsel %vm3689_vm2, %v3861_v33, 0.0  ;;  %v5021_v63 = vadd.f32 %v11740_v46, %v11957_v51  ;;  %v3862_v26 = vmul.f32 %v12031_v5, %v12031_v5  ;;  %v3802_v1 = vmul.f32 0.015625, %v3740_v62  ;;  %v3746_v53 = vpop.xlane.xlu0 %3745  ;;  %v14200_v62 = vld [vmem:[#allocation125_spill] sm:$0xff]  ;;  %v14263_v5 = vld [vmem:[#allocation51_spill] sm:$0xff] }
 0x4ae   : > { %14198 = vst [vmem:[#allocation192_spill] sm:$0xff] %v12062_v25  ;;  %v5456_v45 = vpack.c.bf16 %v5115_v29, %v5114_v36  ;;  %v5052_v41 = vmax.f32 %v5020_v54, 0.0  ;;  %v5022_v48 = vadd.f32 %v11740_v46, %v11920_v23  ;;  %v5023_v27 = vadd.f32 %v11740_v46, %v11932_v56 }
 0x4af   : > { %3916 = vadd.xlane.f32.xlu1 %v3915_v47  ;;  %v5053_v10 = vmax.f32 %v5021_v63, 0.0  ;;  %v3918_v30 = vsel %vm3689_vm2, %v3862_v26, 0.0  ;;  %v12078_v28 = vsub.f32 %v11596_v58, %v3802_v1  ;;  %v3803_v51 = vmul.f32 0.015625, %v3743_v52  ;;  %v3749_v44 = vpop.xlane.xlu1 %3748  ;;  %v14204_v47 = vld [vmem:[#allocation28_spill] sm:$0xff] }
 0x4b0   : > { %7220 = vmatmul.mubr.msk.bf16.gmra.mrb[52].mxu0 %vm1201_vm1, %v5456_v45  ;;  %v12082_v4 = vmul.f32 %v14200_v62, %v5052_v41  ;;  %3919 = vadd.xlane.f32.xlu0 %v3918_v30  ;;  %v5054_v33 = vmax.f32 %v5022_v48, 0.0  ;;  %v5055_v23 = vmax.f32 %v5023_v27, 0.0  ;;  %v3863_v56 = vmul.f32 %v12034_v39, %v12034_v39  ;;  %v14205_v26 = vld [vmem:[#allocation124_spill] sm:$0xff]  ;;  %v14206_v45 = vld [vmem:[#allocation126_spill] sm:$0xff] }
 0x4b1   : > { %14199 = vst [vmem:[#allocation134_spill] sm:$0xff] %v12078_v28  ;;  %v12087_v36 = vmul.f32 %v14201_v22, %v5053_v10  ;;  %v12090_v29 = vsub.f32 %v14202_v49, %v3803_v51  ;;  %v3864_v58 = vmul.f32 %v12053_v9, %v12053_v9  ;;  %v3804_v52 = vmul.f32 0.015625, %v3746_v53  ;;  %v3752_v54 = vpop.xlane.xlu0 %3751  ;;  %v14207_v27 = vld [vmem:[#allocation30_spill] sm:$0xff]  ;;  %v14208_v51 = vld [vmem:[#allocation152_spill] sm:$0xff]  ;;  %v14210_v49 = vld [vmem:[#allocation27_spill] sm:$0xff] }
 0x4b2   : > { %v5116_v63 = vmul.f32 %v12082_v4, %v14204_v47  ;;  %v12097_v1 = vmul.f32 %v14205_v26, %v5054_v33  ;;  %v12100_v41 = vmul.f32 %v14206_v45, %v5055_v23  ;;  %v3921_v48 = vsel %vm3689_vm2, %v3863_v56, 0.0  ;;  %v14211_v47 = vld [vmem:[#allocation29_spill] sm:$0xff]  ;;  %v14251_v39 = vld [vmem:[#allocation164_spill] sm:$0xff] }
 0x4b3   : > { %14203 = vst [vmem:[#allocation189_spill] sm:$0xff] %v12090_v29  ;;  %v5117_v10 = vmul.f32 %v12087_v36, %v14207_v27  ;;  %3922 = vadd.xlane.f32.xlu1 %v3921_v48  ;;  %v3924_v30 = vsel %vm3689_vm2, %v3864_v58, 0.0  ;;  %v12107_v53 = vsub.f32 %v14208_v51, %v3804_v52  ;;  %v3805_v62 = vmul.f32 0.015625, %v3749_v44  ;;  %v3755_v22 = vpop.xlane.xlu1 %3754  ;;  %v14212_v58 = vld [vmem:[#allocation148_spill] sm:$0xff] }
 0x4b4   : > { %v5118_v33 = vmul.f32 %v14210_v49, %v12097_v1  ;;  %v5119_v23 = vmul.f32 %v14211_v47, %v12100_v41  ;;  %3925 = vadd.xlane.f32.xlu0 %v3924_v30  ;;  %v3865_v56 = vmul.f32 %v12062_v25, %v12062_v25  ;;  %v5024_v26 = vadd.f32 %v11740_v46, %v11998_v35 }
 0x4b5   : > { %14209 = vst [vmem:[#allocation199_spill] sm:$0xff] %v12107_v53  ;;  %v5457_v45 = vpack.c.bf16 %v5117_v10, %v5116_v63  ;;  %v12118_v48 = vsub.f32 %v14212_v58, %v3805_v62  ;;  %v5025_v44 = vadd.f32 %v11740_v46, %v12016_v16  ;;  %v3866_v52 = vmul.f32 %v12078_v28, %v12078_v28  ;;  %v3758_v27 = vpop.xlane.xlu0 %3757  ;;  %v14217_v58 = vld [vmem:[#allocation131_spill] sm:$0xff] }
 0x4b6   : > { %v5458_v51 = vpack.c.bf16 %v5119_v23, %v5118_v33  ;;  %v3927_v30 = vsel %vm3689_vm2, %v3865_v56, 0.0  ;;  %v5056_v49 = vmax.f32 %v5024_v26, 0.0  ;;  %v3806_v47 = vmul.f32 0.015625, %v3752_v54  ;;  %v14214_v33 = vld [vmem:[#allocation129_spill] sm:$0xff]  ;;  %v14215_v54 = vld [vmem:[#allocation159_spill] sm:$0xff] }
 0x4b7   : > { %14213 = vst [vmem:[#allocation137_spill] sm:$0xff] %v12118_v48  ;;  %7223 = vmatprep.mubr.msk.bf16.mxu0 %vm1201_vm1, %v5457_v45  ;;  %3928 = vadd.xlane.f32.xlu1 %v3927_v30  ;;  %v5057_v35 = vmax.f32 %v5025_v44, 0.0  ;;  %v3930_v63 = vsel %vm3689_vm2, %v3866_v52, 0.0  ;;  %v5026_v10 = vadd.f32 %v11740_v46, %v11970_v2  ;;  %v5027_v16 = vadd.f32 %v11740_v46, %v11988_v20  ;;  %v3761_v62 = vpop.xlane.xlu1 %3760  ;;  %v14218_v46 = vld [vmem:[#allocation37_spill] sm:$0xff]  ;;  %v14219_v30 = vld [vmem:[#allocation36_spill] sm:$0xff] }
 0x4b8   : > { %7224 = vmatmul.mubr.msk.bf16.gmra.mrb[56].mxu0 %vm1201_vm1, %v5458_v51  ;;  %v12133_v23 = vmul.f32 %v14214_v33, %v5056_v49  ;;  %3931 = vadd.xlane.f32.xlu0 %v3930_v63  ;;  %v12136_v56 = vsub.f32 %v14215_v54, %v3806_v47  ;;  %v3807_v26 = vmul.f32 0.015625, %v3755_v22  ;;  %v3867_v45 = vmul.f32 %v12090_v29, %v12090_v29  ;;  %v14220_v63 = vld [vmem:[#allocation151_spill] sm:$0xff]  ;;  %v14223_v29 = vld [vmem:[#allocation33_spill] sm:$0xff] }
 0x4b9   : > { %v12141_v44 = vmul.f32 %v14217_v58, %v5057_v35  ;;  %v5058_v2 = vmax.f32 %v5026_v10, 0.0  ;;  %v5059_v52 = vmax.f32 %v5027_v16, 0.0  ;;  %v5124_v20 = vmul.f32 %v11770_v15, %v14218_v46  ;;  %v3764_v51 = vpop.xlane.xlu0 %3763  ;;  %v14222_v47 = vld [vmem:[#allocation35_spill] sm:$0xff]  ;;  %v14224_v10 = vld [vmem:[#allocation128_spill] sm:$0xff]  ;;  %v14225_v58 = vld [vmem:[#allocation130_spill] sm:$0xff] }
 0x4ba   : > { %14216 = vst [vmem:[#allocation191_spill] sm:$0xff] %v12136_v56  ;;  %v5120_v49 = vmul.f32 %v12133_v23, %v14219_v30  ;;  %v12148_v33 = vsub.f32 %v14220_v63, %v3807_v26  ;;  %v3933_v22 = vsel %vm3689_vm2, %v3867_v45, 0.0  ;;  %v5125_v54 = vmul.f32 %v11778_v24, %v14222_v47 }
 0x4bb   : > { %v5121_v35 = vmul.f32 %v12141_v44, %v14223_v29  ;;  %v12156_v16 = vmul.f32 %v14224_v10, %v5058_v2  ;;  %v12159_v46 = vmul.f32 %v14225_v58, %v5059_v52  ;;  %3934 = vadd.xlane.f32.xlu1 %v3933_v22  ;;  %v3868_v30 = vmul.f32 %v12107_v53, %v12107_v53  ;;  %v3767_v26 = vpop.xlane.xlu1 %3766  ;;  %v14226_v29 = vld [vmem:[#allocation31_spill] sm:$0xff]  ;;  %v14227_v2 = vld [vmem:[#allocation32_spill] sm:$0xff]  ;;  %v14228_v58 = vld [vmem:[#allocation165_spill] sm:$0xff] }
 0x4bc   : > { %14221 = vst [vmem:[#allocation138_spill] sm:$0xff] %v12148_v33  ;;  %v5461_v63 = vpack.c.bf16 %v5125_v54, %v5124_v20  ;;  %v3808_v28 = vmul.f32 0.015625, %v3758_v27  ;;  %v3809_v45 = vmul.f32 0.015625, %v3761_v62  ;;  %v3869_v47 = vmul.f32 %v12118_v48, %v12118_v48  ;;  %v14230_v20 = vld [vmem:[#allocation147_spill] sm:$0xff] }
 0x4bd   : > { %v5459_v25 = vpack.c.bf16 %v5121_v35, %v5120_v49  ;;  %v5122_v9 = vmul.f32 %v14226_v29, %v12156_v16  ;;  %v5123_v10 = vmul.f32 %v14227_v2, %v12159_v46  ;;  %v3936_v52 = vsel %vm3689_vm2, %v3868_v30, 0.0  ;;  %v3770_v22 = vpop.xlane.xlu0 %3769  ;;  %v14232_v30 = vld [vmem:[#allocation47_spill] sm:$0xff]  ;;  %v14233_v2 = vld [vmem:[#allocation184_spill] sm:$0xff] }
 0x4be   : > { %3937 = vadd.xlane.f32.xlu0 %v3936_v52  ;;  %v12171_v53 = vsub.f32 %v14228_v58, %v3808_v28  ;;  %v12174_v27 = vsub.f32 %v14230_v20, %v3809_v45  ;;  %v3939_v62 = vsel %vm3689_vm2, %v3869_v47, 0.0  ;;  %v3870_v49 = vmul.f32 %v12136_v56, %v12136_v56  ;;  %v14234_v52 = vld [vmem:[#allocation34_spill] sm:$0xff]  ;;  %v14235_v48 = vld [vmem:[#allocation39_spill] sm:$0xff] }
 0x4bf   : > { %7227 = vmatprep.mubr.msk.bf16.mxu0 %vm1201_vm1, %v5459_v25  ;;  %v5460_v54 = vpack.c.bf16 %v5123_v10, %v5122_v9  ;;  %3940 = vadd.xlane.f32.xlu1 %v3939_v62  ;;  %v3810_v35 = vmul.f32 0.015625, %v3764_v51  ;;  %v5126_v29 = vmul.f32 %v14232_v30, %v11754_v8  ;;  %v5127_v28 = vmul.f32 %v14234_v52, %v14233_v2  ;;  %v3773_v58 = vpop.xlane.xlu1 %3772  ;;  %v14236_v9 = vld [vmem:[#allocation157_spill] sm:$0xff] }
 0x4c0   : > { %14229 = vst [vmem:[#allocation139_spill] sm:$0xff] %v12171_v53  ;;  %14231 = vst [vmem:[#allocation143_spill] sm:$0xff] %v12174_v27  ;;  %v3942_v45 = vsel %vm3689_vm2, %v3870_v49, 0.0  ;;  %v3811_v20 = vmul.f32 0.015625, %v3767_v26  ;;  %v3871_v47 = vmul.f32 %v12148_v33, %v12148_v33  ;;  %v5128_v56 = vmul.f32 %v11802_v42, %v14235_v48  ;;  %v14238_v10 = vld [vmem:[#allocation53_spill] sm:$0xff] }
 0x4c1   : > { %7228 = vmatmul.mubr.msk.bf16.gmra.mrb[60].mxu0 %vm1201_vm1, %v5460_v54  ;;  %v12191_v25 = vsub.f32 %v14236_v9, %v3810_v35  ;;  %v5462_v51 = vpack.c.bf16 %v5127_v28, %v5126_v29  ;;  %v5129_v62 = vmul.f32 %v11807_v11, %v14238_v10  ;;  %v3872_v30 = vmul.f32 %v12171_v53, %v12171_v53  ;;  %v3776_v49 = vpop.xlane.xlu0 %3775  ;;  %v14239_v26 = vld [vmem:[#allocation149_spill] sm:$0xff] }
 0x4c2   : > { %7231 = vmatprep.mubr.msk.bf16.mxu0 %vm1201_vm1, %v5461_v63  ;;  %3943 = vadd.xlane.f32.xlu0 %v3942_v45  ;;  %v12199_v52 = vsub.f32 %v14239_v26, %v3811_v20  ;;  %v3945_v48 = vsel %vm3689_vm2, %v3871_v47, 0.0  ;;  %v3812_v54 = vmul.f32 0.015625, %v3770_v22  ;;  %v3813_v33 = vmul.f32 0.015625, %v3773_v58  ;;  %v14241_v63 = vld [vmem:[#allocation162_spill] sm:$0xff]  ;;  %v14245_v22 = vld [vmem:[#allocation49_spill] sm:$0xff] }
 0x4c3   : > { %14237 = vst [vmem:[#allocation146_spill] sm:$0xff] %v12191_v25  ;;  %3946 = vadd.xlane.f32.xlu1 %v3945_v48  ;;  %v5463_v35 = vpack.c.bf16 %v5129_v62, %v5128_v56  ;;  %v3948_v29 = vsel %vm3689_vm2, %v3872_v30, 0.0  ;;  %v3873_v28 = vmul.f32 %v12174_v27, %v12174_v27  ;;  %v3874_v9 = vmul.f32 %v12191_v25, %v12191_v25  ;;  %v3779_v10 = vpop.xlane.xlu1 %3778  ;;  %v14243_v20 = vld [vmem:[#allocation158_spill] sm:$0xff]  ;;  %v14246_v30 = vld [vmem:[#allocation73_spill] sm:$0xff]  ;;  %v14250_v27 = vld [vmem:[#allocation43_spill] sm:$0xff] }
 0x4c4   : > { %14240 = vst [vmem:[#allocation78_spill] sm:$0xff] %v12199_v52  ;;  %v12208_v45 = vsub.f32 %v14241_v63, %v3812_v54  ;;  %v12211_v26 = vsub.f32 %v14243_v20, %v3813_v33  ;;  %v3814_v47 = vmul.f32 0.015625, %v3776_v49  ;;  %v12215_v58 = vmul.f32 %v14245_v22, %v11821_v57  ;;  %v14247_v63 = vld [vmem:[#allocation173_spill] sm:$0xff]  ;;  %v14249_v20 = vld [vmem:[#allocation55_spill] sm:$0xff] }
 0x4c5   : > { %v3951_v56 = vsel %vm3689_vm2, %v3873_v28, 0.0  ;;  %v3954_v62 = vsel %vm3689_vm2, %v3874_v9, 0.0  ;;  %v5131_v48 = vmul.f32 %v14246_v30, %v11824_v38  ;;  %v3875_v25 = vmul.f32 %v12199_v52, %v12199_v52  ;;  %v3782_v54 = vpop.xlane.xlu0 %3781 }
 0x4c6   : > { %14242 = vst [vmem:[#allocation94_spill] sm:$0xff] %v12208_v45  ;;  %14244 = vst [vmem:[#allocation6_spill] sm:$0xff] %v12211_v26  ;;  %3949 = vadd.xlane.f32.xlu0 %v3948_v29  ;;  %v12224_v33 = vsub.f32 %v14247_v63, %v3814_v47  ;;  %v3815_v49 = vmul.f32 0.015625, %v3779_v10  ;;  %v5132_v22 = vmul.f32 %v11842_v31, %v14249_v20  ;;  %v3816_v53 = vmul.f32 0.015625, %v3782_v54  ;;  %v14255_v54 = vld [vmem:[#allocation41_spill] sm:$0xff] }
 0x4c7   : > { %v5133_v28 = vmul.f32 %v11852_v61, %v14250_v27  ;;  %3952 = vadd.xlane.f32.xlu1 %v3951_v56  ;;  %v5464_v9 = vpack.c.bf16 %v5131_v48, %v12215_v58  ;;  %v3957_v30 = vsel %vm3689_vm2, %v3875_v25, 0.0  ;;  %v3876_v52 = vmul.f32 %v12208_v45, %v12208_v45  ;;  %v3785_v29 = vpop.xlane.xlu1 %3784  ;;  %v14253_v58 = vld [vmem:[#allocation156_spill] sm:$0xff] }
 0x4c8   : > { %14248 = vst [vmem:[#allocation58_spill] sm:$0xff] %v12224_v33  ;;  %v12235_v47 = vsub.f32 %v14251_v39, %v3815_v49  ;;  %v3877_v63 = vmul.f32 %v12211_v26, %v12211_v26  ;;  %v3817_v20 = vmul.f32 0.015625, %v3785_v29  ;;  %v12242_v56 = vsub.f32 %v14253_v58, %v3816_v53  ;;  %v14258_v53 = vld [vmem:[#allocation60_spill] sm:$0xff] }
 0x4c9   : > { %v5465_v10 = vpack.c.bf16 %v5133_v28, %v5132_v22  ;;  %7232 = vmatmul.mubr.msk.bf16.gmra.mrb[64].mxu0 %vm1201_vm1, %v5462_v51  ;;  %v3960_v27 = vsel %vm3689_vm2, %v3876_v52, 0.0  ;;  %v3878_v25 = vmul.f32 %v12224_v33, %v12224_v33  ;;  %v3884_v48 = vpop.xlane.xlu0 %3883  ;;  %v12248_v39 = vmul.f32 %v14255_v54, %v11869_v50  ;;  %v14256_v22 = vld [vmem:[#allocation161_spill] sm:$0xff] }
 0x4ca   : > { %14252 = vst [vmem:[#allocation87_spill] sm:$0xff] %v12235_v47  ;;  %14254 = vst [vmem:[#allocation7_spill] sm:$0xff] %v12242_v56  ;;  %7235 = vmatprep.mubr.msk.bf16.mxu0 %vm1201_vm1, %v5463_v35  ;;  %3955 = vadd.xlane.f32.xlu0 %v3954_v62  ;;  %v3963_v49 = vsel %vm3689_vm2, %v3877_v63, 0.0  ;;  %v12253_v51 = vsub.f32 %v14256_v22, %v3817_v20  ;;  %v3978_v52 = vmul.f32 0.015625, %v3884_v48  ;;  %v14259_v33 = vld [vmem:[#allocation45_spill] sm:$0xff]  ;;  %v14260_v62 = vld [vmem:[#allocation48_spill] sm:$0xff] }
 0x4cb   : > { %v12257_v28 = vmul.f32 %v14258_v53, %v11872_v13  ;;  %3958 = vadd.xlane.f32.xlu1 %v3957_v30  ;;  %v3966_v29 = vsel %vm3689_vm2, %v3878_v25, 0.0  ;;  %v3879_v58 = vmul.f32 %v12235_v47, %v12235_v47  ;;  %v3887_v54 = vpop.xlane.xlu1 %3886  ;;  %v12264_v35 = vmul.f32 %v11894_v12, %v14259_v33  ;;  %v14262_v53 = vld [vmem:[#allocation61_spill] sm:$0xff] }
 0x4cc   : > { %14257 = vst [vmem:[#allocation5_spill] sm:$0xff] %v12253_v51  ;;  %v12268_v63 = vmul.f32 %v11904_v3, %v14260_v62  ;;  %v4010_v20 = vadd.f32 1e-05, %v3978_v52  ;;  %v3979_v22 = vmul.f32 0.015625, %v3887_v54  ;;  %v3880_v30 = vmul.f32 %v12242_v56, %v12242_v56  ;;  %v14261_v62 = vld [vmem:[#allocation59_spill] sm:$0xff] }
 0x4cd   : > { %v3969_v25 = vsel %vm3689_vm2, %v3879_v58, 0.0  ;;  %v3890_v47 = vpop.xlane.xlu0 %3889  ;;  %v3881_v33 = vmul.f32 %v12253_v51, %v12253_v51  ;;  %v12281_v26 = vmul.f32 %v14261_v62, %v11917_v14  ;;  %v12287_v45 = vmul.f32 %v14262_v53, %v11924_v55  ;;  %v14264_v62 = vld [vmem:[#allocation54_spill] sm:$0xff] }
 0x4ce   : > { %3961 = vadd.xlane.f32.xlu0 %v3960_v27  ;;  %7778 = vrsqrt.f32 %v4010_v20  ;;  %v4011_v52 = vadd.f32 1e-05, %v3979_v22  ;;  %v3972_v54 = vsel %vm3689_vm2, %v3880_v30, 0.0  ;;  %v3980_v48 = vmul.f32 0.015625, %v3890_v47  ;;  %v14265_v47 = vld [vmem:[#allocation65_spill] sm:$0xff] }
 0x4cf   : > { %3964 = vadd.xlane.f32.xlu1 %v3963_v49  ;;  %v3975_v58 = vsel %vm3689_vm2, %v3881_v33, 0.0  ;;  %v3893_v56 = vpop.xlane.xlu1 %3892  ;;  %v12291_v51 = vmul.f32 %v11961_v17, %v14263_v5  ;;  %v12295_v27 = vmul.f32 %v11965_v18, %v14264_v62  ;;  %v12299_v49 = vmul.f32 %v14265_v47, %v11976_v59  ;;  %v14266_v33 = vld [vmem:[#allocation67_spill] sm:$0xff]  ;;  %v14268_v47 = vld [vmem:[#allocation112_spill] sm:$0xff] }
 0x4d0   : > { %7780 = vrsqrt.f32 %v4011_v52  ;;  %v4012_v20 = vadd.f32 1e-05, %v3980_v48  ;;  %v3981_v22 = vmul.f32 0.015625, %v3893_v56  ;;  %v12308_v62 = vmul.f32 %v14266_v33, %v11981_v34  ;;  %v14267_v52 = vld [vmem:[#allocation57_spill] sm:$0xff]  ;;  %v14272_v33 = vld [vmem:[#allocation38_spill] sm:$0xff] }
 0x4d1   : > { %7236 = vmatmul.mubr.msk.bf16.gmra.mrb[68].mxu0 %vm1201_vm1, %v5464_v9  ;;  %v3896_v30 = vpop.xlane.xlu0 %3895  ;;  %v12312_v56 = vmul.f32 %v12024_v19, %v14267_v52  ;;  %v12317_v53 = vmul.f32 %v12027_v7, %v14268_v47  ;;  %v12323_v0 = vmul.f32 %v14269_v43, %v12045_v32  ;;  %v14270_v52 = vld [vmem:[#allocation111_spill] sm:$0xff]  ;;  %v12339_v43 = vmul.f32 %v12087_v36, %v14272_v33  ;;  %v14278_v47 = vld [vmem:[#allocation42_spill] sm:$0xff]  ;;  %v14281_v33 = vld [vmem:[#allocation69_spill] sm:$0xff] }
 0x4d2   : > { %7239 = vmatprep.mubr.msk.bf16.mxu0 %vm1201_vm1, %v5465_v10  ;;  %3967 = vadd.xlane.f32.xlu0 %v3966_v29  ;;  %7782 = vrsqrt.f32 %v4012_v20  ;;  %v4013_v9 = vadd.f32 1e-05, %v3981_v22  ;;  %v3982_v48 = vmul.f32 0.015625, %v3896_v30  ;;  %v12327_v10 = vmul.f32 %v14270_v52, %v12048_v40  ;;  %v14271_v29 = vld [vmem:[#allocation63_spill] sm:$0xff]  ;;  %v14273_v52 = vld [vmem:[#allocation77_spill] sm:$0xff] }
 0x4d3   : > { %3970 = vadd.xlane.f32.xlu1 %v3969_v25  ;;  %v3899_v5 = vpop.xlane.xlu1 %3898  ;;  %v12331_v20 = vmul.f32 %v12082_v4, %v14271_v29  ;;  %v12343_v60 = vmul.f32 %v14273_v52, %v12097_v1  ;;  %v14275_v29 = vld [vmem:[#allocation79_spill] sm:$0xff]  ;;  %v12355_v25 = vmul.f32 %v12141_v44, %v14278_v47  ;;  %v12372_v47 = vld [vmem:[%s13204_s8] ss:$0 sm:$0xff]  ;;  %v12378_v52 = vmul.f32 %v11770_v15, %v14281_v33  ;;  %v14286_v15 = vld [vmem:[#allocation85_spill] sm:$0xff] }
 0x4d4   : > { %7784 = vrsqrt.f32 %v4013_v9  ;;  %v4014_v22 = vadd.f32 1e-05, %v3982_v48  ;;  %v3983_v30 = vmul.f32 0.015625, %v3899_v5  ;;  %v12347_v37 = vmul.f32 %v14275_v29, %v12100_v41  ;;  %v14276_v9 = vld [vmem:[#allocation66_spill] sm:$0xff]  ;;  %v14279_v29 = vld [vmem:[#allocation40_spill] sm:$0xff] }
 0x4d5   : > { %14274 = vst [vmem:[#allocation8_spill] sm:$0xff] %v12343_v60  ;;  %v12351_v48 = vmul.f32 %v12133_v23, %v14276_v9  ;;  %v14284_v60 = vpack.c.bf16 %v12257_v28, %v12248_v39  ;;  %v12397_v33 = vmul.f32 %v14286_v15, %v14233_v2  ;;  %v14290_v2 = vld [vmem:[#allocation52_spill] sm:$0xff]  ;;  %v14294_v39 = vld [vmem:[#allocation75_spill] sm:$0xff] }
 0x4d6   : > { %3973 = vadd.xlane.f32.xlu0 %v3972_v54  ;;  %7786 = vrsqrt.f32 %v4014_v22  ;;  %v4015_v5 = vadd.f32 1e-05, %v3983_v30  ;;  %v12363_v54 = vmul.f32 %v14279_v29, %v12156_v16  ;;  %v14280_v22 = vld [vmem:[#allocation83_spill] sm:$0xff]  ;;  %v14282_v29 = vld [vmem:[#allocation46_spill] sm:$0xff] }
 0x4d7   : > { %14277 = vst [vmem:[#allocation70_spill] sm:$0xff] %v12351_v48  ;;  %3976 = vadd.xlane.f32.xlu1 %v3975_v58  ;;  %v12367_v30 = vmul.f32 %v14280_v22, %v12159_v46  ;;  %v12382_v6 = vmul.f32 %v11778_v24, %v14282_v29  ;;  %v14283_v22 = vld [vmem:[#allocation177_spill] sm:$0xff]  ;;  %v14285_v58 = vld [vmem:[#allocation44_spill] sm:$0xff] }
 0x4d8   : > { %v7779_v9 = vpop.eup %7778  ;;  %7788 = vrsqrt.f32 %v4015_v5  ;;  %v12393_v48 = vmul.f32 %v14285_v58, %v11754_v8  ;;  %v14288_v8 = vld [vmem:[#allocation72_spill] sm:$0xff]  ;;  %v12416_v58 = vmul.f32 %v11807_v11, %v14290_v2  ;;  %v12428_v5 = vmul.f32 %v14294_v39, %v11824_v38 }
 0x4d9   : > { %v4074_v21 = vmul.f32 %v7779_v9, %v14283_v22  ;;  %7240 = vmatmul.mubr.msk.bf16.gmra.mrb[72].mxu0 %vm1201_vm1, %v14284_v60  ;;  %v14287_v9 = vpack.c.bf16 %v12268_v63, %v12264_v35  ;;  %v12406_v60 = vld [vmem:[%s13205_s9] ss:$0 sm:$0xff]  ;;  %v12412_v28 = vmul.f32 %v11802_v42, %v14288_v8  ;;  %v14291_v35 = vld [vmem:[#allocation50_spill] sm:$0xff]  ;;  %v14295_v8 = vld [vmem:[#allocation81_spill] sm:$0xff] }
 0x4da   : > { %v7781_v24 = vpop.eup %7780  ;;  %v12420_v63 = vmul.f32 %v14291_v35, %v11821_v57  ;;  %v14293_v29 = vld [vmem:[#allocation172_spill] sm:$0xff]  ;;  %v12434_v2 = vmul.f32 %v11842_v31, %v14295_v8 }
 0x4db   : > { %7243 = vmatprep.mubr.msk.bf16.mxu0 %vm1201_vm1, %v14287_v9  ;;  %14289 = vst [vmem:[#allocation93_spill] sm:$0xff] %v12412_v28  ;;  %v4075_v22 = vmul.f32 %v7781_v24, %v14293_v29  ;;  %v4112_v15 = vmul.f32 %v12372_v47, %v4074_v21  ;;  %v14296_v57 = vld [vmem:[#allocation84_spill] sm:$0xff]  ;;  %v14298_v29 = vld [vmem:[#allocation175_spill] sm:$0xff] }
 0x4dc   : > { %14292 = vst [vmem:[#allocation10_spill] sm:$0xff] %v12420_v63  ;;  %v7783_v42 = vpop.eup %7782  ;;  %v12438_v24 = vmul.f32 %v11852_v61, %v14296_v57  ;;  %v14297_v21 = vld [vmem:[#allocation56_spill] sm:$0xff]  ;;  %v14299_v61 = vld [vmem:[#allocation62_spill] sm:$0xff]  ;;  %v14300_v57 = vld [vmem:[#allocation99_spill] sm:$0xff] }
 0x4dd   : > { %v12442_v35 = vmul.f32 %v14297_v21, %v11869_v50  ;;  %v4076_v9 = vmul.f32 %v7783_v42, %v14298_v29  ;;  %v4113_v38 = vmul.f32 %v12372_v47, %v4075_v22  ;;  %v4150_v39 = vadd.f32 %v12406_v60, %v4112_v15  ;;  %v14302_v42 = vld [vmem:[#allocation91_spill] sm:$0xff]  ;;  %v14304_v21 = vld [vmem:[#allocation169_spill] sm:$0xff] }
 0x4de   : > { %v7785_v28 = vpop.eup %7784  ;;  %v12453_v8 = vmul.f32 %v14299_v61, %v11872_v13  ;;  %v12457_v50 = vmul.f32 %v11894_v12, %v14300_v57  ;;  %v12461_v22 = vmul.f32 %v11904_v3, %v14302_v42  ;;  %v14305_v12 = vld [vmem:[#allocation64_spill] sm:$0xff]  ;;  %v14306_v3 = vld [vmem:[#allocation74_spill] sm:$0xff] }
 0x4df   : > { %v4114_v15 = vmul.f32 %v12372_v47, %v4076_v9  ;;  %v4077_v29 = vmul.f32 %v7785_v28, %v14304_v21  ;;  %v4151_v11 = vadd.f32 %v12406_v60, %v4113_v38  ;;  %v4182_v63 = vmax.f32 %v4150_v39, 0.0  ;;  %v14307_v38 = vld [vmem:[#allocation171_spill] sm:$0xff] }
 0x4e0   : > { %14301 = vst [vmem:[#allocation12_spill] sm:$0xff] %v12457_v50  ;;  %14303 = vst [vmem:[#allocation68_spill] sm:$0xff] %v12461_v22  ;;  %v7787_v31 = vpop.eup %7786  ;;  %v12472_v57 = vmul.f32 %v14305_v12, %v11917_v14  ;;  %v12476_v42 = vmul.f32 %v14306_v3, %v11924_v55  ;;  %v14308_v21 = vpack.c.bf16 %v12287_v45, %v12281_v26  ;;  %v14310_v55 = vld [vmem:[#allocation133_spill] sm:$0xff]  ;;  %v14312_v3 = vld [vmem:[#allocation82_spill] sm:$0xff] }
 0x4e1   : > { %v4152_v28 = vadd.f32 %v12406_v60, %v4114_v15  ;;  %v4115_v9 = vmul.f32 %v12372_v47, %v4077_v29  ;;  %v4078_v39 = vmul.f32 %v7787_v31, %v14307_v38  ;;  %v4183_v61 = vmax.f32 %v4151_v11, 0.0  ;;  %v14311_v29 = vld [vmem:[#allocation80_spill] sm:$0xff] }
 0x4e2   : > { %7244 = vmatmul.mubr.msk.bf16.gmra.mrb[76].mxu0 %vm1201_vm1, %v14308_v21  ;;  %v7789_v13 = vpop.eup %7788  ;;  %v14309_v14 = vpack.c.bf16 %v12295_v27, %v12291_v51  ;;  %v4246_v12 = vmul.f32 %v14310_v55, %v4182_v63  ;;  %v5484_v15 = vpack.c.bf16 %v12476_v42, %v12472_v57  ;;  %v5172_v31 = vmul.f32 %v11961_v17, %v14311_v29  ;;  %v14313_v38 = vld [vmem:[#allocation168_spill] sm:$0xff] }
 0x4e3   : > { %v5173_v45 = vmul.f32 %v11965_v18, %v14312_v3  ;;  %v4184_v26 = vmax.f32 %v4152_v28, 0.0  ;;  %v4153_v11 = vadd.f32 %v12406_v60, %v4115_v9  ;;  %v4079_v21 = vmul.f32 %v7789_v13, %v14313_v38  ;;  %v14314_v50 = vld [vmem:[#allocation136_spill] sm:$0xff]  ;;  %v14318_v3 = vld [vmem:[#allocation90_spill] sm:$0xff] }
 0x4e4   : > { %7247 = vmatprep.mubr.msk.bf16.mxu0 %vm1201_vm1, %v14309_v14  ;;  %v4247_v51 = vmul.f32 %v14314_v50, %v4183_v61  ;;  %v4116_v27 = vmul.f32 %v12372_v47, %v4078_v39  ;;  %v14315_v63 = vld [vmem:[#allocation96_spill] sm:$0xff]  ;;  %v5176_v50 = vmul.f32 %v12024_v19, %v14318_v3  ;;  %v14332_v3 = vld [vmem:[#allocation122_spill] sm:$0xff] }
 0x4e5   : > { %v5485_v14 = vpack.c.bf16 %v5173_v45, %v5172_v31  ;;  %v5174_v55 = vmul.f32 %v14315_v63, %v11976_v59  ;;  %v14316_v57 = vld [vmem:[#allocation104_spill] sm:$0xff]  ;;  %v4185_v22 = vmax.f32 %v4153_v11, 0.0  ;;  %v4117_v28 = vmul.f32 %v12372_v47, %v4079_v21  ;;  %v14320_v31 = vld [vmem:[#allocation135_spill] sm:$0xff]  ;;  %v14321_v45 = vld [vmem:[#allocation86_spill] sm:$0xff] }
 0x4e6   : > { %v5175_v42 = vmul.f32 %v14316_v57, %v11981_v34  ;;  %v14317_v17 = vld [vmem:[#allocation132_spill] sm:$0xff]  ;;  %v5188_v18 = vpack.c.bf16 %v4247_v51, %v4246_v12  ;;  %v4154_v9 = vadd.f32 %v12406_v60, %v4116_v27  ;;  %v5178_v12 = vmul.f32 %v14321_v45, %v12045_v32  ;;  %v14323_v51 = vld [vmem:[#allocation106_spill] sm:$0xff] }
 0x4e7   : > { %v4248_v29 = vmul.f32 %v14317_v17, %v4184_v26  ;;  %v14319_v61 = vld [vmem:[#allocation100_spill] sm:$0xff]  ;;  %v4249_v59 = vmul.f32 %v14320_v31, %v4185_v22  ;;  %v4155_v34 = vadd.f32 %v12406_v60, %v4117_v28  ;;  %v14322_v26 = vld [vmem:[#allocation95_spill] sm:$0xff]  ;;  %v5180_v19 = vmul.f32 %v12082_v4, %v14323_v51  ;;  %v14324_v27 = vld [vmem:[#allocation114_spill] sm:$0xff] }
 0x4e8   : > { %v5486_v13 = vpack.c.bf16 %v5175_v42, %v5174_v55  ;;  %v5177_v39 = vmul.f32 %v12027_v7, %v14319_v61  ;;  %7163 = vmatprep.mubr.msk.bf16.mxu1 %vm3689_vm2, %v5188_v18  ;;  %v5179_v11 = vmul.f32 %v14322_v26, %v12048_v40  ;;  %v4186_v38 = vmax.f32 %v4154_v9, 0.0  ;;  %v14326_v32 = vld [vmem:[#allocation102_spill] sm:$0xff]  ;;  %v14328_v4 = vld [vmem:[#allocation141_spill] sm:$0xff] }
 0x4e9   : > { %v5181_v7 = vmul.f32 %v12087_v36, %v14324_v27  ;;  %v14325_v22 = vpack.c.bf16 %v12308_v62, %v12299_v49  ;;  %v5189_v63 = vpack.c.bf16 %v4249_v59, %v4248_v29  ;;  %v4187_v55 = vmax.f32 %v4155_v34, 0.0  ;;  %v14329_v36 = vld [vmem:[#allocation108_spill] sm:$0xff]  ;;  %v14330_v49 = vld [vmem:[#allocation118_spill] sm:$0xff]  ;;  %v14331_v29 = vld [vmem:[#allocation145_spill] sm:$0xff] }
 0x4ea   : > { %v5487_v21 = vpack.c.bf16 %v5177_v39, %v5176_v50  ;;  %v5488_v57 = vpack.c.bf16 %v5179_v11, %v5178_v12  ;;  %v5182_v42 = vmul.f32 %v14326_v32, %v12097_v1  ;;  %v14327_v40 = vpack.c.bf16 %v12317_v53, %v12312_v56  ;;  %v14333_v53 = vld [vmem:[#allocation116_spill] sm:$0xff] }
 0x4eb   : > { %7248 = vmatmul.mubr.msk.bf16.gmra.mrb[80].mxu0 %vm1201_vm1, %v14325_v22  ;;  %v4250_v17 = vmul.f32 %v14328_v4, %v4186_v38  ;;  %v5489_v18 = vpack.c.bf16 %v5181_v7, %v5180_v19  ;;  %v5183_v28 = vmul.f32 %v14329_v36, %v12100_v41  ;;  %v5184_v62 = vmul.f32 %v12133_v23, %v14330_v49  ;;  %v14334_v50 = vld [vmem:[#allocation120_spill] sm:$0xff] }
 0x4ec   : > { %7251 = vmatprep.mubr.msk.bf16.mxu0 %vm1201_vm1, %v14327_v40  ;;  %7164 = vmatmul.mubr.msk.bf16.vlgmr.msra.gmra.mrb[96].mxu1 %vm3689_vm2, %v5189_v63  ;;  %v4251_v9 = vmul.f32 %v14331_v29, %v4187_v55  ;;  %v5185_v1 = vmul.f32 %v12141_v44, %v14332_v3  ;;  %v5186_v56 = vmul.f32 %v14333_v53, %v12156_v16  ;;  %v14337_v16 = vld [vmem:[#allocation8_spill] sm:$0xff]  ;;  %v14353_v63 = vld [vmem:[#allocation170_spill] sm:$0xff] }
 0x4ed   : > { %v5187_v61 = vmul.f32 %v14334_v50, %v12159_v46  ;;  %v5490_v39 = vpack.c.bf16 %v5183_v28, %v5182_v42  ;;  %v14335_v23 = vpack.c.bf16 %v12327_v10, %v12323_v0  ;;  %v14336_v44 = vpack.c.bf16 %v12339_v43, %v12331_v20  ;;  %v14339_v46 = vld [vmem:[#allocation70_spill] sm:$0xff]  ;;  %v14344_v20 = vld [vmem:[#allocation93_spill] sm:$0xff]  ;;  %v14355_v50 = vld [vmem:[#allocation183_spill] sm:$0xff] }
 0x4ee   : > { %v5190_v31 = vpack.c.bf16 %v4251_v9, %v4250_v17  ;;  %v5491_v59 = vpack.c.bf16 %v5185_v1, %v5184_v62  ;;  %v14338_v34 = vpack.c.bf16 %v12347_v37, %v14337_v16  ;;  %v14340_v45 = vpack.c.bf16 %v12355_v25, %v14339_v46  ;;  %v14346_v43 = vld [vmem:[#allocation10_spill] sm:$0xff]  ;;  %v14354_v28 = vld [vmem:[#allocation181_spill] sm:$0xff] }
 0x4ef   : > { %v5492_v41 = vpack.c.bf16 %v5187_v61, %v5186_v56  ;;  %v14341_v0 = vpack.c.bf16 %v12367_v30, %v12363_v54  ;;  %v14342_v10 = vpack.c.bf16 %v12382_v6, %v12378_v52  ;;  %v14343_v37 = vpack.c.bf16 %v12397_v33, %v12393_v48  ;;  %v14350_v52 = vld [vmem:[#allocation68_spill] sm:$0xff] }
 0x4f0   : > { %7167 = vmatprep.mubr.msk.bf16.mxu1 %vm3689_vm2, %v5190_v31  ;;  %v14345_v25 = vpack.c.bf16 %v12416_v58, %v14344_v20  ;;  %v14347_v54 = vpack.c.bf16 %v12428_v5, %v14346_v43  ;;  %v14348_v6 = vpack.c.bf16 %v12438_v24, %v12434_v2  ;;  %v14349_v48 = vpack.c.bf16 %v12453_v8, %v12442_v35  ;;  %v14351_v30 = vld [vmem:[#allocation12_spill] sm:$0xff] }
 0x4f1   : > { %v14352_v33 = vpack.c.bf16 %v14350_v52, %v14351_v30  ;;  %v14359_v30 = vld [vmem:[#allocation144_spill] sm:$0xff] }
 0x4f3   : > { %7252 = vmatmul.mubr.msk.bf16.gmra.mrb[84].mxu0 %vm1201_vm1, %v14335_v23 }
 0x4f4   : > { %7255 = vmatprep.mubr.msk.bf16.mxu0 %vm1201_vm1, %v14336_v44 }
 0x4fb   : > { %7256 = vmatmul.mubr.msk.bf16.gmra.mrb[88].mxu0 %vm1201_vm1, %v14338_v34 }
 0x4fc   : > { %7259 = vmatprep.mubr.msk.bf16.mxu0 %vm1201_vm1, %v14340_v45  ;;  %v14356_v45 = vld [vmem:[#allocation180_spill] sm:$0xff] }
 0x503   : > { %7260 = vmatmul.mubr.msk.bf16.gmra.mrb[92].mxu0 %vm1201_vm1, %v14341_v0 }
 0x504   : > { %7263 = vmatprep.mubr.msk.bf16.mxu0 %vm1201_vm1, %v14342_v10 }
 0x50b   : > { %7264 = vmatmul.mubr.msk.bf16.gmra.mrb[96].mxu0 %vm1201_vm1, %v14343_v37 }
 0x50c   : > { %7267 = vmatprep.mubr.msk.bf16.mxu0 %vm1201_vm1, %v14345_v25  ;;  %v14357_v25 = vld [vmem:[#allocation193_spill] sm:$0xff] }
 0x513   : > { %7268 = vmatmul.mubr.msk.bf16.gmra.mrb[100].mxu0 %vm1201_vm1, %v14347_v54 }
 0x514   : > { %7271 = vmatprep.mubr.msk.bf16.mxu0 %vm1201_vm1, %v14348_v6 }
 0x51b   : > { %7272 = vmatmul.mubr.msk.bf16.gmra.mrb[104].mxu0 %vm1201_vm1, %v14349_v48  ;;  %v14358_v48 = vld [vmem:[#allocation140_spill] sm:$0xff] }
 0x51c   : > { %7275 = vmatprep.mubr.msk.bf16.mxu0 %vm1201_vm1, %v14352_v33 }
 0x523   : > { %7276 = vmatmul.mubr.msk.bf16.gmra.mrb[108].mxu0 %vm1201_vm1, %v5484_v15 }
 0x524   : > { %7279 = vmatprep.mubr.msk.bf16.mxu0 %vm1201_vm1, %v5485_v14 }
 0x52b   : > { %7280 = vmatmul.mubr.msk.bf16.gmra.mrb[112].mxu0 %vm1201_vm1, %v5486_v13 }
 0x52c   : > { %7283 = vmatprep.mubr.msk.bf16.mxu0 %vm1201_vm1, %v5487_v21 }
 0x52e   : > { %v3902_v5 = vpop.xlane.xlu0 %3901 }
 0x52f   : > { %v3984_v58 = vmul.f32 0.015625, %v3902_v5 }
 0x531   : > { %v4016_v2 = vadd.f32 1e-05, %v3984_v58 }
 0x532   : > { %v3905_v24 = vpop.xlane.xlu1 %3904 }
 0x533   : > { %7284 = vmatmul.mubr.msk.bf16.gmra.mrb[116].mxu0 %vm1201_vm1, %v5488_v57  ;;  %7790 = vrsqrt.f32 %v4016_v2  ;;  %v3985_v35 = vmul.f32 0.015625, %v3905_v24 }
 0x534   : > { %7287 = vmatprep.mubr.msk.bf16.mxu0 %vm1201_vm1, %v5489_v18 }
 0x535   : > { %v4017_v8 = vadd.f32 1e-05, %v3985_v35  ;;  %v3908_v12 = vpop.xlane.xlu0 %3907 }
 0x536   : > { %v3986_v26 = vmul.f32 0.015625, %v3908_v12 }
 0x537   : > { %7792 = vrsqrt.f32 %v4017_v8 }
 0x538   : > { %v4018_v15 = vadd.f32 1e-05, %v3986_v26  ;;  %v3911_v14 = vpop.xlane.xlu1 %3910  ;;  %v14360_v26 = vld [vmem:[#allocation182_spill] sm:$0xff] }
 0x539   : > { %v3987_v13 = vmul.f32 0.015625, %v3911_v14  ;;  %v3914_v11 = vpop.xlane.xlu0 %3913 }
 0x53a   : > { %7794 = vrsqrt.f32 %v4018_v15  ;;  %v3988_v38 = vmul.f32 0.015625, %v3914_v11 }
 0x53b   : > { %7288 = vmatmul.mubr.msk.bf16.gmra.mrb[120].mxu0 %vm1201_vm1, %v5490_v39  ;;  %v4019_v21 = vadd.f32 1e-05, %v3987_v13 }
 0x53c   : > { %7291 = vmatprep.mubr.msk.bf16.mxu0 %vm1201_vm1, %v5491_v59  ;;  %v4020_v51 = vadd.f32 1e-05, %v3988_v38  ;;  %v3917_v19 = vpop.xlane.xlu1 %3916 }
 0x53d   : > { %v7791_v27 = vpop.eup %7790  ;;  %7796 = vrsqrt.f32 %v4019_v21  ;;  %v3989_v7 = vmul.f32 0.015625, %v3917_v19  ;;  %v3920_v22 = vpop.xlane.xlu0 %3919  ;;  %v14361_v21 = vld [vmem:[#allocation195_spill] sm:$0xff] }
 0x53e   : > { %v4080_v55 = vmul.f32 %v7791_v27, %v14353_v63  ;;  %7798 = vrsqrt.f32 %v4020_v51  ;;  %v3990_v57 = vmul.f32 0.015625, %v3920_v22 }
 0x53f   : > { %v4021_v32 = vadd.f32 1e-05, %v3989_v7 }
 0x540   : > { %v4022_v42 = vadd.f32 1e-05, %v3990_v57  ;;  %v3923_v40 = vpop.xlane.xlu1 %3922  ;;  %v4118_v4 = vmul.f32 %v12372_v47, %v4080_v55 }
 0x541   : > { %v7793_v17 = vpop.eup %7792  ;;  %7800 = vrsqrt.f32 %v4021_v32  ;;  %v3991_v18 = vmul.f32 0.015625, %v3923_v40  ;;  %v3926_v36 = vpop.xlane.xlu0 %3925 }
 0x542   : > { %v4081_v49 = vmul.f32 %v7793_v17, %v14354_v28  ;;  %7802 = vrsqrt.f32 %v4022_v42  ;;  %v3992_v62 = vmul.f32 0.015625, %v3926_v36  ;;  %v4156_v29 = vadd.f32 %v12406_v60, %v4118_v4  ;;  %v14362_v4 = vld [vmem:[#allocation153_spill] sm:$0xff] }
 0x543   : > { %7292 = vmatmul.mubr.msk.bf16.gmra.mrb[124].mxu0 %vm1201_vm1, %v5492_v41  ;;  %v4023_v9 = vadd.f32 1e-05, %v3991_v18 }
 0x544   : > { %v7795_v3 = vpop.eup %7794  ;;  %v4024_v1 = vadd.f32 1e-05, %v3992_v62  ;;  %v3929_v53 = vpop.xlane.xlu1 %3928  ;;  %v4119_v56 = vmul.f32 %v12372_v47, %v4081_v49  ;;  %v4188_v23 = vmax.f32 %v4156_v29, 0.0  ;;  %v14363_v49 = vld [vmem:[#allocation190_spill] sm:$0xff] }
 0x545   : > { %v4082_v61 = vmul.f32 %v7795_v3, %v14355_v50  ;;  %7804 = vrsqrt.f32 %v4023_v9  ;;  %v3993_v39 = vmul.f32 0.015625, %v3929_v53  ;;  %v3932_v31 = vpop.xlane.xlu0 %3931  ;;  %v14364_v3 = vld [vmem:[#allocation155_spill] sm:$0xff] }
 0x546   : > { %7806 = vrsqrt.f32 %v4024_v1  ;;  %v3994_v59 = vmul.f32 0.015625, %v3932_v31  ;;  %v4157_v41 = vadd.f32 %v12406_v60, %v4119_v56  ;;  %v4252_v52 = vmul.f32 %v14358_v48, %v4188_v23  ;;  %v14365_v56 = vld [vmem:[#allocation200_spill] sm:$0xff]  ;;  %v14368_v48 = vld [vmem:[#allocation134_spill] sm:$0xff] }
 0x547   : > { %v7797_v44 = vpop.eup %7796  ;;  %v4025_v16 = vadd.f32 1e-05, %v3993_v39  ;;  %v4120_v34 = vmul.f32 %v12372_v47, %v4082_v61 }
 0x548   : > { %v7799_v46 = vpop.eup %7798  ;;  %v4083_v0 = vmul.f32 %v7797_v44, %v14356_v45  ;;  %v4026_v10 = vadd.f32 1e-05, %v3994_v59  ;;  %v3935_v37 = vpop.xlane.xlu1 %3934  ;;  %v4189_v20 = vmax.f32 %v4157_v41, 0.0 }
 0x549   : > { %v4084_v43 = vmul.f32 %v7799_v46, %v14357_v25  ;;  %7808 = vrsqrt.f32 %v4025_v16  ;;  %v3995_v54 = vmul.f32 0.015625, %v3935_v37  ;;  %v4158_v6 = vadd.f32 %v12406_v60, %v4120_v34  ;;  %v14366_v37 = vld [vmem:[#allocation192_spill] sm:$0xff] }
 0x54a   : > { %7810 = vrsqrt.f32 %v4026_v10  ;;  %v4253_v33 = vmul.f32 %v14359_v30, %v4189_v20  ;;  %v4121_v5 = vmul.f32 %v12372_v47, %v4083_v0 }
 0x54b   : > { %v7801_v58 = vpop.eup %7800  ;;  %v4027_v2 = vadd.f32 1e-05, %v3995_v54  ;;  %v3938_v24 = vpop.xlane.xlu0 %3937  ;;  %v4190_v35 = vmax.f32 %v4158_v6, 0.0  ;;  %v4122_v8 = vmul.f32 %v12372_v47, %v4084_v43  ;;  %v14367_v54 = vld [vmem:[#allocation150_spill] sm:$0xff] }
 0x54c   : > { %v7803_v12 = vpop.eup %7802  ;;  %v4085_v15 = vmul.f32 %v7801_v58, %v14360_v26  ;;  %v3996_v14 = vmul.f32 0.015625, %v3938_v24  ;;  %v3941_v13 = vpop.xlane.xlu1 %3940  ;;  %v5191_v11 = vpack.c.bf16 %v4253_v33, %v4252_v52  ;;  %v4159_v38 = vadd.f32 %v12406_v60, %v4121_v5  ;;  %v14369_v33 = vld [vmem:[#allocation154_spill] sm:$0xff] }
 0x54d   : > { %v4086_v51 = vmul.f32 %v7803_v12, %v14361_v21  ;;  %7812 = vrsqrt.f32 %v4027_v2  ;;  %v3997_v19 = vmul.f32 0.015625, %v3941_v13  ;;  %v7201_v27 = vpop.f32.mrb[32].mxu0  ;;  %v4160_v57 = vadd.f32 %v12406_v60, %v4122_v8 }
 0x54e   : > { %v4028_v7 = vadd.f32 1e-05, %v3996_v14  ;;  %7168 = vmatmul.mubr.msk.bf16.gmra.mrb[100].mxu1 %vm3689_vm2, %v5191_v11  ;;  %v4191_v22 = vmax.f32 %v4159_v38, 0.0  ;;  %6104 = vst.msk [vmem:[%s12623_s24 + $0x10] sm:$0xff] %vm1201_vm1, %v7201_v27  ;;  %v5687_v63 = vpop.f32.mrb[33].mxu0  ;;  %v4123_v55 = vmul.f32 %v12372_v47, %v4085_v15  ;;  %v4254_v17 = vmul.f32 %v14362_v4, %v4190_v35  ;;  %v14370_v11 = vld [vmem:[#allocation189_spill] sm:$0xff] }
 0x54f   : > { %v7805_v32 = vpop.eup %7804  ;;  %v4029_v42 = vadd.f32 1e-05, %v3997_v19  ;;  %v3944_v40 = vpop.xlane.xlu0 %3943  ;;  %6102 = vst.msk [vmem:[%s12623_s24] sm:$0xff] %vm1201_vm1, %v5687_v63  ;;  %v4124_v36 = vmul.f32 %v12372_v47, %v4086_v51  ;;  %v4192_v41 = vmax.f32 %v4160_v57, 0.0 }
 0x550   : > { %v7202_v18 = vpop.f32.mrb[34].mxu0  ;;  %v7807_v28 = vpop.eup %7806  ;;  %v4087_v62 = vmul.f32 %v7805_v32, %v14363_v49  ;;  %7814 = vrsqrt.f32 %v4028_v7  ;;  %v3998_v29 = vmul.f32 0.015625, %v3944_v40  ;;  %v4255_v1 = vmul.f32 %v14364_v3, %v4191_v22  ;;  %v14371_v7 = vld [vmem:[#allocation163_spill] sm:$0xff] }
 0x551   : > { %v3947_v9 = vpop.xlane.xlu1 %3946  ;;  %6105 = vst.msk [vmem:[%s12623_s24 + $0x18] sm:$0xff] %vm1201_vm1, %v7202_v18  ;;  %v5690_v53 = vpop.f32.mrb[35].mxu0  ;;  %v4088_v50 = vmul.f32 %v7807_v28, %v14365_v56  ;;  %7816 = vrsqrt.f32 %v4029_v42  ;;  %v4161_v39 = vadd.f32 %v12406_v60, %v4123_v55  ;;  %v4162_v45 = vadd.f32 %v12406_v60, %v4124_v36  ;;  %v14372_v42 = vld [vmem:[#allocation167_spill] sm:$0xff] }
 0x552   : > { %v3999_v61 = vmul.f32 0.015625, %v3947_v9  ;;  %6103 = vst.msk [vmem:[%s12623_s24 + $0x8] sm:$0xff] %vm1201_vm1, %v5690_v53  ;;  %v4030_v31 = vadd.f32 1e-05, %v3998_v29  ;;  %v5192_v59 = vpack.c.bf16 %v4255_v1, %v4254_v17  ;;  %v4125_v23 = vmul.f32 %v12372_v47, %v4087_v62  ;;  %v14373_v28 = vld [vmem:[#allocation199_spill] sm:$0xff]  ;;  %v14374_v53 = vld [vmem:[#allocation137_spill] sm:$0xff] }
 0x553   : > { %v7809_v44 = vpop.eup %7808  ;;  %v3950_v34 = vpop.xlane.xlu0 %3949  ;;  %v4193_v46 = vmax.f32 %v4161_v39, 0.0  ;;  %v4126_v0 = vmul.f32 %v12372_v47, %v4088_v50  ;;  %v4256_v6 = vmul.f32 %v14367_v54, %v4192_v41  ;;  %v4194_v24 = vmax.f32 %v4162_v45, 0.0  ;;  %v14375_v41 = vld [vmem:[#allocation160_spill] sm:$0xff] }
 0x554   : > { %v4031_v16 = vadd.f32 1e-05, %v3999_v61  ;;  %v7811_v10 = vpop.eup %7810  ;;  %v4089_v20 = vmul.f32 %v7809_v44, %v14366_v37  ;;  %7818 = vrsqrt.f32 %v4030_v31  ;;  %v4000_v25 = vmul.f32 0.015625, %v3950_v34  ;;  %7171 = vmatprep.mubr.msk.bf16.mxu1 %vm3689_vm2, %v5192_v59  ;;  %v14376_v44 = vld [vmem:[#allocation166_spill] sm:$0xff] }
 0x555   : > { %v3953_v43 = vpop.xlane.xlu1 %3952  ;;  %v4090_v52 = vmul.f32 %v7811_v10, %v14368_v48  ;;  %v4257_v5 = vmul.f32 %v14369_v33, %v4193_v46  ;;  %v4163_v2 = vadd.f32 %v12406_v60, %v4125_v23  ;;  %v4164_v14 = vadd.f32 %v12406_v60, %v4126_v0 }
 0x556   : > { %7820 = vrsqrt.f32 %v4031_v16  ;;  %v4001_v30 = vmul.f32 0.015625, %v3953_v43  ;;  %v4032_v58 = vadd.f32 1e-05, %v4000_v25  ;;  %v4127_v35 = vmul.f32 %v12372_v47, %v4089_v20  ;;  %v14377_v20 = vld [vmem:[#allocation191_spill] sm:$0xff] }
 0x557   : > { %v7813_v8 = vpop.eup %7812  ;;  %v3956_v26 = vpop.xlane.xlu0 %3955  ;;  %v5193_v15 = vpack.c.bf16 %v4257_v5, %v4256_v6  ;;  %v4128_v13 = vmul.f32 %v12372_v47, %v4090_v52  ;;  %v4195_v19 = vmax.f32 %v4163_v2, 0.0  ;;  %v4258_v22 = vmul.f32 %v14371_v7, %v4194_v24  ;;  %v14378_v52 = vld [vmem:[#allocation138_spill] sm:$0xff]  ;;  %v14379_v24 = vld [vmem:[#allocation176_spill] sm:$0xff] }
 0x558   : > { %v4033_v12 = vadd.f32 1e-05, %v4001_v30  ;;  %v4091_v38 = vmul.f32 %v7813_v8, %v14370_v11  ;;  %7822 = vrsqrt.f32 %v4032_v58  ;;  %v4002_v21 = vmul.f32 0.015625, %v3956_v26 }
 0x559   : > { %v3959_v51 = vpop.xlane.xlu1 %3958  ;;  %7172 = vmatmul.mubr.msk.bf16.gmra.mrb[104].mxu1 %vm3689_vm2, %v5193_v15  ;;  %v7205_v63 = vpop.f32.mrb[36].mxu0  ;;  %v4165_v55 = vadd.f32 %v12406_v60, %v4127_v35  ;;  %v4259_v40 = vmul.f32 %v14372_v42, %v4195_v19  ;;  %v4196_v17 = vmax.f32 %v4164_v14, 0.0  ;;  %v4166_v1 = vadd.f32 %v12406_v60, %v4128_v13  ;;  %v14380_v15 = vld [vmem:[#allocation179_spill] sm:$0xff] }
 0x55a   : > { %7824 = vrsqrt.f32 %v4033_v12  ;;  %v4003_v27 = vmul.f32 0.015625, %v3959_v51  ;;  %v7815_v57 = vpop.eup %7814  ;;  %v4034_v32 = vadd.f32 1e-05, %v4002_v21  ;;  %6108 = vst.msk [vmem:[%s12623_s24 + $0x30] sm:$0xff] %vm1201_vm1, %v7205_v63  ;;  %v5703_v4 = vpop.f32.mrb[37].mxu0  ;;  %v4129_v18 = vmul.f32 %v12372_v47, %v4091_v38  ;;  %v14381_v21 = vld [vmem:[#allocation139_spill] sm:$0xff] }
 0x55b   : > { %v7817_v36 = vpop.eup %7816  ;;  %v4092_v49 = vmul.f32 %v7815_v57, %v14373_v28  ;;  %v3962_v29 = vpop.xlane.xlu0 %3961  ;;  %6106 = vst.msk [vmem:[%s12623_s24 + $0x20] sm:$0xff] %vm1201_vm1, %v5703_v4  ;;  %v4197_v3 = vmax.f32 %v4165_v55, 0.0  ;;  %v5194_v39 = vpack.c.bf16 %v4259_v40, %v4258_v22  ;;  %v4260_v23 = vmul.f32 %v14375_v41, %v4196_v17  ;;  %v14382_v63 = vld [vmem:[#allocation143_spill] sm:$0xff]  ;;  %v14386_v41 = vld [vmem:[#allocation78_spill] sm:$0xff] }
 0x55c   : > { %v4035_v62 = vadd.f32 1e-05, %v4003_v27  ;;  %v7206_v9 = vpop.f32.mrb[38].mxu0  ;;  %v4093_v56 = vmul.f32 %v7817_v36, %v14374_v53  ;;  %7826 = vrsqrt.f32 %v4034_v32  ;;  %v4004_v50 = vmul.f32 0.015625, %v3962_v29  ;;  %v14384_v53 = vld [vmem:[#allocation146_spill] sm:$0xff] }
 0x55d   : > { %v3965_v61 = vpop.xlane.xlu1 %3964  ;;  %6109 = vst.msk [vmem:[%s12623_s24 + $0x38] sm:$0xff] %vm1201_vm1, %v7206_v9  ;;  %v5706_v31 = vpop.f32.mrb[39].mxu0  ;;  %v4261_v16 = vmul.f32 %v14376_v44, %v4197_v3  ;;  %7175 = vmatprep.mubr.msk.bf16.mxu1 %vm3689_vm2, %v5194_v39  ;;  %v4167_v45 = vadd.f32 %v12406_v60, %v4129_v18  ;;  %v4198_v0 = vmax.f32 %v4166_v1, 0.0  ;;  %v4130_v10 = vmul.f32 %v12372_v47, %v4092_v49  ;;  %v14383_v18 = vld [vmem:[#allocation174_spill] sm:$0xff] }
 0x55e   : > { %7828 = vrsqrt.f32 %v4035_v62  ;;  %v4005_v59 = vmul.f32 0.015625, %v3965_v61  ;;  %6107 = vst.msk [vmem:[%s12623_s24 + $0x28] sm:$0xff] %vm1201_vm1, %v5706_v31  ;;  %v7819_v34 = vpop.eup %7818  ;;  %v4036_v46 = vadd.f32 1e-05, %v4004_v50  ;;  %v4131_v48 = vmul.f32 %v12372_v47, %v4093_v56  ;;  %v14385_v39 = vld [vmem:[#allocation178_spill] sm:$0xff] }
 0x55f   : > { %v4094_v25 = vmul.f32 %v7819_v34, %v14377_v20  ;;  %v3968_v54 = vpop.xlane.xlu0 %3967  ;;  %v5195_v6 = vpack.c.bf16 %v4261_v16, %v4260_v23  ;;  %v4199_v58 = vmax.f32 %v4167_v45, 0.0  ;;  %v4262_v35 = vmul.f32 %v14379_v24, %v4198_v0 }
 0x560   : > { %v7821_v37 = vpop.eup %7820  ;;  %v4037_v43 = vadd.f32 1e-05, %v4005_v59  ;;  %7830 = vrsqrt.f32 %v4036_v46  ;;  %v4006_v33 = vmul.f32 0.015625, %v3968_v54  ;;  %v4168_v8 = vadd.f32 %v12406_v60, %v4130_v10 }
 0x561   : > { %v4095_v30 = vmul.f32 %v7821_v37, %v14378_v52  ;;  %v3971_v5 = vpop.xlane.xlu1 %3970  ;;  %7176 = vmatmul.mubr.msk.bf16.gmra.mrb[108].mxu1 %vm3689_vm2, %v5195_v6  ;;  %v4263_v14 = vmul.f32 %v14380_v15, %v4199_v58  ;;  %v4169_v13 = vadd.f32 %v12406_v60, %v4131_v48  ;;  %v4132_v11 = vmul.f32 %v12372_v47, %v4094_v25  ;;  %v14387_v37 = vld [vmem:[#allocation186_spill] sm:$0xff]  ;;  %v14388_v25 = vld [vmem:[#allocation188_spill] sm:$0xff]  ;;  %v14392_v15 = vld [vmem:[#allocation187_spill] sm:$0xff] }
 0x562   : > { %7832 = vrsqrt.f32 %v4037_v43  ;;  %v4007_v2 = vmul.f32 0.015625, %v3971_v5  ;;  %v7823_v12 = vpop.eup %7822  ;;  %v4038_v26 = vadd.f32 1e-05, %v4006_v33  ;;  %v4200_v7 = vmax.f32 %v4168_v8, 0.0  ;;  %v14389_v52 = vld [vmem:[#allocation94_spill] sm:$0xff] }
 0x563   : > { %v4096_v51 = vmul.f32 %v7823_v12, %v14381_v21  ;;  %v3974_v27 = vpop.xlane.xlu0 %3973  ;;  %v4133_v22 = vmul.f32 %v12372_v47, %v4095_v30  ;;  %v5196_v42 = vpack.c.bf16 %v4263_v14, %v4262_v35  ;;  %v4201_v17 = vmax.f32 %v4169_v13, 0.0  ;;  %v14390_v58 = vld [vmem:[#allocation6_spill] sm:$0xff]  ;;  %v14391_v12 = vld [vmem:[#allocation185_spill] sm:$0xff] }
 0x564   : > { %v7825_v38 = vpop.eup %7824  ;;  %v4039_v19 = vadd.f32 1e-05, %v4007_v2  ;;  %7834 = vrsqrt.f32 %v4038_v26  ;;  %v4008_v57 = vmul.f32 0.015625, %v3974_v27  ;;  %v4264_v36 = vmul.f32 %v14383_v18, %v4200_v7  ;;  %v14393_v27 = vld [vmem:[#allocation58_spill] sm:$0xff] }
 0x565   : > { %v4097_v55 = vmul.f32 %v7825_v38, %v14382_v63  ;;  %v3977_v32 = vpop.xlane.xlu1 %3976  ;;  %v7209_v4 = vpop.f32.mrb[40].mxu0  ;;  %7179 = vmatprep.mubr.msk.bf16.mxu1 %vm3689_vm2, %v5196_v42  ;;  %v4170_v29 = vadd.f32 %v12406_v60, %v4132_v11  ;;  %v4171_v9 = vadd.f32 %v12406_v60, %v4133_v22  ;;  %v4134_v3 = vmul.f32 %v12372_v47, %v4096_v51 }
 0x566   : > { %7836 = vrsqrt.f32 %v4039_v19  ;;  %v4009_v40 = vmul.f32 0.015625, %v3977_v32  ;;  %v7827_v28 = vpop.eup %7826  ;;  %v4040_v49 = vadd.f32 1e-05, %v4008_v57  ;;  %6112 = vst.msk [vmem:[%s12623_s24 + $0x50] sm:$0xff] %vm1201_vm1, %v7209_v4  ;;  %v5719_v62 = vpop.f32.mrb[41].mxu0  ;;  %v4265_v31 = vmul.f32 %v14385_v39, %v4201_v17  ;;  %v14395_v32 = vld [vmem:[#allocation196_spill] sm:$0xff] }
 0x567   : > { %v4098_v56 = vmul.f32 %v7827_v28, %v14384_v53  ;;  %6110 = vst.msk [vmem:[%s12623_s24 + $0x40] sm:$0xff] %vm1201_vm1, %v5719_v62  ;;  %v7210_v61 = vpop.f32.mrb[42].mxu0  ;;  %v4135_v59 = vmul.f32 %v12372_v47, %v4097_v55  ;;  %v4202_v16 = vmax.f32 %v4170_v29, 0.0  ;;  %v4203_v34 = vmax.f32 %v4171_v9, 0.0  ;;  %v14394_v55 = vld [vmem:[#allocation87_spill] sm:$0xff]  ;;  %v14398_v39 = vld [vmem:[#allocation5_spill] sm:$0xff] }
 0x568   : > { %v7829_v1 = vpop.eup %7828  ;;  %v4041_v50 = vadd.f32 1e-05, %v4009_v40  ;;  %7838 = vrsqrt.f32 %v4040_v49  ;;  %6113 = vst.msk [vmem:[%s12623_s24 + $0x58] sm:$0xff] %vm1201_vm1, %v7210_v61  ;;  %v5722_v44 = vpop.f32.mrb[43].mxu0  ;;  %v5197_v46 = vpack.c.bf16 %v4265_v31, %v4264_v36  ;;  %v4172_v45 = vadd.f32 %v12406_v60, %v4134_v3  ;;  %v14396_v40 = vld [vmem:[#allocation198_spill] sm:$0xff]  ;;  %v14397_v53 = vld [vmem:[#allocation7_spill] sm:$0xff] }
 0x569   : > { %v4099_v23 = vmul.f32 %v7829_v1, %v14386_v41  ;;  %6111 = vst.msk [vmem:[%s12623_s24 + $0x48] sm:$0xff] %vm1201_vm1, %v5722_v44  ;;  %v4173_v0 = vadd.f32 %v12406_v60, %v4135_v59  ;;  %v4266_v20 = vmul.f32 %v14387_v37, %v4202_v16  ;;  %v4267_v43 = vmul.f32 %v14388_v25, %v4203_v34  ;;  %v14399_v41 = vld [vmem:[#allocation194_spill] sm:$0xff]  ;;  %v14400_v44 = vld [vmem:[#allocation197_spill] sm:$0xff] }
 0x56a   : > { %7840 = vrsqrt.f32 %v4041_v50  ;;  %v7831_v10 = vpop.eup %7830  ;;  %v4136_v54 = vmul.f32 %v12372_v47, %v4098_v56  ;;  %7180 = vmatmul.mubr.msk.bf16.gmra.mrb[112].mxu1 %vm3689_vm2, %v5197_v46  ;;  %v4204_v33 = vmax.f32 %v4172_v45, 0.0  ;;  %v14401_v25 = vld [vmem:[#allocation202_spill] sm:$0xff] }
 0x56b   : > { %v4137_v6 = vmul.f32 %v12372_v47, %v4099_v23  ;;  %v4100_v30 = vmul.f32 %v7831_v10, %v14389_v52  ;;  %v4205_v5 = vmax.f32 %v4173_v0, 0.0  ;;  %v5198_v24 = vpack.c.bf16 %v4267_v43, %v4266_v20 }
 0x56c   : > { %v7833_v48 = vpop.eup %7832  ;;  %v4174_v35 = vadd.f32 %v12406_v60, %v4136_v54  ;;  %v4268_v26 = vmul.f32 %v14391_v12, %v4204_v33  ;;  %v14402_v54 = vld [vmem:[#allocation204_spill] sm:$0xff] }
 0x56d   : > { %v4101_v2 = vmul.f32 %v7833_v48, %v14390_v58  ;;  %v4175_v8 = vadd.f32 %v12406_v60, %v4137_v6  ;;  %v4269_v14 = vmul.f32 %v14392_v15, %v4205_v5  ;;  %v4138_v13 = vmul.f32 %v12372_v47, %v4100_v30  ;;  %7183 = vmatprep.mubr.msk.bf16.mxu1 %vm3689_vm2, %v5198_v24 }
 0x56e   : > { %v7835_v11 = vpop.eup %7834  ;;  %v4206_v38 = vmax.f32 %v4174_v35, 0.0  ;;  %v14404_v35 = vld [vmem:[#allocation203_spill] sm:$0xff] }
 0x56f   : > { %v4207_v21 = vmax.f32 %v4175_v8, 0.0  ;;  %v4139_v51 = vmul.f32 %v12372_v47, %v4101_v2  ;;  %v4102_v7 = vmul.f32 %v7835_v11, %v14393_v27  ;;  %v5199_v22 = vpack.c.bf16 %v4269_v14, %v4268_v26 }
 0x570   : > { %v7837_v19 = vpop.eup %7836  ;;  %v4176_v63 = vadd.f32 %v12406_v60, %v4138_v13  ;;  %v4270_v42 = vmul.f32 %v14395_v32, %v4206_v38 }
 0x571   : > { %v4103_v57 = vmul.f32 %v7837_v19, %v14394_v55  ;;  %v4271_v4 = vmul.f32 %v14396_v40, %v4207_v21  ;;  %v4177_v17 = vadd.f32 %v12406_v60, %v4139_v51  ;;  %v7213_v18 = vpop.f32.mrb[44].mxu0  ;;  %v4140_v28 = vmul.f32 %v12372_v47, %v4102_v7 }
 0x572   : > { %v4208_v36 = vmax.f32 %v4176_v63, 0.0  ;;  %v7839_v49 = vpop.eup %7838  ;;  %6116 = vst.msk [vmem:[%s12623_s24 + $0x70] sm:$0xff] %vm1201_vm1, %v7213_v18  ;;  %v5735_v62 = vpop.f32.mrb[45].mxu0  ;;  %7184 = vmatmul.mubr.msk.bf16.gmra.mrb[116].mxu1 %vm3689_vm2, %v5199_v22 }
 0x573   : > { %v5200_v29 = vpack.c.bf16 %v4271_v4, %v4270_v42  ;;  %v4209_v9 = vmax.f32 %v4177_v17, 0.0  ;;  %v4141_v3 = vmul.f32 %v12372_v47, %v4103_v57  ;;  %v4104_v56 = vmul.f32 %v7839_v49, %v14397_v53  ;;  %6114 = vst.msk [vmem:[%s12623_s24 + $0x60] sm:$0xff] %vm1201_vm1, %v5735_v62  ;;  %v7214_v50 = vpop.f32.mrb[46].mxu0 }
 0x574   : > { %v7841_v1 = vpop.eup %7840  ;;  %v4178_v61 = vadd.f32 %v12406_v60, %v4140_v28  ;;  %6117 = vst.msk [vmem:[%s12623_s24 + $0x78] sm:$0xff] %vm1201_vm1, %v7214_v50  ;;  %v5738_v59 = vpop.f32.mrb[47].mxu0  ;;  %v4272_v23 = vmul.f32 %v14399_v41, %v4208_v36 }
 0x575   : > { %v4105_v31 = vmul.f32 %v7841_v1, %v14398_v39  ;;  %7187 = vmatprep.mubr.msk.bf16.mxu1 %vm3689_vm2, %v5200_v29  ;;  %v4273_v16 = vmul.f32 %v14400_v44, %v4209_v9  ;;  %v4179_v34 = vadd.f32 %v12406_v60, %v4141_v3  ;;  %v4142_v46 = vmul.f32 %v12372_v47, %v4104_v56 }
 0x576   : > { %6115 = vst.msk [vmem:[%s12623_s24 + $0x68] sm:$0xff] %vm1201_vm1, %v5738_v59  ;;  %v4210_v45 = vmax.f32 %v4178_v61, 0.0 }
 0x577   : > { %v4143_v0 = vmul.f32 %v12372_v47, %v4105_v31  ;;  %v5201_v10 = vpack.c.bf16 %v4273_v16, %v4272_v23  ;;  %v4211_v37 = vmax.f32 %v4179_v34, 0.0  ;;  %v4180_v20 = vadd.f32 %v12406_v60, %v4142_v46 }
 0x578   : > { %v4274_v43 = vmul.f32 %v14401_v25, %v4210_v45 }
 0x579   : > { %v4275_v6 = vmul.f32 %v14402_v54, %v4211_v37  ;;  %v4181_v48 = vadd.f32 %v12406_v60, %v4143_v0  ;;  %v7217_v52 = vpop.f32.mrb[48].mxu0  ;;  %v4212_v30 = vmax.f32 %v4180_v20, 0.0  ;;  %v14403_v60 = vld [vmem:[#allocation201_spill] sm:$0xff] }
 0x57a   : > { %6120 = vst.msk [vmem:[%s12623_s24 + $0x90] sm:$0xff] %vm1201_vm1, %v7217_v52  ;;  %v5751_v33 = vpop.f32.mrb[49].mxu0  ;;  %7188 = vmatmul.mubr.msk.bf16.gmra.mrb[120].mxu1 %vm3689_vm2, %v5201_v10 }
 0x57b   : > { %v5202_v5 = vpack.c.bf16 %v4275_v6, %v4274_v43  ;;  %v4213_v47 = vmax.f32 %v4181_v48, 0.0  ;;  %6118 = vst.msk [vmem:[%s12623_s24 + $0x80] sm:$0xff] %vm1201_vm1, %v5751_v33  ;;  %v7218_v58 = vpop.f32.mrb[50].mxu0  ;;  %v4276_v24 = vmul.f32 %v14403_v60, %v4212_v30 }
 0x57c   : > { %6121 = vst.msk [vmem:[%s12623_s24 + $0x98] sm:$0xff] %vm1201_vm1, %v7218_v58  ;;  %v5754_v2 = vpop.f32.mrb[51].mxu0 }
 0x57d   : > { %7191 = vmatprep.mubr.msk.bf16.mxu1 %vm3689_vm2, %v5202_v5  ;;  %v4277_v8 = vmul.f32 %v14404_v35, %v4213_v47  ;;  %6119 = vst.msk [vmem:[%s12623_s24 + $0x88] sm:$0xff] %vm1201_vm1, %v5754_v2 }
 0x57f   : > { %v5203_v12 = vpack.c.bf16 %v4277_v8, %v4276_v24 }
 0x582   : > { %7192 = vmatmul.mubr.msk.bf16.gmra.mrb[124].mxu1 %vm3689_vm2, %v5203_v12 }
 0x583   : > { %v7221_v26 = vpop.f32.mrb[52].mxu0 }
 0x584   : > { %6124 = vst.msk [vmem:[%s12623_s24 + $0xb0] sm:$0xff] %vm1201_vm1, %v7221_v26  ;;  %v5767_v15 = vpop.f32.mrb[53].mxu0 }
 0x585   : > { %6122 = vst.msk [vmem:[%s12623_s24 + $0xa0] sm:$0xff] %vm1201_vm1, %v5767_v15  ;;  %v7222_v14 = vpop.f32.mrb[54].mxu0 }
 0x586   : > { %6125 = vst.msk [vmem:[%s12623_s24 + $0xb8] sm:$0xff] %vm1201_vm1, %v7222_v14  ;;  %v5770_v13 = vpop.f32.mrb[55].mxu0 }
 0x587   : > { %6123 = vst.msk [vmem:[%s12623_s24 + $0xa8] sm:$0xff] %vm1201_vm1, %v5770_v13 }
 0x58b   : > { %v7225_v11 = vpop.f32.mrb[56].mxu0 }
 0x58c   : > { %6128 = vst.msk [vmem:[%s12623_s24 + $0xd0] sm:$0xff] %vm1201_vm1, %v7225_v11  ;;  %v5783_v38 = vpop.f32.mrb[57].mxu0 }
 0x58d   : > { %6126 = vst.msk [vmem:[%s12623_s24 + $0xc0] sm:$0xff] %vm1201_vm1, %v5783_v38  ;;  %v7226_v21 = vpop.f32.mrb[58].mxu0 }
 0x58e   : > { %6129 = vst.msk [vmem:[%s12623_s24 + $0xd8] sm:$0xff] %vm1201_vm1, %v7226_v21  ;;  %v5786_v51 = vpop.f32.mrb[59].mxu0 }
 0x58f   : > { %6127 = vst.msk [vmem:[%s12623_s24 + $0xc8] sm:$0xff] %vm1201_vm1, %v5786_v51 }
 0x594   : > { %v7229_v19 = vpop.f32.mrb[60].mxu0 }
 0x595   : > { %6132 = vst.msk [vmem:[%s12623_s24 + $0xf0] sm:$0xff] %vm1201_vm1, %v7229_v19  ;;  %v5799_v27 = vpop.f32.mrb[61].mxu0 }
 0x596   : > { %6130 = vst.msk [vmem:[%s12623_s24 + $0xe0] sm:$0xff] %vm1201_vm1, %v5799_v27  ;;  %v7230_v7 = vpop.f32.mrb[62].mxu0 }
 0x597   : > { %6133 = vst.msk [vmem:[%s12623_s24 + $0xf8] sm:$0xff] %vm1201_vm1, %v7230_v7  ;;  %v5802_v22 = vpop.f32.mrb[63].mxu0 }
 0x598   : > { %6131 = vst.msk [vmem:[%s12623_s24 + $0xe8] sm:$0xff] %vm1201_vm1, %v5802_v22 }
 0x59c   : > { %v7233_v63 = vpop.f32.mrb[64].mxu0 }
 0x59d   : > { %6136 = vst.msk [vmem:[%s12623_s24 + $0x110] sm:$0xff] %vm1201_vm1, %v7233_v63  ;;  %v5815_v55 = vpop.f32.mrb[65].mxu0 }
 0x59e   : > { %6134 = vst.msk [vmem:[%s12623_s24 + $0x100] sm:$0xff] %vm1201_vm1, %v5815_v55  ;;  %v7234_v57 = vpop.f32.mrb[66].mxu0 }
 0x59f   : > { %6137 = vst.msk [vmem:[%s12623_s24 + $0x118] sm:$0xff] %vm1201_vm1, %v7234_v57  ;;  %v5818_v32 = vpop.f32.mrb[67].mxu0 }
 0x5a0   : > { %6135 = vst.msk [vmem:[%s12623_s24 + $0x108] sm:$0xff] %vm1201_vm1, %v5818_v32 }
 0x5a4   : > { %v7237_v42 = vpop.f32.mrb[68].mxu0 }
 0x5a5   : > { %6140 = vst.msk [vmem:[%s12623_s24 + $0x130] sm:$0xff] %vm1201_vm1, %v7237_v42  ;;  %v5831_v40 = vpop.f32.mrb[69].mxu0 }
 0x5a6   : > { %6138 = vst.msk [vmem:[%s12623_s24 + $0x120] sm:$0xff] %vm1201_vm1, %v5831_v40  ;;  %v7238_v4 = vpop.f32.mrb[70].mxu0 }
 0x5a7   : > { %6141 = vst.msk [vmem:[%s12623_s24 + $0x138] sm:$0xff] %vm1201_vm1, %v7238_v4  ;;  %v5834_v17 = vpop.f32.mrb[71].mxu0 }
 0x5a8   : > { %6139 = vst.msk [vmem:[%s12623_s24 + $0x128] sm:$0xff] %vm1201_vm1, %v5834_v17 }
 0x5ac   : > { %v7241_v18 = vpop.f32.mrb[72].mxu0 }
 0x5ad   : > { %6144 = vst.msk [vmem:[%s12623_s24 + $0x150] sm:$0xff] %vm1201_vm1, %v7241_v18  ;;  %v5847_v36 = vpop.f32.mrb[73].mxu0 }
 0x5ae   : > { %6142 = vst.msk [vmem:[%s12623_s24 + $0x140] sm:$0xff] %vm1201_vm1, %v5847_v36  ;;  %v7242_v28 = vpop.f32.mrb[74].mxu0 }
 0x5af   : > { %6145 = vst.msk [vmem:[%s12623_s24 + $0x158] sm:$0xff] %vm1201_vm1, %v7242_v28  ;;  %v5850_v49 = vpop.f32.mrb[75].mxu0 }
 0x5b0   : > { %6143 = vst.msk [vmem:[%s12623_s24 + $0x148] sm:$0xff] %vm1201_vm1, %v5850_v49 }
 0x5b5   : > { %v7245_v62 = vpop.f32.mrb[76].mxu0 }
 0x5b6   : > { %6148 = vst.msk [vmem:[%s12623_s24 + $0x170] sm:$0xff] %vm1201_vm1, %v7245_v62  ;;  %v5863_v29 = vpop.f32.mrb[77].mxu0 }
 0x5b7   : > { %6146 = vst.msk [vmem:[%s12623_s24 + $0x160] sm:$0xff] %vm1201_vm1, %v5863_v29  ;;  %v7246_v9 = vpop.f32.mrb[78].mxu0 }
 0x5b8   : > { %6149 = vst.msk [vmem:[%s12623_s24 + $0x178] sm:$0xff] %vm1201_vm1, %v7246_v9  ;;  %v5866_v3 = vpop.f32.mrb[79].mxu0 }
 0x5b9   : > { %6147 = vst.msk [vmem:[%s12623_s24 + $0x168] sm:$0xff] %vm1201_vm1, %v5866_v3 }
 0x5be   : > { %v7249_v1 = vpop.f32.mrb[80].mxu0 }
 0x5bf   : > { %6152 = vst.msk [vmem:[%s12623_s24 + $0x190] sm:$0xff] %vm1201_vm1, %v7249_v1  ;;  %v5879_v53 = vpop.f32.mrb[81].mxu0  ;;  %v7165_v50 = vpop.f32.mrb[96].mxu1 }
 0x5c0   : > { %6150 = vst.msk [vmem:[%s12623_s24 + $0x180] sm:$0xff] %vm1201_vm1, %v5879_v53  ;;  %v7250_v56 = vpop.f32.mrb[82].mxu0  ;;  %v5318_v39 = vpop.f32.mrb[97].mxu1 }
 0x5c1   : > { %6153 = vst.msk [vmem:[%s12623_s24 + $0x198] sm:$0xff] %vm1201_vm1, %v7250_v56  ;;  %v5882_v61 = vpop.f32.mrb[83].mxu0  ;;  %v7166_v31 = vpop.f32.mrb[98].mxu1 }
 0x5c2   : > { %6072 = vst.msk [vmem:[%s12824_s29 + $0x10] sm:$0xff] %vm3689_vm2, %v7165_v50  ;;  %6070 = vst.msk [vmem:[%s12824_s29] sm:$0xff] %vm3689_vm2, %v5318_v39  ;;  %v5321_v59 = vpop.f32.mrb[99].mxu1 }
 0x5c3   : > { %6151 = vst.msk [vmem:[%s12623_s24 + $0x188] sm:$0xff] %vm1201_vm1, %v5882_v61 }
 0x5c4   : > { %6073 = vst.msk [vmem:[%s12824_s29 + $0x18] sm:$0xff] %vm3689_vm2, %v7166_v31  ;;  %6071 = vst.msk [vmem:[%s12824_s29 + $0x8] sm:$0xff] %vm3689_vm2, %v5321_v59 }
 0x5c6   : > { %v7253_v41 = vpop.f32.mrb[84].mxu0 }
 0x5c7   : > { %6156 = vst.msk [vmem:[%s12623_s24 + $0x1b0] sm:$0xff] %vm1201_vm1, %v7253_v41  ;;  %v5895_v23 = vpop.f32.mrb[85].mxu0 }
 0x5c8   : > { %6154 = vst.msk [vmem:[%s12623_s24 + $0x1a0] sm:$0xff] %vm1201_vm1, %v5895_v23  ;;  %v7254_v44 = vpop.f32.mrb[86].mxu0 }
 0x5c9   : > { %6157 = vst.msk [vmem:[%s12623_s24 + $0x1b8] sm:$0xff] %vm1201_vm1, %v7254_v44  ;;  %v5898_v16 = vpop.f32.mrb[87].mxu0 }
 0x5ca   : > { %6155 = vst.msk [vmem:[%s12623_s24 + $0x1a8] sm:$0xff] %vm1201_vm1, %v5898_v16 }
 0x5ce   : > { %v7257_v34 = vpop.f32.mrb[88].mxu0 }
 0x5cf   : > { %6160 = vst.msk [vmem:[%s12623_s24 + $0x1d0] sm:$0xff] %vm1201_vm1, %v7257_v34  ;;  %v5911_v46 = vpop.f32.mrb[89].mxu0 }
 0x5d0   : > { %6158 = vst.msk [vmem:[%s12623_s24 + $0x1c0] sm:$0xff] %vm1201_vm1, %v5911_v46  ;;  %v7258_v45 = vpop.f32.mrb[90].mxu0 }
 0x5d1   : > { %6161 = vst.msk [vmem:[%s12623_s24 + $0x1d8] sm:$0xff] %vm1201_vm1, %v7258_v45  ;;  %v5914_v0 = vpop.f32.mrb[91].mxu0 }
 0x5d2   : > { %6159 = vst.msk [vmem:[%s12623_s24 + $0x1c8] sm:$0xff] %vm1201_vm1, %v5914_v0 }
 0x5d6   : > { %v7261_v10 = vpop.f32.mrb[92].mxu0 }
 0x5d7   : > { %6164 = vst.msk [vmem:[%s12623_s24 + $0x1f0] sm:$0xff] %vm1201_vm1, %v7261_v10  ;;  %v5927_v37 = vpop.f32.mrb[93].mxu0  ;;  %v6434_v10 = vld [vmem:[%s12623_s24] sm:$0xff] (%p8075_p5) }
 0x5d8   : > { %6162 = vst.msk [vmem:[%s12623_s24 + $0x1e0] sm:$0xff] %vm1201_vm1, %v5927_v37  ;;  %v7262_v20 = vpop.f32.mrb[94].mxu0  ;;  %v6436_v37 = vld [vmem:[%s12623_s24 + $0x8] sm:$0xff] (%p8075_p5)  ;;  %6435 = vst [vmem:[%s12995_s28] sm:$0xff] (%p8075_p5), %v6434_v10 }
 0x5d9   : > { %6165 = vst.msk [vmem:[%s12623_s24 + $0x1f8] sm:$0xff] %vm1201_vm1, %v7262_v20  ;;  %v5930_v25 = vpop.f32.mrb[95].mxu0  ;;  %v6438_v20 = vld [vmem:[%s12623_s24 + $0x10] sm:$0xff] (%p8075_p5)  ;;  %6437 = vst [vmem:[%s12995_s28 + $0x8] sm:$0xff] (%p8075_p5), %v6436_v37 }
 0x5da   : > { %6163 = vst.msk [vmem:[%s12623_s24 + $0x1e8] sm:$0xff] %vm1201_vm1, %v5930_v25  ;;  %v6440_v25 = vld [vmem:[%s12623_s24 + $0x18] sm:$0xff] (%p8075_p5)  ;;  %6439 = vst [vmem:[%s12995_s28 + $0x10] sm:$0xff] (%p8075_p5), %v6438_v20 }
 0x5db   : > { %6441 = vst [vmem:[%s12995_s28 + $0x18] sm:$0xff] (%p8075_p5), %v6440_v25 }
 0x5de   : > { %v7265_v43 = vpop.f32.mrb[96].mxu0 }
 0x5df   : > { %6168 = vst.msk [vmem:[%s12623_s24 + $0x210] sm:$0xff] %vm1201_vm1, %v7265_v43  ;;  %v5943_v54 = vpop.f32.mrb[97].mxu0  ;;  %v6442_v43 = vld [vmem:[%s12623_s24 + $0x20] sm:$0xff] (%p8075_p5) }
 0x5e0   : > { %6166 = vst.msk [vmem:[%s12623_s24 + $0x200] sm:$0xff] %vm1201_vm1, %v5943_v54  ;;  %v7266_v6 = vpop.f32.mrb[98].mxu0  ;;  %v6444_v54 = vld [vmem:[%s12623_s24 + $0x28] sm:$0xff] (%p8075_p5)  ;;  %6443 = vst [vmem:[%s12995_s28 + $0x20] sm:$0xff] (%p8075_p5), %v6442_v43 }
 0x5e1   : > { %6169 = vst.msk [vmem:[%s12623_s24 + $0x218] sm:$0xff] %vm1201_vm1, %v7266_v6  ;;  %v5946_v48 = vpop.f32.mrb[99].mxu0  ;;  %6445 = vst [vmem:[%s12995_s28 + $0x28] sm:$0xff] (%p8075_p5), %v6444_v54  ;;  %v6446_v6 = vld [vmem:[%s12623_s24 + $0x30] sm:$0xff] (%p8075_p5) }
 0x5e2   : > { %6167 = vst.msk [vmem:[%s12623_s24 + $0x208] sm:$0xff] %vm1201_vm1, %v5946_v48  ;;  %v6448_v48 = vld [vmem:[%s12623_s24 + $0x38] sm:$0xff] (%p8075_p5)  ;;  %6447 = vst [vmem:[%s12995_s28 + $0x30] sm:$0xff] (%p8075_p5), %v6446_v6 }
 0x5e3   : > { %6449 = vst [vmem:[%s12995_s28 + $0x38] sm:$0xff] (%p8075_p5), %v6448_v48 }
 0x5e6   : > { %v7269_v52 = vpop.f32.mrb[100].mxu0  ;;  %v6566_v20 = vld [vmem:[%s12623_s24 + $0x210] sm:$0xff] (%p8075_p5) }
 0x5e7   : > { %6172 = vst.msk [vmem:[%s12623_s24 + $0x230] sm:$0xff] %vm1201_vm1, %v7269_v52  ;;  %v5959_v30 = vpop.f32.mrb[101].mxu0  ;;  %v6450_v52 = vld [vmem:[%s12623_s24 + $0x40] sm:$0xff] (%p8075_p5)  ;;  %6567 = vst [vmem:[%s12995_s28 + $0x410] sm:$0xff] (%p8075_p5), %v6566_v20 }
 0x5e8   : > { %6170 = vst.msk [vmem:[%s12623_s24 + $0x220] sm:$0xff] %vm1201_vm1, %v5959_v30  ;;  %v7270_v33 = vpop.f32.mrb[102].mxu0  ;;  %6451 = vst [vmem:[%s12995_s28 + $0x40] sm:$0xff] (%p8075_p5), %v6450_v52  ;;  %v6452_v30 = vld [vmem:[%s12623_s24 + $0x48] sm:$0xff] (%p8075_p5)  ;;  %v6562_v10 = vld [vmem:[%s12623_s24 + $0x200] sm:$0xff] (%p8075_p5) }
 0x5e9   : > { %6173 = vst.msk [vmem:[%s12623_s24 + $0x238] sm:$0xff] %vm1201_vm1, %v7270_v33  ;;  %v5962_v5 = vpop.f32.mrb[103].mxu0  ;;  %v6454_v33 = vld [vmem:[%s12623_s24 + $0x50] sm:$0xff] (%p8075_p5)  ;;  %6453 = vst [vmem:[%s12995_s28 + $0x48] sm:$0xff] (%p8075_p5), %v6452_v30  ;;  %v6564_v37 = vld [vmem:[%s12623_s24 + $0x208] sm:$0xff] (%p8075_p5) }
 0x5ea   : > { %6171 = vst.msk [vmem:[%s12623_s24 + $0x228] sm:$0xff] %vm1201_vm1, %v5962_v5  ;;  %v6456_v5 = vld [vmem:[%s12623_s24 + $0x58] sm:$0xff] (%p8075_p5)  ;;  %6455 = vst [vmem:[%s12995_s28 + $0x50] sm:$0xff] (%p8075_p5), %v6454_v33 }
 0x5eb   : > { %6457 = vst [vmem:[%s12995_s28 + $0x58] sm:$0xff] (%p8075_p5), %v6456_v5  ;;  %6563 = vst [vmem:[%s12995_s28 + $0x400] sm:$0xff] (%p8075_p5), %v6562_v10  ;;  %v6568_v25 = vld [vmem:[%s12623_s24 + $0x218] sm:$0xff] (%p8075_p5) }
 0x5ec   : > { %6565 = vst [vmem:[%s12995_s28 + $0x408] sm:$0xff] (%p8075_p5), %v6564_v37  ;;  %6569 = vst [vmem:[%s12995_s28 + $0x418] sm:$0xff] (%p8075_p5), %v6568_v25 }
 0x5ee   : > { %v7273_v47 = vpop.f32.mrb[104].mxu0  ;;  %v6574_v6 = vld [vmem:[%s12623_s24 + $0x230] sm:$0xff] (%p8075_p5) }
 0x5ef   : > { %6176 = vst.msk [vmem:[%s12623_s24 + $0x250] sm:$0xff] %vm1201_vm1, %v7273_v47  ;;  %v5975_v58 = vpop.f32.mrb[105].mxu0  ;;  %v6458_v47 = vld [vmem:[%s12623_s24 + $0x60] sm:$0xff] (%p8075_p5)  ;;  %6575 = vst [vmem:[%s12995_s28 + $0x430] sm:$0xff] (%p8075_p5), %v6574_v6 }
 0x5f0   : > { %6174 = vst.msk [vmem:[%s12623_s24 + $0x240] sm:$0xff] %vm1201_vm1, %v5975_v58  ;;  %v7274_v2 = vpop.f32.mrb[106].mxu0  ;;  %v6460_v58 = vld [vmem:[%s12623_s24 + $0x68] sm:$0xff] (%p8075_p5)  ;;  %6459 = vst [vmem:[%s12995_s28 + $0x60] sm:$0xff] (%p8075_p5), %v6458_v47  ;;  %v6570_v43 = vld [vmem:[%s12623_s24 + $0x220] sm:$0xff] (%p8075_p5) }
 0x5f1   : > { %6177 = vst.msk [vmem:[%s12623_s24 + $0x258] sm:$0xff] %vm1201_vm1, %v7274_v2  ;;  %v5978_v60 = vpop.f32.mrb[107].mxu0  ;;  %v6462_v2 = vld [vmem:[%s12623_s24 + $0x70] sm:$0xff] (%p8075_p5)  ;;  %6461 = vst [vmem:[%s12995_s28 + $0x68] sm:$0xff] (%p8075_p5), %v6460_v58  ;;  %v6572_v54 = vld [vmem:[%s12623_s24 + $0x228] sm:$0xff] (%p8075_p5) }
 0x5f2   : > { %6175 = vst.msk [vmem:[%s12623_s24 + $0x248] sm:$0xff] %vm1201_vm1, %v5978_v60  ;;  %6463 = vst [vmem:[%s12995_s28 + $0x70] sm:$0xff] (%p8075_p5), %v6462_v2  ;;  %v6464_v60 = vld [vmem:[%s12623_s24 + $0x78] sm:$0xff] (%p8075_p5) }
 0x5f3   : > { %6465 = vst [vmem:[%s12995_s28 + $0x78] sm:$0xff] (%p8075_p5), %v6464_v60  ;;  %6571 = vst [vmem:[%s12995_s28 + $0x420] sm:$0xff] (%p8075_p5), %v6570_v43  ;;  %v6576_v48 = vld [vmem:[%s12623_s24 + $0x238] sm:$0xff] (%p8075_p5) }
 0x5f4   : > { %6573 = vst [vmem:[%s12995_s28 + $0x428] sm:$0xff] (%p8075_p5), %v6572_v54  ;;  %6577 = vst [vmem:[%s12995_s28 + $0x438] sm:$0xff] (%p8075_p5), %v6576_v48 }
 0x5f6   : > { %v7277_v24 = vpop.f32.mrb[108].mxu0  ;;  %v6582_v33 = vld [vmem:[%s12623_s24 + $0x250] sm:$0xff] (%p8075_p5) }
 0x5f7   : > { %6180 = vst.msk [vmem:[%s12623_s24 + $0x270] sm:$0xff] %vm1201_vm1, %v7277_v24  ;;  %v5991_v35 = vpop.f32.mrb[109].mxu0  ;;  %v6466_v24 = vld [vmem:[%s12623_s24 + $0x80] sm:$0xff] (%p8075_p5)  ;;  %6583 = vst [vmem:[%s12995_s28 + $0x450] sm:$0xff] (%p8075_p5), %v6582_v33 }
 0x5f8   : > { %6178 = vst.msk [vmem:[%s12623_s24 + $0x260] sm:$0xff] %vm1201_vm1, %v5991_v35  ;;  %v7278_v8 = vpop.f32.mrb[110].mxu0  ;;  %v6468_v35 = vld [vmem:[%s12623_s24 + $0x88] sm:$0xff] (%p8075_p5)  ;;  %6467 = vst [vmem:[%s12995_s28 + $0x80] sm:$0xff] (%p8075_p5), %v6466_v24  ;;  %v6578_v52 = vld [vmem:[%s12623_s24 + $0x240] sm:$0xff] (%p8075_p5) }
 0x5f9   : > { %6181 = vst.msk [vmem:[%s12623_s24 + $0x278] sm:$0xff] %vm1201_vm1, %v7278_v8  ;;  %v5994_v12 = vpop.f32.mrb[111].mxu0  ;;  %6469 = vst [vmem:[%s12995_s28 + $0x88] sm:$0xff] (%p8075_p5), %v6468_v35  ;;  %v6470_v8 = vld [vmem:[%s12623_s24 + $0x90] sm:$0xff] (%p8075_p5)  ;;  %v6580_v30 = vld [vmem:[%s12623_s24 + $0x248] sm:$0xff] (%p8075_p5) }
 0x5fa   : > { %6179 = vst.msk [vmem:[%s12623_s24 + $0x268] sm:$0xff] %vm1201_vm1, %v5994_v12  ;;  %v6472_v12 = vld [vmem:[%s12623_s24 + $0x98] sm:$0xff] (%p8075_p5)  ;;  %6471 = vst [vmem:[%s12995_s28 + $0x90] sm:$0xff] (%p8075_p5), %v6470_v8 }
 0x5fb   : > { %6473 = vst [vmem:[%s12995_s28 + $0x98] sm:$0xff] (%p8075_p5), %v6472_v12  ;;  %6579 = vst [vmem:[%s12995_s28 + $0x440] sm:$0xff] (%p8075_p5), %v6578_v52  ;;  %v6584_v5 = vld [vmem:[%s12623_s24 + $0x258] sm:$0xff] (%p8075_p5) }
 0x5fc   : > { %6581 = vst [vmem:[%s12995_s28 + $0x448] sm:$0xff] (%p8075_p5), %v6580_v30  ;;  %6585 = vst [vmem:[%s12995_s28 + $0x458] sm:$0xff] (%p8075_p5), %v6584_v5 }
 0x5fe   : > { %v7281_v26 = vpop.f32.mrb[112].mxu0  ;;  %v6590_v2 = vld [vmem:[%s12623_s24 + $0x270] sm:$0xff] (%p8075_p5) }
 0x5ff   : > { %6184 = vst.msk [vmem:[%s12623_s24 + $0x290] sm:$0xff] %vm1201_vm1, %v7281_v26  ;;  %v6007_v15 = vpop.f32.mrb[113].mxu0  ;;  %v6474_v26 = vld [vmem:[%s12623_s24 + $0xa0] sm:$0xff] (%p8075_p5)  ;;  %6591 = vst [vmem:[%s12995_s28 + $0x470] sm:$0xff] (%p8075_p5), %v6590_v2 }
 0x600   : > { %6182 = vst.msk [vmem:[%s12623_s24 + $0x280] sm:$0xff] %vm1201_vm1, %v6007_v15  ;;  %v7282_v14 = vpop.f32.mrb[114].mxu0  ;;  %6475 = vst [vmem:[%s12995_s28 + $0xa0] sm:$0xff] (%p8075_p5), %v6474_v26  ;;  %v6476_v15 = vld [vmem:[%s12623_s24 + $0xa8] sm:$0xff] (%p8075_p5)  ;;  %v6586_v47 = vld [vmem:[%s12623_s24 + $0x260] sm:$0xff] (%p8075_p5) }
 0x601   : > { %6185 = vst.msk [vmem:[%s12623_s24 + $0x298] sm:$0xff] %vm1201_vm1, %v7282_v14  ;;  %v6010_v13 = vpop.f32.mrb[115].mxu0  ;;  %v6478_v14 = vld [vmem:[%s12623_s24 + $0xb0] sm:$0xff] (%p8075_p5)  ;;  %6477 = vst [vmem:[%s12995_s28 + $0xa8] sm:$0xff] (%p8075_p5), %v6476_v15  ;;  %v6588_v58 = vld [vmem:[%s12623_s24 + $0x268] sm:$0xff] (%p8075_p5) }
 0x602   : > { %6183 = vst.msk [vmem:[%s12623_s24 + $0x288] sm:$0xff] %vm1201_vm1, %v6010_v13  ;;  %v6480_v13 = vld [vmem:[%s12623_s24 + $0xb8] sm:$0xff] (%p8075_p5)  ;;  %6479 = vst [vmem:[%s12995_s28 + $0xb0] sm:$0xff] (%p8075_p5), %v6478_v14 }
 0x603   : > { %6481 = vst [vmem:[%s12995_s28 + $0xb8] sm:$0xff] (%p8075_p5), %v6480_v13  ;;  %6587 = vst [vmem:[%s12995_s28 + $0x460] sm:$0xff] (%p8075_p5), %v6586_v47  ;;  %v6592_v60 = vld [vmem:[%s12623_s24 + $0x278] sm:$0xff] (%p8075_p5) }
 0x604   : > { %6589 = vst [vmem:[%s12995_s28 + $0x468] sm:$0xff] (%p8075_p5), %v6588_v58  ;;  %6593 = vst [vmem:[%s12995_s28 + $0x478] sm:$0xff] (%p8075_p5), %v6592_v60 }
 0x606   : > { %v7285_v11 = vpop.f32.mrb[116].mxu0  ;;  %v6598_v8 = vld [vmem:[%s12623_s24 + $0x290] sm:$0xff] (%p8075_p5) }
 0x607   : > { %6188 = vst.msk [vmem:[%s12623_s24 + $0x2b0] sm:$0xff] %vm1201_vm1, %v7285_v11  ;;  %v6023_v38 = vpop.f32.mrb[117].mxu0  ;;  %v6482_v11 = vld [vmem:[%s12623_s24 + $0xc0] sm:$0xff] (%p8075_p5)  ;;  %6599 = vst [vmem:[%s12995_s28 + $0x490] sm:$0xff] (%p8075_p5), %v6598_v8 }
 0x608   : > { %6186 = vst.msk [vmem:[%s12623_s24 + $0x2a0] sm:$0xff] %vm1201_vm1, %v6023_v38  ;;  %v7286_v21 = vpop.f32.mrb[118].mxu0  ;;  %v6484_v38 = vld [vmem:[%s12623_s24 + $0xc8] sm:$0xff] (%p8075_p5)  ;;  %6483 = vst [vmem:[%s12995_s28 + $0xc0] sm:$0xff] (%p8075_p5), %v6482_v11  ;;  %v6594_v24 = vld [vmem:[%s12623_s24 + $0x280] sm:$0xff] (%p8075_p5) }
 0x609   : > { %6189 = vst.msk [vmem:[%s12623_s24 + $0x2b8] sm:$0xff] %vm1201_vm1, %v7286_v21  ;;  %v6026_v51 = vpop.f32.mrb[119].mxu0  ;;  %v6486_v21 = vld [vmem:[%s12623_s24 + $0xd0] sm:$0xff] (%p8075_p5)  ;;  %6485 = vst [vmem:[%s12995_s28 + $0xc8] sm:$0xff] (%p8075_p5), %v6484_v38  ;;  %v6596_v35 = vld [vmem:[%s12623_s24 + $0x288] sm:$0xff] (%p8075_p5) }
 0x60a   : > { %6187 = vst.msk [vmem:[%s12623_s24 + $0x2a8] sm:$0xff] %vm1201_vm1, %v6026_v51  ;;  %6487 = vst [vmem:[%s12995_s28 + $0xd0] sm:$0xff] (%p8075_p5), %v6486_v21  ;;  %v6488_v51 = vld [vmem:[%s12623_s24 + $0xd8] sm:$0xff] (%p8075_p5) }
 0x60b   : > { %6489 = vst [vmem:[%s12995_s28 + $0xd8] sm:$0xff] (%p8075_p5), %v6488_v51  ;;  %6595 = vst [vmem:[%s12995_s28 + $0x480] sm:$0xff] (%p8075_p5), %v6594_v24  ;;  %v6600_v12 = vld [vmem:[%s12623_s24 + $0x298] sm:$0xff] (%p8075_p5) }
 0x60c   : > { %6597 = vst [vmem:[%s12995_s28 + $0x488] sm:$0xff] (%p8075_p5), %v6596_v35  ;;  %6601 = vst [vmem:[%s12995_s28 + $0x498] sm:$0xff] (%p8075_p5), %v6600_v12 }
 0x60e   : > { %v7289_v19 = vpop.f32.mrb[120].mxu0  ;;  %v6606_v14 = vld [vmem:[%s12623_s24 + $0x2b0] sm:$0xff] (%p8075_p5) }
 0x60f   : > { %6192 = vst.msk [vmem:[%s12623_s24 + $0x2d0] sm:$0xff] %vm1201_vm1, %v7289_v19  ;;  %v6039_v27 = vpop.f32.mrb[121].mxu0  ;;  %v6490_v19 = vld [vmem:[%s12623_s24 + $0xe0] sm:$0xff] (%p8075_p5)  ;;  %6607 = vst [vmem:[%s12995_s28 + $0x4b0] sm:$0xff] (%p8075_p5), %v6606_v14 }
 0x610   : > { %6190 = vst.msk [vmem:[%s12623_s24 + $0x2c0] sm:$0xff] %vm1201_vm1, %v6039_v27  ;;  %v7290_v7 = vpop.f32.mrb[122].mxu0  ;;  %v6492_v27 = vld [vmem:[%s12623_s24 + $0xe8] sm:$0xff] (%p8075_p5)  ;;  %6491 = vst [vmem:[%s12995_s28 + $0xe0] sm:$0xff] (%p8075_p5), %v6490_v19  ;;  %v6602_v26 = vld [vmem:[%s12623_s24 + $0x2a0] sm:$0xff] (%p8075_p5) }
 0x611   : > { %6193 = vst.msk [vmem:[%s12623_s24 + $0x2d8] sm:$0xff] %vm1201_vm1, %v7290_v7  ;;  %v6042_v22 = vpop.f32.mrb[123].mxu0  ;;  %6493 = vst [vmem:[%s12995_s28 + $0xe8] sm:$0xff] (%p8075_p5), %v6492_v27  ;;  %v6494_v7 = vld [vmem:[%s12623_s24 + $0xf0] sm:$0xff] (%p8075_p5)  ;;  %v6604_v15 = vld [vmem:[%s12623_s24 + $0x2a8] sm:$0xff] (%p8075_p5) }
 0x612   : > { %6191 = vst.msk [vmem:[%s12623_s24 + $0x2c8] sm:$0xff] %vm1201_vm1, %v6042_v22  ;;  %v6496_v22 = vld [vmem:[%s12623_s24 + $0xf8] sm:$0xff] (%p8075_p5)  ;;  %6495 = vst [vmem:[%s12995_s28 + $0xf0] sm:$0xff] (%p8075_p5), %v6494_v7 }
 0x613   : > { %6497 = vst [vmem:[%s12995_s28 + $0xf8] sm:$0xff] (%p8075_p5), %v6496_v22  ;;  %6603 = vst [vmem:[%s12995_s28 + $0x4a0] sm:$0xff] (%p8075_p5), %v6602_v26  ;;  %v6608_v13 = vld [vmem:[%s12623_s24 + $0x2b8] sm:$0xff] (%p8075_p5) }
 0x614   : > { %6605 = vst [vmem:[%s12995_s28 + $0x4a8] sm:$0xff] (%p8075_p5), %v6604_v15  ;;  %6609 = vst [vmem:[%s12995_s28 + $0x4b8] sm:$0xff] (%p8075_p5), %v6608_v13 }
 0x616   : > { %v7293_v63 = vpop.f32.mrb[124].mxu0  ;;  %v6614_v21 = vld [vmem:[%s12623_s24 + $0x2d0] sm:$0xff] (%p8075_p5) }
 0x617   : > { %6196 = vst.msk [vmem:[%s12623_s24 + $0x2f0] sm:$0xff] %vm1201_vm1, %v7293_v63  ;;  %v6055_v55 = vpop.f32.mrb[125].mxu0  ;;  %v6498_v63 = vld [vmem:[%s12623_s24 + $0x100] sm:$0xff] (%p8075_p5)  ;;  %6615 = vst [vmem:[%s12995_s28 + $0x4d0] sm:$0xff] (%p8075_p5), %v6614_v21 }
 0x618   : > { %6194 = vst.msk [vmem:[%s12623_s24 + $0x2e0] sm:$0xff] %vm1201_vm1, %v6055_v55  ;;  %v7294_v57 = vpop.f32.mrb[126].mxu0  ;;  %6499 = vst [vmem:[%s12995_s28 + $0x200] sm:$0xff] (%p8075_p5), %v6498_v63  ;;  %v6500_v55 = vld [vmem:[%s12623_s24 + $0x108] sm:$0xff] (%p8075_p5)  ;;  %v6610_v11 = vld [vmem:[%s12623_s24 + $0x2c0] sm:$0xff] (%p8075_p5) }
 0x619   : > { %6197 = vst.msk [vmem:[%s12623_s24 + $0x2f8] sm:$0xff] %vm1201_vm1, %v7294_v57  ;;  %v6058_v32 = vpop.f32.mrb[127].mxu0  ;;  %v6502_v57 = vld [vmem:[%s12623_s24 + $0x110] sm:$0xff] (%p8075_p5)  ;;  %6501 = vst [vmem:[%s12995_s28 + $0x208] sm:$0xff] (%p8075_p5), %v6500_v55  ;;  %v6612_v38 = vld [vmem:[%s12623_s24 + $0x2c8] sm:$0xff] (%p8075_p5) }
 0x61a   : > { %6195 = vst.msk [vmem:[%s12623_s24 + $0x2e8] sm:$0xff] %vm1201_vm1, %v6058_v32  ;;  %v6504_v32 = vld [vmem:[%s12623_s24 + $0x118] sm:$0xff] (%p8075_p5)  ;;  %6503 = vst [vmem:[%s12995_s28 + $0x210] sm:$0xff] (%p8075_p5), %v6502_v57 }
 0x61b   : > { %6505 = vst [vmem:[%s12995_s28 + $0x218] sm:$0xff] (%p8075_p5), %v6504_v32  ;;  %6611 = vst [vmem:[%s12995_s28 + $0x4c0] sm:$0xff] (%p8075_p5), %v6610_v11  ;;  %v6616_v51 = vld [vmem:[%s12623_s24 + $0x2d8] sm:$0xff] (%p8075_p5) }
 0x61c   : > { %6613 = vst [vmem:[%s12995_s28 + $0x4c8] sm:$0xff] (%p8075_p5), %v6612_v38  ;;  %6617 = vst [vmem:[%s12995_s28 + $0x4d8] sm:$0xff] (%p8075_p5), %v6616_v51 }
 0x61e   : > { %v6622_v7 = vld [vmem:[%s12623_s24 + $0x2f0] sm:$0xff] (%p8075_p5) }
 0x61f   : > { %v6618_v19 = vld [vmem:[%s12623_s24 + $0x2e0] sm:$0xff] (%p8075_p5)  ;;  %6623 = vst [vmem:[%s12995_s28 + $0x4f0] sm:$0xff] (%p8075_p5), %v6622_v7 }
 0x620   : > { %6619 = vst [vmem:[%s12995_s28 + $0x4e0] sm:$0xff] (%p8075_p5), %v6618_v19  ;;  %v6624_v22 = vld [vmem:[%s12623_s24 + $0x2f8] sm:$0xff] (%p8075_p5) }
 0x621   : > { %v7169_v42 = vpop.f32.mrb[100].mxu1  ;;  %v6620_v27 = vld [vmem:[%s12623_s24 + $0x2e8] sm:$0xff] (%p8075_p5)  ;;  %6625 = vst [vmem:[%s12995_s28 + $0x4f8] sm:$0xff] (%p8075_p5), %v6624_v22 }
 0x622   : > { %6076 = vst.msk [vmem:[%s12824_s29 + $0x30] sm:$0xff] %vm3689_vm2, %v7169_v42  ;;  %v5334_v40 = vpop.f32.mrb[101].mxu1  ;;  %v6506_v42 = vld [vmem:[%s12623_s24 + $0x120] sm:$0xff] (%p8075_p5)  ;;  %6621 = vst [vmem:[%s12995_s28 + $0x4e8] sm:$0xff] (%p8075_p5), %v6620_v27 }
 0x623   : > { %6074 = vst.msk [vmem:[%s12824_s29 + $0x20] sm:$0xff] %vm3689_vm2, %v5334_v40  ;;  %v7170_v4 = vpop.f32.mrb[102].mxu1  ;;  %v6508_v40 = vld [vmem:[%s12623_s24 + $0x128] sm:$0xff] (%p8075_p5)  ;;  %6507 = vst [vmem:[%s12995_s28 + $0x220] sm:$0xff] (%p8075_p5), %v6506_v42 }
 0x624   : > { %6077 = vst.msk [vmem:[%s12824_s29 + $0x38] sm:$0xff] %vm3689_vm2, %v7170_v4  ;;  %v5337_v17 = vpop.f32.mrb[103].mxu1  ;;  %v6510_v4 = vld [vmem:[%s12623_s24 + $0x130] sm:$0xff] (%p8075_p5)  ;;  %6509 = vst [vmem:[%s12995_s28 + $0x228] sm:$0xff] (%p8075_p5), %v6508_v40 }
 0x625   : > { %6075 = vst.msk [vmem:[%s12824_s29 + $0x28] sm:$0xff] %vm3689_vm2, %v5337_v17  ;;  %6511 = vst [vmem:[%s12995_s28 + $0x230] sm:$0xff] (%p8075_p5), %v6510_v4  ;;  %v6512_v17 = vld [vmem:[%s12623_s24 + $0x138] sm:$0xff] (%p8075_p5) }
 0x626   : > { %6513 = vst [vmem:[%s12995_s28 + $0x238] sm:$0xff] (%p8075_p5), %v6512_v17 }
 0x62c   : > { %v7173_v18 = vpop.f32.mrb[104].mxu1 }
 0x62d   : > { %6080 = vst.msk [vmem:[%s12824_s29 + $0x50] sm:$0xff] %vm3689_vm2, %v7173_v18  ;;  %v5350_v36 = vpop.f32.mrb[105].mxu1  ;;  %v6514_v18 = vld [vmem:[%s12623_s24 + $0x140] sm:$0xff] (%p8075_p5) }
 0x62e   : > { %6078 = vst.msk [vmem:[%s12824_s29 + $0x40] sm:$0xff] %vm3689_vm2, %v5350_v36  ;;  %v7174_v28 = vpop.f32.mrb[106].mxu1  ;;  %v6516_v36 = vld [vmem:[%s12623_s24 + $0x148] sm:$0xff] (%p8075_p5)  ;;  %6515 = vst [vmem:[%s12995_s28 + $0x240] sm:$0xff] (%p8075_p5), %v6514_v18 }
 0x62f   : > { %6081 = vst.msk [vmem:[%s12824_s29 + $0x58] sm:$0xff] %vm3689_vm2, %v7174_v28  ;;  %v5353_v49 = vpop.f32.mrb[107].mxu1  ;;  %6517 = vst [vmem:[%s12995_s28 + $0x248] sm:$0xff] (%p8075_p5), %v6516_v36  ;;  %v6518_v28 = vld [vmem:[%s12623_s24 + $0x150] sm:$0xff] (%p8075_p5) }
 0x630   : > { %6079 = vst.msk [vmem:[%s12824_s29 + $0x48] sm:$0xff] %vm3689_vm2, %v5353_v49  ;;  %v6520_v49 = vld [vmem:[%s12623_s24 + $0x158] sm:$0xff] (%p8075_p5)  ;;  %6519 = vst [vmem:[%s12995_s28 + $0x250] sm:$0xff] (%p8075_p5), %v6518_v28 }
 0x631   : > { %6521 = vst [vmem:[%s12995_s28 + $0x258] sm:$0xff] (%p8075_p5), %v6520_v49 }
 0x634   : > { %v7177_v62 = vpop.f32.mrb[108].mxu1 }
 0x635   : > { %6084 = vst.msk [vmem:[%s12824_s29 + $0x70] sm:$0xff] %vm3689_vm2, %v7177_v62  ;;  %v5366_v29 = vpop.f32.mrb[109].mxu1  ;;  %v6522_v62 = vld [vmem:[%s12623_s24 + $0x160] sm:$0xff] (%p8075_p5) }
 0x636   : > { %6082 = vst.msk [vmem:[%s12824_s29 + $0x60] sm:$0xff] %vm3689_vm2, %v5366_v29  ;;  %v7178_v9 = vpop.f32.mrb[110].mxu1  ;;  %6523 = vst [vmem:[%s12995_s28 + $0x260] sm:$0xff] (%p8075_p5), %v6522_v62  ;;  %v6524_v29 = vld [vmem:[%s12623_s24 + $0x168] sm:$0xff] (%p8075_p5) }
 0x637   : > { %6085 = vst.msk [vmem:[%s12824_s29 + $0x78] sm:$0xff] %vm3689_vm2, %v7178_v9  ;;  %v5369_v3 = vpop.f32.mrb[111].mxu1  ;;  %v6526_v9 = vld [vmem:[%s12623_s24 + $0x170] sm:$0xff] (%p8075_p5)  ;;  %6525 = vst [vmem:[%s12995_s28 + $0x268] sm:$0xff] (%p8075_p5), %v6524_v29 }
 0x638   : > { %6083 = vst.msk [vmem:[%s12824_s29 + $0x68] sm:$0xff] %vm3689_vm2, %v5369_v3  ;;  %v6528_v3 = vld [vmem:[%s12623_s24 + $0x178] sm:$0xff] (%p8075_p5)  ;;  %6527 = vst [vmem:[%s12995_s28 + $0x270] sm:$0xff] (%p8075_p5), %v6526_v9 }
 0x639   : > { %6529 = vst [vmem:[%s12995_s28 + $0x278] sm:$0xff] (%p8075_p5), %v6528_v3 }
 0x63d   : > { %v7181_v1 = vpop.f32.mrb[112].mxu1 }
 0x63e   : > { %6088 = vst.msk [vmem:[%s12824_s29 + $0x90] sm:$0xff] %vm3689_vm2, %v7181_v1  ;;  %v5382_v53 = vpop.f32.mrb[113].mxu1  ;;  %v6530_v1 = vld [vmem:[%s12623_s24 + $0x180] sm:$0xff] (%p8075_p5) }
 0x63f   : > { %6086 = vst.msk [vmem:[%s12824_s29 + $0x80] sm:$0xff] %vm3689_vm2, %v5382_v53  ;;  %v7182_v56 = vpop.f32.mrb[114].mxu1  ;;  %v6532_v53 = vld [vmem:[%s12623_s24 + $0x188] sm:$0xff] (%p8075_p5)  ;;  %6531 = vst [vmem:[%s12995_s28 + $0x280] sm:$0xff] (%p8075_p5), %v6530_v1 }
 0x640   : > { %6089 = vst.msk [vmem:[%s12824_s29 + $0x98] sm:$0xff] %vm3689_vm2, %v7182_v56  ;;  %v5385_v50 = vpop.f32.mrb[115].mxu1  ;;  %v6534_v56 = vld [vmem:[%s12623_s24 + $0x190] sm:$0xff] (%p8075_p5)  ;;  %6533 = vst [vmem:[%s12995_s28 + $0x288] sm:$0xff] (%p8075_p5), %v6532_v53 }
 0x641   : > { %6087 = vst.msk [vmem:[%s12824_s29 + $0x88] sm:$0xff] %vm3689_vm2, %v5385_v50  ;;  %6535 = vst [vmem:[%s12995_s28 + $0x290] sm:$0xff] (%p8075_p5), %v6534_v56  ;;  %v6536_v50 = vld [vmem:[%s12623_s24 + $0x198] sm:$0xff] (%p8075_p5) }
 0x642   : > { %6537 = vst [vmem:[%s12995_s28 + $0x298] sm:$0xff] (%p8075_p5), %v6536_v50 }
 0x645   : > { %v7185_v61 = vpop.f32.mrb[116].mxu1 }
 0x646   : > { %6092 = vst.msk [vmem:[%s12824_s29 + $0xb0] sm:$0xff] %vm3689_vm2, %v7185_v61  ;;  %v5398_v39 = vpop.f32.mrb[117].mxu1  ;;  %v6538_v61 = vld [vmem:[%s12623_s24 + $0x1a0] sm:$0xff] (%p8075_p5) }
 0x647   : > { %6090 = vst.msk [vmem:[%s12824_s29 + $0xa0] sm:$0xff] %vm3689_vm2, %v5398_v39  ;;  %v7186_v31 = vpop.f32.mrb[118].mxu1  ;;  %v6540_v39 = vld [vmem:[%s12623_s24 + $0x1a8] sm:$0xff] (%p8075_p5)  ;;  %6539 = vst [vmem:[%s12995_s28 + $0x2a0] sm:$0xff] (%p8075_p5), %v6538_v61 }
 0x648   : > { %6093 = vst.msk [vmem:[%s12824_s29 + $0xb8] sm:$0xff] %vm3689_vm2, %v7186_v31  ;;  %v5401_v59 = vpop.f32.mrb[119].mxu1  ;;  %6541 = vst [vmem:[%s12995_s28 + $0x2a8] sm:$0xff] (%p8075_p5), %v6540_v39  ;;  %v6542_v31 = vld [vmem:[%s12623_s24 + $0x1b0] sm:$0xff] (%p8075_p5) }
 0x649   : > { %6091 = vst.msk [vmem:[%s12824_s29 + $0xa8] sm:$0xff] %vm3689_vm2, %v5401_v59  ;;  %v6544_v59 = vld [vmem:[%s12623_s24 + $0x1b8] sm:$0xff] (%p8075_p5)  ;;  %6543 = vst [vmem:[%s12995_s28 + $0x2b0] sm:$0xff] (%p8075_p5), %v6542_v31 }
 0x64a   : > { %6545 = vst [vmem:[%s12995_s28 + $0x2b8] sm:$0xff] (%p8075_p5), %v6544_v59 }
 0x64d   : > { %v7189_v41 = vpop.f32.mrb[120].mxu1 }
 0x64e   : > { %6096 = vst.msk [vmem:[%s12824_s29 + $0xd0] sm:$0xff] %vm3689_vm2, %v7189_v41  ;;  %v5414_v23 = vpop.f32.mrb[121].mxu1  ;;  %v6546_v41 = vld [vmem:[%s12623_s24 + $0x1c0] sm:$0xff] (%p8075_p5) }
 0x64f   : > { %6094 = vst.msk [vmem:[%s12824_s29 + $0xc0] sm:$0xff] %vm3689_vm2, %v5414_v23  ;;  %v7190_v44 = vpop.f32.mrb[122].mxu1  ;;  %6547 = vst [vmem:[%s12995_s28 + $0x2c0] sm:$0xff] (%p8075_p5), %v6546_v41  ;;  %v6548_v23 = vld [vmem:[%s12623_s24 + $0x1c8] sm:$0xff] (%p8075_p5) }
 0x650   : > { %6097 = vst.msk [vmem:[%s12824_s29 + $0xd8] sm:$0xff] %vm3689_vm2, %v7190_v44  ;;  %v5417_v16 = vpop.f32.mrb[123].mxu1  ;;  %v6550_v44 = vld [vmem:[%s12623_s24 + $0x1d0] sm:$0xff] (%p8075_p5)  ;;  %6549 = vst [vmem:[%s12995_s28 + $0x2c8] sm:$0xff] (%p8075_p5), %v6548_v23 }
 0x651   : > { %6095 = vst.msk [vmem:[%s12824_s29 + $0xc8] sm:$0xff] %vm3689_vm2, %v5417_v16  ;;  %v6552_v16 = vld [vmem:[%s12623_s24 + $0x1d8] sm:$0xff] (%p8075_p5)  ;;  %6551 = vst [vmem:[%s12995_s28 + $0x2d0] sm:$0xff] (%p8075_p5), %v6550_v44 }
 0x652   : > { %6553 = vst [vmem:[%s12995_s28 + $0x2d8] sm:$0xff] (%p8075_p5), %v6552_v16 }
 0x653   : > { %6213 = sbr.rel (!%p8075_p5) target bundleno = 1627 (0x65b), region = 122 }
 0x655   : > { %v7193_v34 = vpop.f32.mrb[124].mxu1 }
 0x656   : > { %6100 = vst.msk [vmem:[%s12824_s29 + $0xf0] sm:$0xff] %vm3689_vm2, %v7193_v34  ;;  %v5430_v46 = vpop.f32.mrb[125].mxu1  ;;  %v6554_v34 = vld [vmem:[%s12623_s24 + $0x1e0] sm:$0xff] (%p8075_p5) }
 0x657   : > { %6098 = vst.msk [vmem:[%s12824_s29 + $0xe0] sm:$0xff] %vm3689_vm2, %v5430_v46  ;;  %v7194_v45 = vpop.f32.mrb[126].mxu1  ;;  %v6556_v46 = vld [vmem:[%s12623_s24 + $0x1e8] sm:$0xff] (%p8075_p5)  ;;  %6555 = vst [vmem:[%s12995_s28 + $0x2e0] sm:$0xff] (%p8075_p5), %v6554_v34 }
 0x658   : > { %6101 = vst.msk [vmem:[%s12824_s29 + $0xf8] sm:$0xff] %vm3689_vm2, %v7194_v45  ;;  %v5433_v0 = vpop.f32.mrb[127].mxu1  ;;  %v6558_v45 = vld [vmem:[%s12623_s24 + $0x1f0] sm:$0xff] (%p8075_p5)  ;;  %6557 = vst [vmem:[%s12995_s28 + $0x2e8] sm:$0xff] (%p8075_p5), %v6556_v46 }
 0x659   : > { %6099 = vst.msk [vmem:[%s12824_s29 + $0xe8] sm:$0xff] %vm3689_vm2, %v5433_v0  ;;  %6559 = vst [vmem:[%s12995_s28 + $0x2f0] sm:$0xff] (%p8075_p5), %v6558_v45  ;;  %v6560_v0 = vld [vmem:[%s12623_s24 + $0x1f8] sm:$0xff] (%p8075_p5) }
 0x65a   : > { %6561 = vst [vmem:[%s12995_s28 + $0x2f8] sm:$0xff] %v6560_v0 }
 0x65b PF: > { %p23_p11 = scmp.ge.s32.totalorder %s8063_s22, 4   ;;  %s14405_s18 = smov %s7958_s19 }
 0x65c   : > { %s14406_s19 = smov %s8073_s25  ;;  %s14407_s20 = smov %s8063_s22 }
 0x65d   :  { %25 = sbr.rel (!%p23_p11) target bundleno = 2 (0x2), region = 202 }

</bundles_post_ra>
